<compile_context>
chip_gen: v5e
topology: v5e:2x2
jax: 0.10.0
libtpu: 0.0.40
codegen_flags: <defaults>
</compile_context>

<pallas_src>
import functools

import jax
import jax.numpy as jnp
import numpy as np
from jax.experimental import pallas as pl
from jax.experimental.pallas import tpu as pltpu

LANE = 128          # lane width / padded channel+feature size
PR = 256            # pooled map rows per batch element (16 x 16)
HALO = 72           # zero rows appended below the pooled map (max tap shift 68, pad to x8)
NTAPS = 25          # 5x5 conv2 taps


# ---------------------------------------------------------------------------
# Fused kernel: B batch elements per grid step.
#   p1_ref  : (B, 4*256, 128) bf16  conv1 im2col patches, pool-window major, 75->128 pad
#   w1_ref  : (128, 128)      bf16  conv1 weights (75 x K, zero padded)
#   w2_ref  : (25, 128, 128)  bf16  conv2 weights, one (K x 2K) block per tap, zero pad
#   b2_ref  : (1, 128)        f32   conv2 bias (2K real entries)
#   wf_ref  : (128, 128)      f32   fc weights (2K x C, zero padded)
#   bf_ref  : (1, 128)        f32   fc bias (C real entries)
#   mask_ref: (1, 256)        f32   1/144 on the valid 12x12 conv2 output grid, else 0
#   o_ref   : (8, 128)        f32   row b holds logits of element (step*B + b)
#   pool_scr: VMEM (256+72,128) f32 pooled conv1 map + zero halo (reused per element)
# ---------------------------------------------------------------------------
def _fused_forward_kernel(B, p1_ref, w1_ref, w2_ref, b2_ref, wf_ref, bf_ref,
                          mask_ref, o_ref, pool_scr):
    # Zero the halo once per grid step (never gate on program_id: scratch is per-core).
    pool_scr[pl.ds(PR, HALO), :] = jnp.zeros((HALO, LANE), jnp.float32)

    rows = []
    for b in range(B):
        # conv1 + ReLU + 2x2 max-pool: one dot per pool-window position, running max,
        # single ReLU afterwards (max(relu(.)) == relu(max(.))).
        pooled = None
        for w in range(4):
            yw = jnp.dot(p1_ref[b, pl.ds(w * PR, PR), :], w1_ref[...],
                         preferred_element_type=jnp.float32)        # (256, 128) f32
            pooled = yw if pooled is None else jnp.maximum(pooled, yw)
        pooled = jnp.maximum(pooled, 0.0)
        pool_scr[pl.ds(0, PR), :] = pooled

        # conv2 as 25 accumulated tap dots: tap (dy,dx) is a static row shift of
        # dy*16+dx into the zero-padded pooled map. bf16 MXU operands, f32 accumulate.
        acc = None
        t = 0
        for dy in range(5):
            for dx in range(5):
                tap = pool_scr[pl.ds(dy * 16 + dx, PR), :].astype(jnp.bfloat16)
                d = jnp.dot(tap, w2_ref[t], preferred_element_type=jnp.float32)
                acc = d if acc is None else acc + d
                t += 1
        y2 = jnp.maximum(acc + b2_ref[...], 0.0)                     # (256, 128) f32

        # masked global average pool on the MXU (mask folds 1/144 + 12x12 validity),
        # then fc.  Rows outside the valid 12x12 grid carry garbage but are masked.
        g = jnp.dot(mask_ref[...], y2, preferred_element_type=jnp.float32)   # (1, 128)
        out = jnp.dot(g, wf_ref[...], preferred_element_type=jnp.float32) + bf_ref[...]
        rows.append(out)

    if B < 8:
        rows.append(jnp.zeros((8 - B, LANE), jnp.float32))
    o_ref[...] = jnp.concatenate(rows, axis=0)                       # one dense store


# ---------------------------------------------------------------------------
# Forward pass.  Plain-JAX glue = conv1 im2col packing / weight repacking / padding.
# ---------------------------------------------------------------------------
def smaller_model_forward(x, conv1_w, conv2_w, conv2_b, fc_w, fc_b):
    N = x.shape[0]
    K = conv1_w.shape[0]          # nkernels
    C = fc_w.shape[0]             # nclasses
    assert x.shape[1:] == (3, 32, 32), "forward implies 32x32 RGB input"
    assert 2 * K <= LANE and C <= LANE

    f32, bf16 = jnp.float32, jnp.bfloat16
    x = x.astype(f32)

    # ---- conv1 im2col (padding=2, kernel 5); feature order = ci*25 + dy*5 + dx.
    xp = jnp.pad(x, ((0, 0), (0, 0), (2, 2), (2, 2)))                 # (N,3,36,36)
    cols = [xp[:, :, dy:dy + 32, dx:dx + 32]
            for dy in range(5) for dx in range(5)]
    P = jnp.stack(cols, axis=2)                                       # (N,3,25,32,32)
    P = P.transpose(0, 3, 4, 1, 2).reshape(N, 32, 32, 75)             # (n,h,w,feat)
    # pool-window position (ph,pw) becomes a leading row block per batch element
    P = (P.reshape(N, 16, 2, 16, 2, 75)
          .transpose(0, 2, 4, 1, 3, 5)                                # (n,ph,pw,hp,wp,f)
          .reshape(N, 4 * PR, 75))
    P1 = jnp.pad(P, ((0, 0), (0, 0), (0, LANE - 75))).astype(bf16)    # bf16 stream

    # ---- batch elements per grid step (keep >=2 grid steps for v7x megacore)
    if N >= 16:
        B = 8
    elif N >= 2:
        B = min(8, max(1, N // 2))
    else:
        B = 1
    G = -(-N // B)
    Npad = G * B
    if Npad > N:
        P1 = jnp.pad(P1, ((0, Npad - N), (0, 0), (0, 0)))

    # ---- conv1 weights (75,K) zero-padded to (128,128), bf16
    W1 = conv1_w.astype(f32).reshape(K, 75).T
    W1p = jnp.zeros((LANE, LANE), f32).at[:75, :K].set(W1).astype(bf16)

    # ---- conv2 weights: per-tap (K,2K) blocks -> (25,128,128), bf16
    W2t = conv2_w.astype(f32).transpose(2, 3, 1, 0).reshape(25, K, 2 * K)
    W2p = jnp.zeros((25, LANE, LANE), f32).at[:, :K, :2 * K].set(W2t).astype(bf16)
    b2p = jnp.zeros((1, LANE), f32).at[0, :2 * K].set(conv2_b.astype(f32))

    # ---- fc weights / bias (tiny; kept f32 for accuracy)
    Wfp = jnp.zeros((LANE, LANE), f32).at[:2 * K, :C].set(fc_w.astype(f32).T)
    bfp = jnp.zeros((1, LANE), f32).at[0, :C].set(fc_b.astype(f32))

    # ---- GAP mask row: 1/144 on the valid 12x12 region of the 16x16 grid
    r = jnp.arange(PR)
    valid = ((r // 16) < 12) & ((r % 16) < 12)
    gap_mask = jnp.where(valid, 1.0 / 144.0, 0.0).astype(f32).reshape(1, PR)

    flops = N * (2 * 4 * PR * LANE * LANE              # conv1
                 + 2 * NTAPS * PR * LANE * LANE        # conv2
                 + 2 * PR * LANE                       # gap
                 + 2 * LANE * LANE)                    # fc
    bytes_accessed = int(2 * P1.size + 2 * (W1p.size + W2p.size)
                         + 4 * (Wfp.size + b2p.size + bfp.size + gap_mask.size)
                         + 4 * G * 8 * LANE)

    kernel = functools.partial(_fused_forward_kernel, B)
    out = pl.pallas_call(
        kernel,
        out_shape=jax.ShapeDtypeStruct((G * 8, LANE), f32),
        grid_spec=pltpu.PrefetchScalarGridSpec(
            num_scalar_prefetch=0,
            grid=(G,),
            in_specs=[
                pl.BlockSpec((B, 4 * PR, LANE), lambda g: (g, 0, 0)),   # P1 (bf16)
                pl.BlockSpec((LANE, LANE), lambda g: (0, 0)),           # W1 (bf16)
                pl.BlockSpec((NTAPS, LANE, LANE), lambda g: (0, 0, 0)), # W2 (bf16)
                pl.BlockSpec((1, LANE), lambda g: (0, 0)),              # b2
                pl.BlockSpec((LANE, LANE), lambda g: (0, 0)),           # Wfc
                pl.BlockSpec((1, LANE), lambda g: (0, 0)),              # bfc
                pl.BlockSpec((1, PR), lambda g: (0, 0)),                # gap mask row
            ],
            out_specs=pl.BlockSpec((8, LANE), lambda g: (g, 0)),
            scratch_shapes=[pltpu.VMEM((PR + HALO, LANE), f32)],
        ),
        compiler_params=pltpu.CompilerParams(
            dimension_semantics=("parallel",)),
        cost_estimate=pl.CostEstimate(flops=flops, transcendentals=0,
                                      bytes_accessed=bytes_accessed),
    )(P1, W1p, W2p, b2p, Wfp, bfp, gap_mask)

    # row b of block g holds logits for element g*B + b
    return out.reshape(G, 8, LANE)[:, :B, :C].reshape(G * B, C)[:N]


# ---------------------------------------------------------------------------
# Pure-JAX reference (independent of the Pallas path) for verification.
# ---------------------------------------------------------------------------
def reference_forward(x, conv1_w, conv2_w, conv2_b, fc_w, fc_b):
    dn = ('NCHW', 'OIHW', 'NCHW')
    hi = jax.lax.Precision.HIGHEST
    y = jax.lax.conv_general_dilated(x, conv1_w, (1, 1), ((2, 2), (2, 2)),
                                     dimension_numbers=dn, precision=hi)
    y = jnp.maximum(y, 0.0)
    y = jax.lax.reduce_window(y, -jnp.inf, jax.lax.max,
                              (1, 1, 2, 2), (1, 1, 2, 2), 'VALID')
    y = jax.lax.conv_general_dilated(y, conv2_w, (1, 1), 'VALID',
                                     dimension_numbers=dn, precision=hi)
    y = y + conv2_b[None, :, None, None]
    y = jnp.maximum(y, 0.0)
    g = jnp.mean(y, axis=(2, 3))                                      # (N, 2K)
    return jnp.dot(g, fc_w.T, precision=hi) + fc_b


if __name__ == "__main__":
    N, K, C = 2, 8, 10   # batch, nkernels, nclasses

    key = jax.random.PRNGKey(0)
    k1, k2, k3, k4, k5, k6 = jax.random.split(key, 6)
    conv1_w = 0.1 * jax.random.normal(k1, (K, 3, 5, 5), jnp.float32)
    conv2_w = 0.1 * jax.random.normal(k2, (2 * K, K, 5, 5), jnp.float32)
    conv2_b = 0.1 * jax.random.normal(k3, (2 * K,), jnp.float32)
    fc_w = 0.1 * jax.random.normal(k4, (C, 2 * K), jnp.float32)
    fc_b = 0.1 * jax.random.normal(k5, (C,), jnp.float32)
    x = jax.random.normal(k6, (N, 3, 32, 32), jnp.float32)

    fwd = jax.jit(smaller_model_forward)
    out = fwd(x, conv1_w, conv2_w, conv2_b, fc_w, fc_b)
    out = jax.block_until_ready(out)

    ref = reference_forward(x, conv1_w, conv2_w, conv2_b, fc_w, fc_b)
    # bf16 MXU operands (f32 accumulation) -> slightly looser tolerance than pure f32.
    np.testing.assert_allclose(np.asarray(out), np.asarray(ref),
                               rtol=1e-2, atol=1e-2)

    print("KERNEL_OK")
</pallas_src>

<mosaic_0001>
module attributes {stable_mosaic.version = 11 : i64} {
  func.func @_fused_forward_kernel(%arg0: i32, %arg1: memref<1x1024x128xbf16, #tpu.memory_space<vmem>>, %arg2: memref<128x128xbf16, #tpu.memory_space<vmem>>, %arg3: memref<25x128x128xbf16, #tpu.memory_space<vmem>>, %arg4: memref<1x128xf32, #tpu.memory_space<vmem>>, %arg5: memref<128x128xf32, #tpu.memory_space<vmem>>, %arg6: memref<1x128xf32, #tpu.memory_space<vmem>>, %arg7: memref<1x256xf32, #tpu.memory_space<vmem>>, %arg8: memref<8x128xf32, #tpu.memory_space<vmem>>, %arg9: memref<328x128xf32, #tpu.memory_space<vmem>>) attributes {dimension_semantics = [#tpu.dimension_semantics<parallel>], iteration_bounds = array<i64: 2>, scalar_prefetch = 0 : i64, scratch_operands = 1 : i64, tpu.core_type = #tpu.core_type<tc>, window_params = [{transform_indices = @transform_0, window_bounds = array<i64: 1, 1024, 128>}, {pipeline_mode = #tpu.pipeline_mode<synchronous>, transform_indices = @transform_1, window_bounds = array<i64: 128, 128>}, {pipeline_mode = #tpu.pipeline_mode<synchronous>, transform_indices = @transform_2, window_bounds = array<i64: 25, 128, 128>}, {pipeline_mode = #tpu.pipeline_mode<synchronous>, transform_indices = @transform_3, window_bounds = array<i64: 1, 128>}, {pipeline_mode = #tpu.pipeline_mode<synchronous>, transform_indices = @transform_4, window_bounds = array<i64: 128, 128>}, {pipeline_mode = #tpu.pipeline_mode<synchronous>, transform_indices = @transform_5, window_bounds = array<i64: 1, 128>}, {pipeline_mode = #tpu.pipeline_mode<synchronous>, transform_indices = @transform_6, window_bounds = array<i64: 1, 256>}, {transform_indices = @transform_7, window_bounds = array<i64: 8, 128>}]} {
    %cst = arith.constant 0.000000e+00 : f32
    %0 = vector.broadcast %cst : f32 to vector<72x128xf32>
    %c256 = arith.constant 256 : index
    %c0 = arith.constant 0 : index
    %1 = vector.load %arg9[%c256, %c0] : memref<328x128xf32, #tpu.memory_space<vmem>>, vector<72x128xf32>
    tpu.vector_store %arg9[%c256, %c0], %0 {strides = array<i32>} : memref<328x128xf32, #tpu.memory_space<vmem>>, vector<72x128xf32>,
    %c0_0 = arith.constant 0 : index
    %c0_1 = arith.constant 0 : index
    %c0_2 = arith.constant 0 : index
    %2 = vector.load %arg1[%c0_0, %c0_1, %c0_2] : memref<1x1024x128xbf16, #tpu.memory_space<vmem>>, vector<1x256x128xbf16>
    %3 = vector.shape_cast %2 : vector<1x256x128xbf16> to vector<256x128xbf16>
    %c0_3 = arith.constant 0 : index
    %c0_4 = arith.constant 0 : index
    %4 = vector.load %arg2[%c0_3, %c0_4] : memref<128x128xbf16, #tpu.memory_space<vmem>>, vector<128x128xbf16>
    %cst_5 = arith.constant dense<0.000000e+00> : vector<256x128xf32>
    %5 = tpu.matmul %3, %4, %cst_5 {dimension_numbers = #tpu.dot_dimension_numbers<[1], [0], [0], [1], [0, 0, 1, 1], [], []>} : vector<256x128xbf16>, vector<128x128xbf16>, vector<256x128xf32> -> vector<256x128xf32>
    %c0_6 = arith.constant 0 : index
    %c256_7 = arith.constant 256 : index
    %c0_8 = arith.constant 0 : index
    %6 = vector.load %arg1[%c0_6, %c256_7, %c0_8] : memref<1x1024x128xbf16, #tpu.memory_space<vmem>>, vector<1x256x128xbf16>
    %7 = vector.shape_cast %6 : vector<1x256x128xbf16> to vector<256x128xbf16>
    %c0_9 = arith.constant 0 : index
    %c0_10 = arith.constant 0 : index
    %8 = vector.load %arg2[%c0_9, %c0_10] : memref<128x128xbf16, #tpu.memory_space<vmem>>, vector<128x128xbf16>
    %cst_11 = arith.constant dense<0.000000e+00> : vector<256x128xf32>
    %9 = tpu.matmul %7, %8, %cst_11 {dimension_numbers = #tpu.dot_dimension_numbers<[1], [0], [0], [1], [0, 0, 1, 1], [], []>} : vector<256x128xbf16>, vector<128x128xbf16>, vector<256x128xf32> -> vector<256x128xf32>
    %10 = arith.maximumf %5, %9 : vector<256x128xf32>
    %c0_12 = arith.constant 0 : index
    %c512 = arith.constant 512 : index
    %c0_13 = arith.constant 0 : index
    %11 = vector.load %arg1[%c0_12, %c512, %c0_13] : memref<1x1024x128xbf16, #tpu.memory_space<vmem>>, vector<1x256x128xbf16>
    %12 = vector.shape_cast %11 : vector<1x256x128xbf16> to vector<256x128xbf16>
    %c0_14 = arith.constant 0 : index
    %c0_15 = arith.constant 0 : index
    %13 = vector.load %arg2[%c0_14, %c0_15] : memref<128x128xbf16, #tpu.memory_space<vmem>>, vector<128x128xbf16>
    %cst_16 = arith.constant dense<0.000000e+00> : vector<256x128xf32>
    %14 = tpu.matmul %12, %13, %cst_16 {dimension_numbers = #tpu.dot_dimension_numbers<[1], [0], [0], [1], [0, 0, 1, 1], [], []>} : vector<256x128xbf16>, vector<128x128xbf16>, vector<256x128xf32> -> vector<256x128xf32>
    %15 = arith.maximumf %10, %14 : vector<256x128xf32>
    %c0_17 = arith.constant 0 : index
    %c768 = arith.constant 768 : index
    %c0_18 = arith.constant 0 : index
    %16 = vector.load %arg1[%c0_17, %c768, %c0_18] : memref<1x1024x128xbf16, #tpu.memory_space<vmem>>, vector<1x256x128xbf16>
    %17 = vector.shape_cast %16 : vector<1x256x128xbf16> to vector<256x128xbf16>
    %c0_19 = arith.constant 0 : index
    %c0_20 = arith.constant 0 : index
    %18 = vector.load %arg2[%c0_19, %c0_20] : memref<128x128xbf16, #tpu.memory_space<vmem>>, vector<128x128xbf16>
    %cst_21 = arith.constant dense<0.000000e+00> : vector<256x128xf32>
    %19 = tpu.matmul %17, %18, %cst_21 {dimension_numbers = #tpu.dot_dimension_numbers<[1], [0], [0], [1], [0, 0, 1, 1], [], []>} : vector<256x128xbf16>, vector<128x128xbf16>, vector<256x128xf32> -> vector<256x128xf32>
    %20 = arith.maximumf %15, %19 : vector<256x128xf32>
    %cst_22 = arith.constant 0.000000e+00 : f32
    %21 = vector.broadcast %cst_22 : f32 to vector<256x128xf32>
    %22 = arith.maximumf %20, %21 : vector<256x128xf32>
    %c0_23 = arith.constant 0 : index
    %c0_24 = arith.constant 0 : index
    %23 = vector.load %arg9[%c0_23, %c0_24] : memref<328x128xf32, #tpu.memory_space<vmem>>, vector<256x128xf32>
    tpu.vector_store %arg9[%c0_23, %c0_24], %22 {strides = array<i32>} : memref<328x128xf32, #tpu.memory_space<vmem>>, vector<256x128xf32>,
    %c0_25 = arith.constant 0 : index
    %c0_26 = arith.constant 0 : index
    %24 = vector.load %arg9[%c0_25, %c0_26] : memref<328x128xf32, #tpu.memory_space<vmem>>, vector<256x128xf32>
    %25 = arith.truncf %24 : vector<256x128xf32> to vector<256x128xbf16>
    %c0_27 = arith.constant 0 : index
    %c0_28 = arith.constant 0 : index
    %c0_29 = arith.constant 0 : index
    %26 = vector.load %arg3[%c0_27, %c0_28, %c0_29] : memref<25x128x128xbf16, #tpu.memory_space<vmem>>, vector<1x128x128xbf16>
    %27 = vector.shape_cast %26 : vector<1x128x128xbf16> to vector<128x128xbf16>
    %cst_30 = arith.constant dense<0.000000e+00> : vector<256x128xf32>
    %28 = tpu.matmul %25, %27, %cst_30 {dimension_numbers = #tpu.dot_dimension_numbers<[1], [0], [0], [1], [0, 0, 1, 1], [], []>} : vector<256x128xbf16>, vector<128x128xbf16>, vector<256x128xf32> -> vector<256x128xf32>
    %c1 = arith.constant 1 : index
    %c0_31 = arith.constant 0 : index
    %29 = vector.load %arg9[%c1, %c0_31] : memref<328x128xf32, #tpu.memory_space<vmem>>, vector<256x128xf32>
    %30 = arith.truncf %29 : vector<256x128xf32> to vector<256x128xbf16>
    %c1_32 = arith.constant 1 : index
    %c0_33 = arith.constant 0 : index
    %c0_34 = arith.constant 0 : index
    %31 = vector.load %arg3[%c1_32, %c0_33, %c0_34] : memref<25x128x128xbf16, #tpu.memory_space<vmem>>, vector<1x128x128xbf16>
    %32 = vector.shape_cast %31 : vector<1x128x128xbf16> to vector<128x128xbf16>
    %cst_35 = arith.constant dense<0.000000e+00> : vector<256x128xf32>
    %33 = tpu.matmul %30, %32, %cst_35 {dimension_numbers = #tpu.dot_dimension_numbers<[1], [0], [0], [1], [0, 0, 1, 1], [], []>} : vector<256x128xbf16>, vector<128x128xbf16>, vector<256x128xf32> -> vector<256x128xf32>
    %34 = arith.addf %28, %33 : vector<256x128xf32>
    %c2 = arith.constant 2 : index
    %c0_36 = arith.constant 0 : index
    %35 = vector.load %arg9[%c2, %c0_36] : memref<328x128xf32, #tpu.memory_space<vmem>>, vector<256x128xf32>
    %36 = arith.truncf %35 : vector<256x128xf32> to vector<256x128xbf16>
    %c2_37 = arith.constant 2 : index
    %c0_38 = arith.constant 0 : index
    %c0_39 = arith.constant 0 : index
    %37 = vector.load %arg3[%c2_37, %c0_38, %c0_39] : memref<25x128x128xbf16, #tpu.memory_space<vmem>>, vector<1x128x128xbf16>
    %38 = vector.shape_cast %37 : vector<1x128x128xbf16> to vector<128x128xbf16>
    %cst_40 = arith.constant dense<0.000000e+00> : vector<256x128xf32>
    %39 = tpu.matmul %36, %38, %cst_40 {dimension_numbers = #tpu.dot_dimension_numbers<[1], [0], [0], [1], [0, 0, 1, 1], [], []>} : vector<256x128xbf16>, vector<128x128xbf16>, vector<256x128xf32> -> vector<256x128xf32>
    %40 = arith.addf %34, %39 : vector<256x128xf32>
    %c3 = arith.constant 3 : index
    %c0_41 = arith.constant 0 : index
    %41 = vector.load %arg9[%c3, %c0_41] : memref<328x128xf32, #tpu.memory_space<vmem>>, vector<256x128xf32>
    %42 = arith.truncf %41 : vector<256x128xf32> to vector<256x128xbf16>
    %c3_42 = arith.constant 3 : index
    %c0_43 = arith.constant 0 : index
    %c0_44 = arith.constant 0 : index
    %43 = vector.load %arg3[%c3_42, %c0_43, %c0_44] : memref<25x128x128xbf16, #tpu.memory_space<vmem>>, vector<1x128x128xbf16>
    %44 = vector.shape_cast %43 : vector<1x128x128xbf16> to vector<128x128xbf16>
    %cst_45 = arith.constant dense<0.000000e+00> : vector<256x128xf32>
    %45 = tpu.matmul %42, %44, %cst_45 {dimension_numbers = #tpu.dot_dimension_numbers<[1], [0], [0], [1], [0, 0, 1, 1], [], []>} : vector<256x128xbf16>, vector<128x128xbf16>, vector<256x128xf32> -> vector<256x128xf32>
    %46 = arith.addf %40, %45 : vector<256x128xf32>
    %c4 = arith.constant 4 : index
    %c0_46 = arith.constant 0 : index
    %47 = vector.load %arg9[%c4, %c0_46] : memref<328x128xf32, #tpu.memory_space<vmem>>, vector<256x128xf32>
    %48 = arith.truncf %47 : vector<256x128xf32> to vector<256x128xbf16>
    %c4_47 = arith.constant 4 : index
    %c0_48 = arith.constant 0 : index
    %c0_49 = arith.constant 0 : index
    %49 = vector.load %arg3[%c4_47, %c0_48, %c0_49] : memref<25x128x128xbf16, #tpu.memory_space<vmem>>, vector<1x128x128xbf16>
    %50 = vector.shape_cast %49 : vector<1x128x128xbf16> to vector<128x128xbf16>
    %cst_50 = arith.constant dense<0.000000e+00> : vector<256x128xf32>
    %51 = tpu.matmul %48, %50, %cst_50 {dimension_numbers = #tpu.dot_dimension_numbers<[1], [0], [0], [1], [0, 0, 1, 1], [], []>} : vector<256x128xbf16>, vector<128x128xbf16>, vector<256x128xf32> -> vector<256x128xf32>
    %52 = arith.addf %46, %51 : vector<256x128xf32>
    %c16 = arith.constant 16 : index
    %c0_51 = arith.constant 0 : index
    %53 = vector.load %arg9[%c16, %c0_51] : memref<328x128xf32, #tpu.memory_space<vmem>>, vector<256x128xf32>
    %54 = arith.truncf %53 : vector<256x128xf32> to vector<256x128xbf16>
    %c5 = arith.constant 5 : index
    %c0_52 = arith.constant 0 : index
    %c0_53 = arith.constant 0 : index
    %55 = vector.load %arg3[%c5, %c0_52, %c0_53] : memref<25x128x128xbf16, #tpu.memory_space<vmem>>, vector<1x128x128xbf16>
    %56 = vector.shape_cast %55 : vector<1x128x128xbf16> to vector<128x128xbf16>
    %cst_54 = arith.constant dense<0.000000e+00> : vector<256x128xf32>
    %57 = tpu.matmul %54, %56, %cst_54 {dimension_numbers = #tpu.dot_dimension_numbers<[1], [0], [0], [1], [0, 0, 1, 1], [], []>} : vector<256x128xbf16>, vector<128x128xbf16>, vector<256x128xf32> -> vector<256x128xf32>
    %58 = arith.addf %52, %57 : vector<256x128xf32>
    %c17 = arith.constant 17 : index
    %c0_55 = arith.constant 0 : index
    %59 = vector.load %arg9[%c17, %c0_55] : memref<328x128xf32, #tpu.memory_space<vmem>>, vector<256x128xf32>
    %60 = arith.truncf %59 : vector<256x128xf32> to vector<256x128xbf16>
    %c6 = arith.constant 6 : index
    %c0_56 = arith.constant 0 : index
    %c0_57 = arith.constant 0 : index
    %61 = vector.load %arg3[%c6, %c0_56, %c0_57] : memref<25x128x128xbf16, #tpu.memory_space<vmem>>, vector<1x128x128xbf16>
    %62 = vector.shape_cast %61 : vector<1x128x128xbf16> to vector<128x128xbf16>
    %cst_58 = arith.constant dense<0.000000e+00> : vector<256x128xf32>
    %63 = tpu.matmul %60, %62, %cst_58 {dimension_numbers = #tpu.dot_dimension_numbers<[1], [0], [0], [1], [0, 0, 1, 1], [], []>} : vector<256x128xbf16>, vector<128x128xbf16>, vector<256x128xf32> -> vector<256x128xf32>
    %64 = arith.addf %58, %63 : vector<256x128xf32>
    %c18 = arith.constant 18 : index
    %c0_59 = arith.constant 0 : index
    %65 = vector.load %arg9[%c18, %c0_59] : memref<328x128xf32, #tpu.memory_space<vmem>>, vector<256x128xf32>
    %66 = arith.truncf %65 : vector<256x128xf32> to vector<256x128xbf16>
    %c7 = arith.constant 7 : index
    %c0_60 = arith.constant 0 : index
    %c0_61 = arith.constant 0 : index
    %67 = vector.load %arg3[%c7, %c0_60, %c0_61] : memref<25x128x128xbf16, #tpu.memory_space<vmem>>, vector<1x128x128xbf16>
    %68 = vector.shape_cast %67 : vector<1x128x128xbf16> to vector<128x128xbf16>
    %cst_62 = arith.constant dense<0.000000e+00> : vector<256x128xf32>
    %69 = tpu.matmul %66, %68, %cst_62 {dimension_numbers = #tpu.dot_dimension_numbers<[1], [0], [0], [1], [0, 0, 1, 1], [], []>} : vector<256x128xbf16>, vector<128x128xbf16>, vector<256x128xf32> -> vector<256x128xf32>
    %70 = arith.addf %64, %69 : vector<256x128xf32>
    %c19 = arith.constant 19 : index
    %c0_63 = arith.constant 0 : index
    %71 = vector.load %arg9[%c19, %c0_63] : memref<328x128xf32, #tpu.memory_space<vmem>>, vector<256x128xf32>
    %72 = arith.truncf %71 : vector<256x128xf32> to vector<256x128xbf16>
    %c8 = arith.constant 8 : index
    %c0_64 = arith.constant 0 : index
    %c0_65 = arith.constant 0 : index
    %73 = vector.load %arg3[%c8, %c0_64, %c0_65] : memref<25x128x128xbf16, #tpu.memory_space<vmem>>, vector<1x128x128xbf16>
    %74 = vector.shape_cast %73 : vector<1x128x128xbf16> to vector<128x128xbf16>
    %cst_66 = arith.constant dense<0.000000e+00> : vector<256x128xf32>
    %75 = tpu.matmul %72, %74, %cst_66 {dimension_numbers = #tpu.dot_dimension_numbers<[1], [0], [0], [1], [0, 0, 1, 1], [], []>} : vector<256x128xbf16>, vector<128x128xbf16>, vector<256x128xf32> -> vector<256x128xf32>
    %76 = arith.addf %70, %75 : vector<256x128xf32>
    %c20 = arith.constant 20 : index
    %c0_67 = arith.constant 0 : index
    %77 = vector.load %arg9[%c20, %c0_67] : memref<328x128xf32, #tpu.memory_space<vmem>>, vector<256x128xf32>
    %78 = arith.truncf %77 : vector<256x128xf32> to vector<256x128xbf16>
    %c9 = arith.constant 9 : index
    %c0_68 = arith.constant 0 : index
    %c0_69 = arith.constant 0 : index
    %79 = vector.load %arg3[%c9, %c0_68, %c0_69] : memref<25x128x128xbf16, #tpu.memory_space<vmem>>, vector<1x128x128xbf16>
    %80 = vector.shape_cast %79 : vector<1x128x128xbf16> to vector<128x128xbf16>
    %cst_70 = arith.constant dense<0.000000e+00> : vector<256x128xf32>
    %81 = tpu.matmul %78, %80, %cst_70 {dimension_numbers = #tpu.dot_dimension_numbers<[1], [0], [0], [1], [0, 0, 1, 1], [], []>} : vector<256x128xbf16>, vector<128x128xbf16>, vector<256x128xf32> -> vector<256x128xf32>
    %82 = arith.addf %76, %81 : vector<256x128xf32>
    %c32 = arith.constant 32 : index
    %c0_71 = arith.constant 0 : index
    %83 = vector.load %arg9[%c32, %c0_71] : memref<328x128xf32, #tpu.memory_space<vmem>>, vector<256x128xf32>
    %84 = arith.truncf %83 : vector<256x128xf32> to vector<256x128xbf16>
    %c10 = arith.constant 10 : index
    %c0_72 = arith.constant 0 : index
    %c0_73 = arith.constant 0 : index
    %85 = vector.load %arg3[%c10, %c0_72, %c0_73] : memref<25x128x128xbf16, #tpu.memory_space<vmem>>, vector<1x128x128xbf16>
    %86 = vector.shape_cast %85 : vector<1x128x128xbf16> to vector<128x128xbf16>
    %cst_74 = arith.constant dense<0.000000e+00> : vector<256x128xf32>
    %87 = tpu.matmul %84, %86, %cst_74 {dimension_numbers = #tpu.dot_dimension_numbers<[1], [0], [0], [1], [0, 0, 1, 1], [], []>} : vector<256x128xbf16>, vector<128x128xbf16>, vector<256x128xf32> -> vector<256x128xf32>
    %88 = arith.addf %82, %87 : vector<256x128xf32>
    %c33 = arith.constant 33 : index
    %c0_75 = arith.constant 0 : index
    %89 = vector.load %arg9[%c33, %c0_75] : memref<328x128xf32, #tpu.memory_space<vmem>>, vector<256x128xf32>
    %90 = arith.truncf %89 : vector<256x128xf32> to vector<256x128xbf16>
    %c11 = arith.constant 11 : index
    %c0_76 = arith.constant 0 : index
    %c0_77 = arith.constant 0 : index
    %91 = vector.load %arg3[%c11, %c0_76, %c0_77] : memref<25x128x128xbf16, #tpu.memory_space<vmem>>, vector<1x128x128xbf16>
    %92 = vector.shape_cast %91 : vector<1x128x128xbf16> to vector<128x128xbf16>
    %cst_78 = arith.constant dense<0.000000e+00> : vector<256x128xf32>
    %93 = tpu.matmul %90, %92, %cst_78 {dimension_numbers = #tpu.dot_dimension_numbers<[1], [0], [0], [1], [0, 0, 1, 1], [], []>} : vector<256x128xbf16>, vector<128x128xbf16>, vector<256x128xf32> -> vector<256x128xf32>
    %94 = arith.addf %88, %93 : vector<256x128xf32>
    %c34 = arith.constant 34 : index
    %c0_79 = arith.constant 0 : index
    %95 = vector.load %arg9[%c34, %c0_79] : memref<328x128xf32, #tpu.memory_space<vmem>>, vector<256x128xf32>
    %96 = arith.truncf %95 : vector<256x128xf32> to vector<256x128xbf16>
    %c12 = arith.constant 12 : index
    %c0_80 = arith.constant 0 : index
    %c0_81 = arith.constant 0 : index
    %97 = vector.load %arg3[%c12, %c0_80, %c0_81] : memref<25x128x128xbf16, #tpu.memory_space<vmem>>, vector<1x128x128xbf16>
    %98 = vector.shape_cast %97 : vector<1x128x128xbf16> to vector<128x128xbf16>
    %cst_82 = arith.constant dense<0.000000e+00> : vector<256x128xf32>
    %99 = tpu.matmul %96, %98, %cst_82 {dimension_numbers = #tpu.dot_dimension_numbers<[1], [0], [0], [1], [0, 0, 1, 1], [], []>} : vector<256x128xbf16>, vector<128x128xbf16>, vector<256x128xf32> -> vector<256x128xf32>
    %100 = arith.addf %94, %99 : vector<256x128xf32>
    %c35 = arith.constant 35 : index
    %c0_83 = arith.constant 0 : index
    %101 = vector.load %arg9[%c35, %c0_83] : memref<328x128xf32, #tpu.memory_space<vmem>>, vector<256x128xf32>
    %102 = arith.truncf %101 : vector<256x128xf32> to vector<256x128xbf16>
    %c13 = arith.constant 13 : index
    %c0_84 = arith.constant 0 : index
    %c0_85 = arith.constant 0 : index
    %103 = vector.load %arg3[%c13, %c0_84, %c0_85] : memref<25x128x128xbf16, #tpu.memory_space<vmem>>, vector<1x128x128xbf16>
    %104 = vector.shape_cast %103 : vector<1x128x128xbf16> to vector<128x128xbf16>
    %cst_86 = arith.constant dense<0.000000e+00> : vector<256x128xf32>
    %105 = tpu.matmul %102, %104, %cst_86 {dimension_numbers = #tpu.dot_dimension_numbers<[1], [0], [0], [1], [0, 0, 1, 1], [], []>} : vector<256x128xbf16>, vector<128x128xbf16>, vector<256x128xf32> -> vector<256x128xf32>
    %106 = arith.addf %100, %105 : vector<256x128xf32>
    %c36 = arith.constant 36 : index
    %c0_87 = arith.constant 0 : index
    %107 = vector.load %arg9[%c36, %c0_87] : memref<328x128xf32, #tpu.memory_space<vmem>>, vector<256x128xf32>
    %108 = arith.truncf %107 : vector<256x128xf32> to vector<256x128xbf16>
    %c14 = arith.constant 14 : index
    %c0_88 = arith.constant 0 : index
    %c0_89 = arith.constant 0 : index
    %109 = vector.load %arg3[%c14, %c0_88, %c0_89] : memref<25x128x128xbf16, #tpu.memory_space<vmem>>, vector<1x128x128xbf16>
    %110 = vector.shape_cast %109 : vector<1x128x128xbf16> to vector<128x128xbf16>
    %cst_90 = arith.constant dense<0.000000e+00> : vector<256x128xf32>
    %111 = tpu.matmul %108, %110, %cst_90 {dimension_numbers = #tpu.dot_dimension_numbers<[1], [0], [0], [1], [0, 0, 1, 1], [], []>} : vector<256x128xbf16>, vector<128x128xbf16>, vector<256x128xf32> -> vector<256x128xf32>
    %112 = arith.addf %106, %111 : vector<256x128xf32>
    %c48 = arith.constant 48 : index
    %c0_91 = arith.constant 0 : index
    %113 = vector.load %arg9[%c48, %c0_91] : memref<328x128xf32, #tpu.memory_space<vmem>>, vector<256x128xf32>
    %114 = arith.truncf %113 : vector<256x128xf32> to vector<256x128xbf16>
    %c15 = arith.constant 15 : index
    %c0_92 = arith.constant 0 : index
    %c0_93 = arith.constant 0 : index
    %115 = vector.load %arg3[%c15, %c0_92, %c0_93] : memref<25x128x128xbf16, #tpu.memory_space<vmem>>, vector<1x128x128xbf16>
    %116 = vector.shape_cast %115 : vector<1x128x128xbf16> to vector<128x128xbf16>
    %cst_94 = arith.constant dense<0.000000e+00> : vector<256x128xf32>
    %117 = tpu.matmul %114, %116, %cst_94 {dimension_numbers = #tpu.dot_dimension_numbers<[1], [0], [0], [1], [0, 0, 1, 1], [], []>} : vector<256x128xbf16>, vector<128x128xbf16>, vector<256x128xf32> -> vector<256x128xf32>
    %118 = arith.addf %112, %117 : vector<256x128xf32>
    %c49 = arith.constant 49 : index
    %c0_95 = arith.constant 0 : index
    %119 = vector.load %arg9[%c49, %c0_95] : memref<328x128xf32, #tpu.memory_space<vmem>>, vector<256x128xf32>
    %120 = arith.truncf %119 : vector<256x128xf32> to vector<256x128xbf16>
    %c16_96 = arith.constant 16 : index
    %c0_97 = arith.constant 0 : index
    %c0_98 = arith.constant 0 : index
    %121 = vector.load %arg3[%c16_96, %c0_97, %c0_98] : memref<25x128x128xbf16, #tpu.memory_space<vmem>>, vector<1x128x128xbf16>
    %122 = vector.shape_cast %121 : vector<1x128x128xbf16> to vector<128x128xbf16>
    %cst_99 = arith.constant dense<0.000000e+00> : vector<256x128xf32>
    %123 = tpu.matmul %120, %122, %cst_99 {dimension_numbers = #tpu.dot_dimension_numbers<[1], [0], [0], [1], [0, 0, 1, 1], [], []>} : vector<256x128xbf16>, vector<128x128xbf16>, vector<256x128xf32> -> vector<256x128xf32>
    %124 = arith.addf %118, %123 : vector<256x128xf32>
    %c50 = arith.constant 50 : index
    %c0_100 = arith.constant 0 : index
    %125 = vector.load %arg9[%c50, %c0_100] : memref<328x128xf32, #tpu.memory_space<vmem>>, vector<256x128xf32>
    %126 = arith.truncf %125 : vector<256x128xf32> to vector<256x128xbf16>
    %c17_101 = arith.constant 17 : index
    %c0_102 = arith.constant 0 : index
    %c0_103 = arith.constant 0 : index
    %127 = vector.load %arg3[%c17_101, %c0_102, %c0_103] : memref<25x128x128xbf16, #tpu.memory_space<vmem>>, vector<1x128x128xbf16>
    %128 = vector.shape_cast %127 : vector<1x128x128xbf16> to vector<128x128xbf16>
    %cst_104 = arith.constant dense<0.000000e+00> : vector<256x128xf32>
    %129 = tpu.matmul %126, %128, %cst_104 {dimension_numbers = #tpu.dot_dimension_numbers<[1], [0], [0], [1], [0, 0, 1, 1], [], []>} : vector<256x128xbf16>, vector<128x128xbf16>, vector<256x128xf32> -> vector<256x128xf32>
    %130 = arith.addf %124, %129 : vector<256x128xf32>
    %c51 = arith.constant 51 : index
    %c0_105 = arith.constant 0 : index
    %131 = vector.load %arg9[%c51, %c0_105] : memref<328x128xf32, #tpu.memory_space<vmem>>, vector<256x128xf32>
    %132 = arith.truncf %131 : vector<256x128xf32> to vector<256x128xbf16>
    %c18_106 = arith.constant 18 : index
    %c0_107 = arith.constant 0 : index
    %c0_108 = arith.constant 0 : index
    %133 = vector.load %arg3[%c18_106, %c0_107, %c0_108] : memref<25x128x128xbf16, #tpu.memory_space<vmem>>, vector<1x128x128xbf16>
    %134 = vector.shape_cast %133 : vector<1x128x128xbf16> to vector<128x128xbf16>
    %cst_109 = arith.constant dense<0.000000e+00> : vector<256x128xf32>
    %135 = tpu.matmul %132, %134, %cst_109 {dimension_numbers = #tpu.dot_dimension_numbers<[1], [0], [0], [1], [0, 0, 1, 1], [], []>} : vector<256x128xbf16>, vector<128x128xbf16>, vector<256x128xf32> -> vector<256x128xf32>
    %136 = arith.addf %130, %135 : vector<256x128xf32>
    %c52 = arith.constant 52 : index
    %c0_110 = arith.constant 0 : index
    %137 = vector.load %arg9[%c52, %c0_110] : memref<328x128xf32, #tpu.memory_space<vmem>>, vector<256x128xf32>
    %138 = arith.truncf %137 : vector<256x128xf32> to vector<256x128xbf16>
    %c19_111 = arith.constant 19 : index
    %c0_112 = arith.constant 0 : index
    %c0_113 = arith.constant 0 : index
    %139 = vector.load %arg3[%c19_111, %c0_112, %c0_113] : memref<25x128x128xbf16, #tpu.memory_space<vmem>>, vector<1x128x128xbf16>
    %140 = vector.shape_cast %139 : vector<1x128x128xbf16> to vector<128x128xbf16>
    %cst_114 = arith.constant dense<0.000000e+00> : vector<256x128xf32>
    %141 = tpu.matmul %138, %140, %cst_114 {dimension_numbers = #tpu.dot_dimension_numbers<[1], [0], [0], [1], [0, 0, 1, 1], [], []>} : vector<256x128xbf16>, vector<128x128xbf16>, vector<256x128xf32> -> vector<256x128xf32>
    %142 = arith.addf %136, %141 : vector<256x128xf32>
    %c64 = arith.constant 64 : index
    %c0_115 = arith.constant 0 : index
    %143 = vector.load %arg9[%c64, %c0_115] : memref<328x128xf32, #tpu.memory_space<vmem>>, vector<256x128xf32>
    %144 = arith.truncf %143 : vector<256x128xf32> to vector<256x128xbf16>
    %c20_116 = arith.constant 20 : index
    %c0_117 = arith.constant 0 : index
    %c0_118 = arith.constant 0 : index
    %145 = vector.load %arg3[%c20_116, %c0_117, %c0_118] : memref<25x128x128xbf16, #tpu.memory_space<vmem>>, vector<1x128x128xbf16>
    %146 = vector.shape_cast %145 : vector<1x128x128xbf16> to vector<128x128xbf16>
    %cst_119 = arith.constant dense<0.000000e+00> : vector<256x128xf32>
    %147 = tpu.matmul %144, %146, %cst_119 {dimension_numbers = #tpu.dot_dimension_numbers<[1], [0], [0], [1], [0, 0, 1, 1], [], []>} : vector<256x128xbf16>, vector<128x128xbf16>, vector<256x128xf32> -> vector<256x128xf32>
    %148 = arith.addf %142, %147 : vector<256x128xf32>
    %c65 = arith.constant 65 : index
    %c0_120 = arith.constant 0 : index
    %149 = vector.load %arg9[%c65, %c0_120] : memref<328x128xf32, #tpu.memory_space<vmem>>, vector<256x128xf32>
    %150 = arith.truncf %149 : vector<256x128xf32> to vector<256x128xbf16>
    %c21 = arith.constant 21 : index
    %c0_121 = arith.constant 0 : index
    %c0_122 = arith.constant 0 : index
    %151 = vector.load %arg3[%c21, %c0_121, %c0_122] : memref<25x128x128xbf16, #tpu.memory_space<vmem>>, vector<1x128x128xbf16>
    %152 = vector.shape_cast %151 : vector<1x128x128xbf16> to vector<128x128xbf16>
    %cst_123 = arith.constant dense<0.000000e+00> : vector<256x128xf32>
    %153 = tpu.matmul %150, %152, %cst_123 {dimension_numbers = #tpu.dot_dimension_numbers<[1], [0], [0], [1], [0, 0, 1, 1], [], []>} : vector<256x128xbf16>, vector<128x128xbf16>, vector<256x128xf32> -> vector<256x128xf32>
    %154 = arith.addf %148, %153 : vector<256x128xf32>
    %c66 = arith.constant 66 : index
    %c0_124 = arith.constant 0 : index
    %155 = vector.load %arg9[%c66, %c0_124] : memref<328x128xf32, #tpu.memory_space<vmem>>, vector<256x128xf32>
    %156 = arith.truncf %155 : vector<256x128xf32> to vector<256x128xbf16>
    %c22 = arith.constant 22 : index
    %c0_125 = arith.constant 0 : index
    %c0_126 = arith.constant 0 : index
    %157 = vector.load %arg3[%c22, %c0_125, %c0_126] : memref<25x128x128xbf16, #tpu.memory_space<vmem>>, vector<1x128x128xbf16>
    %158 = vector.shape_cast %157 : vector<1x128x128xbf16> to vector<128x128xbf16>
    %cst_127 = arith.constant dense<0.000000e+00> : vector<256x128xf32>
    %159 = tpu.matmul %156, %158, %cst_127 {dimension_numbers = #tpu.dot_dimension_numbers<[1], [0], [0], [1], [0, 0, 1, 1], [], []>} : vector<256x128xbf16>, vector<128x128xbf16>, vector<256x128xf32> -> vector<256x128xf32>
    %160 = arith.addf %154, %159 : vector<256x128xf32>
    %c67 = arith.constant 67 : index
    %c0_128 = arith.constant 0 : index
    %161 = vector.load %arg9[%c67, %c0_128] : memref<328x128xf32, #tpu.memory_space<vmem>>, vector<256x128xf32>
    %162 = arith.truncf %161 : vector<256x128xf32> to vector<256x128xbf16>
    %c23 = arith.constant 23 : index
    %c0_129 = arith.constant 0 : index
    %c0_130 = arith.constant 0 : index
    %163 = vector.load %arg3[%c23, %c0_129, %c0_130] : memref<25x128x128xbf16, #tpu.memory_space<vmem>>, vector<1x128x128xbf16>
    %164 = vector.shape_cast %163 : vector<1x128x128xbf16> to vector<128x128xbf16>
    %cst_131 = arith.constant dense<0.000000e+00> : vector<256x128xf32>
    %165 = tpu.matmul %162, %164, %cst_131 {dimension_numbers = #tpu.dot_dimension_numbers<[1], [0], [0], [1], [0, 0, 1, 1], [], []>} : vector<256x128xbf16>, vector<128x128xbf16>, vector<256x128xf32> -> vector<256x128xf32>
    %166 = arith.addf %160, %165 : vector<256x128xf32>
    %c68 = arith.constant 68 : index
    %c0_132 = arith.constant 0 : index
    %167 = vector.load %arg9[%c68, %c0_132] : memref<328x128xf32, #tpu.memory_space<vmem>>, vector<256x128xf32>
    %168 = arith.truncf %167 : vector<256x128xf32> to vector<256x128xbf16>
    %c24 = arith.constant 24 : index
    %c0_133 = arith.constant 0 : index
    %c0_134 = arith.constant 0 : index
    %169 = vector.load %arg3[%c24, %c0_133, %c0_134] : memref<25x128x128xbf16, #tpu.memory_space<vmem>>, vector<1x128x128xbf16>
    %170 = vector.shape_cast %169 : vector<1x128x128xbf16> to vector<128x128xbf16>
    %cst_135 = arith.constant dense<0.000000e+00> : vector<256x128xf32>
    %171 = tpu.matmul %168, %170, %cst_135 {dimension_numbers = #tpu.dot_dimension_numbers<[1], [0], [0], [1], [0, 0, 1, 1], [], []>} : vector<256x128xbf16>, vector<128x128xbf16>, vector<256x128xf32> -> vector<256x128xf32>
    %172 = arith.addf %166, %171 : vector<256x128xf32>
    %c0_136 = arith.constant 0 : index
    %c0_137 = arith.constant 0 : index
    %173 = vector.load %arg4[%c0_136, %c0_137] : memref<1x128xf32, #tpu.memory_space<vmem>>, vector<1x128xf32>
    %174 = vector.broadcast %173 : vector<1x128xf32> to vector<256x128xf32>
    %175 = arith.addf %172, %174 : vector<256x128xf32>
    %cst_138 = arith.constant 0.000000e+00 : f32
    %176 = vector.broadcast %cst_138 : f32 to vector<256x128xf32>
    %177 = arith.maximumf %175, %176 : vector<256x128xf32>
    %c0_139 = arith.constant 0 : index
    %c0_140 = arith.constant 0 : index
    %178 = vector.load %arg7[%c0_139, %c0_140] : memref<1x256xf32, #tpu.memory_space<vmem>>, vector<1x256xf32>
    %cst_141 = arith.constant dense<0.000000e+00> : vector<1x128xf32>
    %179 = tpu.matmul %178, %177, %cst_141 {dimension_numbers = #tpu.dot_dimension_numbers<[1], [0], [0], [1], [0, 0, 1, 1], [], []>} : vector<1x256xf32>, vector<256x128xf32>, vector<1x128xf32> -> vector<1x128xf32>
    %c0_142 = arith.constant 0 : index
    %c0_143 = arith.constant 0 : index
    %180 = vector.load %arg5[%c0_142, %c0_143] : memref<128x128xf32, #tpu.memory_space<vmem>>, vector<128x128xf32>
    %cst_144 = arith.constant dense<0.000000e+00> : vector<1x128xf32>
    %181 = tpu.matmul %179, %180, %cst_144 {dimension_numbers = #tpu.dot_dimension_numbers<[1], [0], [0], [1], [0, 0, 1, 1], [], []>} : vector<1x128xf32>, vector<128x128xf32>, vector<1x128xf32> -> vector<1x128xf32>
    %c0_145 = arith.constant 0 : index
    %c0_146 = arith.constant 0 : index
    %182 = vector.load %arg6[%c0_145, %c0_146] : memref<1x128xf32, #tpu.memory_space<vmem>>, vector<1x128xf32>
    %183 = arith.addf %181, %182 : vector<1x128xf32>
    %cst_147 = arith.constant 0.000000e+00 : f32
    %184 = vector.broadcast %cst_147 : f32 to vector<7x128xf32>
    %185 = tpu.concatenate %183, %184 in 0 : vector<1x128xf32>, vector<7x128xf32> -> vector<8x128xf32>
    %c0_148 = arith.constant 0 : index
    %c0_149 = arith.constant 0 : index
    %186 = vector.load %arg8[%c0_148, %c0_149] : memref<8x128xf32, #tpu.memory_space<vmem>>, vector<8x128xf32>
    tpu.vector_store %arg8[%c0_148, %c0_149], %185 {strides = array<i32>} : memref<8x128xf32, #tpu.memory_space<vmem>>, vector<8x128xf32>,
    return
  }
  func.func @transform_0(%arg0: i32) -> (i32, i32, i32) {
    %c0_i32 = arith.constant 0 : i32
    %c0_i32_0 = arith.constant 0 : i32
    %c0_i32_1 = arith.constant 0 : i32
    return %arg0, %c0_i32, %c0_i32_0 : i32, i32, i32
  }
  func.func @transform_1(%arg0: i32) -> (i32, i32) {
    %c0_i32 = arith.constant 0 : i32
    %c0_i32_0 = arith.constant 0 : i32
    %c0_i32_1 = arith.constant 0 : i32
    return %c0_i32, %c0_i32_0 : i32, i32
  }
  func.func @transform_2(%arg0: i32) -> (i32, i32, i32) {
    %c0_i32 = arith.constant 0 : i32
    %c0_i32_0 = arith.constant 0 : i32
    %c0_i32_1 = arith.constant 0 : i32
    %c0_i32_2 = arith.constant 0 : i32
    return %c0_i32, %c0_i32_0, %c0_i32_1 : i32, i32, i32
  }
  func.func @transform_3(%arg0: i32) -> (i32, i32) {
    %c0_i32 = arith.constant 0 : i32
    %c0_i32_0 = arith.constant 0 : i32
    %c0_i32_1 = arith.constant 0 : i32
    return %c0_i32, %c0_i32_0 : i32, i32
  }
  func.func @transform_4(%arg0: i32) -> (i32, i32) {
    %c0_i32 = arith.constant 0 : i32
    %c0_i32_0 = arith.constant 0 : i32
    %c0_i32_1 = arith.constant 0 : i32
    return %c0_i32, %c0_i32_0 : i32, i32
  }
  func.func @transform_5(%arg0: i32) -> (i32, i32) {
    %c0_i32 = arith.constant 0 : i32
    %c0_i32_0 = arith.constant 0 : i32
    %c0_i32_1 = arith.constant 0 : i32
    return %c0_i32, %c0_i32_0 : i32, i32
  }
  func.func @transform_6(%arg0: i32) -> (i32, i32) {
    %c0_i32 = arith.constant 0 : i32
    %c0_i32_0 = arith.constant 0 : i32
    %c0_i32_1 = arith.constant 0 : i32
    return %c0_i32, %c0_i32_0 : i32, i32
  }
  func.func @transform_7(%arg0: i32) -> (i32, i32) {
    %c0_i32 = arith.constant 0 : i32
    %c0_i32_0 = arith.constant 0 : i32
    return %arg0, %c0_i32 : i32, i32
  }
}

</mosaic_0001>

<bundles_post_ra>
// kernel: smaller_model_forward.1
= control target key start
LH: loop header
LB: loop body
LE: loop exit
PB: predicated region body
PF: predicated region fallthrough
CT: control target
= control target key end

     0   :  { %s9211_s24 = smov 0   ;;  %s11606_s0 = inlined_call_operand.vmem [shape: bf16[2,1024,128], index: 0, kind: input, shape index: {}]   ;;  %s11607_s1 = inlined_call_operand.vmem [shape: bf16[128,128], index: 1, kind: input, shape index: {}]   ;;  %s11608_s2 = inlined_call_operand.vmem [shape: bf16[25,128,128], index: 2, kind: input, shape index: {}]   ;;  %s11609_s3 = inlined_call_operand.vmem [shape: f32[1,128], index: 3, kind: input, shape index: {}]   ;;  %s11610_s4 = inlined_call_operand.vmem [shape: f32[128,128], index: 4, kind: input, shape index: {}]   ;;  %s11611_s5 = inlined_call_operand.vmem [shape: f32[1,128], index: 5, kind: input, shape index: {}]   ;;  %s11612_s6 = inlined_call_operand.vmem [shape: f32[1,256], index: 6, kind: input, shape index: {}]   ;;  %s11613_s7 = inlined_call_operand.vmem [shape: f32[16,128], index: 7, kind: output, shape index: {}]  }
   0x1 LB: > { %s7370_s25 = sadd.s32 4294967295, %s9168_s24   ;;  %p7374_p0 = scmp.ge.s32.totalorder %s9168_s24, 1  ;;  %s9168_s24 = sphi %s9211_s24, %s17_s24  }
   0x2   : > { %p237_p1 = scmp.lt.s32.totalorder %s9168_s24, 3 }
   0x4   : > { %p238_p2 = pnand %p7374_p0, %p237_p1 }
   0x6   : > { %241 = sbr.rel (%p238_p2) target bundleno = 2488 (0x9b8), region = 48 }
   0xb   : > { %v8876_v0 = vld [vmem:[%s11607_s1 + $0x38] sm:$0xff]  ;;  %v8875_v1 = vld [vmem:[%s11607_s1 + $0x30] sm:$0xff]  ;;  %v8874_v2 = vld [vmem:[%s11607_s1 + $0x28] sm:$0xff]  ;;  %p268_p3 = scmp.lt.s32.totalorder %s7370_s25, 1  ;;  %vm7314_vm0 = vcmask 1040384  }
   0xc   : > { %9125 = vmatpush.bf16.msra.mxu1 %v8876_v0  ;;  %9126 = vmatpush.bf16.msra.mxu2 %v8876_v0  ;;  %v8873_v3 = vld [vmem:[%s11607_s1 + $0x20] sm:$0xff]  ;;  %v8872_v4 = vld [vmem:[%s11607_s1 + $0x18] sm:$0xff]  ;;  %v8871_v5 = vld [vmem:[%s11607_s1 + $0x10] sm:$0xff] }
   0xd   : > { %9127 = vmatpush.bf16.msra.mxu3 %v8876_v0  ;;  %478 = vmatpush.bf16.msra.mxu0 %v8876_v0  ;;  %s11645_s25 = smov (!%p268_p3, %s7370_s25), 1  ;;  %v8870_v6 = vld [vmem:[%s11607_s1 + $0x8] sm:$0xff]  ;;  %v8869_v7 = vld [vmem:[%s11607_s1] sm:$0xff]  ;;  %v8940_v61 = vld [vmem:[%s11608_s2 + $0x78] sm:$0xff] }
   0xe   : > { %s8852_s17 = sshll.u32 %s11645_s25, 9  ;;  %v8939_v63 = vld [vmem:[%s11608_s2 + $0x70] sm:$0xff]  ;;  %s7377_s20 = sshll.u32 %s11645_s25, 3 }
   0xf   : > { %s9253_s22 = scalar_lea.vmem %s11606_s0, %s8852_s17  ;;  %s276_s28 = scalar_lea.vmem %s11613_s7, %s7377_s20 }
  0x10   : > { %9128 = vmatpush.bf16.msra.mxu1 %v8875_v1  ;;  %9129 = vmatpush.bf16.msra.mxu2 %v8875_v1  ;;  %v8858_v8 = vld [vmem:[%s9253_s22 + $0x28] sm:$0xff]  ;;  %v8859_v11 = vld [vmem:[%s9253_s22 + $0x30] sm:$0xff]  ;;  %v8853_v14 = vld [vmem:[%s9253_s22] sm:$0xff] }
  0x11   : > { %9130 = vmatpush.bf16.msra.mxu3 %v8875_v1  ;;  %479 = vmatpush.bf16.msra.mxu0 %v8875_v1  ;;  %v8862_v9 = vld [vmem:[%s9253_s22 + $0x48] sm:$0xff]  ;;  %v8863_v12 = vld [vmem:[%s9253_s22 + $0x50] sm:$0xff]  ;;  %v8860_v15 = vld [vmem:[%s9253_s22 + $0x38] sm:$0xff] }
  0x12   : > { %v8866_v10 = vld [vmem:[%s9253_s22 + $0x68] sm:$0xff]  ;;  %v8867_v13 = vld [vmem:[%s9253_s22 + $0x70] sm:$0xff]  ;;  %v8864_v16 = vld [vmem:[%s9253_s22 + $0x58] sm:$0xff] }
  0x13   : > { %v8868_v17 = vld [vmem:[%s9253_s22 + $0x78] sm:$0xff]  ;;  %v8854_v18 = vld [vmem:[%s9253_s22 + $0x8] sm:$0xff]  ;;  %v8861_v19 = vld [vmem:[%s9253_s22 + $0x40] sm:$0xff] }
  0x14   : > { %9131 = vmatpush.bf16.msra.mxu1 %v8874_v2  ;;  %9132 = vmatpush.bf16.msra.mxu2 %v8874_v2  ;;  %v8865_v20 = vld [vmem:[%s9253_s22 + $0x60] sm:$0xff]  ;;  %v8855_v22 = vld [vmem:[%s9253_s22 + $0x10] sm:$0xff]  ;;  %v8910_v25 = vld [vmem:[%s9253_s22 + $0x188] sm:$0xff] }
  0x15   : > { %9133 = vmatpush.bf16.msra.mxu3 %v8874_v2  ;;  %480 = vmatpush.bf16.msra.mxu0 %v8874_v2  ;;  %v8909_v21 = vld [vmem:[%s9253_s22 + $0x180] sm:$0xff]  ;;  %v8856_v26 = vld [vmem:[%s9253_s22 + $0x18] sm:$0xff]  ;;  %v8878_v27 = vld [vmem:[%s9253_s22 + $0x88] sm:$0xff] }
  0x16   : > { %v8877_v23 = vld [vmem:[%s9253_s22 + $0x80] sm:$0xff]  ;;  %v8894_v28 = vld [vmem:[%s9253_s22 + $0x108] sm:$0xff]  ;;  %v8911_v29 = vld [vmem:[%s9253_s22 + $0x190] sm:$0xff] }
  0x17   : > { %v8893_v24 = vld [vmem:[%s9253_s22 + $0x100] sm:$0xff]  ;;  %v8879_v31 = vld [vmem:[%s9253_s22 + $0x90] sm:$0xff]  ;;  %v8912_v33 = vld [vmem:[%s9253_s22 + $0x198] sm:$0xff] }
  0x18   : > { %9134 = vmatpush.bf16.msra.mxu1 %v8873_v3  ;;  %9135 = vmatpush.bf16.msra.mxu2 %v8873_v3  ;;  %v8857_v30 = vld [vmem:[%s9253_s22 + $0x20] sm:$0xff]  ;;  %v8895_v32 = vld [vmem:[%s9253_s22 + $0x110] sm:$0xff]  ;;  %v8880_v34 = vld [vmem:[%s9253_s22 + $0x98] sm:$0xff] }
  0x19   : > { %9136 = vmatpush.bf16.msra.mxu3 %v8873_v3  ;;  %481 = vmatpush.bf16.msra.mxu0 %v8873_v3  ;;  %v8896_v35 = vld [vmem:[%s9253_s22 + $0x118] sm:$0xff]  ;;  %v8913_v36 = vld [vmem:[%s9253_s22 + $0x1a0] sm:$0xff]  ;;  %v8914_v40 = vld [vmem:[%s9253_s22 + $0x1a8] sm:$0xff] }
  0x1a   : > { %v8881_v37 = vld [vmem:[%s9253_s22 + $0xa0] sm:$0xff]  ;;  %v8882_v46 = vld [vmem:[%s9253_s22 + $0xa8] sm:$0xff]  ;;  %v8915_v49 = vld [vmem:[%s9253_s22 + $0x1b0] sm:$0xff] }
  0x1b   : > { %v8897_v38 = vld [vmem:[%s9253_s22 + $0x120] sm:$0xff]  ;;  %v8898_v47 = vld [vmem:[%s9253_s22 + $0x128] sm:$0xff]  ;;  %v8883_v55 = vld [vmem:[%s9253_s22 + $0xb0] sm:$0xff] }
  0x1c   : > { %9137 = vmatpush.bf16.msra.mxu1 %v8872_v4  ;;  %9138 = vmatpush.bf16.msra.mxu2 %v8872_v4  ;;  %v8899_v56 = vld [vmem:[%s9253_s22 + $0x130] sm:$0xff]  ;;  %v8916_v58 = vld [vmem:[%s9253_s22 + $0x1b8] sm:$0xff] }
  0x1d   : > { %9139 = vmatpush.bf16.msra.mxu3 %v8872_v4  ;;  %482 = vmatpush.bf16.msra.mxu0 %v8872_v4 }
  0x20   : > { %9140 = vmatpush.bf16.msra.mxu1 %v8871_v5  ;;  %9141 = vmatpush.bf16.msra.mxu2 %v8871_v5 }
  0x21   : > { %9142 = vmatpush.bf16.msra.mxu3 %v8871_v5  ;;  %483 = vmatpush.bf16.msra.mxu0 %v8871_v5 }
  0x24   : > { %9143 = vmatpush.bf16.msra.mxu1 %v8870_v6  ;;  %9144 = vmatpush.bf16.msra.mxu2 %v8870_v6 }
  0x25   : > { %9145 = vmatpush.bf16.msra.mxu3 %v8870_v6  ;;  %484 = vmatpush.bf16.msra.mxu0 %v8870_v6 }
  0x28   : > { %9146 = vmatpush.bf16.msra.mxu1 %v8869_v7  ;;  %9147 = vmatpush.bf16.msra.mxu2 %v8869_v7 }
  0x29   : > { %9148 = vmatpush.bf16.msra.mxu3 %v8869_v7  ;;  %485 = vmatpush.bf16.msra.mxu0 %v8869_v7 }
  0x2b   : > { %511 = vmatmul.bf16.vlgmr.msra.gmra.mxu1 %v8858_v8  ;;  %531 = vmatmul.bf16.vlgmr.msra.gmra.mxu2 %v8862_v9  ;;  %v8937_v8 = vld [vmem:[%s11608_s2 + $0x60] sm:$0xff] }
  0x2c   : > { %695 = vmatpush.bf16.msrb.mxu1 %v8876_v0  ;;  %944 = vmatpush.bf16.msrb.mxu2 %v8876_v0 }
  0x2d   : > { %1193 = vmatpush.bf16.msrb.mxu3 %v8876_v0  ;;  %486 = vmatmul.bf16.vlgmr.msra.gmra.mxu0 %v8853_v14 }
  0x2e   : > { %551 = vmatmul.bf16.vlgmr.msra.gmra.mxu3 %v8866_v10  ;;  %1555 = vmatpush.bf16.msrb.mxu0 %v8940_v61 }
  0x30   : > { %696 = vmatpush.bf16.msrb.mxu1 %v8875_v1  ;;  %945 = vmatpush.bf16.msrb.mxu2 %v8875_v1 }
  0x31   : > { %1194 = vmatpush.bf16.msrb.mxu3 %v8875_v1 }
  0x32   : > { %1556 = vmatpush.bf16.msrb.mxu0 %v8939_v63 }
  0x34   : > { %697 = vmatpush.bf16.msrb.mxu1 %v8874_v2  ;;  %946 = vmatpush.bf16.msrb.mxu2 %v8874_v2 }
  0x35   : > { %1195 = vmatpush.bf16.msrb.mxu3 %v8874_v2  ;;  %v8884_v2 = vld [vmem:[%s9253_s22 + $0xb8] sm:$0xff] }
  0x38   : > { %698 = vmatpush.bf16.msrb.mxu1 %v8873_v3  ;;  %947 = vmatpush.bf16.msrb.mxu2 %v8873_v3 }
  0x39   : > { %1196 = vmatpush.bf16.msrb.mxu3 %v8873_v3  ;;  %v8900_v3 = vld [vmem:[%s9253_s22 + $0x138] sm:$0xff] }
  0x3b   : > { %516 = vmatmul.bf16.gmra.mxu1 %v8859_v11  ;;  %536 = vmatmul.bf16.gmra.mxu2 %v8863_v12  ;;  %v8936_v11 = vld [vmem:[%s11608_s2 + $0x58] sm:$0xff] }
  0x3c   : > { %699 = vmatpush.bf16.msrb.mxu1 %v8872_v4  ;;  %948 = vmatpush.bf16.msrb.mxu2 %v8872_v4 }
  0x3d   : > { %1197 = vmatpush.bf16.msrb.mxu3 %v8872_v4  ;;  %491 = vmatmul.bf16.gmra.mxu0 %v8854_v18  ;;  %v8938_v4 = vld [vmem:[%s11608_s2 + $0x68] sm:$0xff]  ;;  %v8901_v18 = vld [vmem:[%s9253_s22 + $0x140] sm:$0xff] }
  0x3e   : > { %556 = vmatmul.bf16.gmra.mxu3 %v8867_v13  ;;  %1557 = vmatpush.bf16.msrb.mxu0 %v8938_v4  ;;  %v8935_v13 = vld [vmem:[%s11608_s2 + $0x50] sm:$0xff] }
  0x40   : > { %700 = vmatpush.bf16.msrb.mxu1 %v8871_v5  ;;  %949 = vmatpush.bf16.msrb.mxu2 %v8871_v5 }
  0x41   : > { %1198 = vmatpush.bf16.msrb.mxu3 %v8871_v5 }
  0x42   : > { %1558 = vmatpush.bf16.msrb.mxu0 %v8937_v8 }
  0x44   : > { %701 = vmatpush.bf16.msrb.mxu1 %v8870_v6  ;;  %950 = vmatpush.bf16.msrb.mxu2 %v8870_v6 }
  0x45   : > { %1199 = vmatpush.bf16.msrb.mxu3 %v8870_v6  ;;  %v8917_v6 = vld [vmem:[%s9253_s22 + $0x1c0] sm:$0xff] }
  0x46   : > { %1559 = vmatpush.bf16.msrb.mxu0 %v8936_v11  ;;  %v8887_v11 = vld [vmem:[%s9253_s22 + $0xd0] sm:$0xff] }
  0x48   : > { %702 = vmatpush.bf16.msrb.mxu1 %v8869_v7  ;;  %951 = vmatpush.bf16.msrb.mxu2 %v8869_v7 }
  0x49   : > { %1200 = vmatpush.bf16.msrb.mxu3 %v8869_v7 }
  0x4a   : > { %1560 = vmatpush.bf16.msrb.mxu0 %v8935_v13  ;;  %v8903_v13 = vld [vmem:[%s9253_s22 + $0x150] sm:$0xff] }
  0x4b   : > { %521 = vmatmul.bf16.gmra.mxu1 %v8860_v15  ;;  %541 = vmatmul.bf16.gmra.mxu2 %v8864_v16 }
  0x4d   : > { %496 = vmatmul.bf16.gmra.mxu0 %v8855_v22 }
  0x4e   : > { %561 = vmatmul.bf16.gmra.mxu3 %v8868_v17  ;;  %v8885_v17 = vld [vmem:[%s9253_s22 + $0xc0] sm:$0xff] }
  0x5b   : > { %526 = vmatmul.bf16.gmra.mxu1 %v8861_v19  ;;  %546 = vmatmul.bf16.gmra.mxu2 %v8865_v20  ;;  %v8934_v19 = vld [vmem:[%s11608_s2 + $0x48] sm:$0xff] }
  0x5c   : > { %1561 = vmatpush.bf16.msrb.mxu0 %v8934_v19 }
  0x5d   : > { %501 = vmatmul.bf16.gmra.mxu0 %v8856_v26 }
  0x5e   : > { %1201 = vmatmul.bf16.vlgmr.msrb.gmra.mxu3 %v8909_v21  ;;  %v8918_v21 = vld [vmem:[%s9253_s22 + $0x1c8] sm:$0xff] }
  0x6b   : > { %703 = vmatmul.bf16.vlgmr.msrb.gmra.mxu1 %v8877_v23  ;;  %952 = vmatmul.bf16.vlgmr.msrb.gmra.mxu2 %v8893_v24  ;;  %v8933_v23 = vld [vmem:[%s11608_s2 + $0x40] sm:$0xff] }
  0x6c   : > { %1562 = vmatpush.bf16.msrb.mxu0 %v8933_v23 }
  0x6d   : > { %506 = vmatmul.bf16.gmra.mxu0 %v8857_v30 }
  0x6e   : > { %1206 = vmatmul.bf16.gmra.mxu3 %v8910_v25 }
  0x7b   : > { %708 = vmatmul.bf16.gmra.mxu1 %v8878_v27  ;;  %957 = vmatmul.bf16.gmra.mxu2 %v8894_v28 }
  0x7e   : > { %1211 = vmatmul.bf16.gmra.mxu3 %v8911_v29 }
  0x8b   : > { %713 = vmatmul.bf16.gmra.mxu1 %v8879_v31  ;;  %962 = vmatmul.bf16.gmra.mxu2 %v8895_v32 }
  0x8e   : > { %1216 = vmatmul.bf16.gmra.mxu3 %v8912_v33 }
  0x9b   : > { %718 = vmatmul.bf16.gmra.mxu1 %v8880_v34  ;;  %967 = vmatmul.bf16.gmra.mxu2 %v8896_v35  ;;  %v8886_v35 = vld [vmem:[%s9253_s22 + $0xc8] sm:$0xff] }
  0x9e   : > { %1221 = vmatmul.bf16.gmra.mxu3 %v8913_v36  ;;  %v8902_v36 = vld [vmem:[%s9253_s22 + $0x148] sm:$0xff] }
  0xa8   : > { %v9286_v39 = vpop.f32.mrf.mxu1 }
  0xaa   : > { %v487_v7 = vpop.f32.mrf.mxu0 }
  0xab   : > { %723 = vmatmul.bf16.gmra.mxu1 %v8881_v37  ;;  %972 = vmatmul.bf16.gmra.mxu2 %v8897_v38  ;;  %v8919_v38 = vld [vmem:[%s9253_s22 + $0x1d0] sm:$0xff] }
  0xae   : > { %1226 = vmatmul.bf16.gmra.mxu3 %v8914_v40  ;;  %v9289_v41 = vpop.f32.mrf.mxu2 }
  0xb0   : > { %v9293_v43 = vpop.f32.mrf.mxu1 }
  0xb1   : > { %v9291_v42 = vpop.f32.mrf.mxu3 }
  0xb2   : > { %v489_v14 = vpop.f32.mrf.mxu0 }
  0xb6   : > { %v9295_v44 = vpop.f32.mrf.mxu2 }
  0xb8   : > { %v9301_v48 = vpop.f32.mrf.mxu1 }
  0xb9   : > { %v9297_v45 = vpop.f32.mrf.mxu3 }
  0xba   : > { %v492_v25 = vpop.f32.mrf.mxu0 }
  0xbb   : > { %728 = vmatmul.bf16.gmra.mxu1 %v8882_v46  ;;  %977 = vmatmul.bf16.gmra.mxu2 %v8898_v47 }
  0xbe   : > { %1231 = vmatmul.bf16.gmra.mxu3 %v8915_v49  ;;  %v9304_v50 = vpop.f32.mrf.mxu2 }
  0xc0   : > { %v9308_v52 = vpop.f32.mrf.mxu1 }
  0xc1   : > { %v9306_v51 = vpop.f32.mrf.mxu3 }
  0xc2   : > { %v494_v40 = vpop.f32.mrf.mxu0 }
  0xc6   : > { %v9310_v53 = vpop.f32.mrf.mxu2 }
  0xc8   : > { %v9316_v57 = vpop.f32.mrf.mxu1 }
  0xc9   : > { %v9312_v54 = vpop.f32.mrf.mxu3 }
  0xcb   : > { %733 = vmatmul.bf16.gmra.mxu1 %v8883_v55  ;;  %982 = vmatmul.bf16.gmra.mxu2 %v8899_v56 }
  0xce   : > { %1236 = vmatmul.bf16.gmra.mxu3 %v8916_v58  ;;  %v9319_v59 = vpop.f32.mrf.mxu2 }
  0xd0   : > { %v9326_v62 = vpop.f32.mrf.mxu1 }
  0xd1   : > { %v9321_v60 = vpop.f32.mrf.mxu3 }
  0xd6   : > { %v9331_v0 = vpop.f32.mrf.mxu2 }
  0xd8   : > { %v9340_v5 = vpop.f32.mrf.mxu1 }
  0xd9   : > { %v9333_v1 = vpop.f32.mrf.mxu3 }
  0xdb   : > { %738 = vmatmul.bf16.gmra.mxu1 %v8884_v2  ;;  %987 = vmatmul.bf16.gmra.mxu2 %v8900_v3  ;;  %v497_v3 = vpop.f32.mrf.mxu0 }
  0xde   : > { %1241 = vmatmul.bf16.gmra.mxu3 %v8917_v6  ;;  %v9346_v9 = vpop.f32.mrf.mxu2 }
  0xe0   : > { %v9351_v12 = vpop.f32.mrf.mxu1 }
  0xe1   : > { %v1202_v10 = vpop.f32.mrf.mxu3 }
  0xe6   : > { %v9356_v15 = vpop.f32.mrf.mxu2 }
  0xe8   : > { %v704_v20 = vpop.f32.mrf.mxu1 }
  0xe9   : > { %v1204_v16 = vpop.f32.mrf.mxu3  ;;  %v784_v22 = vmax.f32 %v487_v7, %v704_v20  ;;  %v499_v20 = vpop.f32.mrf.mxu0 }
  0xeb   : > { %743 = vmatmul.bf16.gmra.mxu1 %v8885_v17  ;;  %992 = vmatmul.bf16.gmra.mxu2 %v8901_v18 }
  0xee   : > { %1246 = vmatmul.bf16.gmra.mxu3 %v8918_v21  ;;  %v953_v24 = vpop.f32.mrf.mxu2 }
  0xef   : > { %v1033_v26 = vmax.f32 %v784_v22, %v953_v24 }
  0xf0   : > { %v706_v28 = vpop.f32.mrf.mxu1 }
  0xf1   : > { %v1207_v27 = vpop.f32.mrf.mxu3  ;;  %v1282_v29 = vmax.f32 %v1033_v26, %v1202_v10  ;;  %v785_v31 = vmax.f32 %v489_v14, %v706_v28 }
  0xf3   : > { %v9367_v30 = vmax.f32 %v1282_v29, 0.0 }
  0xf5   : > { %1346 = vst [vmem:[#allocation2] sm:$0xff] %v9367_v30 }
  0xf6   : > { %v955_v32 = vpop.f32.mrf.mxu2 }
  0xf7   : > { %v1034_v33 = vmax.f32 %v785_v31, %v955_v32 }
  0xf8   : > { %v709_v37 = vpop.f32.mrf.mxu1 }
  0xf9   : > { %v1209_v34 = vpop.f32.mrf.mxu3  ;;  %v1283_v46 = vmax.f32 %v1034_v33, %v1204_v16  ;;  %v786_v49 = vmax.f32 %v492_v25, %v709_v37  ;;  %v8920_v16 = vld [vmem:[%s9253_s22 + $0x1d8] sm:$0xff]  ;;  %v502_v33 = vpop.f32.mrf.mxu0 }
  0xfa   : > { %v8888_v37 = vld [vmem:[%s9253_s22 + $0xd8] sm:$0xff] }
  0xfb   : > { %v9373_v47 = vmax.f32 %v1283_v46, 0.0  ;;  %748 = vmatmul.bf16.gmra.mxu1 %v8886_v35  ;;  %997 = vmatmul.bf16.gmra.mxu2 %v8902_v36  ;;  %v8921_v46 = vld [vmem:[%s9253_s22 + $0x1e0] sm:$0xff] }
  0xfd   : > { %1347 = vst [vmem:[#allocation2 + $0x8] sm:$0xff] %v9373_v47  ;;  %v1410_v55 = vpack.c.bf16 %v9373_v47, %v9367_v30 }
  0xfe   : > { %1251 = vmatmul.bf16.gmra.mxu3 %v8919_v38  ;;  %v958_v56 = vpop.f32.mrf.mxu2  ;;  %v8904_v38 = vld [vmem:[%s9253_s22 + $0x158] sm:$0xff] }
  0xff   : > { %v1035_v58 = vmax.f32 %v786_v49, %v958_v56 }
 0x100   : > { %v711_v63 = vpop.f32.mrf.mxu1 }
 0x101   : > { %v1212_v61 = vpop.f32.mrf.mxu3  ;;  %v1284_v2 = vmax.f32 %v1035_v58, %v1207_v27  ;;  %v787_v6 = vmax.f32 %v494_v40, %v711_v63 }
 0x103   : > { %v9378_v4 = vmax.f32 %v1284_v2, 0.0 }
 0x104   : > { %v1442_v21 = vld [vmem:[#allocation2 + $0x1] sm:$0xff] }
 0x105   : > { %1348 = vst [vmem:[#allocation2 + $0x10] sm:$0xff] %v9378_v4 }
 0x106   : > { %v960_v7 = vpop.f32.mrf.mxu2 }
 0x107   : > { %v1036_v8 = vmax.f32 %v787_v6, %v960_v7 }
 0x108   : > { %v714_v14 = vpop.f32.mrf.mxu1 }
 0x109   : > { %v1214_v10 = vpop.f32.mrf.mxu3  ;;  %v1285_v17 = vmax.f32 %v1036_v8, %v1209_v34  ;;  %v788_v19 = vmax.f32 %v497_v3, %v714_v14 }
 0x10b   : > { %v9384_v18 = vmax.f32 %v1285_v17, 0.0  ;;  %753 = vmatmul.bf16.gmra.mxu1 %v8887_v11  ;;  %1002 = vmatmul.bf16.gmra.mxu2 %v8903_v13  ;;  %v8955_v11 = vld [vmem:[%s11608_s2 + $0xf0] sm:$0xff]  ;;  %v504_v13 = vpop.f32.mrf.mxu0 }
 0x10c   : > { %v1443_v22 = vld [vmem:[#allocation2 + $0x9] sm:$0xff] }
 0x10d   : > { %1349 = vst [vmem:[#allocation2 + $0x18] sm:$0xff] %v9384_v18  ;;  %v1474_v23 = vpack.c.bf16 %v1443_v22, %v1442_v21  ;;  %v1411_v24 = vpack.c.bf16 %v9384_v18, %v9378_v4 }
 0x10e   : > { %1256 = vmatmul.bf16.gmra.mxu3 %v8920_v16  ;;  %v963_v25 = vpop.f32.mrf.mxu2 }
 0x10f   : > { %v1037_v26 = vmax.f32 %v788_v19, %v963_v25  ;;  %1563 = vmatmul.bf16.vlgmr.msrb.gmra.mxu0 %v1474_v23  ;;  %v8954_v19 = vld [vmem:[%s11608_s2 + $0xe8] sm:$0xff]  ;;  %v8889_v25 = vld [vmem:[%s9253_s22 + $0xe0] sm:$0xff] }
 0x110   : > { %v716_v28 = vpop.f32.mrf.mxu1 }
 0x111   : > { %v1217_v27 = vpop.f32.mrf.mxu3  ;;  %v1286_v29 = vmax.f32 %v1037_v26, %v1212_v61  ;;  %v789_v32 = vmax.f32 %v499_v20, %v716_v28  ;;  %v8956_v61 = vld [vmem:[%s11608_s2 + $0xf8] sm:$0xff]  ;;  %v8905_v26 = vld [vmem:[%s9253_s22 + $0x160] sm:$0xff] }
 0x112   : > { %2128 = vmatpush.bf16.msra.mxu3 %v8956_v61 }
 0x113   : > { %v9389_v31 = vmax.f32 %v1286_v29, 0.0  ;;  %v8922_v29 = vld [vmem:[%s9253_s22 + $0x1e8] sm:$0xff] }
 0x114   : > { %v1444_v63 = vld [vmem:[#allocation2 + $0x11] sm:$0xff] }
 0x115   : > { %1350 = vst [vmem:[#allocation2 + $0x20] sm:$0xff] %v9389_v31 }
 0x116   : > { %v965_v34 = vpop.f32.mrf.mxu2  ;;  %2129 = vmatpush.bf16.msra.mxu3 %v8955_v11 }
 0x117   : > { %v1038_v35 = vmax.f32 %v789_v32, %v965_v34 }
 0x118   : > { %v719_v40 = vpop.f32.mrf.mxu1 }
 0x119   : > { %v1219_v36 = vpop.f32.mrf.mxu3  ;;  %v1287_v49 = vmax.f32 %v1038_v35, %v1214_v10  ;;  %v790_v58 = vmax.f32 %v502_v33, %v719_v40  ;;  %v507_v33 = vpop.f32.mrf.mxu0  ;;  %v8952_v40 = vld [vmem:[%s11608_s2 + $0xd8] sm:$0xff] }
 0x11a   : > { %2130 = vmatpush.bf16.msra.mxu3 %v8954_v19  ;;  %v8946_v19 = vld [vmem:[%s11608_s2 + $0xa8] sm:$0xff] }
 0x11b   : > { %v9395_v56 = vmax.f32 %v1287_v49, 0.0  ;;  %758 = vmatmul.bf16.gmra.mxu1 %v8888_v37  ;;  %1007 = vmatmul.bf16.gmra.mxu2 %v8904_v38  ;;  %v8932_v37 = vld [vmem:[%s11608_s2 + $0x38] sm:$0xff] }
 0x11c   : > { %v1445_v2 = vld [vmem:[#allocation2 + $0x19] sm:$0xff]  ;;  %1692 = vmatpush.bf16.msra.mxu1 %v8932_v37  ;;  %v8923_v37 = vld [vmem:[%s9253_s22 + $0x1f0] sm:$0xff] }
 0x11d   : > { %1351 = vst [vmem:[#allocation2 + $0x28] sm:$0xff] %v9395_v56  ;;  %v1475_v3 = vpack.c.bf16 %v1445_v2, %v1444_v63  ;;  %v1412_v7 = vpack.c.bf16 %v9395_v56, %v9389_v31  ;;  %v8948_v38 = vld [vmem:[%s11608_s2 + $0xb8] sm:$0xff] }
 0x11e   : > { %1261 = vmatmul.bf16.gmra.mxu3 %v8921_v46  ;;  %v968_v6 = vpop.f32.mrf.mxu2  ;;  %1894 = vmatpush.bf16.msra.mxu2 %v8948_v38 }
 0x11f   : > { %v1039_v8 = vmax.f32 %v790_v58, %v968_v6  ;;  %1568 = vmatmul.bf16.gmra.mxu0 %v1475_v3  ;;  %v8931_v3 = vld [vmem:[%s11608_s2 + $0x30] sm:$0xff] }
 0x120   : > { %v721_v14 = vpop.f32.mrf.mxu1  ;;  %v8947_v6 = vld [vmem:[%s11608_s2 + $0xb0] sm:$0xff]  ;;  %1693 = vmatpush.bf16.msra.mxu1 %v8931_v3 }
 0x121   : > { %v1222_v10 = vpop.f32.mrf.mxu3  ;;  %v1288_v16 = vmax.f32 %v1039_v8, %v1217_v27  ;;  %v791_v20 = vmax.f32 %v504_v13, %v721_v14  ;;  %v8953_v27 = vld [vmem:[%s11608_s2 + $0xe0] sm:$0xff]  ;;  %v8951_v8 = vld [vmem:[%s11608_s2 + $0xd0] sm:$0xff] }
 0x122   : > { %2131 = vmatpush.bf16.msra.mxu3 %v8953_v27  ;;  %1895 = vmatpush.bf16.msra.mxu2 %v8947_v6 }
 0x123   : > { %v9406_v17 = vmax.f32 %v1288_v16, 0.0  ;;  %v8930_v16 = vld [vmem:[%s11608_s2 + $0x28] sm:$0xff] }
 0x124   : > { %1694 = vmatpush.bf16.msra.mxu1 %v8930_v16  ;;  %v8943_v16 = vld [vmem:[%s11608_s2 + $0x90] sm:$0xff] }
 0x125   : > { %1352 = vst [vmem:[#allocation2 + $0x30] sm:$0xff] %v9406_v17 }
 0x126   : > { %v970_v21 = vpop.f32.mrf.mxu2  ;;  %2132 = vmatpush.bf16.msra.mxu3 %v8952_v40  ;;  %1896 = vmatpush.bf16.msra.mxu2 %v8946_v19 }
 0x127   : > { %v1040_v22 = vmax.f32 %v791_v20, %v970_v21  ;;  %v8950_v20 = vld [vmem:[%s11608_s2 + $0xc8] sm:$0xff]  ;;  %v509_v21 = vpop.f32.mrf.mxu0 }
 0x128   : > { %v724_v28 = vpop.f32.mrf.mxu1 }
 0x129   : > { %v1224_v23 = vpop.f32.mrf.mxu3  ;;  %v1289_v32 = vmax.f32 %v1040_v22, %v1219_v36  ;;  %v792_v35 = vmax.f32 %v507_v33, %v724_v28  ;;  %v1446_v36 = vld [vmem:[#allocation2 + $0x21] sm:$0xff] }
 0x12a   : > { %2133 = vmatpush.bf16.msra.mxu3 %v8951_v8  ;;  %v8949_v33 = vld [vmem:[%s11608_s2 + $0xc0] sm:$0xff] }
 0x12b   : > { %v9418_v34 = vmax.f32 %v1289_v32, 0.0  ;;  %763 = vmatmul.bf16.gmra.mxu1 %v8889_v25  ;;  %1012 = vmatmul.bf16.gmra.mxu2 %v8905_v26  ;;  %v8890_v25 = vld [vmem:[%s9253_s22 + $0xe8] sm:$0xff]  ;;  %v8945_v32 = vld [vmem:[%s11608_s2 + $0xa0] sm:$0xff] }
 0x12c   : > { %v1447_v46 = vld [vmem:[#allocation2 + $0x29] sm:$0xff]  ;;  %1897 = vmatpush.bf16.msra.mxu2 %v8945_v32  ;;  %v8925_v32 = vld [vmem:[%s11608_s2] sm:$0xff] }
 0x12d   : > { %1353 = vst [vmem:[#allocation2 + $0x38] sm:$0xff] %v9418_v34  ;;  %v1476_v49 = vpack.c.bf16 %v1447_v46, %v1446_v36  ;;  %v1413_v61 = vpack.c.bf16 %v9418_v34, %v9406_v17  ;;  %v8906_v26 = vld [vmem:[%s9253_s22 + $0x168] sm:$0xff]  ;;  %v8928_v36 = vld [vmem:[%s11608_s2 + $0x18] sm:$0xff] }
 0x12e   : > { %1266 = vmatmul.bf16.gmra.mxu3 %v8922_v29  ;;  %v973_v58 = vpop.f32.mrf.mxu2  ;;  %v8929_v29 = vld [vmem:[%s11608_s2 + $0x20] sm:$0xff]  ;;  %v8944_v46 = vld [vmem:[%s11608_s2 + $0x98] sm:$0xff] }
 0x12f   : > { %v1041_v63 = vmax.f32 %v792_v35, %v973_v58  ;;  %1573 = vmatmul.bf16.gmra.mxu0 %v1476_v49  ;;  %2134 = vmatpush.bf16.msra.mxu3 %v8950_v20 }
 0x130   : > { %v726_v11 = vpop.f32.mrf.mxu1  ;;  %1695 = vmatpush.bf16.msra.mxu1 %v8929_v29  ;;  %1898 = vmatpush.bf16.msra.mxu2 %v8944_v46  ;;  %v8907_v29 = vld [vmem:[%s9253_s22 + $0x170] sm:$0xff] }
 0x131   : > { %v1227_v2 = vpop.f32.mrf.mxu3  ;;  %v1290_v13 = vmax.f32 %v1041_v63, %v1222_v10  ;;  %v793_v10 = vmax.f32 %v509_v21, %v726_v11  ;;  %v8926_v21 = vld [vmem:[%s11608_s2 + $0x8] sm:$0xff] }
 0x133   : > { %v9441_v14 = vmax.f32 %v1290_v13, 0.0  ;;  %2135 = vmatpush.bf16.msra.mxu3 %v8949_v33  ;;  %v8927_v13 = vld [vmem:[%s11608_s2 + $0x10] sm:$0xff]  ;;  %v8941_v33 = vld [vmem:[%s11608_s2 + $0x80] sm:$0xff] }
 0x134   : > { %v1448_v49 = vld [vmem:[#allocation2 + $0x31] sm:$0xff]  ;;  %1696 = vmatpush.bf16.msra.mxu1 %v8928_v36  ;;  %1899 = vmatpush.bf16.msra.mxu2 %v8943_v16 }
 0x135   : > { %1354 = vst [vmem:[#allocation2 + $0x40] sm:$0xff] %v9441_v14 }
 0x136   : > { %v975_v22 = vpop.f32.mrf.mxu2 }
 0x137   : > { %v1042_v27 = vmax.f32 %v793_v10, %v975_v22  ;;  %v8942_v10 = vld [vmem:[%s11608_s2 + $0x88] sm:$0xff] }
 0x138   : > { %v729_v35 = vpop.f32.mrf.mxu1  ;;  %1697 = vmatpush.bf16.msra.mxu1 %v8927_v13  ;;  %1900 = vmatpush.bf16.msra.mxu2 %v8942_v10  ;;  %v8892_v10 = vld [vmem:[%s9253_s22 + $0xf8] sm:$0xff] }
 0x139   : > { %v1229_v28 = vpop.f32.mrf.mxu3  ;;  %v1291_v38 = vmax.f32 %v1042_v27, %v1224_v23  ;;  %v794_v23 = vmax.f32 %v9286_v39, %v729_v35 }
 0x13b   : > { %v9465_v40 = vmax.f32 %v1291_v38, 0.0  ;;  %768 = vmatmul.bf16.gmra.mxu1 %v8890_v25  ;;  %1017 = vmatmul.bf16.gmra.mxu2 %v8906_v26  ;;  %v8891_v25 = vld [vmem:[%s9253_s22 + $0xf0] sm:$0xff] }
 0x13c   : > { %v1449_v58 = vld [vmem:[#allocation2 + $0x39] sm:$0xff]  ;;  %1698 = vmatpush.bf16.msra.mxu1 %v8926_v21  ;;  %1901 = vmatpush.bf16.msra.mxu2 %v8941_v33 }
 0x13d   : > { %1355 = vst [vmem:[#allocation2 + $0x48] sm:$0xff] %v9465_v40  ;;  %v1477_v63 = vpack.c.bf16 %v1449_v58, %v1448_v49  ;;  %v1414_v6 = vpack.c.bf16 %v9465_v40, %v9441_v14 }
 0x13e   : > { %1271 = vmatmul.bf16.gmra.mxu3 %v8923_v37  ;;  %v978_v3 = vpop.f32.mrf.mxu2  ;;  %v8924_v37 = vld [vmem:[%s9253_s22 + $0x1f8] sm:$0xff] }
 0x13f   : > { %v1043_v8 = vmax.f32 %v794_v23, %v978_v3  ;;  %1578 = vmatmul.bf16.gmra.mxu0 %v1477_v63 }
 0x140   : > { %v731_v39 = vpop.f32.mrf.mxu1  ;;  %1699 = vmatpush.bf16.msra.mxu1 %v8925_v32 }
 0x141   : > { %v1232_v11 = vpop.f32.mrf.mxu3  ;;  %v1292_v19 = vmax.f32 %v1043_v8, %v1227_v2  ;;  %v795_v22 = vmax.f32 %v9293_v43, %v731_v39 }
 0x143   : > { %v9483_v20 = vmax.f32 %v1292_v19, 0.0 }
 0x144   : > { %v1450_v36 = vld [vmem:[#allocation2 + $0x41] sm:$0xff] }
 0x145   : > { %1356 = vst [vmem:[#allocation2 + $0x50] sm:$0xff] %v9483_v20 }
 0x146   : > { %v980_v2 = vpop.f32.mrf.mxu2 }
 0x147   : > { %v1044_v26 = vmax.f32 %v795_v22, %v980_v2  ;;  %v8908_v22 = vld [vmem:[%s9253_s22 + $0x178] sm:$0xff]  ;;  %v2016_v2 = vld [vmem:[#allocation2 + $0xb] sm:$0xff] }
 0x148   : > { %v734_v35 = vpop.f32.mrf.mxu1 }
 0x149   : > { %v1234_v27 = vpop.f32.mrf.mxu3  ;;  %v1293_v38 = vmax.f32 %v1044_v26, %v1229_v28  ;;  %v796_v49 = vmax.f32 %v9301_v48, %v734_v35 }
 0x14b   : > { %v9502_v43 = vmax.f32 %v1293_v38, 0.0  ;;  %773 = vmatmul.bf16.gmra.mxu1 %v8891_v25  ;;  %1022 = vmatmul.bf16.gmra.mxu2 %v8907_v29  ;;  %v2015_v29 = vld [vmem:[#allocation2 + $0x3] sm:$0xff] }
 0x14c   : > { %v1451_v46 = vld [vmem:[#allocation2 + $0x49] sm:$0xff]  ;;  %v2047_v32 = vpack.c.bf16 %v2016_v2, %v2015_v29 }
 0x14d   : > { %1357 = vst [vmem:[#allocation2 + $0x58] sm:$0xff] %v9502_v43  ;;  %v1478_v58 = vpack.c.bf16 %v1451_v46, %v1450_v36  ;;  %v1415_v23 = vpack.c.bf16 %v9502_v43, %v9483_v20 }
 0x14e   : > { %1276 = vmatmul.bf16.gmra.mxu3 %v8924_v37  ;;  %v983_v28 = vpop.f32.mrf.mxu2 }
 0x14f   : > { %v1045_v63 = vmax.f32 %v796_v49, %v983_v28  ;;  %1583 = vmatmul.bf16.gmra.mxu0 %v1478_v58 }
 0x150   : > { %v736_v8 = vpop.f32.mrf.mxu1 }
 0x151   : > { %v1237_v3 = vpop.f32.mrf.mxu3  ;;  %v1294_v13 = vmax.f32 %v1045_v63, %v1232_v11  ;;  %v797_v39 = vmax.f32 %v9308_v52, %v736_v8 }
 0x153   : > { %v9508_v16 = vmax.f32 %v1294_v13, 0.0  ;;  %v1782_v13 = vld [vmem:[#allocation2 + $0xa] sm:$0xff] }
 0x154   : > { %v1452_v11 = vld [vmem:[#allocation2 + $0x51] sm:$0xff] }
 0x155   : > { %1358 = vst [vmem:[#allocation2 + $0x60] sm:$0xff] %v9508_v16 }
 0x156   : > { %v985_v19 = vpop.f32.mrf.mxu2 }
 0x157   : > { %v1046_v21 = vmax.f32 %v797_v39, %v985_v19  ;;  %v2018_v19 = vld [vmem:[#allocation2 + $0x1b] sm:$0xff] }
 0x158   : > { %v739_v25 = vpop.f32.mrf.mxu1 }
 0x159   : > { %v1239_v48 = vpop.f32.mrf.mxu3  ;;  %v1295_v26 = vmax.f32 %v1046_v21, %v1234_v27  ;;  %v798_v52 = vmax.f32 %v9316_v57, %v739_v25  ;;  %v2017_v25 = vld [vmem:[#allocation2 + $0x13] sm:$0xff] }
 0x15b   : > { %v9514_v33 = vmax.f32 %v1295_v26, 0.0  ;;  %778 = vmatmul.bf16.gmra.mxu1 %v8892_v10  ;;  %1027 = vmatmul.bf16.gmra.mxu2 %v8908_v22  ;;  %v1781_v10 = vld [vmem:[#allocation2 + $0x2] sm:$0xff]  ;;  %v2048_v26 = vpack.c.bf16 %v2018_v19, %v2017_v25 }
 0x15c   : > { %v1453_v35 = vld [vmem:[#allocation2 + $0x59] sm:$0xff]  ;;  %v1813_v2 = vpack.c.bf16 %v1782_v13, %v1781_v10 }
 0x15d   : > { %1359 = vst [vmem:[#allocation2 + $0x68] sm:$0xff] %v9514_v33  ;;  %v1479_v37 = vpack.c.bf16 %v1453_v35, %v1452_v11  ;;  %v1416_v38 = vpack.c.bf16 %v9514_v33, %v9508_v16  ;;  %v1783_v13 = vld [vmem:[#allocation2 + $0x12] sm:$0xff] }
 0x15e   : > { %2136 = vmatmul.bf16.vlgmr.msra.gmra.mxu3 %v2047_v32  ;;  %v988_v36 = vpop.f32.mrf.mxu2  ;;  %v8964_v33 = vld [vmem:[%s11608_s2 + $0x138] sm:$0xff] }
 0x15f   : > { %v1047_v46 = vmax.f32 %v798_v52, %v988_v36  ;;  %1588 = vmatmul.bf16.gmra.mxu0 %v1479_v37 }
 0x160   : > { %v741_v49 = vpop.f32.mrf.mxu1  ;;  %2362 = vmatpush.bf16.msra.mxu0 %v8964_v33 }
 0x161   : > { %v1242_v27 = vpop.f32.mrf.mxu3  ;;  %v1296_v58 = vmax.f32 %v1047_v46, %v1237_v3  ;;  %v799_v63 = vmax.f32 %v9326_v62, %v741_v49  ;;  %v1784_v49 = vld [vmem:[#allocation2 + $0x1a] sm:$0xff] }
 0x162   : > { %v1814_v19 = vpack.c.bf16 %v1784_v49, %v1783_v13 }
 0x163   : > { %v9520_v28 = vmax.f32 %v1296_v58, 0.0 }
 0x164   : > { %v1454_v62 = vld [vmem:[#allocation2 + $0x61] sm:$0xff] }
 0x165   : > { %1360 = vst [vmem:[#allocation2 + $0x70] sm:$0xff] %v9520_v28 }
 0x166   : > { %v990_v8 = vpop.f32.mrf.mxu2 }
 0x167   : > { %v1048_v39 = vmax.f32 %v799_v63, %v990_v8  ;;  %v2020_v63 = vld [vmem:[#allocation2 + $0x2b] sm:$0xff] }
 0x168   : > { %v744_v21 = vpop.f32.mrf.mxu1 }
 0x169   : > { %v1244_v57 = vpop.f32.mrf.mxu3  ;;  %v1297_v22 = vmax.f32 %v1048_v39, %v1239_v48  ;;  %v800_v32 = vmax.f32 %v9340_v5, %v744_v21  ;;  %v2019_v21 = vld [vmem:[#allocation2 + $0x23] sm:$0xff] }
 0x16a   : > { %v2049_v10 = vpack.c.bf16 %v2020_v63, %v2019_v21 }
 0x16b   : > { %v9524_v29 = vmax.f32 %v1297_v22, 0.0  ;;  %1700 = vmatmul.bf16.vlgmr.msra.gmra.mxu1 %v1410_v55  ;;  %1902 = vmatmul.bf16.vlgmr.msra.gmra.mxu2 %v1813_v2 }
 0x16c   : > { %v1455_v3 = vld [vmem:[#allocation2 + $0x69] sm:$0xff] }
 0x16d   : > { %1361 = vst [vmem:[#allocation2 + $0x78] sm:$0xff] %v9524_v29  ;;  %v1480_v11 = vpack.c.bf16 %v1455_v3, %v1454_v62  ;;  %v1417_v48 = vpack.c.bf16 %v9524_v29, %v9520_v28 }
 0x16e   : > { %2141 = vmatmul.bf16.gmra.mxu3 %v2048_v26  ;;  %v993_v35 = vpop.f32.mrf.mxu2 }
 0x16f   : > { %v1049_v52 = vmax.f32 %v800_v32, %v993_v35  ;;  %1593 = vmatmul.bf16.gmra.mxu0 %v1480_v11  ;;  %v1786_v35 = vld [vmem:[#allocation2 + $0x2a] sm:$0xff] }
 0x170   : > { %v746_v36 = vpop.f32.mrf.mxu1 }
 0x171   : > { %v1247_v37 = vpop.f32.mrf.mxu3  ;;  %v1298_v46 = vmax.f32 %v1049_v52, %v1242_v27  ;;  %v801_v47 = vmax.f32 %v9351_v12, %v746_v36  ;;  %v2022_v36 = vld [vmem:[#allocation2 + $0x3b] sm:$0xff] }
 0x173   : > { %v9533_v30 = vmax.f32 %v1298_v46, 0.0 }
 0x174   : > { %v1456_v12 = vld [vmem:[#allocation2 + $0x71] sm:$0xff] }
 0x175   : > { %1362 = vst [vmem:[#allocation2 + $0x80] sm:$0xff] %v9533_v30 }
 0x176   : > { %v995_v55 = vpop.f32.mrf.mxu2 }
 0x177   : > { %v1050_v58 = vmax.f32 %v801_v47, %v995_v55  ;;  %v1785_v47 = vld [vmem:[#allocation2 + $0x22] sm:$0xff] }
 0x178   : > { %v749_v8 = vpop.f32.mrf.mxu1  ;;  %v1815_v49 = vpack.c.bf16 %v1786_v35, %v1785_v47 }
 0x179   : > { %v1249_v5 = vpop.f32.mrf.mxu3  ;;  %v1299_v39 = vmax.f32 %v1050_v58, %v1244_v57  ;;  %v802_v2 = vmax.f32 %v9289_v41, %v749_v8  ;;  %v2021_v58 = vld [vmem:[#allocation2 + $0x33] sm:$0xff] }
 0x17a   : > { %v2050_v63 = vpack.c.bf16 %v2022_v36, %v2021_v58 }
 0x17b   : > { %v9537_v22 = vmax.f32 %v1299_v39, 0.0  ;;  %1705 = vmatmul.bf16.gmra.mxu1 %v1411_v24  ;;  %1907 = vmatmul.bf16.gmra.mxu2 %v1814_v19 }
 0x17c   : > { %v1457_v27 = vld [vmem:[#allocation2 + $0x79] sm:$0xff] }
 0x17d   : > { %1363 = vst [vmem:[#allocation2 + $0x88] sm:$0xff] %v9537_v22  ;;  %v1481_v25 = vpack.c.bf16 %v1457_v27, %v1456_v12  ;;  %v1418_v57 = vpack.c.bf16 %v9537_v22, %v9533_v30 }
 0x17e   : > { %2146 = vmatmul.bf16.gmra.mxu3 %v2049_v10  ;;  %v998_v26 = vpop.f32.mrf.mxu2 }
 0x17f   : > { %v1051_v62 = vmax.f32 %v802_v2, %v998_v26  ;;  %1598 = vmatmul.bf16.gmra.mxu0 %v1481_v25 }
 0x180   : > { %v751_v32 = vpop.f32.mrf.mxu1 }
 0x181   : > { %v1252_v3 = vpop.f32.mrf.mxu3  ;;  %v1300_v11 = vmax.f32 %v1051_v62, %v1247_v37  ;;  %v803_v18 = vmax.f32 %v9295_v44, %v751_v32  ;;  %v2024_v32 = vld [vmem:[#allocation2 + $0x4b] sm:$0xff] }
 0x183   : > { %v9546_v4 = vmax.f32 %v1300_v11, 0.0 }
 0x184   : > { %v1458_v37 = vld [vmem:[#allocation2 + $0x81] sm:$0xff] }
 0x185   : > { %1364 = vst [vmem:[#allocation2 + $0x90] sm:$0xff] %v9546_v4 }
 0x186   : > { %v1000_v24 = vpop.f32.mrf.mxu2 }
 0x187   : > { %v1052_v52 = vmax.f32 %v803_v18, %v1000_v24  ;;  %v1787_v18 = vld [vmem:[#allocation2 + $0x32] sm:$0xff] }
 0x188   : > { %v754_v46 = vpop.f32.mrf.mxu1 }
 0x189   : > { %v1254_v41 = vpop.f32.mrf.mxu3  ;;  %v1301_v55 = vmax.f32 %v1052_v52, %v1249_v5  ;;  %v804_v39 = vmax.f32 %v9304_v50, %v754_v46  ;;  %v1788_v50 = vld [vmem:[#allocation2 + $0x3a] sm:$0xff]  ;;  %v2023_v52 = vld [vmem:[#allocation2 + $0x43] sm:$0xff] }
 0x18a   : > { %v1816_v35 = vpack.c.bf16 %v1788_v50, %v1787_v18  ;;  %v2051_v36 = vpack.c.bf16 %v2024_v32, %v2023_v52 }
 0x18b   : > { %v9550_v8 = vmax.f32 %v1301_v55, 0.0  ;;  %1710 = vmatmul.bf16.gmra.mxu1 %v1412_v7  ;;  %1912 = vmatmul.bf16.gmra.mxu2 %v1815_v49 }
 0x18c   : > { %v9555_v44 = vpop.f32.mrf.mxu0  ;;  %v1459_v13 = vld [vmem:[#allocation2 + $0x89] sm:$0xff] }
 0x18d   : > { %1365 = vst [vmem:[#allocation2 + $0x98] sm:$0xff] %v9550_v8  ;;  %v1482_v5 = vpack.c.bf16 %v1459_v13, %v1458_v37  ;;  %v1419_v19 = vpack.c.bf16 %v9550_v8, %v9546_v4 }
 0x18e   : > { %2151 = vmatmul.bf16.gmra.mxu3 %v2050_v63  ;;  %v1003_v21 = vpop.f32.mrf.mxu2 }
 0x18f   : > { %v1053_v10 = vmax.f32 %v804_v39, %v1003_v21  ;;  %1603 = vmatmul.bf16.gmra.mxu0 %v1482_v5 }
 0x190   : > { %v756_v31 = vpop.f32.mrf.mxu1 }
 0x191   : > { %v1257_v12 = vpop.f32.mrf.mxu3  ;;  %v1302_v56 = vmax.f32 %v1053_v10, %v1252_v3  ;;  %v805_v2 = vmax.f32 %v9310_v53, %v756_v31  ;;  %v2026_v31 = vld [vmem:[#allocation2 + $0x5b] sm:$0xff] }
 0x193   : > { %v9561_v7 = vmax.f32 %v1302_v56, 0.0 }
 0x194   : > { %v9563_v27 = vpop.f32.mrf.mxu0  ;;  %v1460_v46 = vld [vmem:[#allocation2 + $0x91] sm:$0xff] }
 0x195   : > { %1366 = vst [vmem:[#allocation2 + $0xa0] sm:$0xff] %v9561_v7 }
 0x196   : > { %v1005_v25 = vpop.f32.mrf.mxu2 }
 0x197   : > { %v1054_v26 = vmax.f32 %v805_v2, %v1005_v25  ;;  %v1789_v2 = vld [vmem:[#allocation2 + $0x42] sm:$0xff] }
 0x198   : > { %v759_v11 = vpop.f32.mrf.mxu1 }
 0x199   : > { %v1259_v62 = vpop.f32.mrf.mxu3  ;;  %v1303_v24 = vmax.f32 %v1054_v26, %v1254_v41  ;;  %v806_v55 = vmax.f32 %v9319_v59, %v759_v11  ;;  %v1790_v59 = vld [vmem:[#allocation2 + $0x4a] sm:$0xff]  ;;  %v2025_v26 = vld [vmem:[#allocation2 + $0x53] sm:$0xff] }
 0x19a   : > { %v1817_v50 = vpack.c.bf16 %v1790_v59, %v1789_v2  ;;  %v2052_v32 = vpack.c.bf16 %v2026_v31, %v2025_v26 }
 0x19b   : > { %v9567_v3 = vmax.f32 %v1303_v24, 0.0  ;;  %1715 = vmatmul.bf16.gmra.mxu1 %v1413_v61  ;;  %1917 = vmatmul.bf16.gmra.mxu2 %v1816_v35 }
 0x19c   : > { %v9572_v53 = vpop.f32.mrf.mxu0  ;;  %v1461_v47 = vld [vmem:[#allocation2 + $0x99] sm:$0xff] }
 0x19d   : > { %1367 = vst [vmem:[#allocation2 + $0xa8] sm:$0xff] %v9567_v3  ;;  %v1483_v41 = vpack.c.bf16 %v1461_v47, %v1460_v46  ;;  %v1420_v49 = vpack.c.bf16 %v9567_v3, %v9561_v7 }
 0x19e   : > { %2156 = vmatmul.bf16.gmra.mxu3 %v2051_v36  ;;  %v1008_v58 = vpop.f32.mrf.mxu2 }
 0x19f   : > { %v1055_v63 = vmax.f32 %v806_v55, %v1008_v58  ;;  %1608 = vmatmul.bf16.gmra.mxu0 %v1483_v41 }
 0x1a0   : > { %v761_v17 = vpop.f32.mrf.mxu1 }
 0x1a1   : > { %v1262_v37 = vpop.f32.mrf.mxu3  ;;  %v1304_v34 = vmax.f32 %v1055_v63, %v1257_v12  ;;  %v807_v39 = vmax.f32 %v9331_v0, %v761_v17  ;;  %v2028_v17 = vld [vmem:[#allocation2 + $0x6b] sm:$0xff] }
 0x1a3   : > { %v9578_v61 = vmax.f32 %v1304_v34, 0.0 }
 0x1a4   : > { %v9580_v13 = vpop.f32.mrf.mxu0  ;;  %v1462_v11 = vld [vmem:[#allocation2 + $0xa1] sm:$0xff] }
 0x1a5   : > { %1368 = vst [vmem:[#allocation2 + $0xb0] sm:$0xff] %v9578_v61 }
 0x1a6   : > { %v1010_v5 = vpop.f32.mrf.mxu2 }
 0x1a7   : > { %v1056_v21 = vmax.f32 %v807_v39, %v1010_v5  ;;  %v1791_v39 = vld [vmem:[#allocation2 + $0x52] sm:$0xff] }
 0x1a8   : > { %v764_v56 = vpop.f32.mrf.mxu1 }
 0x1a9   : > { %v1264_v10 = vpop.f32.mrf.mxu3  ;;  %v1305_v25 = vmax.f32 %v1056_v21, %v1259_v62  ;;  %v808_v24 = vmax.f32 %v9346_v9, %v764_v56  ;;  %v1792_v9 = vld [vmem:[#allocation2 + $0x5a] sm:$0xff]  ;;  %v2027_v21 = vld [vmem:[#allocation2 + $0x63] sm:$0xff] }
 0x1aa   : > { %v1818_v59 = vpack.c.bf16 %v1792_v9, %v1791_v39  ;;  %v2053_v31 = vpack.c.bf16 %v2028_v17, %v2027_v21  ;;  %v9170_v21 = vmov 0.0  }
 0x1ab   : > { %v9584_v12 = vmax.f32 %v1305_v25, 0.0  ;;  %1720 = vmatmul.bf16.gmra.mxu1 %v1414_v6  ;;  %1922 = vmatmul.bf16.gmra.mxu2 %v1817_v50  ;;  %277 = vst [vmem:[#allocation2 + $0x100] sm:$0xff] %v9170_v21 }
 0x1ac   : > { %v9589_v0 = vpop.f32.mrf.mxu0  ;;  %v1463_v18 = vld [vmem:[#allocation2 + $0xa9] sm:$0xff]  ;;  %278 = vst [vmem:[#allocation2 + $0x108] sm:$0xff] %v9170_v21 }
 0x1ad   : > { %1369 = vst [vmem:[#allocation2 + $0xb8] sm:$0xff] %v9584_v12  ;;  %v1484_v62 = vpack.c.bf16 %v1463_v18, %v1462_v11  ;;  %v1421_v35 = vpack.c.bf16 %v9584_v12, %v9578_v61  ;;  %v1802_v8 = vld [vmem:[#allocation2 + $0xaa] sm:$0xff] }
 0x1ae   : > { %2161 = vmatmul.bf16.gmra.mxu3 %v2052_v32  ;;  %v1013_v52 = vpop.f32.mrf.mxu2  ;;  %279 = vst [vmem:[#allocation2 + $0x110] sm:$0xff] %v9170_v21  ;;  %v8987_v61 = vld [vmem:[%s11608_s2 + $0x1f0] sm:$0xff] }
 0x1af   : > { %v1057_v36 = vmax.f32 %v808_v24, %v1013_v52  ;;  %1613 = vmatmul.bf16.gmra.mxu0 %v1484_v62  ;;  %280 = vst [vmem:[#allocation2 + $0x118] sm:$0xff] %v9170_v21 }
 0x1b0   : > { %v766_v14 = vpop.f32.mrf.mxu1  ;;  %281 = vst [vmem:[#allocation2 + $0x120] sm:$0xff] %v9170_v21 }
 0x1b1   : > { %v1267_v46 = vpop.f32.mrf.mxu3  ;;  %v1306_v40 = vmax.f32 %v1057_v36, %v1262_v37  ;;  %v809_v55 = vmax.f32 %v9356_v15, %v766_v14  ;;  %v2030_v14 = vld [vmem:[#allocation2 + $0x7b] sm:$0xff]  ;;  %282 = vst [vmem:[#allocation2 + $0x128] sm:$0xff] %v9170_v21 }
 0x1b2   : > { %283 = vst [vmem:[#allocation2 + $0x130] sm:$0xff] %v9170_v21 }
 0x1b3   : > { %v9595_v6 = vmax.f32 %v1306_v40, 0.0  ;;  %284 = vst [vmem:[#allocation2 + $0x138] sm:$0xff] %v9170_v21 }
 0x1b4   : > { %v9597_v47 = vpop.f32.mrf.mxu0  ;;  %v1464_v56 = vld [vmem:[#allocation2 + $0xb1] sm:$0xff]  ;;  %285 = vst [vmem:[#allocation2 + $0x140] sm:$0xff] %v9170_v21 }
 0x1b5   : > { %1370 = vst [vmem:[#allocation2 + $0xc0] sm:$0xff] %v9595_v6 }
 0x1b6   : > { %v1015_v41 = vpop.f32.mrf.mxu2 }
 0x1b7   : > { %v1058_v58 = vmax.f32 %v809_v55, %v1015_v41  ;;  %v1793_v55 = vld [vmem:[#allocation2 + $0x62] sm:$0xff] }
 0x1b8   : > { %v769_v34 = vpop.f32.mrf.mxu1 }
 0x1b9   : > { %v1269_v63 = vpop.f32.mrf.mxu3  ;;  %v1307_v5 = vmax.f32 %v1058_v58, %v1264_v10  ;;  %v810_v25 = vmax.f32 %v9291_v42, %v769_v34  ;;  %v1794_v42 = vld [vmem:[#allocation2 + $0x6a] sm:$0xff]  ;;  %v2029_v58 = vld [vmem:[#allocation2 + $0x73] sm:$0xff] }
 0x1ba   : > { %v1819_v9 = vpack.c.bf16 %v1794_v42, %v1793_v55  ;;  %v2054_v17 = vpack.c.bf16 %v2030_v14, %v2029_v58  ;;  %v2031_v55 = vld [vmem:[#allocation2 + $0x83] sm:$0xff] }
 0x1bb   : > { %v9601_v37 = vmax.f32 %v1307_v5, 0.0  ;;  %1725 = vmatmul.bf16.gmra.mxu1 %v1415_v23  ;;  %1927 = vmatmul.bf16.gmra.mxu2 %v1818_v59 }
 0x1bc   : > { %v9606_v15 = vpop.f32.mrf.mxu0  ;;  %v1465_v2 = vld [vmem:[#allocation2 + $0xb9] sm:$0xff] }
 0x1bd   : > { %1371 = vst [vmem:[#allocation2 + $0xc8] sm:$0xff] %v9601_v37  ;;  %v1485_v10 = vpack.c.bf16 %v1465_v2, %v1464_v56  ;;  %v1422_v50 = vpack.c.bf16 %v9601_v37, %v9595_v6 }
 0x1be   : > { %2166 = vmatmul.bf16.gmra.mxu3 %v2053_v31  ;;  %v1018_v26 = vpop.f32.mrf.mxu2 }
 0x1bf   : > { %v1059_v32 = vmax.f32 %v810_v25, %v1018_v26  ;;  %1618 = vmatmul.bf16.gmra.mxu0 %v1485_v10  ;;  %v8963_v25 = vld [vmem:[%s11608_s2 + $0x130] sm:$0xff] }
 0x1c0   : > { %v771_v20 = vpop.f32.mrf.mxu1  ;;  %2363 = vmatpush.bf16.msra.mxu0 %v8963_v25  ;;  %v1798_v25 = vld [vmem:[#allocation2 + $0x8a] sm:$0xff] }
 0x1c1   : > { %v1272_v11 = vpop.f32.mrf.mxu3  ;;  %v1308_v43 = vmax.f32 %v1059_v32, %v1267_v46  ;;  %v811_v24 = vmax.f32 %v9297_v45, %v771_v20 }
 0x1c3   : > { %v9612_v23 = vmax.f32 %v1308_v43, 0.0 }
 0x1c4   : > { %v9614_v18 = vpop.f32.mrf.mxu0  ;;  %v1466_v34 = vld [vmem:[#allocation2 + $0xc1] sm:$0xff] }
 0x1c5   : > { %1372 = vst [vmem:[#allocation2 + $0xd0] sm:$0xff] %v9612_v23 }
 0x1c6   : > { %v1020_v62 = vpop.f32.mrf.mxu2 }
 0x1c7   : > { %v1060_v52 = vmax.f32 %v811_v24, %v1020_v62  ;;  %v2032_v24 = vld [vmem:[#allocation2 + $0x8b] sm:$0xff] }
 0x1c8   : > { %v774_v40 = vpop.f32.mrf.mxu1  ;;  %v8962_v62 = vld [vmem:[%s11608_s2 + $0x128] sm:$0xff] }
 0x1c9   : > { %v1274_v36 = vpop.f32.mrf.mxu3  ;;  %v1309_v41 = vmax.f32 %v1060_v52, %v1269_v63  ;;  %v812_v5 = vmax.f32 %v9306_v51, %v774_v40  ;;  %v1795_v52 = vld [vmem:[#allocation2 + $0x72] sm:$0xff]  ;;  %2364 = vmatpush.bf16.msra.mxu0 %v8962_v62 }
 0x1cb   : > { %v9618_v46 = vmax.f32 %v1309_v41, 0.0  ;;  %1730 = vmatmul.bf16.gmra.mxu1 %v1416_v38  ;;  %1932 = vmatmul.bf16.gmra.mxu2 %v1819_v9  ;;  %v2055_v41 = vpack.c.bf16 %v2032_v24, %v2031_v55  ;;  %v8961_v9 = vld [vmem:[%s11608_s2 + $0x120] sm:$0xff] }
 0x1cc   : > { %v9623_v45 = vpop.f32.mrf.mxu0  ;;  %v1467_v39 = vld [vmem:[#allocation2 + $0xc9] sm:$0xff] }
 0x1cd   : > { %1373 = vst [vmem:[#allocation2 + $0xd8] sm:$0xff] %v9618_v46  ;;  %v1486_v63 = vpack.c.bf16 %v1467_v39, %v1466_v34  ;;  %v1423_v31 = vpack.c.bf16 %v9618_v46, %v9612_v23  ;;  %2365 = vmatpush.bf16.msra.mxu0 %v8961_v9  ;;  %v1797_v24 = vld [vmem:[#allocation2 + $0x82] sm:$0xff] }
 0x1ce   : > { %2171 = vmatmul.bf16.gmra.mxu3 %v2054_v17  ;;  %v1023_v59 = vpop.f32.mrf.mxu2 }
 0x1cf   : > { %v1061_v56 = vmax.f32 %v812_v5, %v1023_v59  ;;  %1623 = vmatmul.bf16.gmra.mxu0 %v1486_v63  ;;  %v8960_v63 = vld [vmem:[%s11608_s2 + $0x118] sm:$0xff] }
 0x1d0   : > { %v776_v38 = vpop.f32.mrf.mxu1 }
 0x1d1   : > { %v1277_v16 = vpop.f32.mrf.mxu3  ;;  %v1310_v2 = vmax.f32 %v1061_v56, %v1272_v11  ;;  %v813_v26 = vmax.f32 %v9312_v54, %v776_v38  ;;  %v1796_v11 = vld [vmem:[#allocation2 + $0x7a] sm:$0xff]  ;;  %2366 = vmatpush.bf16.msra.mxu0 %v8960_v63 }
 0x1d2   : > { %v1820_v40 = vpack.c.bf16 %v1796_v11, %v1795_v52  ;;  %v2034_v11 = vld [vmem:[#allocation2 + $0x9b] sm:$0xff]  ;;  %v2033_v52 = vld [vmem:[#allocation2 + $0x93] sm:$0xff] }
 0x1d3   : > { %v9632_v51 = vmax.f32 %v1310_v2, 0.0 }
 0x1d4   : > { %v9637_v10 = vpop.f32.mrf.mxu0  ;;  %v1468_v17 = vld [vmem:[#allocation2 + $0xd1] sm:$0xff] }
 0x1d5   : > { %1374 = vst [vmem:[#allocation2 + $0xe0] sm:$0xff] %v9632_v51 }
 0x1d6   : > { %v1025_v32 = vpop.f32.mrf.mxu2 }
 0x1d7   : > { %v1062_v20 = vmax.f32 %v813_v26, %v1025_v32 }
 0x1d8   : > { %v779_v42 = vpop.f32.mrf.mxu1 }
 0x1d9   : > { %v1279_v43 = vpop.f32.mrf.mxu3  ;;  %v1311_v14 = vmax.f32 %v1062_v20, %v1274_v36  ;;  %v814_v34 = vmax.f32 %v9321_v60, %v779_v42  ;;  %v8959_v60 = vld [vmem:[%s11608_s2 + $0x110] sm:$0xff]  ;;  %v1821_v42 = vpack.c.bf16 %v1798_v25, %v1797_v24 }
 0x1da   : > { %2367 = vmatpush.bf16.msra.mxu0 %v8959_v60  ;;  %v2036_v60 = vld [vmem:[#allocation2 + $0xab] sm:$0xff] }
 0x1db   : > { %v9644_v54 = vmax.f32 %v1311_v14, 0.0  ;;  %1735 = vmatmul.bf16.gmra.mxu1 %v1417_v48  ;;  %1937 = vmatmul.bf16.gmra.mxu2 %v1820_v40  ;;  %v2056_v14 = vpack.c.bf16 %v2034_v11, %v2033_v52 }
 0x1dc   : > { %v9652_v58 = vpop.f32.mrf.mxu0  ;;  %v1469_v36 = vld [vmem:[#allocation2 + $0xd9] sm:$0xff] }
 0x1dd   : > { %1375 = vst [vmem:[#allocation2 + $0xe8] sm:$0xff] %v9644_v54  ;;  %v1487_v39 = vpack.c.bf16 %v1469_v36, %v1468_v17  ;;  %v1424_v28 = vpack.c.bf16 %v9644_v54, %v9632_v51 }
 0x1de   : > { %2176 = vmatmul.bf16.gmra.mxu3 %v2055_v41  ;;  %v1028_v5 = vpop.f32.mrf.mxu2 }
 0x1df   : > { %v1063_v29 = vmax.f32 %v814_v34, %v1028_v5  ;;  %1628 = vmatmul.bf16.gmra.mxu0 %v1487_v39 }
 0x1e0   : > { %v781_v59 = vpop.f32.mrf.mxu1 }
 0x1e1   : > { %v2137_v48 = vpop.f32.mrf.mxu3  ;;  %v1312_v21 = vmax.f32 %v1063_v29, %v1277_v16  ;;  %v815_v38 = vmax.f32 %v9333_v1, %v781_v59  ;;  %v8958_v16 = vld [vmem:[%s11608_s2 + $0x108] sm:$0xff]  ;;  %v8957_v1 = vld [vmem:[%s11608_s2 + $0x100] sm:$0xff] }
 0x1e2   : > { %2368 = vmatpush.bf16.msra.mxu0 %v8958_v16  ;;  %v1800_v59 = vld [vmem:[#allocation2 + $0x9a] sm:$0xff] }
 0x1e3   : > { %v9661_v56 = vmax.f32 %v1312_v21, 0.0 }
 0x1e4   : > { %v9666_v33 = vpop.f32.mrf.mxu0  ;;  %v1470_v41 = vld [vmem:[#allocation2 + $0xe1] sm:$0xff] }
 0x1e5   : > { %1376 = vst [vmem:[#allocation2 + $0xf0] sm:$0xff] %v9661_v56 }
 0x1e6   : > { %v1030_v2 = vpop.f32.mrf.mxu2  ;;  %2369 = vmatpush.bf16.msra.mxu0 %v8957_v1 }
 0x1e7   : > { %v1064_v26 = vmax.f32 %v815_v38, %v1030_v2  ;;  %v1799_v2 = vld [vmem:[#allocation2 + $0x92] sm:$0xff] }
 0x1e8   : > { %v1701_v20 = vpop.f32.mrf.mxu1  ;;  %v1822_v25 = vpack.c.bf16 %v1800_v59, %v1799_v2  ;;  %v2250_v59 = vld [vmem:[#allocation2 + $0xc] sm:$0xff] }
 0x1e9   : > { %v2139_v32 = vpop.f32.mrf.mxu3  ;;  %v1313_v62 = vmax.f32 %v1064_v26, %v1279_v43  ;;  %v1702_v9 = vadd.f32 %v1701_v20, %v9555_v44  ;;  %v2035_v26 = vld [vmem:[#allocation2 + $0xa3] sm:$0xff] }
 0x1ea   : > { %v2057_v16 = vpack.c.bf16 %v2036_v60, %v2035_v26 }
 0x1eb   : > { %v9673_v40 = vmax.f32 %v1313_v62, 0.0  ;;  %1740 = vmatmul.bf16.gmra.mxu1 %v1418_v57  ;;  %1942 = vmatmul.bf16.gmra.mxu2 %v1821_v42 }
 0x1ec   : > { %v9681_v55 = vpop.f32.mrf.mxu0  ;;  %v1471_v43 = vld [vmem:[#allocation2 + $0xe9] sm:$0xff] }
 0x1ed   : > { %1377 = vst [vmem:[#allocation2 + $0xf8] sm:$0xff] %v9673_v40  ;;  %v1488_v17 = vpack.c.bf16 %v1471_v43, %v1470_v41  ;;  %v1425_v30 = vpack.c.bf16 %v9673_v40, %v9661_v56 }
 0x1ee   : > { %2181 = vmatmul.bf16.gmra.mxu3 %v2056_v14  ;;  %v1903_v36 = vpop.f32.mrf.mxu2 }
 0x1ef   : > { %v1983_v22 = vadd.f32 %v1903_v36, %v1702_v9  ;;  %1633 = vmatmul.bf16.gmra.mxu0 %v1488_v17  ;;  %v2038_v17 = vld [vmem:[#allocation2 + $0xbb] sm:$0xff] }
 0x1f0   : > { %v1703_v34 = vpop.f32.mrf.mxu1 }
 0x1f1   : > { %v2142_v57 = vpop.f32.mrf.mxu3  ;;  %v9687_v39 = vadd.f32 %v2137_v48, %v1983_v22  ;;  %v1704_v29 = vadd.f32 %v1703_v34, %v9563_v27  ;;  %v1801_v22 = vld [vmem:[#allocation2 + $0xa2] sm:$0xff]  ;;  %v2037_v34 = vld [vmem:[#allocation2 + $0xb3] sm:$0xff] }
 0x1f4   : > { %v9689_v5 = vpop.f32.mrf.mxu0  ;;  %v1472_v20 = vld [vmem:[#allocation2 + $0xf1] sm:$0xff]  ;;  %v1473_v24 = vld [vmem:[#allocation2 + $0xf9] sm:$0xff] }
 0x1f5   : > { %v1489_v62 = vpack.c.bf16 %v1473_v24, %v1472_v20 }
 0x1f6   : > { %v1905_v63 = vpop.f32.mrf.mxu2 }
 0x1f7   : > { %v1984_v21 = vadd.f32 %v1905_v63, %v1704_v29  ;;  %v2058_v63 = vpack.c.bf16 %v2038_v17, %v2037_v34 }
 0x1f8   : > { %v1706_v38 = vpop.f32.mrf.mxu1 }
 0x1f9   : > { %v2144_v44 = vpop.f32.mrf.mxu3  ;;  %v9692_v11 = vadd.f32 %v2139_v32, %v1984_v21  ;;  %v1707_v48 = vadd.f32 %v1706_v38, %v9572_v53  ;;  %v1823_v53 = vpack.c.bf16 %v1802_v8, %v1801_v22  ;;  %v2251_v8 = vld [vmem:[#allocation2 + $0x14] sm:$0xff] }
 0x1fb   : > { %1745 = vmatmul.bf16.gmra.mxu1 %v1419_v19  ;;  %1947 = vmatmul.bf16.gmra.mxu2 %v1822_v25 }
 0x1fc   : > { %v9697_v27 = vpop.f32.mrf.mxu0 }
 0x1fe   : > { %2186 = vmatmul.bf16.gmra.mxu3 %v2057_v16  ;;  %v1908_v42 = vpop.f32.mrf.mxu2 }
 0x1ff   : > { %v1985_v52 = vadd.f32 %v1908_v42, %v1707_v48  ;;  %1638 = vmatmul.bf16.gmra.mxu0 %v1489_v62  ;;  %v2040_v48 = vld [vmem:[#allocation2 + $0xcb] sm:$0xff] }
 0x200   : > { %v1708_v32 = vpop.f32.mrf.mxu1  ;;  %v1803_v42 = vld [vmem:[#allocation2 + $0xb2] sm:$0xff] }
 0x201   : > { %v2147_v14 = vpop.f32.mrf.mxu3  ;;  %v9700_v1 = vadd.f32 %v2142_v57, %v1985_v52  ;;  %v1709_v43 = vadd.f32 %v1708_v32, %v9580_v13  ;;  %v2249_v57 = vld [vmem:[#allocation2 + $0x4] sm:$0xff] }
 0x202   : > { %v2281_v60 = vpack.c.bf16 %v2250_v59, %v2249_v57  ;;  %v2039_v52 = vld [vmem:[#allocation2 + $0xc3] sm:$0xff] }
 0x203   : > { %v1806_v59 = vld [vmem:[#allocation2 + $0xca] sm:$0xff] }
 0x204   : > { %v9702_v41 = vpop.f32.mrf.mxu0 }
 0x206   : > { %v1910_v4 = vpop.f32.mrf.mxu2 }
 0x207   : > { %v1986_v19 = vadd.f32 %v1910_v4, %v1709_v43  ;;  %v2059_v43 = vpack.c.bf16 %v2040_v48, %v2039_v52  ;;  %v2252_v4 = vld [vmem:[#allocation2 + $0x1c] sm:$0xff] }
 0x208   : > { %v1711_v36 = vpop.f32.mrf.mxu1  ;;  %v2282_v17 = vpack.c.bf16 %v2252_v4, %v2251_v8  ;;  %v8980_v48 = vld [vmem:[%s11608_s2 + $0x1b8] sm:$0xff]  ;;  %v8979_v4 = vld [vmem:[%s11608_s2 + $0x1b0] sm:$0xff] }
 0x209   : > { %v2149_v9 = vpop.f32.mrf.mxu3  ;;  %v9705_v29 = vadd.f32 %v2144_v44, %v1986_v19  ;;  %v1712_v21 = vadd.f32 %v1711_v36, %v9589_v0  ;;  %2830 = vmatpush.bf16.msrb.mxu2 %v8980_v48 }
 0x20b   : > { %1750 = vmatmul.bf16.gmra.mxu1 %v1420_v49  ;;  %1952 = vmatmul.bf16.gmra.mxu2 %v1823_v53  ;;  %v1804_v49 = vld [vmem:[#allocation2 + $0xba] sm:$0xff]  ;;  %v8986_v53 = vld [vmem:[%s11608_s2 + $0x1e8] sm:$0xff] }
 0x20c   : > { %v9710_v13 = vpop.f32.mrf.mxu0  ;;  %v1824_v0 = vpack.c.bf16 %v1804_v49, %v1803_v42  ;;  %v2253_v42 = vld [vmem:[#allocation2 + $0x24] sm:$0xff] }
 0x20d   : > { %2831 = vmatpush.bf16.msrb.mxu2 %v8979_v4 }
 0x20e   : > { %2191 = vmatmul.bf16.gmra.mxu3 %v2058_v63  ;;  %v1913_v38 = vpop.f32.mrf.mxu2 }
 0x20f   : > { %v1987_v2 = vadd.f32 %v1913_v38, %v1712_v21  ;;  %2370 = vmatmul.bf16.vlgmr.msra.gmra.mxu0 %v2281_v60  ;;  %v2042_v60 = vld [vmem:[#allocation2 + $0xdb] sm:$0xff] }
 0x210   : > { %v1713_v44 = vpop.f32.mrf.mxu1  ;;  %v8985_v38 = vld [vmem:[%s11608_s2 + $0x1e0] sm:$0xff] }
 0x211   : > { %v2152_v25 = vpop.f32.mrf.mxu3  ;;  %v9713_v26 = vadd.f32 %v2147_v14, %v1987_v2  ;;  %v1714_v7 = vadd.f32 %v1713_v44, %v9597_v47  ;;  %v8988_v47 = vld [vmem:[%s11608_s2 + $0x1f8] sm:$0xff] }
 0x212   : > { %3064 = vmatpush.bf16.msrb.mxu3 %v8988_v47 }
 0x214   : > { %v9715_v16 = vpop.f32.mrf.mxu0 }
 0x216   : > { %v1915_v3 = vpop.f32.mrf.mxu2  ;;  %3065 = vmatpush.bf16.msrb.mxu3 %v8987_v61 }
 0x217   : > { %v1988_v20 = vadd.f32 %v1915_v3, %v1714_v7  ;;  %v2041_v7 = vld [vmem:[#allocation2 + $0xd3] sm:$0xff] }
 0x218   : > { %v1716_v62 = vpop.f32.mrf.mxu1  ;;  %v2060_v49 = vpack.c.bf16 %v2042_v60, %v2041_v7 }
 0x219   : > { %v2154_v24 = vpop.f32.mrf.mxu3  ;;  %v9718_v32 = vadd.f32 %v2149_v9, %v1988_v20  ;;  %v1717_v19 = vadd.f32 %v1716_v62, %v9606_v15  ;;  %v2254_v20 = vld [vmem:[#allocation2 + $0x2c] sm:$0xff] }
 0x21a   : > { %3066 = vmatpush.bf16.msrb.mxu3 %v8986_v53  ;;  %v2283_v37 = vpack.c.bf16 %v2254_v20, %v2253_v42  ;;  %v2044_v53 = vld [vmem:[#allocation2 + $0xeb] sm:$0xff]  ;;  %v8968_v20 = vld [vmem:[%s11608_s2 + $0x158] sm:$0xff] }
 0x21b   : > { %1755 = vmatmul.bf16.gmra.mxu1 %v1421_v35  ;;  %1957 = vmatmul.bf16.gmra.mxu2 %v1824_v0 }
 0x21c   : > { %v9726_v14 = vpop.f32.mrf.mxu0 }
 0x21e   : > { %2196 = vmatmul.bf16.gmra.mxu3 %v2059_v43  ;;  %v1918_v9 = vpop.f32.mrf.mxu2  ;;  %v8971_v43 = vld [vmem:[%s11608_s2 + $0x170] sm:$0xff] }
 0x21f   : > { %v1989_v36 = vadd.f32 %v1918_v9, %v1717_v19  ;;  %2375 = vmatmul.bf16.gmra.mxu0 %v2282_v17  ;;  %3067 = vmatpush.bf16.msrb.mxu3 %v8985_v38  ;;  %v8970_v19 = vld [vmem:[%s11608_s2 + $0x168] sm:$0xff]  ;;  %v1807_v38 = vld [vmem:[#allocation2 + $0xd2] sm:$0xff] }
 0x220   : > { %v1718_v12 = vpop.f32.mrf.mxu1  ;;  %v8978_v17 = vld [vmem:[%s11608_s2 + $0x1a8] sm:$0xff] }
 0x221   : > { %v2157_v22 = vpop.f32.mrf.mxu3  ;;  %v9732_v35 = vadd.f32 %v2152_v25, %v1989_v36  ;;  %v1719_v15 = vadd.f32 %v1718_v12, %v9614_v18  ;;  %v1805_v25 = vld [vmem:[#allocation2 + $0xc2] sm:$0xff]  ;;  %v8972_v18 = vld [vmem:[%s11608_s2 + $0x178] sm:$0xff]  ;;  %2832 = vmatpush.bf16.msrb.mxu2 %v8978_v17 }
 0x222   : > { %v1825_v44 = vpack.c.bf16 %v1806_v59, %v1805_v25  ;;  %2596 = vmatpush.bf16.msrb.mxu1 %v8972_v18  ;;  %v8982_v9 = vld [vmem:[%s11608_s2 + $0x1c8] sm:$0xff]  ;;  %v1808_v12 = vld [vmem:[#allocation2 + $0xda] sm:$0xff] }
 0x223   : > { %v8969_v59 = vld [vmem:[%s11608_s2 + $0x160] sm:$0xff]  ;;  %v8976_v18 = vld [vmem:[%s11608_s2 + $0x198] sm:$0xff] }
 0x224   : > { %v9737_v34 = vpop.f32.mrf.mxu0  ;;  %v2043_v25 = vld [vmem:[#allocation2 + $0xe3] sm:$0xff]  ;;  %v2045_v17 = vld [vmem:[#allocation2 + $0xf3] sm:$0xff] }
 0x225   : > { %v2061_v7 = vpack.c.bf16 %v2044_v53, %v2043_v25 }
 0x226   : > { %v1920_v63 = vpop.f32.mrf.mxu2  ;;  %2597 = vmatpush.bf16.msrb.mxu1 %v8971_v43  ;;  %v8974_v43 = vld [vmem:[%s11608_s2 + $0x188] sm:$0xff] }
 0x227   : > { %v1990_v57 = vadd.f32 %v1920_v63, %v1719_v15 }
 0x228   : > { %v1721_v2 = vpop.f32.mrf.mxu1 }
 0x229   : > { %v2159_v21 = vpop.f32.mrf.mxu3  ;;  %v9743_v3 = vadd.f32 %v2154_v24, %v1990_v57  ;;  %v8984_v24 = vld [vmem:[%s11608_s2 + $0x1d8] sm:$0xff]  ;;  %v1722_v6 = vadd.f32 %v1721_v2, %v9623_v45  ;;  %v8983_v45 = vld [vmem:[%s11608_s2 + $0x1d0] sm:$0xff]  ;;  %v8977_v57 = vld [vmem:[%s11608_s2 + $0x1a0] sm:$0xff]  ;;  %v1826_v2 = vpack.c.bf16 %v1808_v12, %v1807_v38 }
 0x22a   : > { %3068 = vmatpush.bf16.msrb.mxu3 %v8984_v24  ;;  %2598 = vmatpush.bf16.msrb.mxu1 %v8970_v19  ;;  %v1810_v19 = vld [vmem:[#allocation2 + $0xea] sm:$0xff]  ;;  %v8973_v12 = vld [vmem:[%s11608_s2 + $0x180] sm:$0xff] }
 0x22b   : > { %1760 = vmatmul.bf16.gmra.mxu1 %v1422_v50  ;;  %1962 = vmatmul.bf16.gmra.mxu2 %v1825_v44  ;;  %v2257_v38 = vld [vmem:[#allocation2 + $0x44] sm:$0xff] }
 0x22c   : > { %v9757_v62 = vpop.f32.mrf.mxu0  ;;  %2833 = vmatpush.bf16.msrb.mxu2 %v8977_v57 }
 0x22e   : > { %2201 = vmatmul.bf16.gmra.mxu3 %v2060_v49  ;;  %v1923_v50 = vpop.f32.mrf.mxu2  ;;  %2599 = vmatpush.bf16.msrb.mxu1 %v8969_v59  ;;  %v2256_v49 = vld [vmem:[#allocation2 + $0x3c] sm:$0xff] }
 0x22f   : > { %v1991_v0 = vadd.f32 %v1923_v50, %v1722_v6  ;;  %2380 = vmatmul.bf16.gmra.mxu0 %v2283_v37  ;;  %3069 = vmatpush.bf16.msrb.mxu3 %v8983_v45  ;;  %v8967_v6 = vld [vmem:[%s11608_s2 + $0x150] sm:$0xff] }
 0x230   : > { %v1723_v47 = vpop.f32.mrf.mxu1  ;;  %2834 = vmatpush.bf16.msrb.mxu2 %v8976_v18  ;;  %v8975_v37 = vld [vmem:[%s11608_s2 + $0x190] sm:$0xff] }
 0x231   : > { %v2162_v52 = vpop.f32.mrf.mxu3  ;;  %v9769_v8 = vadd.f32 %v2157_v22, %v1991_v0  ;;  %v1724_v61 = vadd.f32 %v1723_v47, %v9637_v10  ;;  %v8981_v10 = vld [vmem:[%s11608_s2 + $0x1c0] sm:$0xff] }
 0x232   : > { %2600 = vmatpush.bf16.msrb.mxu1 %v8968_v20 }
 0x233   : > { %3070 = vmatpush.bf16.msrb.mxu3 %v8982_v9 }
 0x234   : > { %v9780_v36 = vpop.f32.mrf.mxu0  ;;  %2835 = vmatpush.bf16.msrb.mxu2 %v8975_v37  ;;  %v2951_v37 = vld [vmem:[#allocation2 + $0x12] sm:$0xff] }
 0x236   : > { %v1925_v22 = vpop.f32.mrf.mxu2  ;;  %2601 = vmatpush.bf16.msrb.mxu1 %v8967_v6 }
 0x237   : > { %v1992_v15 = vadd.f32 %v1925_v22, %v1724_v61  ;;  %3071 = vmatpush.bf16.msrb.mxu3 %v8981_v10  ;;  %v2046_v61 = vld [vmem:[#allocation2 + $0xfb] sm:$0xff]  ;;  %v2258_v10 = vld [vmem:[#allocation2 + $0x4c] sm:$0xff] }
 0x238   : > { %v1726_v60 = vpop.f32.mrf.mxu1  ;;  %2836 = vmatpush.bf16.msrb.mxu2 %v8974_v43  ;;  %v8965_v22 = vld [vmem:[%s11608_s2 + $0x140] sm:$0xff]  ;;  %v2062_v57 = vpack.c.bf16 %v2046_v61, %v2045_v17  ;;  %v2285_v25 = vpack.c.bf16 %v2258_v10, %v2257_v38  ;;  %v2717_v10 = vld [vmem:[#allocation2 + $0x11] sm:$0xff] }
 0x239   : > { %v2164_v63 = vpop.f32.mrf.mxu3  ;;  %v9792_v44 = vadd.f32 %v2159_v21, %v1992_v15  ;;  %v2255_v21 = vld [vmem:[#allocation2 + $0x34] sm:$0xff]  ;;  %v1727_v24 = vadd.f32 %v1726_v60, %v9652_v58  ;;  %v8966_v58 = vld [vmem:[%s11608_s2 + $0x148] sm:$0xff]  ;;  %v2260_v43 = vld [vmem:[#allocation2 + $0x5c] sm:$0xff] }
 0x23a   : > { %v2284_v42 = vpack.c.bf16 %v2256_v49, %v2255_v21  ;;  %2602 = vmatpush.bf16.msrb.mxu1 %v8966_v58  ;;  %v1809_v15 = vld [vmem:[#allocation2 + $0xe2] sm:$0xff] }
 0x23b   : > { %1765 = vmatmul.bf16.gmra.mxu1 %v1423_v31  ;;  %1967 = vmatmul.bf16.gmra.mxu2 %v1826_v2  ;;  %v1827_v59 = vpack.c.bf16 %v1810_v19, %v1809_v15 }
 0x23c   : > { %v9803_v48 = vpop.f32.mrf.mxu0  ;;  %2837 = vmatpush.bf16.msrb.mxu2 %v8973_v12  ;;  %v2718_v12 = vld [vmem:[#allocation2 + $0x19] sm:$0xff] }
 0x23e   : > { %2206 = vmatmul.bf16.gmra.mxu3 %v2061_v7  ;;  %v1928_v23 = vpop.f32.mrf.mxu2  ;;  %2603 = vmatpush.bf16.msrb.mxu1 %v8965_v22 }
 0x23f   : > { %v1993_v46 = vadd.f32 %v1928_v23, %v1727_v24  ;;  %2385 = vmatmul.bf16.gmra.mxu0 %v2284_v42  ;;  %v1812_v24 = vld [vmem:[#allocation2 + $0xfa] sm:$0xff] }
 0x240   : > { %v1728_v50 = vpop.f32.mrf.mxu1 }
 0x241   : > { %v2167_v31 = vpop.f32.mrf.mxu3  ;;  %v9812_v0 = vadd.f32 %v2162_v52, %v1993_v46  ;;  %v1729_v45 = vadd.f32 %v1728_v50, %v9666_v33  ;;  %v2952_v46 = vld [vmem:[#allocation2 + $0x1a] sm:$0xff] }
 0x242   : > { %v2983_v58 = vpack.c.bf16 %v2952_v46, %v2951_v37 }
 0x244   : > { %v9820_v4 = vpop.f32.mrf.mxu0 }
 0x246   : > { %v1930_v47 = vpop.f32.mrf.mxu2 }
 0x247   : > { %v1994_v9 = vadd.f32 %v1930_v47, %v1729_v45 }
 0x248   : > { %v1731_v53 = vpop.f32.mrf.mxu1 }
 0x249   : > { %v2169_v52 = vpop.f32.mrf.mxu3  ;;  %v9829_v33 = vadd.f32 %v2164_v63, %v1994_v9  ;;  %v1732_v2 = vadd.f32 %v1731_v53, %v9681_v55 }
 0x24b   : > { %1770 = vmatmul.bf16.gmra.mxu1 %v1424_v28  ;;  %1972 = vmatmul.bf16.gmra.mxu2 %v1827_v59  ;;  %v1811_v28 = vld [vmem:[#allocation2 + $0xf2] sm:$0xff]  ;;  %v2954_v59 = vld [vmem:[#allocation2 + $0x2a] sm:$0xff] }
 0x24c   : > { %v9834_v60 = vpop.f32.mrf.mxu0  ;;  %v9842_v55 = vpack.c.bf16 %v1812_v24, %v1811_v28 }
 0x24e   : > { %2211 = vmatmul.bf16.gmra.mxu3 %v2062_v57  ;;  %v1933_v7 = vpop.f32.mrf.mxu2 }
 0x24f   : > { %v1995_v49 = vadd.f32 %v1933_v7, %v1732_v2  ;;  %2390 = vmatmul.bf16.gmra.mxu0 %v2285_v25  ;;  %v2749_v2 = vpack.c.bf16 %v2718_v12, %v2717_v10  ;;  %v2953_v25 = vld [vmem:[#allocation2 + $0x22] sm:$0xff] }
 0x250   : > { %v1733_v63 = vpop.f32.mrf.mxu1 }
 0x251   : > { %v2172_v20 = vpop.f32.mrf.mxu3  ;;  %v9837_v18 = vadd.f32 %v2167_v31, %v1995_v49  ;;  %v1734_v51 = vadd.f32 %v1733_v63, %v9689_v5  ;;  %v2259_v31 = vld [vmem:[#allocation2 + $0x54] sm:$0xff]  ;;  %v2984_v49 = vpack.c.bf16 %v2954_v59, %v2953_v25  ;;  %v2261_v63 = vld [vmem:[#allocation2 + $0x64] sm:$0xff] }
 0x252   : > { %v2286_v47 = vpack.c.bf16 %v2260_v43, %v2259_v31  ;;  %v2486_v43 = vld [vmem:[#allocation2 + $0x28] sm:$0xff]  ;;  %v2263_v59 = vld [vmem:[#allocation2 + $0x74] sm:$0xff] }
 0x253   : > { %v2720_v31 = vld [vmem:[#allocation2 + $0x29] sm:$0xff] }
 0x254   : > { %v9839_v21 = vpop.f32.mrf.mxu0 }
 0x256   : > { %v1935_v54 = vpop.f32.mrf.mxu2 }
 0x257   : > { %v1996_v42 = vadd.f32 %v1935_v54, %v1734_v51 }
 0x258   : > { %v1736_v6 = vpop.f32.mrf.mxu1 }
 0x259   : > { %v2174_v23 = vpop.f32.mrf.mxu3  ;;  %v9844_v50 = vadd.f32 %v2169_v52, %v1996_v42  ;;  %v1737_v45 = vadd.f32 %v1736_v6, %v9697_v27  ;;  %v2483_v27 = vld [vmem:[#allocation2 + $0x10] sm:$0xff] }
 0x25b   : > { %1775 = vmatmul.bf16.gmra.mxu1 %v1425_v30  ;;  %1977 = vmatmul.bf16.gmra.mxu2 %v9842_v55  ;;  %v2484_v30 = vld [vmem:[#allocation2 + $0x18] sm:$0xff] }
 0x25c   : > { %v9850_v5 = vpop.f32.mrf.mxu0  ;;  %v2515_v38 = vpack.c.bf16 %v2484_v30, %v2483_v27  ;;  %v2955_v30 = vld [vmem:[#allocation2 + $0x32] sm:$0xff] }
 0x25e   : > { %3072 = vmatmul.bf16.vlgmr.msrb.gmra.mxu3 %v2983_v58  ;;  %v1938_v19 = vpop.f32.mrf.mxu2 }
 0x25f   : > { %v1997_v17 = vadd.f32 %v1938_v19, %v1737_v45  ;;  %2395 = vmatmul.bf16.gmra.mxu0 %v2286_v47  ;;  %v2956_v19 = vld [vmem:[#allocation2 + $0x3a] sm:$0xff] }
 0x260   : > { %v1738_v52 = vpop.f32.mrf.mxu1 }
 0x261   : > { %v2177_v9 = vpop.f32.mrf.mxu3  ;;  %v9853_v61 = vadd.f32 %v2172_v20, %v1997_v17  ;;  %v1739_v56 = vadd.f32 %v1738_v52, %v9702_v41  ;;  %v2262_v20 = vld [vmem:[#allocation2 + $0x6c] sm:$0xff]  ;;  %v2719_v52 = vld [vmem:[#allocation2 + $0x21] sm:$0xff] }
 0x262   : > { %v2287_v54 = vpack.c.bf16 %v2262_v20, %v2261_v63 }
 0x264   : > { %v9855_v22 = vpop.f32.mrf.mxu0 }
 0x266   : > { %v1940_v40 = vpop.f32.mrf.mxu2 }
 0x267   : > { %v1998_v53 = vadd.f32 %v1940_v40, %v1739_v56  ;;  %v2750_v40 = vpack.c.bf16 %v2720_v31, %v2719_v52 }
 0x268   : > { %v1741_v57 = vpop.f32.mrf.mxu1 }
 0x269   : > { %v2179_v15 = vpop.f32.mrf.mxu3  ;;  %v9858_v7 = vadd.f32 %v2174_v23, %v1998_v53  ;;  %v1742_v51 = vadd.f32 %v1741_v57, %v9710_v13  ;;  %v2485_v13 = vld [vmem:[#allocation2 + $0x20] sm:$0xff] }
 0x26a   : > { %v2516_v56 = vpack.c.bf16 %v2486_v43, %v2485_v13  ;;  %v2264_v53 = vld [vmem:[#allocation2 + $0x7c] sm:$0xff]  ;;  %v2265_v13 = vld [vmem:[#allocation2 + $0x84] sm:$0xff] }
 0x26b   : > { %2604 = vmatmul.bf16.vlgmr.msrb.gmra.mxu1 %v2515_v38  ;;  %2838 = vmatmul.bf16.vlgmr.msrb.gmra.mxu2 %v2749_v2  ;;  %v2288_v27 = vpack.c.bf16 %v2264_v53, %v2263_v59 }
 0x26c   : > { %v9860_v41 = vpop.f32.mrf.mxu0 }
 0x26e   : > { %3077 = vmatmul.bf16.gmra.mxu3 %v2984_v49  ;;  %v1943_v28 = vpop.f32.mrf.mxu2 }
 0x26f   : > { %v1999_v24 = vadd.f32 %v1943_v28, %v1742_v51  ;;  %2400 = vmatmul.bf16.gmra.mxu0 %v2287_v54  ;;  %v2488_v51 = vld [vmem:[#allocation2 + $0x38] sm:$0xff] }
 0x270   : > { %v1743_v46 = vpop.f32.mrf.mxu1  ;;  %v2722_v54 = vld [vmem:[#allocation2 + $0x39] sm:$0xff] }
 0x271   : > { %v2182_v42 = vpop.f32.mrf.mxu3  ;;  %v9863_v6 = vadd.f32 %v2177_v9, %v1999_v24  ;;  %v1744_v37 = vadd.f32 %v1743_v46, %v9715_v16  ;;  %v2985_v9 = vpack.c.bf16 %v2956_v19, %v2955_v30  ;;  %v2958_v46 = vld [vmem:[#allocation2 + $0x4a] sm:$0xff] }
 0x274   : > { %v9865_v23 = vpop.f32.mrf.mxu0 }
 0x276   : > { %v1945_v58 = vpop.f32.mrf.mxu2 }
 0x277   : > { %v2000_v45 = vadd.f32 %v1945_v58, %v1744_v37  ;;  %v2721_v58 = vld [vmem:[#allocation2 + $0x31] sm:$0xff] }
 0x278   : > { %v1746_v17 = vpop.f32.mrf.mxu1  ;;  %v2751_v31 = vpack.c.bf16 %v2722_v54, %v2721_v58  ;;  %v2489_v54 = vld [vmem:[#allocation2 + $0x40] sm:$0xff] }
 0x279   : > { %v2184_v47 = vpop.f32.mrf.mxu3  ;;  %v9868_v12 = vadd.f32 %v2179_v15, %v2000_v45  ;;  %v1747_v57 = vadd.f32 %v1746_v17, %v9726_v14  ;;  %v2487_v14 = vld [vmem:[#allocation2 + $0x30] sm:$0xff]  ;;  %v2957_v45 = vld [vmem:[#allocation2 + $0x42] sm:$0xff] }
 0x27a   : > { %v2517_v43 = vpack.c.bf16 %v2488_v51, %v2487_v14  ;;  %v2266_v17 = vld [vmem:[#allocation2 + $0x8c] sm:$0xff] }
 0x27b   : > { %2609 = vmatmul.bf16.gmra.mxu1 %v2516_v56  ;;  %2843 = vmatmul.bf16.gmra.mxu2 %v2750_v40  ;;  %v2289_v40 = vpack.c.bf16 %v2266_v17, %v2265_v13  ;;  %v2959_v14 = vld [vmem:[#allocation2 + $0x52] sm:$0xff] }
 0x27c   : > { %v9870_v16 = vpop.f32.mrf.mxu0 }
 0x27e   : > { %3082 = vmatmul.bf16.gmra.mxu3 %v2985_v9  ;;  %v1948_v10 = vpop.f32.mrf.mxu2 }
 0x27f   : > { %v2001_v38 = vadd.f32 %v1948_v10, %v1747_v57  ;;  %2405 = vmatmul.bf16.gmra.mxu0 %v2288_v27 }
 0x280   : > { %v1748_v25 = vpop.f32.mrf.mxu1 }
 0x281   : > { %v2187_v2 = vpop.f32.mrf.mxu3  ;;  %v9873_v49 = vadd.f32 %v2182_v42, %v2001_v38  ;;  %v1749_v20 = vadd.f32 %v1748_v25, %v9737_v34  ;;  %v2986_v42 = vpack.c.bf16 %v2958_v46, %v2957_v45  ;;  %v2490_v25 = vld [vmem:[#allocation2 + $0x48] sm:$0xff] }
 0x282   : > { %v2518_v46 = vpack.c.bf16 %v2490_v25, %v2489_v54  ;;  %v2961_v54 = vld [vmem:[#allocation2 + $0x62] sm:$0xff] }
 0x284   : > { %v9875_v15 = vpop.f32.mrf.mxu0 }
 0x286   : > { %v1950_v63 = vpop.f32.mrf.mxu2 }
 0x287   : > { %v2002_v28 = vadd.f32 %v1950_v63, %v1749_v20  ;;  %v2960_v63 = vld [vmem:[#allocation2 + $0x5a] sm:$0xff] }
 0x288   : > { %v1751_v37 = vpop.f32.mrf.mxu1  ;;  %v2987_v58 = vpack.c.bf16 %v2960_v63, %v2959_v14 }
 0x289   : > { %v2189_v24 = vpop.f32.mrf.mxu3  ;;  %v9878_v19 = vadd.f32 %v2184_v47, %v2002_v28  ;;  %v1752_v52 = vadd.f32 %v1751_v37, %v9757_v62  ;;  %v2724_v62 = vld [vmem:[#allocation2 + $0x49] sm:$0xff]  ;;  %v2723_v28 = vld [vmem:[#allocation2 + $0x41] sm:$0xff] }
 0x28a   : > { %v2752_v37 = vpack.c.bf16 %v2724_v62, %v2723_v28  ;;  %v2491_v62 = vld [vmem:[#allocation2 + $0x50] sm:$0xff] }
 0x28b   : > { %2614 = vmatmul.bf16.gmra.mxu1 %v2517_v43  ;;  %2848 = vmatmul.bf16.gmra.mxu2 %v2751_v31  ;;  %v2268_v43 = vld [vmem:[#allocation2 + $0x9c] sm:$0xff] }
 0x28c   : > { %v2371_v34 = vpop.f32.mrf.mxu0 }
 0x28d   : > { %v9882_v56 = vadd.f32 %v2371_v34, %v9687_v39 }
 0x28e   : > { %3087 = vmatmul.bf16.gmra.mxu3 %v2986_v42  ;;  %v1953_v30 = vpop.f32.mrf.mxu2 }
 0x28f   : > { %v2003_v9 = vadd.f32 %v1953_v30, %v1752_v52  ;;  %2410 = vmatmul.bf16.gmra.mxu0 %v2289_v40 }
 0x290   : > { %v1753_v59 = vpop.f32.mrf.mxu1 }
 0x291   : > { %v2192_v53 = vpop.f32.mrf.mxu3  ;;  %v9884_v47 = vadd.f32 %v2187_v2, %v2003_v9  ;;  %v1754_v27 = vadd.f32 %v1753_v59, %v9780_v36  ;;  %v2267_v36 = vld [vmem:[#allocation2 + $0x94] sm:$0xff] }
 0x292   : > { %v2290_v42 = vpack.c.bf16 %v2268_v43, %v2267_v36 }
 0x294   : > { %v2373_v57 = vpop.f32.mrf.mxu0 }
 0x295   : > { %v9888_v10 = vadd.f32 %v2373_v57, %v9692_v11  ;;  %v2492_v57 = vld [vmem:[#allocation2 + $0x58] sm:$0xff] }
 0x296   : > { %v1955_v38 = vpop.f32.mrf.mxu2  ;;  %v2519_v63 = vpack.c.bf16 %v2492_v57, %v2491_v62  ;;  %v2963_v62 = vld [vmem:[#allocation2 + $0x72] sm:$0xff] }
 0x297   : > { %v2004_v20 = vadd.f32 %v1955_v38, %v1754_v27  ;;  %v2962_v38 = vld [vmem:[#allocation2 + $0x6a] sm:$0xff] }
 0x298   : > { %v1756_v51 = vpop.f32.mrf.mxu1  ;;  %v2988_v28 = vpack.c.bf16 %v2962_v38, %v2961_v54 }
 0x299   : > { %v2194_v39 = vpop.f32.mrf.mxu3  ;;  %v9890_v2 = vadd.f32 %v2189_v24, %v2004_v20  ;;  %v1757_v31 = vadd.f32 %v1756_v51, %v9803_v48  ;;  %v2726_v48 = vld [vmem:[#allocation2 + $0x59] sm:$0xff]  ;;  %v2725_v20 = vld [vmem:[#allocation2 + $0x51] sm:$0xff] }
 0x29a   : > { %v2753_v51 = vpack.c.bf16 %v2726_v48, %v2725_v20  ;;  %v2493_v48 = vld [vmem:[#allocation2 + $0x60] sm:$0xff] }
 0x29b   : > { %2619 = vmatmul.bf16.gmra.mxu1 %v2518_v46  ;;  %2853 = vmatmul.bf16.gmra.mxu2 %v2752_v37  ;;  %v2270_v46 = vld [vmem:[#allocation2 + $0xac] sm:$0xff] }
 0x29c   : > { %v2376_v11 = vpop.f32.mrf.mxu0 }
 0x29d   : > { %v9894_v45 = vadd.f32 %v2376_v11, %v9700_v1 }
 0x29e   : > { %3092 = vmatmul.bf16.gmra.mxu3 %v2987_v58  ;;  %v1958_v17 = vpop.f32.mrf.mxu2 }
 0x29f   : > { %v2005_v34 = vadd.f32 %v1958_v17, %v1757_v31  ;;  %2415 = vmatmul.bf16.gmra.mxu0 %v2290_v42 }
 0x2a0   : > { %v1758_v52 = vpop.f32.mrf.mxu1 }
 0x2a1   : > { %v2197_v13 = vpop.f32.mrf.mxu3  ;;  %v9896_v24 = vadd.f32 %v2192_v53, %v2005_v34  ;;  %v1759_v30 = vadd.f32 %v1758_v52, %v9820_v4  ;;  %v2269_v4 = vld [vmem:[#allocation2 + $0xa4] sm:$0xff] }
 0x2a2   : > { %v2291_v58 = vpack.c.bf16 %v2270_v46, %v2269_v4 }
 0x2a4   : > { %v2378_v40 = vpop.f32.mrf.mxu0 }
 0x2a5   : > { %v9900_v9 = vadd.f32 %v2378_v40, %v9705_v29  ;;  %v2494_v40 = vld [vmem:[#allocation2 + $0x68] sm:$0xff] }
 0x2a6   : > { %v1960_v59 = vpop.f32.mrf.mxu2  ;;  %v2520_v38 = vpack.c.bf16 %v2494_v40, %v2493_v48  ;;  %v2965_v48 = vld [vmem:[#allocation2 + $0x82] sm:$0xff] }
 0x2a7   : > { %v2006_v27 = vadd.f32 %v1960_v59, %v1759_v30  ;;  %v2964_v59 = vld [vmem:[#allocation2 + $0x7a] sm:$0xff] }
 0x2a8   : > { %v1761_v25 = vpop.f32.mrf.mxu1  ;;  %v2989_v20 = vpack.c.bf16 %v2964_v59, %v2963_v62 }
 0x2a9   : > { %v2199_v1 = vpop.f32.mrf.mxu3  ;;  %v9902_v53 = vadd.f32 %v2194_v39, %v2006_v27  ;;  %v1762_v37 = vadd.f32 %v1761_v25, %v9834_v60  ;;  %v2728_v60 = vld [vmem:[#allocation2 + $0x69] sm:$0xff]  ;;  %v2727_v27 = vld [vmem:[#allocation2 + $0x61] sm:$0xff] }
 0x2aa   : > { %v2754_v25 = vpack.c.bf16 %v2728_v60, %v2727_v27  ;;  %v2495_v60 = vld [vmem:[#allocation2 + $0x70] sm:$0xff] }
 0x2ab   : > { %2624 = vmatmul.bf16.gmra.mxu1 %v2519_v63  ;;  %2858 = vmatmul.bf16.gmra.mxu2 %v2753_v51  ;;  %v2272_v63 = vld [vmem:[#allocation2 + $0xbc] sm:$0xff] }
 0x2ac   : > { %v2381_v29 = vpop.f32.mrf.mxu0 }
 0x2ad   : > { %v9906_v14 = vadd.f32 %v2381_v29, %v9713_v26 }
 0x2ae   : > { %3097 = vmatmul.bf16.gmra.mxu3 %v2988_v28  ;;  %v1963_v43 = vpop.f32.mrf.mxu2 }
 0x2af   : > { %v2007_v11 = vadd.f32 %v1963_v43, %v1762_v37  ;;  %2420 = vmatmul.bf16.gmra.mxu0 %v2291_v58 }
 0x2b0   : > { %v1763_v31 = vpop.f32.mrf.mxu1 }
 0x2b1   : > { %v2202_v36 = vpop.f32.mrf.mxu3  ;;  %v9908_v39 = vadd.f32 %v2197_v13, %v2007_v11  ;;  %v1764_v17 = vadd.f32 %v1763_v31, %v9839_v21  ;;  %v2271_v21 = vld [vmem:[#allocation2 + $0xb4] sm:$0xff] }
 0x2b2   : > { %v2292_v28 = vpack.c.bf16 %v2272_v63, %v2271_v21 }
 0x2b4   : > { %v2383_v42 = vpop.f32.mrf.mxu0 }
 0x2b5   : > { %v9912_v34 = vadd.f32 %v2383_v42, %v9718_v32  ;;  %v2496_v42 = vld [vmem:[#allocation2 + $0x78] sm:$0xff] }
 0x2b6   : > { %v1965_v52 = vpop.f32.mrf.mxu2  ;;  %v2521_v59 = vpack.c.bf16 %v2496_v42, %v2495_v60 }
 0x2b7   : > { %v2008_v30 = vadd.f32 %v1965_v52, %v1764_v17  ;;  %v2966_v52 = vld [vmem:[#allocation2 + $0x8a] sm:$0xff] }
 0x2b8   : > { %v1766_v57 = vpop.f32.mrf.mxu1  ;;  %v2990_v27 = vpack.c.bf16 %v2966_v52, %v2965_v48  ;;  %v2731_v52 = vld [vmem:[#allocation2 + $0x81] sm:$0xff] }
 0x2b9   : > { %v2204_v26 = vpop.f32.mrf.mxu3  ;;  %v9914_v13 = vadd.f32 %v2199_v1, %v2008_v30  ;;  %v1767_v51 = vadd.f32 %v1766_v57, %v9850_v5  ;;  %v2730_v5 = vld [vmem:[#allocation2 + $0x79] sm:$0xff]  ;;  %v2729_v30 = vld [vmem:[#allocation2 + $0x71] sm:$0xff] }
 0x2ba   : > { %v2755_v57 = vpack.c.bf16 %v2730_v5, %v2729_v30  ;;  %v2968_v5 = vld [vmem:[#allocation2 + $0x9a] sm:$0xff] }
 0x2bb   : > { %2629 = vmatmul.bf16.gmra.mxu1 %v2520_v38  ;;  %2863 = vmatmul.bf16.gmra.mxu2 %v2754_v25  ;;  %v2274_v38 = vld [vmem:[#allocation2 + $0xcc] sm:$0xff] }
 0x2bc   : > { %v2386_v32 = vpop.f32.mrf.mxu0 }
 0x2bd   : > { %v9918_v54 = vadd.f32 %v2386_v32, %v9732_v35 }
 0x2be   : > { %3102 = vmatmul.bf16.gmra.mxu3 %v2989_v20  ;;  %v1968_v46 = vpop.f32.mrf.mxu2 }
 0x2bf   : > { %v2009_v29 = vadd.f32 %v1968_v46, %v1767_v51  ;;  %2425 = vmatmul.bf16.gmra.mxu0 %v2292_v28 }
 0x2c0   : > { %v1768_v37 = vpop.f32.mrf.mxu1 }
 0x2c1   : > { %v2207_v4 = vpop.f32.mrf.mxu3  ;;  %v9920_v1 = vadd.f32 %v2202_v36, %v2009_v29  ;;  %v1769_v43 = vadd.f32 %v1768_v37, %v9855_v22  ;;  %v2273_v22 = vld [vmem:[#allocation2 + $0xc4] sm:$0xff] }
 0x2c2   : > { %v2293_v20 = vpack.c.bf16 %v2274_v38, %v2273_v22  ;;  %v8993_v38 = vld [vmem:[%s11608_s2 + $0x220] sm:$0xff] }
 0x2c4   : > { %v2388_v58 = vpop.f32.mrf.mxu0 }
 0x2c5   : > { %v9924_v11 = vadd.f32 %v2388_v58, %v9743_v3  ;;  %v2498_v58 = vld [vmem:[#allocation2 + $0x88] sm:$0xff] }
 0x2c6   : > { %v1970_v31 = vpop.f32.mrf.mxu2 }
 0x2c7   : > { %v2010_v17 = vadd.f32 %v1970_v31, %v1769_v43  ;;  %v2732_v43 = vld [vmem:[#allocation2 + $0x89] sm:$0xff] }
 0x2c8   : > { %v1771_v40 = vpop.f32.mrf.mxu1  ;;  %v2756_v30 = vpack.c.bf16 %v2732_v43, %v2731_v52  ;;  %v8990_v52 = vld [vmem:[%s11608_s2 + $0x208] sm:$0xff] }
 0x2c9   : > { %v2209_v35 = vpop.f32.mrf.mxu3  ;;  %v9926_v36 = vadd.f32 %v2204_v26, %v2010_v17  ;;  %v1772_v25 = vadd.f32 %v1771_v40, %v9860_v41  ;;  %v8996_v26 = vld [vmem:[%s11608_s2 + $0x238] sm:$0xff]  ;;  %v8995_v41 = vld [vmem:[%s11608_s2 + $0x230] sm:$0xff]  ;;  %v2497_v17 = vld [vmem:[#allocation2 + $0x80] sm:$0xff] }
 0x2ca   : > { %3298 = vmatpush.bf16.msrb.mxu0 %v8996_v26  ;;  %v8994_v40 = vld [vmem:[%s11608_s2 + $0x228] sm:$0xff]  ;;  %v2522_v60 = vpack.c.bf16 %v2498_v58, %v2497_v17  ;;  %v2734_v58 = vld [vmem:[#allocation2 + $0x99] sm:$0xff]  ;;  %v2733_v17 = vld [vmem:[#allocation2 + $0x91] sm:$0xff] }
 0x2cb   : > { %2634 = vmatmul.bf16.gmra.mxu1 %v2521_v59  ;;  %2868 = vmatmul.bf16.gmra.mxu2 %v2755_v57  ;;  %v2276_v57 = vld [vmem:[#allocation2 + $0xdc] sm:$0xff] }
 0x2cc   : > { %v2391_v3 = vpop.f32.mrf.mxu0 }
 0x2cd   : > { %v9930_v62 = vadd.f32 %v2391_v3, %v9769_v8 }
 0x2ce   : > { %3107 = vmatmul.bf16.gmra.mxu3 %v2990_v27  ;;  %v1973_v63 = vpop.f32.mrf.mxu2  ;;  %3299 = vmatpush.bf16.msrb.mxu0 %v8995_v41  ;;  %v2275_v27 = vld [vmem:[#allocation2 + $0xd4] sm:$0xff] }
 0x2cf   : > { %v2011_v32 = vadd.f32 %v1973_v63, %v1772_v25  ;;  %2430 = vmatmul.bf16.gmra.mxu0 %v2293_v20  ;;  %v2294_v25 = vpack.c.bf16 %v2276_v57, %v2275_v27  ;;  %v8989_v27 = vld [vmem:[%s11608_s2 + $0x200] sm:$0xff] }
 0x2d0   : > { %v1773_v51 = vpop.f32.mrf.mxu1 }
 0x2d1   : > { %v2212_v21 = vpop.f32.mrf.mxu3  ;;  %v9935_v28 = vadd.f32 %v2207_v4, %v2011_v32  ;;  %v1774_v8 = vadd.f32 %v1773_v51, %v9865_v23  ;;  %v2967_v23 = vld [vmem:[#allocation2 + $0x92] sm:$0xff] }
 0x2d2   : > { %3300 = vmatpush.bf16.msrb.mxu0 %v8994_v40  ;;  %v8992_v51 = vld [vmem:[%s11608_s2 + $0x218] sm:$0xff] }
 0x2d4   : > { %v2393_v46 = vpop.f32.mrf.mxu0 }
 0x2d5   : > { %v9942_v29 = vadd.f32 %v2393_v46, %v9792_v44  ;;  %v2991_v44 = vpack.c.bf16 %v2968_v5, %v2967_v23  ;;  %v2970_v5 = vld [vmem:[#allocation2 + $0xaa] sm:$0xff] }
 0x2d6   : > { %v1975_v37 = vpop.f32.mrf.mxu2  ;;  %3301 = vmatpush.bf16.msrb.mxu0 %v8993_v38 }
 0x2d7   : > { %v2012_v31 = vadd.f32 %v1975_v37, %v1774_v8  ;;  %v2500_v37 = vld [vmem:[#allocation2 + $0x98] sm:$0xff] }
 0x2d8   : > { %v1776_v4 = vpop.f32.mrf.mxu1 }
 0x2d9   : > { %v2214_v42 = vpop.f32.mrf.mxu3  ;;  %v9947_v59 = vadd.f32 %v2209_v35, %v2012_v31  ;;  %v1777_v3 = vadd.f32 %v1776_v4, %v9870_v16  ;;  %v2499_v4 = vld [vmem:[#allocation2 + $0x90] sm:$0xff] }
 0x2da   : > { %3302 = vmatpush.bf16.msrb.mxu0 %v8992_v51 }
 0x2db   : > { %2639 = vmatmul.bf16.gmra.mxu1 %v2522_v60  ;;  %2873 = vmatmul.bf16.gmra.mxu2 %v2756_v30  ;;  %v2757_v60 = vpack.c.bf16 %v2734_v58, %v2733_v17  ;;  %v2972_v58 = vld [vmem:[#allocation2 + $0xba] sm:$0xff] }
 0x2dc   : > { %v2396_v48 = vpop.f32.mrf.mxu0 }
 0x2dd   : > { %v9954_v22 = vadd.f32 %v2396_v48, %v9812_v0  ;;  %v8991_v0 = vld [vmem:[%s11608_s2 + $0x210] sm:$0xff]  ;;  %v2277_v48 = vld [vmem:[#allocation2 + $0xe4] sm:$0xff] }
 0x2de   : > { %3112 = vmatmul.bf16.gmra.mxu3 %v2991_v44  ;;  %v1978_v35 = vpop.f32.mrf.mxu2  ;;  %3303 = vmatpush.bf16.msrb.mxu0 %v8991_v0  ;;  %v2278_v44 = vld [vmem:[#allocation2 + $0xec] sm:$0xff] }
 0x2df   : > { %v2013_v20 = vadd.f32 %v1978_v35, %v1777_v3  ;;  %2435 = vmatmul.bf16.gmra.mxu0 %v2294_v25 }
 0x2e0   : > { %v1778_v32 = vpop.f32.mrf.mxu1 }
 0x2e1   : > { %v3073_v63 = vpop.f32.mrf.mxu3  ;;  %v9959_v26 = vadd.f32 %v2212_v21, %v2013_v20  ;;  %v1779_v16 = vadd.f32 %v1778_v32, %v9875_v15  ;;  %v2523_v15 = vpack.c.bf16 %v2500_v37, %v2499_v4 }
 0x2e2   : > { %3304 = vmatpush.bf16.msrb.mxu0 %v8990_v52 }
 0x2e4   : > { %v2398_v46 = vpop.f32.mrf.mxu0 }
 0x2e5   : > { %v9966_v41 = vadd.f32 %v2398_v46, %v9829_v33  ;;  %v2969_v33 = vld [vmem:[#allocation2 + $0xa2] sm:$0xff] }
 0x2e6   : > { %v1980_v8 = vpop.f32.mrf.mxu2  ;;  %v2992_v23 = vpack.c.bf16 %v2970_v5, %v2969_v33  ;;  %3305 = vmatpush.bf16.msrb.mxu0 %v8989_v27  ;;  %v2501_v5 = vld [vmem:[#allocation2 + $0xa0] sm:$0xff] }
 0x2e7   : > { %v2014_v43 = vadd.f32 %v1980_v8, %v1779_v16  ;;  %v2502_v16 = vld [vmem:[#allocation2 + $0xa8] sm:$0xff] }
 0x2e8   : > { %v2605_v21 = vpop.f32.mrf.mxu1  ;;  %v2736_v8 = vld [vmem:[#allocation2 + $0xa9] sm:$0xff]  ;;  %v2524_v17 = vpack.c.bf16 %v2502_v16, %v2501_v5 }
 0x2e9   : > { %v3075_v31 = vpop.f32.mrf.mxu3  ;;  %v2685_v40 = vadd.f32 %v2605_v21, %v9882_v56  ;;  %v9972_v30 = vadd.f32 %v2214_v42, %v2014_v43  ;;  %v2295_v56 = vpack.c.bf16 %v2278_v44, %v2277_v48  ;;  %v2735_v21 = vld [vmem:[#allocation2 + $0xa1] sm:$0xff] }
 0x2ea   : > { %v2758_v52 = vpack.c.bf16 %v2736_v8, %v2735_v21  ;;  %v2503_v8 = vld [vmem:[#allocation2 + $0xb0] sm:$0xff] }
 0x2eb   : > { %2644 = vmatmul.bf16.gmra.mxu1 %v2523_v15  ;;  %2878 = vmatmul.bf16.gmra.mxu2 %v2757_v60  ;;  %v2279_v15 = vld [vmem:[#allocation2 + $0xf4] sm:$0xff] }
 0x2ec   : > { %v2401_v57 = vpop.f32.mrf.mxu0 }
 0x2ed   : > { %v9978_v38 = vadd.f32 %v2401_v57, %v9837_v18 }
 0x2ee   : > { %3117 = vmatmul.bf16.gmra.mxu3 %v2992_v23  ;;  %v2839_v3 = vpop.f32.mrf.mxu2 }
 0x2ef   : > { %v2919_v42 = vadd.f32 %v2839_v3, %v2685_v40  ;;  %2440 = vmatmul.bf16.gmra.mxu0 %v2295_v56 }
 0x2f0   : > { %v2607_v35 = vpop.f32.mrf.mxu1 }
 0x2f1   : > { %v3078_v25 = vpop.f32.mrf.mxu3  ;;  %v2686_v20 = vadd.f32 %v2607_v35, %v9888_v10  ;;  %v9981_v32 = vadd.f32 %v3073_v63, %v2919_v42  ;;  %v2971_v10 = vld [vmem:[#allocation2 + $0xb2] sm:$0xff] }
 0x2f2   : > { %v2993_v40 = vpack.c.bf16 %v2972_v58, %v2971_v10  ;;  %v2504_v35 = vld [vmem:[#allocation2 + $0xb8] sm:$0xff] }
 0x2f4   : > { %v2403_v51 = vpop.f32.mrf.mxu0 }
 0x2f5   : > { %v9984_v46 = vadd.f32 %v2403_v51, %v9844_v50  ;;  %v2280_v50 = vld [vmem:[#allocation2 + $0xfc] sm:$0xff] }
 0x2f6   : > { %v2841_v0 = vpop.f32.mrf.mxu2  ;;  %v2296_v23 = vpack.c.bf16 %v2280_v50, %v2279_v15 }
 0x2f7   : > { %v2920_v18 = vadd.f32 %v2841_v0, %v2686_v20  ;;  %v2738_v20 = vld [vmem:[#allocation2 + $0xb9] sm:$0xff]  ;;  %v2974_v0 = vld [vmem:[#allocation2 + $0xca] sm:$0xff] }
 0x2f8   : > { %v2610_v43 = vpop.f32.mrf.mxu1 }
 0x2f9   : > { %v3080_v37 = vpop.f32.mrf.mxu3  ;;  %v2687_v4 = vadd.f32 %v2610_v43, %v9894_v45  ;;  %v9987_v63 = vadd.f32 %v3075_v31, %v2920_v18  ;;  %v2737_v18 = vld [vmem:[#allocation2 + $0xb1] sm:$0xff]  ;;  %v2525_v43 = vpack.c.bf16 %v2504_v35, %v2503_v8 }
 0x2fa   : > { %v2759_v5 = vpack.c.bf16 %v2738_v20, %v2737_v18  ;;  %v2505_v20 = vld [vmem:[#allocation2 + $0xc0] sm:$0xff] }
 0x2fb   : > { %2649 = vmatmul.bf16.gmra.mxu1 %v2524_v17  ;;  %2883 = vmatmul.bf16.gmra.mxu2 %v2758_v52  ;;  %v3185_v17 = vld [vmem:[#allocation2 + $0x13] sm:$0xff] }
 0x2fc   : > { %v2406_v60 = vpop.f32.mrf.mxu0 }
 0x2fd   : > { %v9990_v33 = vadd.f32 %v2406_v60, %v9853_v61 }
 0x2fe   : > { %3122 = vmatmul.bf16.gmra.mxu3 %v2993_v40  ;;  %v2844_v44 = vpop.f32.mrf.mxu2 }
 0x2ff   : > { %v2921_v57 = vadd.f32 %v2844_v44, %v2687_v4  ;;  %2445 = vmatmul.bf16.gmra.mxu0 %v2296_v23  ;;  %v3186_v4 = vld [vmem:[#allocation2 + $0x1b] sm:$0xff] }
 0x300   : > { %v2612_v45 = vpop.f32.mrf.mxu1  ;;  %v3217_v10 = vpack.c.bf16 %v3186_v4, %v3185_v17  ;;  %v9019_v17 = vld [vmem:[%s11608_s2 + $0x2f0] sm:$0xff] }
 0x301   : > { %v3083_v48 = vpop.f32.mrf.mxu3  ;;  %v2688_v27 = vadd.f32 %v2612_v45, %v9900_v9  ;;  %v9993_v31 = vadd.f32 %v3078_v25, %v2921_v57  ;;  %v2973_v9 = vld [vmem:[#allocation2 + $0xc2] sm:$0xff] }
 0x302   : > { %v2994_v21 = vpack.c.bf16 %v2974_v0, %v2973_v9  ;;  %v2506_v45 = vld [vmem:[#allocation2 + $0xc8] sm:$0xff] }
 0x304   : > { %v2408_v56 = vpop.f32.mrf.mxu0 }
 0x305   : > { %v9996_v3 = vadd.f32 %v2408_v56, %v9858_v7 }
 0x306   : > { %v2846_v42 = vpop.f32.mrf.mxu2 }
 0x307   : > { %v2922_v51 = vadd.f32 %v2846_v42, %v2688_v27  ;;  %v2740_v27 = vld [vmem:[#allocation2 + $0xc9] sm:$0xff]  ;;  %v2976_v42 = vld [vmem:[#allocation2 + $0xda] sm:$0xff] }
 0x308   : > { %v2615_v16 = vpop.f32.mrf.mxu1 }
 0x309   : > { %v3085_v61 = vpop.f32.mrf.mxu3  ;;  %v2689_v58 = vadd.f32 %v2615_v16, %v9906_v14  ;;  %v9999_v25 = vadd.f32 %v3080_v37, %v2922_v51  ;;  %v2739_v51 = vld [vmem:[#allocation2 + $0xc1] sm:$0xff]  ;;  %v2526_v16 = vpack.c.bf16 %v2506_v45, %v2505_v20 }
 0x30a   : > { %v2760_v8 = vpack.c.bf16 %v2740_v27, %v2739_v51 }
 0x30b   : > { %2654 = vmatmul.bf16.gmra.mxu1 %v2525_v43  ;;  %2888 = vmatmul.bf16.gmra.mxu2 %v2759_v5  ;;  %v3187_v43 = vld [vmem:[#allocation2 + $0x23] sm:$0xff]  ;;  %v9020_v5 = vld [vmem:[%s11608_s2 + $0x2f8] sm:$0xff] }
 0x30c   : > { %v2411_v7 = vpop.f32.mrf.mxu0  ;;  %4000 = vmatpush.bf16.msra.mxu3 %v9020_v5  ;;  %v9016_v5 = vld [vmem:[%s11608_s2 + $0x2d8] sm:$0xff] }
 0x30d   : > { %v10002_v52 = vadd.f32 %v2411_v7, %v9863_v6 }
 0x30e   : > { %3127 = vmatmul.bf16.gmra.mxu3 %v2994_v21  ;;  %v2849_v40 = vpop.f32.mrf.mxu2 }
 0x30f   : > { %v2923_v15 = vadd.f32 %v2849_v40, %v2689_v58  ;;  %3306 = vmatmul.bf16.vlgmr.msrb.gmra.mxu0 %v3217_v10  ;;  %v3188_v58 = vld [vmem:[#allocation2 + $0x2b] sm:$0xff] }
 0x310   : > { %v2617_v14 = vpop.f32.mrf.mxu1  ;;  %4001 = vmatpush.bf16.msra.mxu3 %v9019_v17  ;;  %v9003_v17 = vld [vmem:[%s11608_s2 + $0x270] sm:$0xff] }
 0x311   : > { %v3088_v50 = vpop.f32.mrf.mxu3  ;;  %v2690_v60 = vadd.f32 %v2617_v14, %v9912_v34  ;;  %v10005_v37 = vadd.f32 %v3083_v48, %v2923_v15  ;;  %v2975_v34 = vld [vmem:[#allocation2 + $0xd2] sm:$0xff] }
 0x312   : > { %v2995_v18 = vpack.c.bf16 %v2976_v42, %v2975_v34  ;;  %v3190_v34 = vld [vmem:[#allocation2 + $0x3b] sm:$0xff] }
 0x314   : > { %v2413_v23 = vpop.f32.mrf.mxu0 }
 0x315   : > { %v10008_v44 = vadd.f32 %v2413_v23, %v9868_v12  ;;  %v2508_v23 = vld [vmem:[#allocation2 + $0xd8] sm:$0xff] }
 0x316   : > { %v2851_v57 = vpop.f32.mrf.mxu2 }
 0x317   : > { %v2924_v56 = vadd.f32 %v2851_v57, %v2690_v60  ;;  %v2742_v57 = vld [vmem:[#allocation2 + $0xd9] sm:$0xff] }
 0x318   : > { %v2620_v35 = vpop.f32.mrf.mxu1 }
 0x319   : > { %v3090_v6 = vpop.f32.mrf.mxu3  ;;  %v2691_v0 = vadd.f32 %v2620_v35, %v9918_v54  ;;  %v10011_v48 = vadd.f32 %v3085_v61, %v2924_v56  ;;  %v3218_v54 = vpack.c.bf16 %v3188_v58, %v3187_v43  ;;  %v2978_v56 = vld [vmem:[#allocation2 + $0xea] sm:$0xff]  ;;  %v9017_v35 = vld [vmem:[%s11608_s2 + $0x2e0] sm:$0xff]  ;;  %v3189_v58 = vld [vmem:[#allocation2 + $0x33] sm:$0xff] }
 0x31a   : > { %v3219_v43 = vpack.c.bf16 %v3190_v34, %v3189_v58  ;;  %v9009_v34 = vld [vmem:[%s11608_s2 + $0x2a0] sm:$0xff] }
 0x31b   : > { %2659 = vmatmul.bf16.gmra.mxu1 %v2526_v16  ;;  %2893 = vmatmul.bf16.gmra.mxu2 %v2760_v8 }
 0x31c   : > { %v2416_v12 = vpop.f32.mrf.mxu0 }
 0x31d   : > { %v10017_v9 = vadd.f32 %v2416_v12, %v9873_v49  ;;  %v9018_v49 = vld [vmem:[%s11608_s2 + $0x2e8] sm:$0xff] }
 0x31e   : > { %3132 = vmatmul.bf16.gmra.mxu3 %v2995_v18  ;;  %v2854_v21 = vpop.f32.mrf.mxu2 }
 0x31f   : > { %v2925_v4 = vadd.f32 %v2854_v21, %v2691_v0  ;;  %3311 = vmatmul.bf16.gmra.mxu0 %v3218_v54  ;;  %4002 = vmatpush.bf16.msra.mxu3 %v9018_v49 }
 0x320   : > { %v2622_v7 = vpop.f32.mrf.mxu1 }
 0x321   : > { %v3093_v61 = vpop.f32.mrf.mxu3  ;;  %v2692_v10 = vadd.f32 %v2622_v7, %v9924_v11  ;;  %v10023_v40 = vadd.f32 %v3088_v50, %v2925_v4  ;;  %v2507_v11 = vld [vmem:[#allocation2 + $0xd0] sm:$0xff] }
 0x322   : > { %v2741_v50 = vld [vmem:[#allocation2 + $0xd1] sm:$0xff]  ;;  %v2527_v51 = vpack.c.bf16 %v2508_v23, %v2507_v11  ;;  %v9002_v23 = vld [vmem:[%s11608_s2 + $0x268] sm:$0xff] }
 0x323   : > { %v2761_v0 = vpack.c.bf16 %v2742_v57, %v2741_v50  ;;  %4003 = vmatpush.bf16.msra.mxu3 %v9017_v35  ;;  %v9010_v57 = vld [vmem:[%s11608_s2 + $0x2a8] sm:$0xff]  ;;  %v2509_v35 = vld [vmem:[#allocation2 + $0xe0] sm:$0xff] }
 0x324   : > { %v2418_v15 = vpop.f32.mrf.mxu0 }
 0x325   : > { %v10029_v14 = vadd.f32 %v2418_v15, %v9878_v19  ;;  %v2977_v19 = vld [vmem:[#allocation2 + $0xe2] sm:$0xff]  ;;  %v9015_v15 = vld [vmem:[%s11608_s2 + $0x2d0] sm:$0xff] }
 0x326   : > { %v2856_v60 = vpop.f32.mrf.mxu2  ;;  %v2996_v8 = vpack.c.bf16 %v2978_v56, %v2977_v19  ;;  %v2510_v56 = vld [vmem:[#allocation2 + $0xe8] sm:$0xff] }
 0x327   : > { %v2926_v45 = vadd.f32 %v2856_v60, %v2692_v10  ;;  %4004 = vmatpush.bf16.msra.mxu3 %v9016_v5  ;;  %v9011_v10 = vld [vmem:[%s11608_s2 + $0x2b0] sm:$0xff] }
 0x328   : > { %v2625_v42 = vpop.f32.mrf.mxu1 }
 0x329   : > { %v3095_v27 = vpop.f32.mrf.mxu3  ;;  %v2693_v20 = vadd.f32 %v2625_v42, %v9930_v62  ;;  %v10035_v16 = vadd.f32 %v3090_v6, %v2926_v45  ;;  %v9004_v62 = vld [vmem:[%s11608_s2 + $0x278] sm:$0xff]  ;;  %v2744_v42 = vld [vmem:[#allocation2 + $0xe9] sm:$0xff] }
 0x32a   : > { %v9012_v6 = vld [vmem:[%s11608_s2 + $0x2b8] sm:$0xff]  ;;  %3532 = vmatpush.bf16.msra.mxu1 %v9004_v62  ;;  %v3191_v62 = vld [vmem:[#allocation2 + $0x43] sm:$0xff] }
 0x32b   : > { %2664 = vmatmul.bf16.gmra.mxu1 %v2527_v51  ;;  %2898 = vmatmul.bf16.gmra.mxu2 %v2761_v0  ;;  %v2528_v0 = vpack.c.bf16 %v2510_v56, %v2509_v35 }
 0x32c   : > { %v2421_v18 = vpop.f32.mrf.mxu0  ;;  %3766 = vmatpush.bf16.msra.mxu2 %v9012_v6  ;;  %4005 = vmatpush.bf16.msra.mxu3 %v9015_v15 }
 0x32d   : > { %v10038_v12 = vadd.f32 %v2421_v18, %v9884_v47  ;;  %v9013_v18 = vld [vmem:[%s11608_s2 + $0x2c0] sm:$0xff] }
 0x32e   : > { %3137 = vmatmul.bf16.gmra.mxu3 %v2996_v8  ;;  %v2859_v54 = vpop.f32.mrf.mxu2  ;;  %3533 = vmatpush.bf16.msra.mxu1 %v9003_v17  ;;  %v9001_v8 = vld [vmem:[%s11608_s2 + $0x260] sm:$0xff]  ;;  %v8999_v17 = vld [vmem:[%s11608_s2 + $0x250] sm:$0xff] }
 0x32f   : > { %v2927_v21 = vadd.f32 %v2859_v54, %v2693_v20  ;;  %3316 = vmatmul.bf16.gmra.mxu0 %v3219_v43  ;;  %v2743_v20 = vld [vmem:[#allocation2 + $0xe1] sm:$0xff]  ;;  %v3192_v43 = vld [vmem:[#allocation2 + $0x4b] sm:$0xff]  ;;  %v9000_v54 = vld [vmem:[%s11608_s2 + $0x258] sm:$0xff] }
 0x330   : > { %v2627_v47 = vpop.f32.mrf.mxu1  ;;  %3767 = vmatpush.bf16.msra.mxu2 %v9011_v10  ;;  %v2762_v19 = vpack.c.bf16 %v2744_v42, %v2743_v20  ;;  %v3220_v5 = vpack.c.bf16 %v3192_v43, %v3191_v62  ;;  %v9007_v10 = vld [vmem:[%s11608_s2 + $0x290] sm:$0xff]  ;;  %v2512_v42 = vld [vmem:[#allocation2 + $0xf8] sm:$0xff] }
 0x331   : > { %v3098_v4 = vpop.f32.mrf.mxu3  ;;  %v2694_v7 = vadd.f32 %v2627_v47, %v9942_v29  ;;  %v10059_v49 = vadd.f32 %v3093_v61, %v2927_v21  ;;  %v9014_v61 = vld [vmem:[%s11608_s2 + $0x2c8] sm:$0xff] }
 0x332   : > { %3534 = vmatpush.bf16.msra.mxu1 %v9002_v23  ;;  %4006 = vmatpush.bf16.msra.mxu3 %v9014_v61  ;;  %v2981_v23 = vld [vmem:[#allocation2 + $0x102] sm:$0xff]  ;;  %v2982_v61 = vld [vmem:[#allocation2 + $0x10a] sm:$0xff] }
 0x334   : > { %v2423_v60 = vpop.f32.mrf.mxu0  ;;  %3768 = vmatpush.bf16.msra.mxu2 %v9010_v57 }
 0x335   : > { %v10062_v29 = vadd.f32 %v2423_v60, %v9890_v2 }
 0x336   : > { %v2861_v45 = vpop.f32.mrf.mxu2  ;;  %3535 = vmatpush.bf16.msra.mxu1 %v9001_v8  ;;  %4007 = vmatpush.bf16.msra.mxu3 %v9013_v18  ;;  %v9005_v18 = vld [vmem:[%s11608_s2 + $0x280] sm:$0xff] }
 0x337   : > { %v2928_v11 = vadd.f32 %v2861_v45, %v2694_v7  ;;  %v9006_v45 = vld [vmem:[%s11608_s2 + $0x288] sm:$0xff] }
 0x338   : > { %v2630_v2 = vpop.f32.mrf.mxu1  ;;  %3769 = vmatpush.bf16.msra.mxu2 %v9009_v34  ;;  %v8997_v34 = vld [vmem:[%s11608_s2 + $0x240] sm:$0xff] }
 0x339   : > { %v3100_v50 = vpop.f32.mrf.mxu3  ;;  %v2695_v51 = vadd.f32 %v2630_v2, %v9954_v22  ;;  %v10083_v58 = vadd.f32 %v3095_v27, %v2928_v11  ;;  %v9008_v27 = vld [vmem:[%s11608_s2 + $0x298] sm:$0xff] }
 0x33a   : > { %3536 = vmatpush.bf16.msra.mxu1 %v9000_v54  ;;  %v2746_v11 = vld [vmem:[#allocation2 + $0xf9] sm:$0xff] }
 0x33b   : > { %2669 = vmatmul.bf16.gmra.mxu1 %v2528_v0  ;;  %2903 = vmatmul.bf16.gmra.mxu2 %v2762_v19 }
 0x33c   : > { %v2426_v22 = vpop.f32.mrf.mxu0  ;;  %3770 = vmatpush.bf16.msra.mxu2 %v9008_v27 }
 0x33d   : > { %v10087_v6 = vadd.f32 %v2426_v22, %v9896_v24  ;;  %v3194_v22 = vld [vmem:[#allocation2 + $0x5b] sm:$0xff] }
 0x33e   : > { %3142 = vmatmul.bf16.gmra.mxu3 %v9842_v55  ;;  %v2864_v21 = vpop.f32.mrf.mxu2  ;;  %3537 = vmatpush.bf16.msra.mxu1 %v8999_v17 }
 0x33f   : > { %v2929_v47 = vadd.f32 %v2864_v21, %v2695_v51  ;;  %3321 = vmatmul.bf16.gmra.mxu0 %v3220_v5  ;;  %v2511_v51 = vld [vmem:[#allocation2 + $0xf0] sm:$0xff] }
 0x340   : > { %v2632_v7 = vpop.f32.mrf.mxu1  ;;  %3771 = vmatpush.bf16.msra.mxu2 %v9007_v10  ;;  %v2529_v19 = vpack.c.bf16 %v2512_v42, %v2511_v51  ;;  %v3193_v5 = vld [vmem:[#allocation2 + $0x53] sm:$0xff]  ;;  %v2747_v10 = vld [vmem:[#allocation2 + $0x101] sm:$0xff]  ;;  %v3196_v51 = vld [vmem:[#allocation2 + $0x6b] sm:$0xff] }
 0x341   : > { %v3103_v55 = vpop.f32.mrf.mxu3  ;;  %v2696_v24 = vadd.f32 %v2632_v7, %v9966_v41  ;;  %v10102_v15 = vadd.f32 %v3098_v4, %v2929_v47  ;;  %v8998_v41 = vld [vmem:[%s11608_s2 + $0x248] sm:$0xff]  ;;  %v2745_v4 = vld [vmem:[#allocation2 + $0xf1] sm:$0xff]  ;;  %v3221_v54 = vpack.c.bf16 %v3194_v22, %v3193_v5 }
 0x342   : > { %3538 = vmatpush.bf16.msra.mxu1 %v8998_v41  ;;  %v2763_v8 = vpack.c.bf16 %v2746_v11, %v2745_v4  ;;  %v3888_v4 = vld [vmem:[#allocation2 + $0x29] sm:$0xff] }
 0x344   : > { %v2428_v60 = vpop.f32.mrf.mxu0  ;;  %3772 = vmatpush.bf16.msra.mxu2 %v9006_v45  ;;  %v9159_v45 = vld [vmem:[#allocation2 + $0x100] sm:$0xff] }
 0x345   : > { %v10105_v57 = vadd.f32 %v2428_v60, %v9902_v53  ;;  %v2998_v53 = vpack.c.bf16 %v2982_v61, %v2981_v23  ;;  %v2748_v60 = vld [vmem:[#allocation2 + $0x109] sm:$0xff] }
 0x346   : > { %v2866_v56 = vpop.f32.mrf.mxu2  ;;  %3539 = vmatpush.bf16.msra.mxu1 %v8997_v34  ;;  %v2764_v42 = vpack.c.bf16 %v2748_v60, %v2747_v10  ;;  %v3419_v10 = vld [vmem:[#allocation2 + $0x14] sm:$0xff]  ;;  %v3653_v60 = vld [vmem:[#allocation2 + $0x20] sm:$0xff] }
 0x347   : > { %v2930_v2 = vadd.f32 %v2866_v56, %v2696_v24  ;;  %v2530_v56 = vpack.c.bf16 %v9159_v45, %v9159_v45 }
 0x348   : > { %v2635_v20 = vpop.f32.mrf.mxu1  ;;  %3773 = vmatpush.bf16.msra.mxu2 %v9005_v18 }
 0x349   : > { %v3105_v35 = vpop.f32.mrf.mxu3  ;;  %v2697_v0 = vadd.f32 %v2635_v20, %v9978_v38  ;;  %v10120_v43 = vadd.f32 %v3100_v50, %v2930_v2  ;;  %v3887_v20 = vld [vmem:[#allocation2 + $0x21] sm:$0xff] }
 0x34b   : > { %2674 = vmatmul.bf16.gmra.mxu1 %v2529_v19  ;;  %2908 = vmatmul.bf16.gmra.mxu2 %v2763_v8 }
 0x34c   : > { %v2431_v62 = vpop.f32.mrf.mxu0 }
 0x34d   : > { %v10123_v38 = vadd.f32 %v2431_v62, %v9908_v39 }
 0x34e   : > { %3147 = vmatmul.bf16.gmra.mxu3 %v2998_v53  ;;  %v2869_v27 = vpop.f32.mrf.mxu2  ;;  %v3195_v53 = vld [vmem:[#allocation2 + $0x63] sm:$0xff] }
 0x34f   : > { %v2931_v21 = vadd.f32 %v2869_v27, %v2697_v0  ;;  %3326 = vmatmul.bf16.gmra.mxu0 %v3221_v54  ;;  %v3222_v19 = vpack.c.bf16 %v3196_v51, %v3195_v53  ;;  %v3420_v27 = vld [vmem:[#allocation2 + $0x1c] sm:$0xff] }
 0x350   : > { %v2637_v7 = vpop.f32.mrf.mxu1 }
 0x351   : > { %v3108_v47 = vpop.f32.mrf.mxu3  ;;  %v2698_v50 = vadd.f32 %v2637_v7, %v9984_v46  ;;  %v10126_v24 = vadd.f32 %v3103_v55, %v2931_v21  ;;  %v3919_v55 = vpack.c.bf16 %v3888_v4, %v3887_v20  ;;  %v3654_v21 = vld [vmem:[#allocation2 + $0x28] sm:$0xff]  ;;  %v3197_v4 = vld [vmem:[#allocation2 + $0x73] sm:$0xff] }
 0x352   : > { %v3685_v45 = vpack.c.bf16 %v3654_v21, %v3653_v60  ;;  %v3655_v21 = vld [vmem:[#allocation2 + $0x30] sm:$0xff] }
 0x353   : > { %v3200_v60 = vld [vmem:[#allocation2 + $0x8b] sm:$0xff] }
 0x354   : > { %v2433_v17 = vpop.f32.mrf.mxu0 }
 0x355   : > { %v10129_v23 = vadd.f32 %v2433_v17, %v9914_v13 }
 0x356   : > { %v2871_v61 = vpop.f32.mrf.mxu2 }
 0x357   : > { %v2932_v39 = vadd.f32 %v2871_v61, %v2698_v50  ;;  %v3890_v50 = vld [vmem:[#allocation2 + $0x39] sm:$0xff] }
 0x358   : > { %v2640_v11 = vpop.f32.mrf.mxu1 }
 0x359   : > { %v3110_v41 = vpop.f32.mrf.mxu3  ;;  %v2699_v2 = vadd.f32 %v2640_v11, %v9990_v33  ;;  %v10132_v46 = vadd.f32 %v3105_v35, %v2932_v39  ;;  %v3451_v39 = vpack.c.bf16 %v3420_v27, %v3419_v10  ;;  %v3421_v27 = vld [vmem:[#allocation2 + $0x24] sm:$0xff] }
 0x35b   : > { %2679 = vmatmul.bf16.gmra.mxu1 %v2530_v56  ;;  %2913 = vmatmul.bf16.gmra.mxu2 %v2764_v42  ;;  %v3198_v42 = vld [vmem:[#allocation2 + $0x7b] sm:$0xff] }
 0x35c   : > { %v2436_v13 = vpop.f32.mrf.mxu0 }
 0x35d   : > { %v10135_v0 = vadd.f32 %v2436_v13, %v9920_v1 }
 0x35e   : > { %4008 = vmatmul.bf16.vlgmr.msra.gmra.mxu3 %v3919_v55  ;;  %v2874_v8 = vpop.f32.mrf.mxu2 }
 0x35f   : > { %v2933_v34 = vadd.f32 %v2874_v8, %v2699_v2  ;;  %3331 = vmatmul.bf16.gmra.mxu0 %v3222_v19  ;;  %v3223_v2 = vpack.c.bf16 %v3198_v42, %v3197_v4 }
 0x360   : > { %v2642_v22 = vpop.f32.mrf.mxu1 }
 0x361   : > { %v3113_v18 = vpop.f32.mrf.mxu3  ;;  %v2700_v33 = vadd.f32 %v2642_v22, %v9996_v3  ;;  %v10138_v35 = vadd.f32 %v3108_v47, %v2933_v34  ;;  %v3889_v3 = vld [vmem:[#allocation2 + $0x31] sm:$0xff] }
 0x362   : > { %v3920_v56 = vpack.c.bf16 %v3890_v50, %v3889_v3  ;;  %v3422_v34 = vld [vmem:[#allocation2 + $0x2c] sm:$0xff]  ;;  %v3656_v22 = vld [vmem:[#allocation2 + $0x38] sm:$0xff] }
 0x363   : > { %v3452_v50 = vpack.c.bf16 %v3422_v34, %v3421_v27  ;;  %v3423_v34 = vld [vmem:[#allocation2 + $0x34] sm:$0xff] }
 0x364   : > { %v2438_v62 = vpop.f32.mrf.mxu0 }
 0x365   : > { %v10141_v5 = vadd.f32 %v2438_v62, %v9926_v36  ;;  %v3892_v62 = vld [vmem:[#allocation2 + $0x49] sm:$0xff] }
 0x366   : > { %v2876_v54 = vpop.f32.mrf.mxu2 }
 0x367   : > { %v2934_v7 = vadd.f32 %v2876_v54, %v2700_v33 }
 0x368   : > { %v2645_v17 = vpop.f32.mrf.mxu1 }
 0x369   : > { %v3115_v1 = vpop.f32.mrf.mxu3  ;;  %v2701_v61 = vadd.f32 %v2645_v17, %v10002_v52  ;;  %v10144_v47 = vadd.f32 %v3110_v41, %v2934_v7  ;;  %v3686_v17 = vpack.c.bf16 %v3656_v22, %v3655_v21  ;;  %v3657_v22 = vld [vmem:[#allocation2 + $0x40] sm:$0xff] }
 0x36a   : > { %v3202_v21 = vld [vmem:[#allocation2 + $0x9b] sm:$0xff] }
 0x36b   : > { %3540 = vmatmul.bf16.vlgmr.msra.gmra.mxu1 %v3451_v39  ;;  %3774 = vmatmul.bf16.vlgmr.msra.gmra.mxu2 %v3685_v45 }
 0x36c   : > { %v2441_v36 = vpop.f32.mrf.mxu0 }
 0x36d   : > { %v10147_v11 = vadd.f32 %v2441_v36, %v9935_v28 }
 0x36e   : > { %4013 = vmatmul.bf16.gmra.mxu3 %v3920_v56  ;;  %v2879_v20 = vpop.f32.mrf.mxu2 }
 0x36f   : > { %v2935_v55 = vadd.f32 %v2879_v20, %v2701_v61  ;;  %3336 = vmatmul.bf16.gmra.mxu0 %v3223_v2  ;;  %v3199_v61 = vld [vmem:[#allocation2 + $0x83] sm:$0xff] }
 0x370   : > { %v2647_v52 = vpop.f32.mrf.mxu1  ;;  %v3224_v45 = vpack.c.bf16 %v3200_v60, %v3199_v61 }
 0x371   : > { %v3118_v51 = vpop.f32.mrf.mxu3  ;;  %v2702_v13 = vadd.f32 %v2647_v52, %v10008_v44  ;;  %v10150_v41 = vadd.f32 %v3113_v18, %v2935_v55  ;;  %v3891_v44 = vld [vmem:[#allocation2 + $0x41] sm:$0xff] }
 0x372   : > { %v3921_v10 = vpack.c.bf16 %v3892_v62, %v3891_v44  ;;  %v3424_v55 = vld [vmem:[#allocation2 + $0x3c] sm:$0xff]  ;;  %v3658_v52 = vld [vmem:[#allocation2 + $0x48] sm:$0xff] }
 0x373   : > { %v3453_v62 = vpack.c.bf16 %v3424_v55, %v3423_v34  ;;  %v3425_v55 = vld [vmem:[#allocation2 + $0x44] sm:$0xff] }
 0x374   : > { %v2443_v53 = vpop.f32.mrf.mxu0 }
 0x375   : > { %v10153_v19 = vadd.f32 %v2443_v53, %v9947_v59  ;;  %v3894_v53 = vld [vmem:[#allocation2 + $0x59] sm:$0xff] }
 0x376   : > { %v2881_v8 = vpop.f32.mrf.mxu2 }
 0x377   : > { %v2936_v33 = vadd.f32 %v2881_v8, %v2702_v13 }
 0x378   : > { %v2650_v54 = vpop.f32.mrf.mxu1 }
 0x379   : > { %v3120_v28 = vpop.f32.mrf.mxu3  ;;  %v2703_v7 = vadd.f32 %v2650_v54, %v10017_v9  ;;  %v10156_v18 = vadd.f32 %v3115_v1, %v2936_v33  ;;  %v3687_v54 = vpack.c.bf16 %v3658_v52, %v3657_v22  ;;  %v3659_v52 = vld [vmem:[#allocation2 + $0x50] sm:$0xff] }
 0x37a   : > { %v3204_v22 = vld [vmem:[#allocation2 + $0xab] sm:$0xff] }
 0x37b   : > { %3545 = vmatmul.bf16.gmra.mxu1 %v3452_v50  ;;  %3779 = vmatmul.bf16.gmra.mxu2 %v3686_v17 }
 0x37c   : > { %v2446_v59 = vpop.f32.mrf.mxu0 }
 0x37d   : > { %v10159_v39 = vadd.f32 %v2446_v59, %v9959_v26 }
 0x37e   : > { %4018 = vmatmul.bf16.gmra.mxu3 %v3921_v10  ;;  %v2884_v3 = vpop.f32.mrf.mxu2 }
 0x37f   : > { %v2937_v56 = vadd.f32 %v2884_v3, %v2703_v7  ;;  %3341 = vmatmul.bf16.gmra.mxu0 %v3224_v45  ;;  %v3201_v7 = vld [vmem:[#allocation2 + $0x93] sm:$0xff] }
 0x380   : > { %v2652_v9 = vpop.f32.mrf.mxu1  ;;  %v3225_v17 = vpack.c.bf16 %v3202_v21, %v3201_v7 }
 0x381   : > { %v3123_v42 = vpop.f32.mrf.mxu3  ;;  %v2704_v36 = vadd.f32 %v2652_v9, %v10029_v14  ;;  %v10162_v1 = vadd.f32 %v3118_v51, %v2937_v56  ;;  %v3893_v14 = vld [vmem:[#allocation2 + $0x51] sm:$0xff] }
 0x382   : > { %v3922_v27 = vpack.c.bf16 %v3894_v53, %v3893_v14  ;;  %v3426_v56 = vld [vmem:[#allocation2 + $0x4c] sm:$0xff]  ;;  %v3660_v9 = vld [vmem:[#allocation2 + $0x58] sm:$0xff] }
 0x383   : > { %v3454_v53 = vpack.c.bf16 %v3426_v56, %v3425_v55  ;;  %v3427_v56 = vld [vmem:[#allocation2 + $0x54] sm:$0xff] }
 0x384   : > { %v2448_v4 = vpop.f32.mrf.mxu0 }
 0x385   : > { %v10165_v2 = vadd.f32 %v2448_v4, %v9972_v30  ;;  %v3896_v4 = vld [vmem:[#allocation2 + $0x69] sm:$0xff] }
 0x386   : > { %v2886_v20 = vpop.f32.mrf.mxu2 }
 0x387   : > { %v2938_v13 = vadd.f32 %v2886_v20, %v2704_v36 }
 0x388   : > { %v2655_v8 = vpop.f32.mrf.mxu1 }
 0x389   : > { %v3125_v26 = vpop.f32.mrf.mxu3  ;;  %v2705_v33 = vadd.f32 %v2655_v8, %v10038_v12  ;;  %v10168_v51 = vadd.f32 %v3120_v28, %v2938_v13  ;;  %v3688_v8 = vpack.c.bf16 %v3660_v9, %v3659_v52  ;;  %v3661_v9 = vld [vmem:[#allocation2 + $0x60] sm:$0xff] }
 0x38a   : > { %v3206_v52 = vld [vmem:[#allocation2 + $0xbb] sm:$0xff] }
 0x38b   : > { %3550 = vmatmul.bf16.gmra.mxu1 %v3453_v62  ;;  %3784 = vmatmul.bf16.gmra.mxu2 %v3687_v54 }
 0x38c   : > { %v3307_v30 = vpop.f32.mrf.mxu0 }
 0x38d   : > { %v10171_v50 = vadd.f32 %v3307_v30, %v9981_v32 }
 0x38e   : > { %4023 = vmatmul.bf16.gmra.mxu3 %v3922_v27  ;;  %v2889_v44 = vpop.f32.mrf.mxu2 }
 0x38f   : > { %v2939_v10 = vadd.f32 %v2889_v44, %v2705_v33  ;;  %3346 = vmatmul.bf16.gmra.mxu0 %v3225_v17  ;;  %v3203_v33 = vld [vmem:[#allocation2 + $0xa3] sm:$0xff] }
 0x390   : > { %v2657_v12 = vpop.f32.mrf.mxu1  ;;  %v3226_v54 = vpack.c.bf16 %v3204_v22, %v3203_v33 }
 0x391   : > { %v3128_v60 = vpop.f32.mrf.mxu3  ;;  %v2706_v59 = vadd.f32 %v2657_v12, %v10062_v29  ;;  %v10174_v28 = vadd.f32 %v3123_v42, %v2939_v10  ;;  %v3895_v29 = vld [vmem:[#allocation2 + $0x61] sm:$0xff] }
 0x392   : > { %v3923_v34 = vpack.c.bf16 %v3896_v4, %v3895_v29  ;;  %v3428_v10 = vld [vmem:[#allocation2 + $0x5c] sm:$0xff]  ;;  %v3662_v12 = vld [vmem:[#allocation2 + $0x68] sm:$0xff] }
 0x393   : > { %v3455_v4 = vpack.c.bf16 %v3428_v10, %v3427_v56  ;;  %v3429_v10 = vld [vmem:[#allocation2 + $0x64] sm:$0xff] }
 0x394   : > { %v3309_v61 = vpop.f32.mrf.mxu0 }
 0x395   : > { %v10177_v45 = vadd.f32 %v3309_v61, %v9987_v63  ;;  %v3898_v61 = vld [vmem:[#allocation2 + $0x79] sm:$0xff] }
 0x396   : > { %v2891_v3 = vpop.f32.mrf.mxu2 }
 0x397   : > { %v2940_v36 = vadd.f32 %v2891_v3, %v2706_v59 }
 0x398   : > { %v2660_v20 = vpop.f32.mrf.mxu1 }
 0x399   : > { %v3130_v32 = vpop.f32.mrf.mxu3  ;;  %v2707_v13 = vadd.f32 %v2660_v20, %v10087_v6  ;;  %v10180_v42 = vadd.f32 %v3125_v26, %v2940_v36  ;;  %v3689_v20 = vpack.c.bf16 %v3662_v12, %v3661_v9  ;;  %v3663_v12 = vld [vmem:[#allocation2 + $0x70] sm:$0xff] }
 0x39a   : > { %v3208_v9 = vld [vmem:[#allocation2 + $0xcb] sm:$0xff] }
 0x39b   : > { %3555 = vmatmul.bf16.gmra.mxu1 %v3454_v53  ;;  %3789 = vmatmul.bf16.gmra.mxu2 %v3688_v8 }
 0x39c   : > { %v3312_v63 = vpop.f32.mrf.mxu0 }
 0x39d   : > { %v10183_v62 = vadd.f32 %v3312_v63, %v9993_v31 }
 0x39e   : > { %4028 = vmatmul.bf16.gmra.mxu3 %v3923_v34  ;;  %v2894_v14 = vpop.f32.mrf.mxu2 }
 0x39f   : > { %v2941_v27 = vadd.f32 %v2894_v14, %v2707_v13  ;;  %3351 = vmatmul.bf16.gmra.mxu0 %v3226_v54  ;;  %v3205_v13 = vld [vmem:[#allocation2 + $0xb3] sm:$0xff] }
 0x3a0   : > { %v2662_v6 = vpop.f32.mrf.mxu1  ;;  %v3227_v8 = vpack.c.bf16 %v3206_v52, %v3205_v13 }
 0x3a1   : > { %v3133_v21 = vpop.f32.mrf.mxu3  ;;  %v2708_v30 = vadd.f32 %v2662_v6, %v10105_v57  ;;  %v10186_v26 = vadd.f32 %v3128_v60, %v2941_v27  ;;  %v3897_v57 = vld [vmem:[#allocation2 + $0x71] sm:$0xff] }
 0x3a2   : > { %v3924_v55 = vpack.c.bf16 %v3898_v61, %v3897_v57  ;;  %v3430_v27 = vld [vmem:[#allocation2 + $0x6c] sm:$0xff]  ;;  %v3664_v6 = vld [vmem:[#allocation2 + $0x78] sm:$0xff] }
 0x3a3   : > { %v3456_v61 = vpack.c.bf16 %v3430_v27, %v3429_v10  ;;  %v3431_v27 = vld [vmem:[#allocation2 + $0x74] sm:$0xff] }
 0x3a4   : > { %v3314_v7 = vpop.f32.mrf.mxu0 }
 0x3a5   : > { %v10189_v17 = vadd.f32 %v3314_v7, %v9999_v25  ;;  %v3900_v7 = vld [vmem:[#allocation2 + $0x89] sm:$0xff] }
 0x3a6   : > { %v2896_v44 = vpop.f32.mrf.mxu2 }
 0x3a7   : > { %v2942_v59 = vadd.f32 %v2896_v44, %v2708_v30 }
 0x3a8   : > { %v2665_v3 = vpop.f32.mrf.mxu1 }
 0x3a9   : > { %v3135_v31 = vpop.f32.mrf.mxu3  ;;  %v2709_v36 = vadd.f32 %v2665_v3, %v10123_v38  ;;  %v10192_v60 = vadd.f32 %v3130_v32, %v2942_v59  ;;  %v3690_v3 = vpack.c.bf16 %v3664_v6, %v3663_v12  ;;  %v3665_v6 = vld [vmem:[#allocation2 + $0x80] sm:$0xff] }
 0x3aa   : > { %v3210_v12 = vld [vmem:[#allocation2 + $0xdb] sm:$0xff] }
 0x3ab   : > { %3560 = vmatmul.bf16.gmra.mxu1 %v3455_v4  ;;  %3794 = vmatmul.bf16.gmra.mxu2 %v3689_v20 }
 0x3ac   : > { %v3317_v25 = vpop.f32.mrf.mxu0 }
 0x3ad   : > { %v10195_v53 = vadd.f32 %v3317_v25, %v10005_v37 }
 0x3ae   : > { %4033 = vmatmul.bf16.gmra.mxu3 %v3924_v55  ;;  %v2899_v29 = vpop.f32.mrf.mxu2 }
 0x3af   : > { %v2943_v34 = vadd.f32 %v2899_v29, %v2709_v36  ;;  %3356 = vmatmul.bf16.gmra.mxu0 %v3227_v8  ;;  %v3207_v36 = vld [vmem:[#allocation2 + $0xc3] sm:$0xff] }
 0x3b0   : > { %v2667_v38 = vpop.f32.mrf.mxu1  ;;  %v3228_v20 = vpack.c.bf16 %v3208_v9, %v3207_v36 }
 0x3b1   : > { %v3138_v22 = vpop.f32.mrf.mxu3  ;;  %v2710_v63 = vadd.f32 %v2667_v38, %v10129_v23  ;;  %v10198_v32 = vadd.f32 %v3133_v21, %v2943_v34  ;;  %v3899_v23 = vld [vmem:[#allocation2 + $0x81] sm:$0xff] }
 0x3b2   : > { %v3925_v56 = vpack.c.bf16 %v3900_v7, %v3899_v23  ;;  %v3432_v34 = vld [vmem:[#allocation2 + $0x7c] sm:$0xff]  ;;  %v3666_v38 = vld [vmem:[#allocation2 + $0x88] sm:$0xff] }
 0x3b3   : > { %v3457_v7 = vpack.c.bf16 %v3432_v34, %v3431_v27  ;;  %v9026_v27 = vld [vmem:[%s11608_s2 + $0x328] sm:$0xff] }
 0x3b4   : > { %v3319_v33 = vpop.f32.mrf.mxu0 }
 0x3b5   : > { %v10201_v54 = vadd.f32 %v3319_v33, %v10011_v48  ;;  %v3902_v33 = vld [vmem:[#allocation2 + $0x99] sm:$0xff] }
 0x3b6   : > { %v2901_v14 = vpop.f32.mrf.mxu2 }
 0x3b7   : > { %v2944_v30 = vadd.f32 %v2901_v14, %v2710_v63 }
 0x3b8   : > { %v2670_v44 = vpop.f32.mrf.mxu1 }
 0x3b9   : > { %v3140_v37 = vpop.f32.mrf.mxu3  ;;  %v2711_v59 = vadd.f32 %v2670_v44, %v10135_v0  ;;  %v10204_v21 = vadd.f32 %v3135_v31, %v2944_v30  ;;  %v3691_v44 = vpack.c.bf16 %v3666_v38, %v3665_v6  ;;  %v3433_v38 = vld [vmem:[#allocation2 + $0x84] sm:$0xff] }
 0x3bb   : > { %3565 = vmatmul.bf16.gmra.mxu1 %v3456_v61  ;;  %3799 = vmatmul.bf16.gmra.mxu2 %v3690_v3 }
 0x3bc   : > { %v3322_v48 = vpop.f32.mrf.mxu0 }
 0x3bd   : > { %v10207_v4 = vadd.f32 %v3322_v48, %v10023_v40 }
 0x3be   : > { %4038 = vmatmul.bf16.gmra.mxu3 %v3925_v56  ;;  %v2904_v57 = vpop.f32.mrf.mxu2 }
 0x3bf   : > { %v2945_v55 = vadd.f32 %v2904_v57, %v2711_v59  ;;  %3361 = vmatmul.bf16.gmra.mxu0 %v3228_v20  ;;  %v3209_v59 = vld [vmem:[#allocation2 + $0xd3] sm:$0xff] }
 0x3c0   : > { %v2672_v0 = vpop.f32.mrf.mxu1  ;;  %v3229_v3 = vpack.c.bf16 %v3210_v12, %v3209_v59  ;;  %v9025_v12 = vld [vmem:[%s11608_s2 + $0x320] sm:$0xff] }
 0x3c1   : > { %v3143_v52 = vpop.f32.mrf.mxu3  ;;  %v2712_v25 = vadd.f32 %v2672_v0, %v10141_v5  ;;  %v10210_v31 = vadd.f32 %v3138_v22, %v2945_v55  ;;  %v3901_v5 = vld [vmem:[#allocation2 + $0x91] sm:$0xff] }
 0x3c2   : > { %v3926_v10 = vpack.c.bf16 %v3902_v33, %v3901_v5  ;;  %v3434_v0 = vld [vmem:[#allocation2 + $0x8c] sm:$0xff]  ;;  %v3211_v5 = vld [vmem:[#allocation2 + $0xe3] sm:$0xff] }
 0x3c3   : > { %v3458_v33 = vpack.c.bf16 %v3434_v0, %v3433_v38 }
 0x3c4   : > { %v3324_v13 = vpop.f32.mrf.mxu0 }
 0x3c5   : > { %v10213_v8 = vadd.f32 %v3324_v13, %v10035_v16 }
 0x3c6   : > { %v2906_v29 = vpop.f32.mrf.mxu2 }
 0x3c7   : > { %v2946_v63 = vadd.f32 %v2906_v29, %v2712_v25  ;;  %v3668_v25 = vld [vmem:[#allocation2 + $0x98] sm:$0xff]  ;;  %v3904_v29 = vld [vmem:[#allocation2 + $0xa9] sm:$0xff] }
 0x3c8   : > { %v2675_v14 = vpop.f32.mrf.mxu1 }
 0x3c9   : > { %v3145_v40 = vpop.f32.mrf.mxu3  ;;  %v2713_v30 = vadd.f32 %v2675_v14, %v10147_v11  ;;  %v10216_v22 = vadd.f32 %v3140_v37, %v2946_v63  ;;  %v9028_v37 = vld [vmem:[%s11608_s2 + $0x338] sm:$0xff] }
 0x3ca   : > { %4234 = vmatpush.bf16.msra.mxu0 %v9028_v37  ;;  %v9023_v37 = vld [vmem:[%s11608_s2 + $0x310] sm:$0xff] }
 0x3cb   : > { %3570 = vmatmul.bf16.gmra.mxu1 %v3457_v7  ;;  %3804 = vmatmul.bf16.gmra.mxu2 %v3691_v44  ;;  %v3212_v7 = vld [vmem:[#allocation2 + $0xeb] sm:$0xff] }
 0x3cc   : > { %v3327_v16 = vpop.f32.mrf.mxu0 }
 0x3cd   : > { %v10219_v61 = vadd.f32 %v3327_v16, %v10059_v49  ;;  %v9027_v49 = vld [vmem:[%s11608_s2 + $0x330] sm:$0xff] }
 0x3ce   : > { %4043 = vmatmul.bf16.gmra.mxu3 %v3926_v10  ;;  %v2909_v23 = vpop.f32.mrf.mxu2  ;;  %4235 = vmatpush.bf16.msra.mxu0 %v9027_v49  ;;  %v3436_v49 = vld [vmem:[#allocation2 + $0x9c] sm:$0xff] }
 0x3cf   : > { %v2947_v56 = vadd.f32 %v2909_v23, %v2713_v30  ;;  %3366 = vmatmul.bf16.gmra.mxu0 %v3229_v3 }
 0x3d0   : > { %v2677_v11 = vpop.f32.mrf.mxu1 }
 0x3d1   : > { %v3148_v9 = vpop.f32.mrf.mxu3  ;;  %v2714_v48 = vadd.f32 %v2677_v11, %v10153_v19  ;;  %v10225_v36 = vadd.f32 %v3143_v52, %v2947_v56  ;;  %v3667_v52 = vld [vmem:[#allocation2 + $0x90] sm:$0xff]  ;;  %v9024_v56 = vld [vmem:[%s11608_s2 + $0x318] sm:$0xff] }
 0x3d2   : > { %v3692_v14 = vpack.c.bf16 %v3668_v25, %v3667_v52  ;;  %4236 = vmatpush.bf16.msra.mxu0 %v9026_v27  ;;  %v3906_v25 = vld [vmem:[#allocation2 + $0xb9] sm:$0xff] }
 0x3d3   : > { %v3214_v27 = vld [vmem:[#allocation2 + $0xfb] sm:$0xff] }
 0x3d4   : > { %v3329_v20 = vpop.f32.mrf.mxu0 }
 0x3d5   : > { %v10228_v57 = vadd.f32 %v3329_v20, %v10083_v58  ;;  %v3903_v58 = vld [vmem:[#allocation2 + $0xa1] sm:$0xff] }
 0x3d6   : > { %v2911_v55 = vpop.f32.mrf.mxu2  ;;  %v3927_v30 = vpack.c.bf16 %v3904_v29, %v3903_v58  ;;  %4237 = vmatpush.bf16.msra.mxu0 %v9025_v12  ;;  %v3435_v29 = vld [vmem:[#allocation2 + $0x94] sm:$0xff] }
 0x3d7   : > { %v2948_v13 = vadd.f32 %v2911_v55, %v2714_v48  ;;  %v3670_v55 = vld [vmem:[#allocation2 + $0xa8] sm:$0xff]  ;;  %v3459_v38 = vpack.c.bf16 %v3436_v49, %v3435_v29  ;;  %v3213_v58 = vld [vmem:[#allocation2 + $0xf3] sm:$0xff] }
 0x3d8   : > { %v2680_v34 = vpop.f32.mrf.mxu1  ;;  %v3437_v49 = vld [vmem:[#allocation2 + $0xa4] sm:$0xff] }
 0x3d9   : > { %v3150_v19 = vpop.f32.mrf.mxu3  ;;  %v2715_v63 = vadd.f32 %v2680_v34, %v10159_v39  ;;  %v10237_v6 = vadd.f32 %v3145_v40, %v2948_v13  ;;  %v3230_v39 = vpack.c.bf16 %v3212_v7, %v3211_v5  ;;  %v3669_v34 = vld [vmem:[#allocation2 + $0xa0] sm:$0xff]  ;;  %v3216_v29 = vld [vmem:[#allocation2 + $0x10b] sm:$0xff] }
 0x3da   : > { %4238 = vmatpush.bf16.msra.mxu0 %v9024_v56  ;;  %v3693_v52 = vpack.c.bf16 %v3670_v55, %v3669_v34  ;;  %v3438_v56 = vld [vmem:[#allocation2 + $0xac] sm:$0xff] }
 0x3db   : > { %3575 = vmatmul.bf16.gmra.mxu1 %v3458_v33  ;;  %3809 = vmatmul.bf16.gmra.mxu2 %v3692_v14  ;;  %v3908_v55 = vld [vmem:[#allocation2 + $0xc9] sm:$0xff] }
 0x3dc   : > { %v3332_v44 = vpop.f32.mrf.mxu0 }
 0x3dd   : > { %v10240_v10 = vadd.f32 %v3332_v44, %v10102_v15  ;;  %v9021_v44 = vld [vmem:[%s11608_s2 + $0x300] sm:$0xff] }
 0x3de   : > { %4048 = vmatmul.bf16.gmra.mxu3 %v3927_v30  ;;  %v2914_v16 = vpop.f32.mrf.mxu2  ;;  %4239 = vmatpush.bf16.msra.mxu0 %v9023_v37 }
 0x3df   : > { %v2949_v59 = vadd.f32 %v2914_v16, %v2715_v63  ;;  %3371 = vmatmul.bf16.gmra.mxu0 %v3230_v39  ;;  %v9022_v63 = vld [vmem:[%s11608_s2 + $0x308] sm:$0xff] }
 0x3e0   : > { %v2682_v3 = vpop.f32.mrf.mxu1 }
 0x3e1   : > { %v4009_v40 = vpop.f32.mrf.mxu3  ;;  %v2716_v23 = vadd.f32 %v2682_v3, %v10165_v2  ;;  %v10249_v11 = vadd.f32 %v3148_v9, %v2949_v59 }
 0x3e2   : > { %4240 = vmatpush.bf16.msra.mxu0 %v9022_v63 }
 0x3e4   : > { %v3334_v15 = vpop.f32.mrf.mxu0 }
 0x3e5   : > { %v10252_v48 = vadd.f32 %v3334_v15, %v10120_v43  ;;  %v3905_v43 = vld [vmem:[#allocation2 + $0xb1] sm:$0xff] }
 0x3e6   : > { %v2916_v20 = vpop.f32.mrf.mxu2  ;;  %v3928_v14 = vpack.c.bf16 %v3906_v25, %v3905_v43  ;;  %4241 = vmatpush.bf16.msra.mxu0 %v9021_v44  ;;  %v3672_v15 = vld [vmem:[#allocation2 + $0xb8] sm:$0xff]  ;;  %v3671_v25 = vld [vmem:[#allocation2 + $0xb0] sm:$0xff] }
 0x3e7   : > { %v2950_v0 = vadd.f32 %v2916_v20, %v2716_v23 }
 0x3e8   : > { %v3541_v13 = vpop.f32.mrf.mxu1 }
 0x3e9   : > { %v4011_v2 = vpop.f32.mrf.mxu3  ;;  %v3621_v9 = vadd.f32 %v3541_v13, %v10171_v50  ;;  %v10261_v33 = vadd.f32 %v3150_v19, %v2950_v0  ;;  %v3231_v50 = vpack.c.bf16 %v3214_v27, %v3213_v58  ;;  %v3215_v13 = vld [vmem:[#allocation2 + $0x103] sm:$0xff] }
 0x3eb   : > { %3580 = vmatmul.bf16.gmra.mxu1 %v3459_v38  ;;  %3814 = vmatmul.bf16.gmra.mxu2 %v3693_v52  ;;  %v3232_v52 = vpack.c.bf16 %v3216_v29, %v3215_v13  ;;  %v4121_v13 = vld [vmem:[#allocation2 + $0x22] sm:$0xff] }
 0x3ec   : > { %v3337_v30 = vpop.f32.mrf.mxu0 }
 0x3ed   : > { %v10264_v7 = vadd.f32 %v3337_v30, %v10126_v24 }
 0x3ee   : > { %4053 = vmatmul.bf16.gmra.mxu3 %v3928_v14  ;;  %v3775_v5 = vpop.f32.mrf.mxu2 }
 0x3ef   : > { %v3855_v39 = vadd.f32 %v3775_v5, %v3621_v9  ;;  %3376 = vmatmul.bf16.gmra.mxu0 %v3231_v50  ;;  %v3907_v9 = vld [vmem:[#allocation2 + $0xc1] sm:$0xff] }
 0x3f0   : > { %v3543_v12 = vpop.f32.mrf.mxu1 }
 0x3f1   : > { %v4014_v19 = vpop.f32.mrf.mxu3  ;;  %v3622_v16 = vadd.f32 %v3543_v12, %v10177_v45  ;;  %v10270_v59 = vadd.f32 %v4009_v40, %v3855_v39  ;;  %v3460_v45 = vpack.c.bf16 %v3438_v56, %v3437_v49  ;;  %v3694_v40 = vpack.c.bf16 %v3672_v15, %v3671_v25  ;;  %v3440_v39 = vld [vmem:[#allocation2 + $0xbc] sm:$0xff]  ;;  %v3674_v12 = vld [vmem:[#allocation2 + $0xc8] sm:$0xff]  ;;  %v3439_v56 = vld [vmem:[#allocation2 + $0xb4] sm:$0xff] }
 0x3f2   : > { %v3673_v15 = vld [vmem:[#allocation2 + $0xc0] sm:$0xff]  ;;  %v3461_v49 = vpack.c.bf16 %v3440_v39, %v3439_v56  ;;  %v4122_v25 = vld [vmem:[#allocation2 + $0x2a] sm:$0xff] }
 0x3f3   : > { %v3441_v39 = vld [vmem:[#allocation2 + $0xc4] sm:$0xff] }
 0x3f4   : > { %v3339_v3 = vpop.f32.mrf.mxu0 }
 0x3f5   : > { %v10273_v23 = vadd.f32 %v3339_v3, %v10132_v46  ;;  %v3929_v46 = vpack.c.bf16 %v3908_v55, %v3907_v9  ;;  %v3695_v55 = vpack.c.bf16 %v3674_v12, %v3673_v15  ;;  %v3675_v12 = vld [vmem:[#allocation2 + $0xd0] sm:$0xff]  ;;  %v4124_v15 = vld [vmem:[#allocation2 + $0x3a] sm:$0xff] }
 0x3f6   : > { %v3777_v24 = vpop.f32.mrf.mxu2 }
 0x3f7   : > { %v3856_v37 = vadd.f32 %v3777_v24, %v3622_v16 }
 0x3f8   : > { %v3546_v0 = vpop.f32.mrf.mxu1 }
 0x3f9   : > { %v4016_v20 = vpop.f32.mrf.mxu3  ;;  %v3623_v34 = vadd.f32 %v3546_v0, %v10183_v62  ;;  %v10276_v38 = vadd.f32 %v4011_v2, %v3856_v37 }
 0x3fb   : > { %3585 = vmatmul.bf16.gmra.mxu1 %v3460_v45  ;;  %3819 = vmatmul.bf16.gmra.mxu2 %v3694_v40 }
 0x3fc   : > { %v3342_v43 = vpop.f32.mrf.mxu0 }
 0x3fd   : > { %v10279_v63 = vadd.f32 %v3342_v43, %v10138_v35  ;;  %v3910_v35 = vld [vmem:[#allocation2 + $0xd9] sm:$0xff] }
 0x3fe   : > { %4058 = vmatmul.bf16.gmra.mxu3 %v3929_v46  ;;  %v3780_v14 = vpop.f32.mrf.mxu2 }
 0x3ff   : > { %v3857_v58 = vadd.f32 %v3780_v14, %v3623_v34  ;;  %3381 = vmatmul.bf16.gmra.mxu0 %v3232_v52  ;;  %v4153_v34 = vpack.c.bf16 %v4122_v25, %v4121_v13  ;;  %v9051_v13 = vld [vmem:[%s11608_s2 + $0x3f0] sm:$0xff] }
 0x400   : > { %v3548_v30 = vpop.f32.mrf.mxu1 }
 0x401   : > { %v4019_v27 = vpop.f32.mrf.mxu3  ;;  %v3624_v62 = vadd.f32 %v3548_v30, %v10189_v17  ;;  %v10282_v50 = vadd.f32 %v4014_v19, %v3857_v58  ;;  %v3909_v17 = vld [vmem:[#allocation2 + $0xd1] sm:$0xff] }
 0x402   : > { %v3930_v0 = vpack.c.bf16 %v3910_v35, %v3909_v17  ;;  %v3442_v58 = vld [vmem:[#allocation2 + $0xcc] sm:$0xff]  ;;  %v3676_v30 = vld [vmem:[#allocation2 + $0xd8] sm:$0xff] }
 0x403   : > { %v3462_v35 = vpack.c.bf16 %v3442_v58, %v3441_v39  ;;  %v3913_v58 = vld [vmem:[#allocation2 + $0xf1] sm:$0xff] }
 0x404   : > { %v3344_v2 = vpop.f32.mrf.mxu0 }
 0x405   : > { %v10285_v44 = vadd.f32 %v3344_v2, %v10144_v47  ;;  %v3912_v2 = vld [vmem:[#allocation2 + $0xe9] sm:$0xff] }
 0x406   : > { %v3782_v5 = vpop.f32.mrf.mxu2 }
 0x407   : > { %v3858_v16 = vadd.f32 %v3782_v5, %v3624_v62 }
 0x408   : > { %v3551_v24 = vpop.f32.mrf.mxu1 }
 0x409   : > { %v4021_v3 = vpop.f32.mrf.mxu3  ;;  %v3625_v37 = vadd.f32 %v3551_v24, %v10195_v53  ;;  %v10288_v19 = vadd.f32 %v4016_v20, %v3858_v16  ;;  %v3696_v24 = vpack.c.bf16 %v3676_v30, %v3675_v12  ;;  %v3914_v30 = vld [vmem:[#allocation2 + $0xf9] sm:$0xff] }
 0x40a   : > { %v9049_v12 = vld [vmem:[%s11608_s2 + $0x3e0] sm:$0xff] }
 0x40b   : > { %3590 = vmatmul.bf16.gmra.mxu1 %v3461_v49  ;;  %3824 = vmatmul.bf16.gmra.mxu2 %v3695_v55 }
 0x40c   : > { %v3347_v47 = vpop.f32.mrf.mxu0 }
 0x40d   : > { %v10291_v29 = vadd.f32 %v3347_v47, %v10150_v41 }
 0x40e   : > { %4063 = vmatmul.bf16.gmra.mxu3 %v3930_v0  ;;  %v3785_v45 = vpop.f32.mrf.mxu2 }
 0x40f   : > { %v3859_v40 = vadd.f32 %v3785_v45, %v3625_v37  ;;  %4242 = vmatmul.bf16.vlgmr.msra.gmra.mxu0 %v4153_v34  ;;  %v4123_v37 = vld [vmem:[#allocation2 + $0x32] sm:$0xff] }
 0x410   : > { %v3553_v53 = vpop.f32.mrf.mxu1  ;;  %v4154_v55 = vpack.c.bf16 %v4124_v15, %v4123_v37  ;;  %v9048_v37 = vld [vmem:[%s11608_s2 + $0x3d8] sm:$0xff] }
 0x411   : > { %v4024_v9 = vpop.f32.mrf.mxu3  ;;  %v3626_v46 = vadd.f32 %v3553_v53, %v10201_v54  ;;  %v10294_v20 = vadd.f32 %v4019_v27, %v3859_v40  ;;  %v3911_v54 = vld [vmem:[#allocation2 + $0xe1] sm:$0xff] }
 0x412   : > { %v3931_v56 = vpack.c.bf16 %v3912_v2, %v3911_v54  ;;  %v9050_v40 = vld [vmem:[%s11608_s2 + $0x3e8] sm:$0xff]  ;;  %v3677_v2 = vld [vmem:[#allocation2 + $0xe0] sm:$0xff] }
 0x414   : > { %v3349_v52 = vpop.f32.mrf.mxu0 }
 0x415   : > { %v10297_v43 = vadd.f32 %v3349_v52, %v10156_v18  ;;  %v3678_v52 = vld [vmem:[#allocation2 + $0xe8] sm:$0xff] }
 0x416   : > { %v3787_v14 = vpop.f32.mrf.mxu2  ;;  %v3697_v39 = vpack.c.bf16 %v3678_v52, %v3677_v2  ;;  %v9034_v52 = vld [vmem:[%s11608_s2 + $0x368] sm:$0xff] }
 0x417   : > { %v3860_v62 = vadd.f32 %v3787_v14, %v3626_v46  ;;  %v3444_v46 = vld [vmem:[#allocation2 + $0xdc] sm:$0xff] }
 0x418   : > { %v3556_v5 = vpop.f32.mrf.mxu1 }
 0x419   : > { %v4026_v41 = vpop.f32.mrf.mxu3  ;;  %v3627_v16 = vadd.f32 %v3556_v5, %v10207_v4  ;;  %v10300_v27 = vadd.f32 %v4021_v3, %v3860_v62  ;;  %v9052_v4 = vld [vmem:[%s11608_s2 + $0x3f8] sm:$0xff] }
 0x41a   : > { %4936 = vmatpush.bf16.msrb.mxu3 %v9052_v4  ;;  %v3443_v62 = vld [vmem:[#allocation2 + $0xd4] sm:$0xff] }
 0x41b   : > { %3595 = vmatmul.bf16.gmra.mxu1 %v3462_v35  ;;  %3829 = vmatmul.bf16.gmra.mxu2 %v3696_v24  ;;  %v3932_v35 = vpack.c.bf16 %v3914_v30, %v3913_v58  ;;  %v4126_v24 = vld [vmem:[#allocation2 + $0x4a] sm:$0xff] }
 0x41c   : > { %v3352_v18 = vpop.f32.mrf.mxu0  ;;  %v3446_v30 = vld [vmem:[#allocation2 + $0xec] sm:$0xff] }
 0x41d   : > { %v10303_v49 = vadd.f32 %v3352_v18, %v10162_v1 }
 0x41e   : > { %4068 = vmatmul.bf16.gmra.mxu3 %v3931_v56  ;;  %v3790_v17 = vpop.f32.mrf.mxu2  ;;  %v4125_v56 = vld [vmem:[#allocation2 + $0x42] sm:$0xff] }
 0x41f   : > { %v3861_v0 = vadd.f32 %v3790_v17, %v3627_v16  ;;  %4247 = vmatmul.bf16.gmra.mxu0 %v4154_v55  ;;  %4937 = vmatpush.bf16.msrb.mxu3 %v9051_v13  ;;  %v4155_v18 = vpack.c.bf16 %v4126_v24, %v4125_v56  ;;  %v9047_v13 = vld [vmem:[%s11608_s2 + $0x3d0] sm:$0xff]  ;;  %v9041_v56 = vld [vmem:[%s11608_s2 + $0x3a0] sm:$0xff] }
 0x420   : > { %v3558_v3 = vpop.f32.mrf.mxu1 }
 0x421   : > { %v4029_v25 = vpop.f32.mrf.mxu3  ;;  %v3628_v47 = vadd.f32 %v3558_v3, %v10213_v8  ;;  %v10312_v34 = vadd.f32 %v4024_v9, %v3861_v0  ;;  %v9035_v3 = vld [vmem:[%s11608_s2 + $0x370] sm:$0xff] }
 0x423   : > { %4938 = vmatpush.bf16.msrb.mxu3 %v9050_v40 }
 0x424   : > { %v3354_v1 = vpop.f32.mrf.mxu0 }
 0x425   : > { %v10315_v45 = vadd.f32 %v3354_v1, %v10168_v51  ;;  %v3463_v51 = vpack.c.bf16 %v3444_v46, %v3443_v62  ;;  %v3916_v46 = vld [vmem:[#allocation2 + $0x109] sm:$0xff] }
 0x426   : > { %v3792_v53 = vpop.f32.mrf.mxu2 }
 0x427   : > { %v3862_v14 = vadd.f32 %v3792_v53, %v3628_v47  ;;  %4939 = vmatpush.bf16.msrb.mxu3 %v9049_v12  ;;  %v9043_v47 = vld [vmem:[%s11608_s2 + $0x3b0] sm:$0xff]  ;;  %v3915_v53 = vld [vmem:[#allocation2 + $0x101] sm:$0xff] }
 0x428   : > { %v3561_v9 = vpop.f32.mrf.mxu1 }
 0x429   : > { %v10320_v8 = vpop.f32.mrf.mxu3  ;;  %v3629_v5 = vadd.f32 %v3561_v9, %v10219_v61  ;;  %v10326_v16 = vadd.f32 %v4026_v41, %v3862_v14  ;;  %v9036_v61 = vld [vmem:[%s11608_s2 + $0x378] sm:$0xff]  ;;  %v9042_v14 = vld [vmem:[%s11608_s2 + $0x3a8] sm:$0xff] }
 0x42a   : > { %v9044_v41 = vld [vmem:[%s11608_s2 + $0x3b8] sm:$0xff]  ;;  %4468 = vmatpush.bf16.msrb.mxu1 %v9036_v61 }
 0x42b   : > { %3600 = vmatmul.bf16.gmra.mxu1 %v3463_v51  ;;  %3834 = vmatmul.bf16.gmra.mxu2 %v3697_v39  ;;  %v3680_v9 = vld [vmem:[#allocation2 + $0xf8] sm:$0xff]  ;;  %v3679_v51 = vld [vmem:[#allocation2 + $0xf0] sm:$0xff]  ;;  %v3933_v39 = vpack.c.bf16 %v3916_v46, %v3915_v53 }
 0x42c   : > { %v3357_v54 = vpop.f32.mrf.mxu0  ;;  %4702 = vmatpush.bf16.msrb.mxu2 %v9044_v41  ;;  %4940 = vmatpush.bf16.msrb.mxu3 %v9048_v37  ;;  %v3698_v24 = vpack.c.bf16 %v3680_v9, %v3679_v51  ;;  %v4128_v41 = vld [vmem:[#allocation2 + $0x5a] sm:$0xff]  ;;  %v4127_v37 = vld [vmem:[#allocation2 + $0x52] sm:$0xff] }
 0x42d   : > { %v10329_v15 = vadd.f32 %v3357_v54, %v10174_v28  ;;  %v9033_v54 = vld [vmem:[%s11608_s2 + $0x360] sm:$0xff]  ;;  %v9039_v53 = vld [vmem:[%s11608_s2 + $0x390] sm:$0xff] }
 0x42e   : > { %4073 = vmatmul.bf16.gmra.mxu3 %v3932_v35  ;;  %v3795_v55 = vpop.f32.mrf.mxu2  ;;  %4469 = vmatpush.bf16.msrb.mxu1 %v9035_v3  ;;  %v9160_v51 = vld [vmem:[#allocation2 + $0x100] sm:$0xff] }
 0x42f   : > { %v3863_v4 = vadd.f32 %v3795_v55, %v3629_v5  ;;  %4252 = vmatmul.bf16.gmra.mxu0 %v4155_v18  ;;  %v3445_v5 = vld [vmem:[#allocation2 + $0xe4] sm:$0xff] }
 0x430   : > { %v3563_v28 = vpop.f32.mrf.mxu1  ;;  %4703 = vmatpush.bf16.msrb.mxu2 %v9043_v47  ;;  %4941 = vmatpush.bf16.msrb.mxu3 %v9047_v13  ;;  %v3464_v35 = vpack.c.bf16 %v3446_v30, %v3445_v5  ;;  %v9045_v18 = vld [vmem:[%s11608_s2 + $0x3c0] sm:$0xff]  ;;  %v9038_v30 = vld [vmem:[%s11608_s2 + $0x388] sm:$0xff] }
 0x431   : > { %v10340_v17 = vpop.f32.mrf.mxu3  ;;  %v3630_v0 = vadd.f32 %v3563_v28, %v10228_v57  ;;  %v10352_v1 = vadd.f32 %v4029_v25, %v3863_v4  ;;  %v9046_v25 = vld [vmem:[%s11608_s2 + $0x3c8] sm:$0xff]  ;;  %v4156_v4 = vpack.c.bf16 %v4128_v41, %v4127_v37  ;;  %v9032_v28 = vld [vmem:[%s11608_s2 + $0x358] sm:$0xff] }
 0x432   : > { %4470 = vmatpush.bf16.msrb.mxu1 %v9034_v52  ;;  %v4130_v41 = vld [vmem:[#allocation2 + $0x6a] sm:$0xff]  ;;  %v4129_v37 = vld [vmem:[#allocation2 + $0x62] sm:$0xff] }
 0x434   : > { %v3359_v40 = vpop.f32.mrf.mxu0  ;;  %4704 = vmatpush.bf16.msrb.mxu2 %v9042_v14  ;;  %4942 = vmatpush.bf16.msrb.mxu3 %v9046_v25  ;;  %v3917_v14 = vld [vmem:[#allocation2 + $0x111] sm:$0xff] }
 0x435   : > { %v10355_v57 = vadd.f32 %v3359_v40, %v10180_v42  ;;  %v9031_v40 = vld [vmem:[%s11608_s2 + $0x350] sm:$0xff] }
 0x436   : > { %v3797_v58 = vpop.f32.mrf.mxu2  ;;  %4471 = vmatpush.bf16.msrb.mxu1 %v9033_v54  ;;  %v9029_v54 = vld [vmem:[%s11608_s2 + $0x340] sm:$0xff] }
 0x437   : > { %v3864_v62 = vadd.f32 %v3797_v58, %v3630_v0  ;;  %v3918_v58 = vld [vmem:[#allocation2 + $0x119] sm:$0xff] }
 0x438   : > { %v3566_v42 = vpop.f32.mrf.mxu1  ;;  %4705 = vmatpush.bf16.msrb.mxu2 %v9041_v56  ;;  %4943 = vmatpush.bf16.msrb.mxu3 %v9045_v18  ;;  %v9037_v56 = vld [vmem:[%s11608_s2 + $0x380] sm:$0xff] }
 0x439   : > { %v4036_v2 = vpop.f32.mrf.mxu3  ;;  %v3631_v12 = vadd.f32 %v3566_v42, %v10240_v10  ;;  %v10377_v61 = vadd.f32 %v10320_v8, %v3864_v62  ;;  %v9040_v8 = vld [vmem:[%s11608_s2 + $0x398] sm:$0xff] }
 0x43a   : > { %4472 = vmatpush.bf16.msrb.mxu1 %v9032_v28  ;;  %v3447_v62 = vld [vmem:[#allocation2 + $0xf4] sm:$0xff] }
 0x43b   : > { %3605 = vmatmul.bf16.gmra.mxu1 %v3464_v35  ;;  %3839 = vmatmul.bf16.gmra.mxu2 %v3698_v24 }
 0x43c   : > { %v3362_v10 = vpop.f32.mrf.mxu0  ;;  %4706 = vmatpush.bf16.msrb.mxu2 %v9040_v8 }
 0x43d   : > { %v10380_v55 = vadd.f32 %v3362_v10, %v10186_v26 }
 0x43e   : > { %4078 = vmatmul.bf16.gmra.mxu3 %v3933_v39  ;;  %v3800_v0 = vpop.f32.mrf.mxu2  ;;  %4473 = vmatpush.bf16.msrb.mxu1 %v9031_v40  ;;  %v10407_v39 = vpack.c.bf16 %v9160_v51, %v9160_v51  ;;  %v3449_v40 = vld [vmem:[#allocation2 + $0x104] sm:$0xff] }
 0x43f   : > { %v3865_v3 = vadd.f32 %v3800_v0, %v3631_v12  ;;  %4257 = vmatmul.bf16.gmra.mxu0 %v4156_v4  ;;  %v3934_v12 = vpack.c.bf16 %v3918_v58, %v3917_v14  ;;  %v4157_v4 = vpack.c.bf16 %v4130_v41, %v4129_v37 }
 0x440   : > { %v3568_v13 = vpop.f32.mrf.mxu1  ;;  %4707 = vmatpush.bf16.msrb.mxu2 %v9039_v53  ;;  %v3450_v53 = vld [vmem:[#allocation2 + $0x10c] sm:$0xff] }
 0x441   : > { %v4039_v47 = vpop.f32.mrf.mxu3  ;;  %v3632_v26 = vadd.f32 %v3568_v13, %v10252_v48  ;;  %v10396_v46 = vadd.f32 %v10340_v17, %v3865_v3  ;;  %v9030_v48 = vld [vmem:[%s11608_s2 + $0x348] sm:$0xff]  ;;  %v3448_v17 = vld [vmem:[#allocation2 + $0xfc] sm:$0xff] }
 0x442   : > { %4474 = vmatpush.bf16.msrb.mxu1 %v9030_v48  ;;  %v3465_v24 = vpack.c.bf16 %v3448_v17, %v3447_v62  ;;  %v3466_v48 = vpack.c.bf16 %v3450_v53, %v3449_v40  ;;  %v4823_v17 = vld [vmem:[#allocation2 + $0x30] sm:$0xff]  ;;  %v4589_v40 = vld [vmem:[#allocation2 + $0x24] sm:$0xff] }
 0x444   : > { %v3364_v52 = vpop.f32.mrf.mxu0  ;;  %4708 = vmatpush.bf16.msrb.mxu2 %v9038_v30  ;;  %v4824_v30 = vld [vmem:[#allocation2 + $0x38] sm:$0xff] }
 0x445   : > { %v10399_v25 = vadd.f32 %v3364_v52, %v10192_v60 }
 0x446   : > { %v3802_v9 = vpop.f32.mrf.mxu2  ;;  %4475 = vmatpush.bf16.msrb.mxu1 %v9029_v54 }
 0x447   : > { %v3866_v42 = vadd.f32 %v3802_v9, %v3632_v26 }
 0x448   : > { %v3571_v60 = vpop.f32.mrf.mxu1  ;;  %4709 = vmatpush.bf16.msrb.mxu2 %v9037_v56 }
 0x449   : > { %v4041_v5 = vpop.f32.mrf.mxu3  ;;  %v3633_v35 = vadd.f32 %v3571_v60, %v10264_v7  ;;  %v10416_v18 = vadd.f32 %v4036_v2, %v3866_v42 }
 0x44b   : > { %3610 = vmatmul.bf16.gmra.mxu1 %v3465_v24  ;;  %3844 = vmatmul.bf16.gmra.mxu2 %v10407_v39 }
 0x44c   : > { %v3367_v10 = vpop.f32.mrf.mxu0 }
 0x44d   : > { %v10420_v7 = vadd.f32 %v3367_v10, %v10198_v32 }
 0x44e   : > { %4083 = vmatmul.bf16.gmra.mxu3 %v3934_v12  ;;  %v3805_v28 = vpop.f32.mrf.mxu2 }
 0x44f   : > { %v3867_v8 = vadd.f32 %v3805_v28, %v3633_v35  ;;  %4262 = vmatmul.bf16.gmra.mxu0 %v4157_v4  ;;  %v4356_v4 = vld [vmem:[#allocation2 + $0x2b] sm:$0xff] }
 0x450   : > { %v3573_v3 = vpop.f32.mrf.mxu1  ;;  %v4590_v28 = vld [vmem:[#allocation2 + $0x2c] sm:$0xff] }
 0x451   : > { %v4044_v0 = vpop.f32.mrf.mxu3  ;;  %v3634_v2 = vadd.f32 %v3573_v3, %v10273_v23  ;;  %v10423_v13 = vadd.f32 %v4039_v47, %v3867_v8  ;;  %v4855_v23 = vpack.c.bf16 %v4824_v30, %v4823_v17  ;;  %v4132_v47 = vld [vmem:[#allocation2 + $0x7a] sm:$0xff]  ;;  %v4826_v3 = vld [vmem:[#allocation2 + $0x48] sm:$0xff] }
 0x452   : > { %v4134_v30 = vld [vmem:[#allocation2 + $0x8a] sm:$0xff] }
 0x454   : > { %v3369_v26 = vpop.f32.mrf.mxu0 }
 0x455   : > { %v10426_v52 = vadd.f32 %v3369_v26, %v10204_v21  ;;  %v4131_v21 = vld [vmem:[#allocation2 + $0x72] sm:$0xff]  ;;  %v4355_v26 = vld [vmem:[#allocation2 + $0x23] sm:$0xff] }
 0x456   : > { %v3807_v14 = vpop.f32.mrf.mxu2  ;;  %v4158_v12 = vpack.c.bf16 %v4132_v47, %v4131_v21 }
 0x457   : > { %v3868_v32 = vadd.f32 %v3807_v14, %v3634_v2  ;;  %v4387_v14 = vpack.c.bf16 %v4356_v4, %v4355_v26 }
 0x458   : > { %v3576_v9 = vpop.f32.mrf.mxu1 }
 0x459   : > { %v4046_v58 = vpop.f32.mrf.mxu3  ;;  %v3635_v62 = vadd.f32 %v3576_v9, %v10279_v63  ;;  %v10429_v42 = vadd.f32 %v4041_v5, %v3868_v32  ;;  %v4621_v32 = vpack.c.bf16 %v4590_v28, %v4589_v40  ;;  %v4133_v9 = vld [vmem:[#allocation2 + $0x82] sm:$0xff]  ;;  %v4357_v28 = vld [vmem:[#allocation2 + $0x33] sm:$0xff] }
 0x45a   : > { %v4159_v17 = vpack.c.bf16 %v4134_v30, %v4133_v9 }
 0x45b   : > { %3615 = vmatmul.bf16.gmra.mxu1 %v3466_v48  ;;  %3849 = vmatmul.bf16.gmra.mxu2 %v10407_v39 }
 0x45c   : > { %v3372_v51 = vpop.f32.mrf.mxu0 }
 0x45d   : > { %v10433_v60 = vadd.f32 %v3372_v51, %v10210_v31 }
 0x45e   : > { %4944 = vmatmul.bf16.vlgmr.msrb.gmra.mxu3 %v4855_v23  ;;  %v3810_v35 = vpop.f32.mrf.mxu2 }
 0x45f   : > { %v3869_v24 = vadd.f32 %v3810_v35, %v3635_v62  ;;  %4267 = vmatmul.bf16.gmra.mxu0 %v4158_v12 }
 0x460   : > { %v3578_v63 = vpop.f32.mrf.mxu1 }
 0x461   : > { %v4049_v54 = vpop.f32.mrf.mxu3  ;;  %v3636_v5 = vadd.f32 %v3578_v63, %v10285_v44  ;;  %v10436_v56 = vadd.f32 %v4044_v0, %v3869_v24  ;;  %v4825_v44 = vld [vmem:[#allocation2 + $0x40] sm:$0xff] }
 0x462   : > { %v4856_v48 = vpack.c.bf16 %v4826_v3, %v4825_v44  ;;  %v4358_v63 = vld [vmem:[#allocation2 + $0x3b] sm:$0xff] }
 0x464   : > { %v3374_v41 = vpop.f32.mrf.mxu0 }
 0x465   : > { %v10439_v10 = vadd.f32 %v3374_v41, %v10216_v22 }
 0x466   : > { %v3812_v37 = vpop.f32.mrf.mxu2 }
 0x467   : > { %v3870_v8 = vadd.f32 %v3812_v37, %v3636_v5  ;;  %v4592_v5 = vld [vmem:[#allocation2 + $0x3c] sm:$0xff] }
 0x468   : > { %v3581_v2 = vpop.f32.mrf.mxu1  ;;  %v4828_v37 = vld [vmem:[#allocation2 + $0x58] sm:$0xff] }
 0x469   : > { %v4051_v31 = vpop.f32.mrf.mxu3  ;;  %v3637_v53 = vadd.f32 %v3581_v2, %v10291_v29  ;;  %v10442_v0 = vadd.f32 %v4046_v58, %v3870_v8  ;;  %v4591_v8 = vld [vmem:[#allocation2 + $0x34] sm:$0xff]  ;;  %v4388_v2 = vpack.c.bf16 %v4358_v63, %v4357_v28 }
 0x46a   : > { %v4622_v26 = vpack.c.bf16 %v4592_v5, %v4591_v8  ;;  %v4359_v5 = vld [vmem:[#allocation2 + $0x43] sm:$0xff] }
 0x46b   : > { %4476 = vmatmul.bf16.vlgmr.msrb.gmra.mxu1 %v4387_v14  ;;  %4710 = vmatmul.bf16.vlgmr.msrb.gmra.mxu2 %v4621_v32  ;;  %v4135_v14 = vld [vmem:[#allocation2 + $0x92] sm:$0xff] }
 0x46c   : > { %v3377_v22 = vpop.f32.mrf.mxu0 }
 0x46d   : > { %v10445_v62 = vadd.f32 %v3377_v22, %v10225_v36 }
 0x46e   : > { %4949 = vmatmul.bf16.gmra.mxu3 %v4856_v48  ;;  %v3815_v23 = vpop.f32.mrf.mxu2 }
 0x46f   : > { %v3871_v47 = vadd.f32 %v3815_v23, %v3637_v53  ;;  %4272 = vmatmul.bf16.gmra.mxu0 %v4159_v17  ;;  %v4136_v53 = vld [vmem:[#allocation2 + $0x9a] sm:$0xff] }
 0x470   : > { %v3583_v29 = vpop.f32.mrf.mxu1  ;;  %v4160_v44 = vpack.c.bf16 %v4136_v53, %v4135_v14 }
 0x471   : > { %v4054_v51 = vpop.f32.mrf.mxu3  ;;  %v3638_v21 = vadd.f32 %v3583_v29, %v10297_v43  ;;  %v10448_v58 = vadd.f32 %v4049_v54, %v3871_v47  ;;  %v4827_v43 = vld [vmem:[#allocation2 + $0x50] sm:$0xff] }
 0x472   : > { %v4857_v40 = vpack.c.bf16 %v4828_v37, %v4827_v43  ;;  %v4360_v29 = vld [vmem:[#allocation2 + $0x4b] sm:$0xff] }
 0x474   : > { %v3379_v12 = vpop.f32.mrf.mxu0 }
 0x475   : > { %v10451_v35 = vadd.f32 %v3379_v12, %v10237_v6 }
 0x476   : > { %v3817_v24 = vpop.f32.mrf.mxu2 }
 0x477   : > { %v3872_v41 = vadd.f32 %v3817_v24, %v3638_v21  ;;  %v4594_v21 = vld [vmem:[#allocation2 + $0x4c] sm:$0xff] }
 0x478   : > { %v3586_v4 = vpop.f32.mrf.mxu1  ;;  %v4830_v24 = vld [vmem:[#allocation2 + $0x68] sm:$0xff] }
 0x479   : > { %v4056_v36 = vpop.f32.mrf.mxu3  ;;  %v3639_v3 = vadd.f32 %v3586_v4, %v10303_v49  ;;  %v10454_v54 = vadd.f32 %v4051_v31, %v3872_v41  ;;  %v4593_v41 = vld [vmem:[#allocation2 + $0x44] sm:$0xff]  ;;  %v4389_v4 = vpack.c.bf16 %v4360_v29, %v4359_v5 }
 0x47a   : > { %v4623_v28 = vpack.c.bf16 %v4594_v21, %v4593_v41  ;;  %v4361_v21 = vld [vmem:[#allocation2 + $0x53] sm:$0xff] }
 0x47b   : > { %4481 = vmatmul.bf16.gmra.mxu1 %v4388_v2  ;;  %4715 = vmatmul.bf16.gmra.mxu2 %v4622_v26  ;;  %v4137_v2 = vld [vmem:[#allocation2 + $0xa2] sm:$0xff] }
 0x47c   : > { %v3382_v6 = vpop.f32.mrf.mxu0 }
 0x47d   : > { %v10457_v32 = vadd.f32 %v3382_v6, %v10249_v11 }
 0x47e   : > { %4954 = vmatmul.bf16.gmra.mxu3 %v4857_v40  ;;  %v3820_v48 = vpop.f32.mrf.mxu2 }
 0x47f   : > { %v3873_v30 = vadd.f32 %v3820_v48, %v3639_v3  ;;  %4277 = vmatmul.bf16.gmra.mxu0 %v4160_v44  ;;  %v4138_v3 = vld [vmem:[#allocation2 + $0xaa] sm:$0xff] }
 0x480   : > { %v3588_v49 = vpop.f32.mrf.mxu1  ;;  %v4161_v43 = vpack.c.bf16 %v4138_v3, %v4137_v2 }
 0x481   : > { %v4059_v22 = vpop.f32.mrf.mxu3  ;;  %v3640_v9 = vadd.f32 %v3588_v49, %v10315_v45  ;;  %v10460_v31 = vadd.f32 %v4054_v51, %v3873_v30  ;;  %v4829_v45 = vld [vmem:[#allocation2 + $0x60] sm:$0xff] }
 0x482   : > { %v4858_v8 = vpack.c.bf16 %v4830_v24, %v4829_v45  ;;  %v4362_v49 = vld [vmem:[#allocation2 + $0x5b] sm:$0xff] }
 0x484   : > { %v3384_v17 = vpop.f32.mrf.mxu0 }
 0x485   : > { %v10463_v23 = vadd.f32 %v3384_v17, %v10261_v33 }
 0x486   : > { %v3822_v47 = vpop.f32.mrf.mxu2 }
 0x487   : > { %v3874_v12 = vadd.f32 %v3822_v47, %v3640_v9  ;;  %v4596_v9 = vld [vmem:[#allocation2 + $0x5c] sm:$0xff] }
 0x488   : > { %v3591_v63 = vpop.f32.mrf.mxu1  ;;  %v4832_v47 = vld [vmem:[#allocation2 + $0x78] sm:$0xff] }
 0x489   : > { %v4061_v11 = vpop.f32.mrf.mxu3  ;;  %v3641_v37 = vadd.f32 %v3591_v63, %v10329_v15  ;;  %v10466_v51 = vadd.f32 %v4056_v36, %v3874_v12  ;;  %v4595_v12 = vld [vmem:[#allocation2 + $0x54] sm:$0xff]  ;;  %v4390_v63 = vpack.c.bf16 %v4362_v49, %v4361_v21 }
 0x48a   : > { %v4624_v5 = vpack.c.bf16 %v4596_v9, %v4595_v12  ;;  %v4363_v9 = vld [vmem:[#allocation2 + $0x63] sm:$0xff] }
 0x48b   : > { %4486 = vmatmul.bf16.gmra.mxu1 %v4389_v4  ;;  %4720 = vmatmul.bf16.gmra.mxu2 %v4623_v28  ;;  %v4139_v4 = vld [vmem:[#allocation2 + $0xb2] sm:$0xff] }
 0x48c   : > { %v4243_v33 = vpop.f32.mrf.mxu0 }
 0x48d   : > { %v10469_v26 = vadd.f32 %v4243_v33, %v10270_v59 }
 0x48e   : > { %4959 = vmatmul.bf16.gmra.mxu3 %v4858_v8  ;;  %v3825_v40 = vpop.f32.mrf.mxu2 }
 0x48f   : > { %v3875_v53 = vadd.f32 %v3825_v40, %v3641_v37  ;;  %4282 = vmatmul.bf16.gmra.mxu0 %v4161_v43  ;;  %v4140_v37 = vld [vmem:[#allocation2 + $0xba] sm:$0xff] }
 0x490   : > { %v3593_v15 = vpop.f32.mrf.mxu1  ;;  %v4162_v45 = vpack.c.bf16 %v4140_v37, %v4139_v4 }
 0x491   : > { %v4064_v6 = vpop.f32.mrf.mxu3  ;;  %v3642_v14 = vadd.f32 %v3593_v15, %v10355_v57  ;;  %v10472_v36 = vadd.f32 %v4059_v22, %v3875_v53  ;;  %v4831_v57 = vld [vmem:[#allocation2 + $0x70] sm:$0xff] }
 0x492   : > { %v4859_v41 = vpack.c.bf16 %v4832_v47, %v4831_v57  ;;  %v4364_v15 = vld [vmem:[#allocation2 + $0x6b] sm:$0xff] }
 0x494   : > { %v4245_v44 = vpop.f32.mrf.mxu0 }
 0x495   : > { %v10475_v48 = vadd.f32 %v4245_v44, %v10276_v38 }
 0x496   : > { %v3827_v30 = vpop.f32.mrf.mxu2 }
 0x497   : > { %v3876_v17 = vadd.f32 %v3827_v30, %v3642_v14  ;;  %v4598_v14 = vld [vmem:[#allocation2 + $0x6c] sm:$0xff] }
 0x498   : > { %v3596_v29 = vpop.f32.mrf.mxu1  ;;  %v4834_v30 = vld [vmem:[#allocation2 + $0x88] sm:$0xff] }
 0x499   : > { %v4066_v59 = vpop.f32.mrf.mxu3  ;;  %v3643_v24 = vadd.f32 %v3596_v29, %v10380_v55  ;;  %v10478_v22 = vadd.f32 %v4061_v11, %v3876_v17  ;;  %v4597_v17 = vld [vmem:[#allocation2 + $0x64] sm:$0xff]  ;;  %v4391_v29 = vpack.c.bf16 %v4364_v15, %v4363_v9 }
 0x49a   : > { %v4625_v21 = vpack.c.bf16 %v4598_v14, %v4597_v17  ;;  %v4365_v14 = vld [vmem:[#allocation2 + $0x73] sm:$0xff] }
 0x49b   : > { %4491 = vmatmul.bf16.gmra.mxu1 %v4390_v63  ;;  %4725 = vmatmul.bf16.gmra.mxu2 %v4624_v5  ;;  %v4141_v63 = vld [vmem:[#allocation2 + $0xc2] sm:$0xff] }
 0x49c   : > { %v4248_v38 = vpop.f32.mrf.mxu0 }
 0x49d   : > { %v10481_v28 = vadd.f32 %v4248_v38, %v10282_v50 }
 0x49e   : > { %4964 = vmatmul.bf16.gmra.mxu3 %v4859_v41  ;;  %v3830_v8 = vpop.f32.mrf.mxu2 }
 0x49f   : > { %v3877_v3 = vadd.f32 %v3830_v8, %v3643_v24  ;;  %4287 = vmatmul.bf16.gmra.mxu0 %v4162_v45  ;;  %v4142_v24 = vld [vmem:[#allocation2 + $0xca] sm:$0xff] }
 0x4a0   : > { %v3598_v55 = vpop.f32.mrf.mxu1  ;;  %v4163_v57 = vpack.c.bf16 %v4142_v24, %v4141_v63 }
 0x4a1   : > { %v4069_v33 = vpop.f32.mrf.mxu3  ;;  %v3644_v2 = vadd.f32 %v3598_v55, %v10399_v25  ;;  %v10484_v11 = vadd.f32 %v4064_v6, %v3877_v3  ;;  %v4833_v25 = vld [vmem:[#allocation2 + $0x80] sm:$0xff] }
 0x4a2   : > { %v4860_v12 = vpack.c.bf16 %v4834_v30, %v4833_v25  ;;  %v4366_v55 = vld [vmem:[#allocation2 + $0x7b] sm:$0xff] }
 0x4a4   : > { %v4250_v43 = vpop.f32.mrf.mxu0 }
 0x4a5   : > { %v10487_v40 = vadd.f32 %v4250_v43, %v10288_v19 }
 0x4a6   : > { %v3832_v53 = vpop.f32.mrf.mxu2 }
 0x4a7   : > { %v3878_v44 = vadd.f32 %v3832_v53, %v3644_v2  ;;  %v4600_v2 = vld [vmem:[#allocation2 + $0x7c] sm:$0xff] }
 0x4a8   : > { %v3601_v49 = vpop.f32.mrf.mxu1  ;;  %v4836_v53 = vld [vmem:[#allocation2 + $0x98] sm:$0xff] }
 0x4a9   : > { %v4071_v50 = vpop.f32.mrf.mxu3  ;;  %v3645_v47 = vadd.f32 %v3601_v49, %v10420_v7  ;;  %v10490_v6 = vadd.f32 %v4066_v59, %v3878_v44  ;;  %v4599_v44 = vld [vmem:[#allocation2 + $0x74] sm:$0xff]  ;;  %v4392_v49 = vpack.c.bf16 %v4366_v55, %v4365_v14 }
 0x4aa   : > { %v4626_v9 = vpack.c.bf16 %v4600_v2, %v4599_v44  ;;  %v4367_v2 = vld [vmem:[#allocation2 + $0x83] sm:$0xff] }
 0x4ab   : > { %4496 = vmatmul.bf16.gmra.mxu1 %v4391_v29  ;;  %4730 = vmatmul.bf16.gmra.mxu2 %v4625_v21  ;;  %v4143_v29 = vld [vmem:[#allocation2 + $0xd2] sm:$0xff] }
 0x4ac   : > { %v4253_v19 = vpop.f32.mrf.mxu0 }
 0x4ad   : > { %v10493_v5 = vadd.f32 %v4253_v19, %v10294_v20 }
 0x4ae   : > { %4969 = vmatmul.bf16.gmra.mxu3 %v4860_v12  ;;  %v3835_v41 = vpop.f32.mrf.mxu2 }
 0x4af   : > { %v3879_v37 = vadd.f32 %v3835_v41, %v3645_v47  ;;  %4292 = vmatmul.bf16.gmra.mxu0 %v4163_v57  ;;  %v4144_v47 = vld [vmem:[#allocation2 + $0xda] sm:$0xff] }
 0x4b0   : > { %v3603_v7 = vpop.f32.mrf.mxu1  ;;  %v4164_v25 = vpack.c.bf16 %v4144_v47, %v4143_v29 }
 0x4b1   : > { %v4074_v38 = vpop.f32.mrf.mxu3  ;;  %v3646_v4 = vadd.f32 %v3603_v7, %v10426_v52  ;;  %v10496_v59 = vadd.f32 %v4069_v33, %v3879_v37  ;;  %v4835_v52 = vld [vmem:[#allocation2 + $0x90] sm:$0xff] }
 0x4b2   : > { %v4861_v17 = vpack.c.bf16 %v4836_v53, %v4835_v52  ;;  %v4368_v7 = vld [vmem:[#allocation2 + $0x8b] sm:$0xff] }
 0x4b4   : > { %v4255_v45 = vpop.f32.mrf.mxu0 }
 0x4b5   : > { %v10499_v8 = vadd.f32 %v4255_v45, %v10300_v27 }
 0x4b6   : > { %v3837_v3 = vpop.f32.mrf.mxu2 }
 0x4b7   : > { %v3880_v43 = vadd.f32 %v3837_v3, %v3646_v4  ;;  %v4602_v4 = vld [vmem:[#allocation2 + $0x8c] sm:$0xff] }
 0x4b8   : > { %v3606_v15 = vpop.f32.mrf.mxu1  ;;  %v4838_v3 = vld [vmem:[#allocation2 + $0xa8] sm:$0xff] }
 0x4b9   : > { %v4076_v20 = vpop.f32.mrf.mxu3  ;;  %v3647_v30 = vadd.f32 %v3606_v15, %v10433_v60  ;;  %v10502_v33 = vadd.f32 %v4071_v50, %v3880_v43  ;;  %v4601_v43 = vld [vmem:[#allocation2 + $0x84] sm:$0xff]  ;;  %v4393_v15 = vpack.c.bf16 %v4368_v7, %v4367_v2  ;;  %v4840_v7 = vld [vmem:[#allocation2 + $0xb8] sm:$0xff] }
 0x4ba   : > { %v4627_v14 = vpack.c.bf16 %v4602_v4, %v4601_v43  ;;  %v9058_v43 = vld [vmem:[%s11608_s2 + $0x428] sm:$0xff] }
 0x4bb   : > { %4501 = vmatmul.bf16.gmra.mxu1 %v4392_v49  ;;  %4735 = vmatmul.bf16.gmra.mxu2 %v4626_v9  ;;  %v4145_v49 = vld [vmem:[#allocation2 + $0xe2] sm:$0xff] }
 0x4bc   : > { %v4258_v27 = vpop.f32.mrf.mxu0 }
 0x4bd   : > { %v10505_v21 = vadd.f32 %v4258_v27, %v10312_v34 }
 0x4be   : > { %4974 = vmatmul.bf16.gmra.mxu3 %v4861_v17  ;;  %v3840_v12 = vpop.f32.mrf.mxu2 }
 0x4bf   : > { %v3881_v24 = vadd.f32 %v3840_v12, %v3647_v30  ;;  %4297 = vmatmul.bf16.gmra.mxu0 %v4164_v25  ;;  %v4146_v30 = vld [vmem:[#allocation2 + $0xea] sm:$0xff] }
 0x4c0   : > { %v3608_v60 = vpop.f32.mrf.mxu1  ;;  %v4165_v52 = vpack.c.bf16 %v4146_v30, %v4145_v49 }
 0x4c1   : > { %v4079_v19 = vpop.f32.mrf.mxu3  ;;  %v3648_v63 = vadd.f32 %v3608_v60, %v10439_v10  ;;  %v10508_v50 = vadd.f32 %v4074_v38, %v3881_v24  ;;  %v4837_v10 = vld [vmem:[#allocation2 + $0xa0] sm:$0xff] }
 0x4c2   : > { %v4862_v44 = vpack.c.bf16 %v4838_v3, %v4837_v10  ;;  %v4148_v10 = vld [vmem:[#allocation2 + $0xfa] sm:$0xff] }
 0x4c4   : > { %v4260_v57 = vpop.f32.mrf.mxu0 }
 0x4c5   : > { %v10511_v41 = vadd.f32 %v4260_v57, %v10326_v16  ;;  %v4604_v57 = vld [vmem:[#allocation2 + $0x9c] sm:$0xff] }
 0x4c6   : > { %v3842_v37 = vpop.f32.mrf.mxu2 }
 0x4c7   : > { %v3882_v45 = vadd.f32 %v3842_v37, %v3648_v63  ;;  %v4370_v63 = vld [vmem:[#allocation2 + $0x9b] sm:$0xff] }
 0x4c8   : > { %v3611_v55 = vpop.f32.mrf.mxu1 }
 0x4c9   : > { %v4081_v34 = vpop.f32.mrf.mxu3  ;;  %v3649_v53 = vadd.f32 %v3611_v55, %v10445_v62  ;;  %v10514_v38 = vadd.f32 %v4076_v20, %v3882_v45  ;;  %v9060_v20 = vld [vmem:[%s11608_s2 + $0x438] sm:$0xff] }
 0x4ca   : > { %5170 = vmatpush.bf16.msrb.mxu0 %v9060_v20  ;;  %v4369_v45 = vld [vmem:[#allocation2 + $0x93] sm:$0xff] }
 0x4cb   : > { %4506 = vmatmul.bf16.gmra.mxu1 %v4393_v15  ;;  %4740 = vmatmul.bf16.gmra.mxu2 %v4627_v14  ;;  %v4394_v55 = vpack.c.bf16 %v4370_v63, %v4369_v45  ;;  %v4147_v14 = vld [vmem:[#allocation2 + $0xf2] sm:$0xff]  ;;  %v4605_v45 = vld [vmem:[#allocation2 + $0xa4] sm:$0xff] }
 0x4cc   : > { %v4263_v16 = vpop.f32.mrf.mxu0  ;;  %v4606_v63 = vld [vmem:[#allocation2 + $0xac] sm:$0xff] }
 0x4cd   : > { %v10517_v9 = vadd.f32 %v4263_v16, %v10352_v1  ;;  %v9059_v1 = vld [vmem:[%s11608_s2 + $0x430] sm:$0xff]  ;;  %v9057_v16 = vld [vmem:[%s11608_s2 + $0x420] sm:$0xff] }
 0x4ce   : > { %4979 = vmatmul.bf16.gmra.mxu3 %v4862_v44  ;;  %v3845_v17 = vpop.f32.mrf.mxu2  ;;  %5171 = vmatpush.bf16.msrb.mxu0 %v9059_v1 }
 0x4cf   : > { %v3883_v47 = vadd.f32 %v3845_v17, %v3649_v53  ;;  %4302 = vmatmul.bf16.gmra.mxu0 %v4165_v52 }
 0x4d0   : > { %v3613_v62 = vpop.f32.mrf.mxu1 }
 0x4d1   : > { %v4084_v27 = vpop.f32.mrf.mxu3  ;;  %v3650_v29 = vadd.f32 %v3613_v62, %v10451_v35  ;;  %v10523_v25 = vadd.f32 %v4079_v19, %v3883_v47  ;;  %v4603_v19 = vld [vmem:[#allocation2 + $0x94] sm:$0xff] }
 0x4d2   : > { %v4628_v2 = vpack.c.bf16 %v4604_v57, %v4603_v19  ;;  %5172 = vmatpush.bf16.msrb.mxu0 %v9058_v43  ;;  %v9056_v62 = vld [vmem:[%s11608_s2 + $0x418] sm:$0xff]  ;;  %v4150_v19 = vld [vmem:[#allocation2 + $0x10a] sm:$0xff] }
 0x4d4   : > { %v4265_v12 = vpop.f32.mrf.mxu0 }
 0x4d5   : > { %v10526_v24 = vadd.f32 %v4265_v12, %v10377_v61  ;;  %v4839_v61 = vld [vmem:[#allocation2 + $0xb0] sm:$0xff] }
 0x4d6   : > { %v3847_v60 = vpop.f32.mrf.mxu2  ;;  %v4863_v15 = vpack.c.bf16 %v4840_v7, %v4839_v61  ;;  %5173 = vmatpush.bf16.msrb.mxu0 %v9057_v16  ;;  %v9055_v12 = vld [vmem:[%s11608_s2 + $0x410] sm:$0xff]  ;;  %v4842_v7 = vld [vmem:[#allocation2 + $0xc8] sm:$0xff] }
 0x4d7   : > { %v3884_v37 = vadd.f32 %v3847_v60, %v3650_v29  ;;  %v4372_v60 = vld [vmem:[#allocation2 + $0xab] sm:$0xff] }
 0x4d8   : > { %v3616_v4 = vpop.f32.mrf.mxu1  ;;  %v9054_v61 = vld [vmem:[%s11608_s2 + $0x408] sm:$0xff] }
 0x4d9   : > { %v4086_v35 = vpop.f32.mrf.mxu3  ;;  %v3651_v3 = vadd.f32 %v3616_v4, %v10457_v32  ;;  %v10535_v53 = vadd.f32 %v4081_v34, %v3884_v37  ;;  %v4166_v32 = vpack.c.bf16 %v4148_v10, %v4147_v14  ;;  %v4371_v37 = vld [vmem:[#allocation2 + $0xa3] sm:$0xff] }
 0x4da   : > { %5174 = vmatpush.bf16.msrb.mxu0 %v9056_v62 }
 0x4db   : > { %4511 = vmatmul.bf16.gmra.mxu1 %v4394_v55  ;;  %4745 = vmatmul.bf16.gmra.mxu2 %v4628_v2  ;;  %v4629_v55 = vpack.c.bf16 %v4606_v63, %v4605_v45  ;;  %v4841_v2 = vld [vmem:[#allocation2 + $0xc0] sm:$0xff]  ;;  %v4373_v63 = vld [vmem:[#allocation2 + $0xb3] sm:$0xff] }
 0x4dc   : > { %v4268_v44 = vpop.f32.mrf.mxu0  ;;  %v4152_v45 = vld [vmem:[#allocation2 + $0x11a] sm:$0xff] }
 0x4dd   : > { %v10538_v30 = vadd.f32 %v4268_v44, %v10396_v46 }
 0x4de   : > { %4984 = vmatmul.bf16.gmra.mxu3 %v4863_v15  ;;  %v3850_v49 = vpop.f32.mrf.mxu2  ;;  %5175 = vmatpush.bf16.msrb.mxu0 %v9055_v12  ;;  %v4864_v15 = vpack.c.bf16 %v4842_v7, %v4841_v2  ;;  %v4608_v12 = vld [vmem:[#allocation2 + $0xbc] sm:$0xff]  ;;  %v4607_v7 = vld [vmem:[#allocation2 + $0xb4] sm:$0xff] }
 0x4df   : > { %v3885_v52 = vadd.f32 %v3850_v49, %v3651_v3  ;;  %4307 = vmatmul.bf16.gmra.mxu0 %v4166_v32 }
 0x4e0   : > { %v3618_v17 = vpop.f32.mrf.mxu1 }
 0x4e1   : > { %v4945_v34 = vpop.f32.mrf.mxu3  ;;  %v3652_v47 = vadd.f32 %v3618_v17, %v10463_v23  ;;  %v10547_v29 = vadd.f32 %v4084_v27, %v3885_v52  ;;  %v4149_v27 = vld [vmem:[#allocation2 + $0x102] sm:$0xff] }
 0x4e2   : > { %v4167_v14 = vpack.c.bf16 %v4150_v19, %v4149_v27  ;;  %5176 = vmatpush.bf16.msrb.mxu0 %v9054_v61  ;;  %v4843_v19 = vld [vmem:[#allocation2 + $0xd0] sm:$0xff] }
 0x4e4   : > { %v4270_v46 = vpop.f32.mrf.mxu0 }
 0x4e5   : > { %v10550_v20 = vadd.f32 %v4270_v46, %v10416_v18  ;;  %v4395_v18 = vpack.c.bf16 %v4372_v60, %v4371_v37  ;;  %v4374_v46 = vld [vmem:[#allocation2 + $0xbb] sm:$0xff] }
 0x4e6   : > { %v3852_v1 = vpop.f32.mrf.mxu2 }
 0x4e7   : > { %v3886_v57 = vadd.f32 %v3852_v1, %v3652_v47 }
 0x4e8   : > { %v4477_v4 = vpop.f32.mrf.mxu1 }
 0x4e9   : > { %v4947_v23 = vpop.f32.mrf.mxu3  ;;  %v4557_v3 = vadd.f32 %v4477_v4, %v10469_v26  ;;  %v10559_v43 = vadd.f32 %v4086_v35, %v3886_v57  ;;  %v9053_v26 = vld [vmem:[%s11608_s2 + $0x400] sm:$0xff]  ;;  %v4844_v57 = vld [vmem:[#allocation2 + $0xd8] sm:$0xff] }
 0x4ea   : > { %5177 = vmatpush.bf16.msrb.mxu0 %v9053_v26  ;;  %v4151_v4 = vld [vmem:[#allocation2 + $0x112] sm:$0xff] }
 0x4eb   : > { %4516 = vmatmul.bf16.gmra.mxu1 %v4395_v18  ;;  %4750 = vmatmul.bf16.gmra.mxu2 %v4629_v55  ;;  %v4168_v18 = vpack.c.bf16 %v4152_v45, %v4151_v4  ;;  %v5058_v4 = vld [vmem:[#allocation2 + $0x39] sm:$0xff]  ;;  %v5057_v45 = vld [vmem:[#allocation2 + $0x31] sm:$0xff] }
 0x4ec   : > { %v4273_v10 = vpop.f32.mrf.mxu0 }
 0x4ed   : > { %v10562_v44 = vadd.f32 %v4273_v10, %v10423_v13 }
 0x4ee   : > { %4989 = vmatmul.bf16.gmra.mxu3 %v4864_v15  ;;  %v4711_v32 = vpop.f32.mrf.mxu2 }
 0x4ef   : > { %v4791_v16 = vadd.f32 %v4711_v32, %v4557_v3  ;;  %4312 = vmatmul.bf16.gmra.mxu0 %v4167_v14 }
 0x4f0   : > { %v4479_v35 = vpop.f32.mrf.mxu1 }
 0x4f1   : > { %v4950_v49 = vpop.f32.mrf.mxu3  ;;  %v4558_v52 = vadd.f32 %v4479_v35, %v10475_v48  ;;  %v10568_v17 = vadd.f32 %v4945_v34, %v4791_v16  ;;  %v4396_v48 = vpack.c.bf16 %v4374_v46, %v4373_v63  ;;  %v4630_v34 = vpack.c.bf16 %v4608_v12, %v4607_v7  ;;  %v4376_v35 = vld [vmem:[#allocation2 + $0xcb] sm:$0xff]  ;;  %v4375_v12 = vld [vmem:[#allocation2 + $0xc3] sm:$0xff] }
 0x4f4   : > { %v4275_v47 = vpop.f32.mrf.mxu0 }
 0x4f5   : > { %v10571_v62 = vadd.f32 %v4275_v47, %v10429_v42  ;;  %v4865_v42 = vpack.c.bf16 %v4844_v57, %v4843_v19  ;;  %v4397_v57 = vpack.c.bf16 %v4376_v35, %v4375_v12 }
 0x4f6   : > { %v4713_v13 = vpop.f32.mrf.mxu2 }
 0x4f7   : > { %v4792_v1 = vadd.f32 %v4713_v13, %v4558_v52  ;;  %v4610_v52 = vld [vmem:[#allocation2 + $0xcc] sm:$0xff] }
 0x4f8   : > { %v4482_v37 = vpop.f32.mrf.mxu1 }
 0x4f9   : > { %v4952_v60 = vpop.f32.mrf.mxu3  ;;  %v4559_v27 = vadd.f32 %v4482_v37, %v10481_v28  ;;  %v10574_v3 = vadd.f32 %v4947_v23, %v4792_v1  ;;  %v4609_v1 = vld [vmem:[#allocation2 + $0xc4] sm:$0xff] }
 0x4fa   : > { %v4631_v37 = vpack.c.bf16 %v4610_v52, %v4609_v1  ;;  %v4377_v52 = vld [vmem:[#allocation2 + $0xd3] sm:$0xff] }
 0x4fb   : > { %4521 = vmatmul.bf16.gmra.mxu1 %v4396_v48  ;;  %4755 = vmatmul.bf16.gmra.mxu2 %v4630_v34  ;;  %v5089_v48 = vpack.c.bf16 %v5058_v4, %v5057_v45 }
 0x4fc   : > { %v4278_v55 = vpop.f32.mrf.mxu0 }
 0x4fd   : > { %v10577_v2 = vadd.f32 %v4278_v55, %v10436_v56  ;;  %v4846_v56 = vld [vmem:[#allocation2 + $0xe8] sm:$0xff] }
 0x4fe   : > { %4994 = vmatmul.bf16.gmra.mxu3 %v4865_v42  ;;  %v4716_v61 = vpop.f32.mrf.mxu2 }
 0x4ff   : > { %v4793_v15 = vadd.f32 %v4716_v61, %v4559_v27  ;;  %4317 = vmatmul.bf16.gmra.mxu0 %v4168_v18 }
 0x500   : > { %v4484_v10 = vpop.f32.mrf.mxu1 }
 0x501   : > { %v4955_v14 = vpop.f32.mrf.mxu3  ;;  %v4560_v28 = vadd.f32 %v4484_v10, %v10487_v40  ;;  %v10580_v26 = vadd.f32 %v4950_v49, %v4793_v15  ;;  %v4845_v40 = vld [vmem:[#allocation2 + $0xe0] sm:$0xff] }
 0x502   : > { %v4866_v7 = vpack.c.bf16 %v4846_v56, %v4845_v40  ;;  %v4378_v10 = vld [vmem:[#allocation2 + $0xdb] sm:$0xff] }
 0x504   : > { %v4280_v23 = vpop.f32.mrf.mxu0 }
 0x505   : > { %v10583_v32 = vadd.f32 %v4280_v23, %v10442_v0 }
 0x506   : > { %v4718_v16 = vpop.f32.mrf.mxu2 }
 0x507   : > { %v4794_v47 = vadd.f32 %v4718_v16, %v4560_v28  ;;  %v4612_v28 = vld [vmem:[#allocation2 + $0xdc] sm:$0xff] }
 0x508   : > { %v4487_v46 = vpop.f32.mrf.mxu1  ;;  %v4848_v16 = vld [vmem:[#allocation2 + $0xf8] sm:$0xff] }
 0x509   : > { %v4957_v13 = vpop.f32.mrf.mxu3  ;;  %v4561_v63 = vadd.f32 %v4487_v46, %v10493_v5  ;;  %v10586_v49 = vadd.f32 %v4952_v60, %v4794_v47  ;;  %v4611_v47 = vld [vmem:[#allocation2 + $0xd4] sm:$0xff]  ;;  %v4398_v46 = vpack.c.bf16 %v4378_v10, %v4377_v52 }
 0x50a   : > { %v4632_v12 = vpack.c.bf16 %v4612_v28, %v4611_v47 }
 0x50b   : > { %4526 = vmatmul.bf16.gmra.mxu1 %v4397_v57  ;;  %4760 = vmatmul.bf16.gmra.mxu2 %v4631_v37  ;;  %v5059_v57 = vld [vmem:[#allocation2 + $0x41] sm:$0xff] }
 0x50c   : > { %v4283_v0 = vpop.f32.mrf.mxu0 }
 0x50d   : > { %v10589_v27 = vadd.f32 %v4283_v0, %v10448_v58 }
 0x50e   : > { %4999 = vmatmul.bf16.gmra.mxu3 %v4866_v7  ;;  %v4721_v34 = vpop.f32.mrf.mxu2 }
 0x50f   : > { %v4795_v19 = vadd.f32 %v4721_v34, %v4561_v63  ;;  %5178 = vmatmul.bf16.vlgmr.msrb.gmra.mxu0 %v5089_v48  ;;  %v5060_v63 = vld [vmem:[#allocation2 + $0x49] sm:$0xff] }
 0x510   : > { %v4489_v5 = vpop.f32.mrf.mxu1  ;;  %v5090_v40 = vpack.c.bf16 %v5060_v63, %v5059_v57  ;;  %v9083_v48 = vld [vmem:[%s11608_s2 + $0x4f0] sm:$0xff]  ;;  %v9080_v63 = vld [vmem:[%s11608_s2 + $0x4d8] sm:$0xff] }
 0x511   : > { %v4960_v42 = vpop.f32.mrf.mxu3  ;;  %v4562_v18 = vadd.f32 %v4489_v5, %v10499_v8  ;;  %v10592_v60 = vadd.f32 %v4955_v14, %v4795_v19  ;;  %v4847_v8 = vld [vmem:[#allocation2 + $0xf0] sm:$0xff]  ;;  %v9082_v5 = vld [vmem:[%s11608_s2 + $0x4e8] sm:$0xff] }
 0x512   : > { %v4867_v1 = vpack.c.bf16 %v4848_v16, %v4847_v8  ;;  %v4613_v16 = vld [vmem:[#allocation2 + $0xe4] sm:$0xff] }
 0x514   : > { %v4285_v55 = vpop.f32.mrf.mxu0 }
 0x515   : > { %v10595_v61 = vadd.f32 %v4285_v55, %v10454_v54  ;;  %v4380_v55 = vld [vmem:[#allocation2 + $0xeb] sm:$0xff] }
 0x516   : > { %v4723_v15 = vpop.f32.mrf.mxu2 }
 0x517   : > { %v4796_v23 = vadd.f32 %v4723_v15, %v4562_v18  ;;  %v4614_v15 = vld [vmem:[#allocation2 + $0xec] sm:$0xff] }
 0x518   : > { %v4492_v35 = vpop.f32.mrf.mxu1  ;;  %v4633_v52 = vpack.c.bf16 %v4614_v15, %v4613_v16  ;;  %v4382_v15 = vld [vmem:[#allocation2 + $0xfb] sm:$0xff] }
 0x519   : > { %v4962_v58 = vpop.f32.mrf.mxu3  ;;  %v4563_v56 = vadd.f32 %v4492_v35, %v10505_v21  ;;  %v10598_v14 = vadd.f32 %v4957_v13, %v4796_v23  ;;  %v9084_v21 = vld [vmem:[%s11608_s2 + $0x4f8] sm:$0xff]  ;;  %v4379_v23 = vld [vmem:[#allocation2 + $0xe3] sm:$0xff] }
 0x51a   : > { %5872 = vmatpush.bf16.msra.mxu3 %v9084_v21  ;;  %v4399_v35 = vpack.c.bf16 %v4380_v55, %v4379_v23 }
 0x51b   : > { %4531 = vmatmul.bf16.gmra.mxu1 %v4398_v46  ;;  %4765 = vmatmul.bf16.gmra.mxu2 %v4632_v12  ;;  %v5061_v12 = vld [vmem:[#allocation2 + $0x51] sm:$0xff] }
 0x51c   : > { %v4288_v54 = vpop.f32.mrf.mxu0 }
 0x51d   : > { %v10601_v37 = vadd.f32 %v4288_v54, %v10460_v31 }
 0x51e   : > { %5004 = vmatmul.bf16.gmra.mxu3 %v4867_v1  ;;  %v4726_v7 = vpop.f32.mrf.mxu2 }
 0x51f   : > { %v4797_v4 = vadd.f32 %v4726_v7, %v4563_v56  ;;  %5183 = vmatmul.bf16.gmra.mxu0 %v5090_v40  ;;  %5873 = vmatpush.bf16.msra.mxu3 %v9083_v48  ;;  %v5062_v56 = vld [vmem:[#allocation2 + $0x59] sm:$0xff]  ;;  %v9067_v7 = vld [vmem:[%s11608_s2 + $0x470] sm:$0xff] }
 0x520   : > { %v4494_v13 = vpop.f32.mrf.mxu1  ;;  %v5091_v1 = vpack.c.bf16 %v5062_v56, %v5061_v12  ;;  %v9073_v56 = vld [vmem:[%s11608_s2 + $0x4a0] sm:$0xff] }
 0x521   : > { %v4965_v0 = vpop.f32.mrf.mxu3  ;;  %v4564_v45 = vadd.f32 %v4494_v13, %v10511_v41  ;;  %v10610_v34 = vadd.f32 %v4960_v42, %v4797_v4  ;;  %v9075_v4 = vld [vmem:[%s11608_s2 + $0x4b0] sm:$0xff] }
 0x522   : > { %v9079_v13 = vld [vmem:[%s11608_s2 + $0x4d0] sm:$0xff] }
 0x523   : > { %5874 = vmatpush.bf16.msra.mxu3 %v9082_v5  ;;  %v9066_v5 = vld [vmem:[%s11608_s2 + $0x468] sm:$0xff] }
 0x524   : > { %v4290_v31 = vpop.f32.mrf.mxu0 }
 0x525   : > { %v10613_v19 = vadd.f32 %v4290_v31, %v10466_v51  ;;  %v9081_v51 = vld [vmem:[%s11608_s2 + $0x4e0] sm:$0xff]  ;;  %v4381_v31 = vld [vmem:[#allocation2 + $0xf3] sm:$0xff] }
 0x526   : > { %v4728_v18 = vpop.f32.mrf.mxu2 }
 0x527   : > { %v4798_v10 = vadd.f32 %v4728_v18, %v4564_v45  ;;  %5875 = vmatpush.bf16.msra.mxu3 %v9081_v51  ;;  %v9074_v18 = vld [vmem:[%s11608_s2 + $0x4a8] sm:$0xff]  ;;  %v9065_v51 = vld [vmem:[%s11608_s2 + $0x460] sm:$0xff] }
 0x528   : > { %v4497_v28 = vpop.f32.mrf.mxu1 }
 0x529   : > { %v4967_v41 = vpop.f32.mrf.mxu3  ;;  %v4565_v42 = vadd.f32 %v4497_v28, %v10517_v9  ;;  %v10622_v47 = vadd.f32 %v4962_v58, %v4798_v10  ;;  %v9068_v9 = vld [vmem:[%s11608_s2 + $0x478] sm:$0xff] }
 0x52a   : > { %v9076_v58 = vld [vmem:[%s11608_s2 + $0x4b8] sm:$0xff]  ;;  %5404 = vmatpush.bf16.msra.mxu1 %v9068_v9  ;;  %v5063_v9 = vld [vmem:[#allocation2 + $0x61] sm:$0xff] }
 0x52b   : > { %4536 = vmatmul.bf16.gmra.mxu1 %v4399_v35  ;;  %4770 = vmatmul.bf16.gmra.mxu2 %v4633_v52  ;;  %v4615_v10 = vld [vmem:[#allocation2 + $0xf4] sm:$0xff]  ;;  %v4616_v28 = vld [vmem:[#allocation2 + $0xfc] sm:$0xff]  ;;  %v4400_v35 = vpack.c.bf16 %v4382_v15, %v4381_v31 }
 0x52c   : > { %v4293_v46 = vpop.f32.mrf.mxu0  ;;  %5638 = vmatpush.bf16.msra.mxu2 %v9076_v58  ;;  %5876 = vmatpush.bf16.msra.mxu3 %v9080_v63  ;;  %v4634_v52 = vpack.c.bf16 %v4616_v28, %v4615_v10  ;;  %v4383_v31 = vld [vmem:[#allocation2 + $0x103] sm:$0xff] }
 0x52d   : > { %v10626_v8 = vadd.f32 %v4293_v46, %v10472_v36  ;;  %v9077_v46 = vld [vmem:[%s11608_s2 + $0x4c0] sm:$0xff]  ;;  %v9070_v10 = vld [vmem:[%s11608_s2 + $0x488] sm:$0xff] }
 0x52e   : > { %5009 = vmatmul.bf16.gmra.mxu3 %v10407_v39  ;;  %v4731_v54 = vpop.f32.mrf.mxu2  ;;  %5405 = vmatpush.bf16.msra.mxu1 %v9067_v7 }
 0x52f   : > { %v4799_v57 = vadd.f32 %v4731_v54, %v4565_v42  ;;  %5188 = vmatmul.bf16.gmra.mxu0 %v5091_v1  ;;  %v5064_v1 = vld [vmem:[#allocation2 + $0x69] sm:$0xff]  ;;  %v9064_v54 = vld [vmem:[%s11608_s2 + $0x458] sm:$0xff] }
 0x530   : > { %v4499_v36 = vpop.f32.mrf.mxu1  ;;  %5639 = vmatpush.bf16.msra.mxu2 %v9075_v4  ;;  %5877 = vmatpush.bf16.msra.mxu3 %v9079_v13  ;;  %v5092_v63 = vpack.c.bf16 %v5064_v1, %v5063_v9  ;;  %v9063_v4 = vld [vmem:[%s11608_s2 + $0x450] sm:$0xff] }
 0x531   : > { %v4970_v40 = vpop.f32.mrf.mxu3  ;;  %v4566_v21 = vadd.f32 %v4499_v36, %v10526_v24  ;;  %v10647_v45 = vadd.f32 %v4965_v0, %v4799_v57  ;;  %v9078_v0 = vld [vmem:[%s11608_s2 + $0x4c8] sm:$0xff]  ;;  %v9071_v13 = vld [vmem:[%s11608_s2 + $0x490] sm:$0xff] }
 0x532   : > { %5406 = vmatpush.bf16.msra.mxu1 %v9066_v5 }
 0x534   : > { %v4295_v48 = vpop.f32.mrf.mxu0  ;;  %5640 = vmatpush.bf16.msra.mxu2 %v9074_v18  ;;  %5878 = vmatpush.bf16.msra.mxu3 %v9078_v0  ;;  %v4384_v18 = vld [vmem:[#allocation2 + $0x10b] sm:$0xff] }
 0x535   : > { %v10650_v24 = vadd.f32 %v4295_v48, %v10478_v22  ;;  %v4617_v0 = vld [vmem:[#allocation2 + $0x104] sm:$0xff] }
 0x536   : > { %v4733_v55 = vpop.f32.mrf.mxu2  ;;  %5407 = vmatpush.bf16.msra.mxu1 %v9065_v51  ;;  %v9069_v51 = vld [vmem:[%s11608_s2 + $0x480] sm:$0xff] }
 0x537   : > { %v4800_v23 = vadd.f32 %v4733_v55, %v4566_v21  ;;  %v4618_v55 = vld [vmem:[#allocation2 + $0x10c] sm:$0xff] }
 0x538   : > { %v4502_v16 = vpop.f32.mrf.mxu1  ;;  %5641 = vmatpush.bf16.msra.mxu2 %v9073_v56  ;;  %5879 = vmatpush.bf16.msra.mxu3 %v9077_v46  ;;  %v5066_v46 = vld [vmem:[#allocation2 + $0x79] sm:$0xff] }
 0x539   : > { %v4972_v22 = vpop.f32.mrf.mxu3  ;;  %v4567_v42 = vadd.f32 %v4502_v16, %v10538_v30  ;;  %v10671_v12 = vadd.f32 %v4967_v41, %v4800_v23  ;;  %v9072_v41 = vld [vmem:[%s11608_s2 + $0x498] sm:$0xff]  ;;  %v4401_v16 = vpack.c.bf16 %v4384_v18, %v4383_v31 }
 0x53a   : > { %5408 = vmatpush.bf16.msra.mxu1 %v9064_v54 }
 0x53b   : > { %4541 = vmatmul.bf16.gmra.mxu1 %v4400_v35  ;;  %4775 = vmatmul.bf16.gmra.mxu2 %v4634_v52 }
 0x53c   : > { %v4298_v30 = vpop.f32.mrf.mxu0  ;;  %5642 = vmatpush.bf16.msra.mxu2 %v9072_v41 }
 0x53d   : > { %v10675_v58 = vadd.f32 %v4298_v30, %v10484_v11  ;;  %v5065_v30 = vld [vmem:[#allocation2 + $0x71] sm:$0xff] }
 0x53e   : > { %5014 = vmatmul.bf16.gmra.mxu3 %v10407_v39  ;;  %v4736_v57 = vpop.f32.mrf.mxu2  ;;  %5409 = vmatpush.bf16.msra.mxu1 %v9063_v4  ;;  %v5093_v9 = vpack.c.bf16 %v5066_v46, %v5065_v30  ;;  %v4619_v4 = vld [vmem:[#allocation2 + $0x114] sm:$0xff] }
 0x53f   : > { %v4801_v36 = vadd.f32 %v4736_v57, %v4567_v42  ;;  %5193 = vmatmul.bf16.gmra.mxu0 %v5092_v63  ;;  %v4635_v42 = vpack.c.bf16 %v4618_v55, %v4617_v0 }
 0x540   : > { %v4504_v7 = vpop.f32.mrf.mxu1  ;;  %5643 = vmatpush.bf16.msra.mxu2 %v9071_v13  ;;  %v4620_v13 = vld [vmem:[#allocation2 + $0x11c] sm:$0xff] }
 0x541   : > { %v4975_v21 = vpop.f32.mrf.mxu3  ;;  %v4568_v11 = vadd.f32 %v4504_v7, %v10550_v20  ;;  %v10690_v48 = vadd.f32 %v4970_v40, %v4801_v36  ;;  %v9062_v20 = vld [vmem:[%s11608_s2 + $0x448] sm:$0xff]  ;;  %v4385_v7 = vld [vmem:[#allocation2 + $0x113] sm:$0xff]  ;;  %v4636_v55 = vpack.c.bf16 %v4620_v13, %v4619_v4 }
 0x542   : > { %5410 = vmatpush.bf16.msra.mxu1 %v9062_v20  ;;  %v5760_v20 = vld [vmem:[#allocation2 + $0x3c] sm:$0xff]  ;;  %v5525_v4 = vld [vmem:[#allocation2 + $0x33] sm:$0xff] }
 0x544   : > { %v4300_v5 = vpop.f32.mrf.mxu0  ;;  %5644 = vmatpush.bf16.msra.mxu2 %v9070_v10 }
 0x545   : > { %v10693_v15 = vadd.f32 %v4300_v5, %v10490_v6  ;;  %v9061_v6 = vld [vmem:[%s11608_s2 + $0x440] sm:$0xff] }
 0x546   : > { %v4738_v40 = vpop.f32.mrf.mxu2  ;;  %5411 = vmatpush.bf16.msra.mxu1 %v9061_v6 }
 0x547   : > { %v4802_v28 = vadd.f32 %v4738_v40, %v4568_v11 }
 0x548   : > { %v4507_v35 = vpop.f32.mrf.mxu1  ;;  %5645 = vmatpush.bf16.msra.mxu2 %v9069_v51 }
 0x549   : > { %v4977_v23 = vpop.f32.mrf.mxu3  ;;  %v4569_v52 = vadd.f32 %v4507_v35, %v10562_v44  ;;  %v10708_v56 = vadd.f32 %v4972_v22, %v4802_v28 }
 0x54b   : > { %4546 = vmatmul.bf16.gmra.mxu1 %v4401_v16  ;;  %4780 = vmatmul.bf16.gmra.mxu2 %v4635_v42  ;;  %v5068_v16 = vld [vmem:[#allocation2 + $0x89] sm:$0xff] }
 0x54c   : > { %v4303_v1 = vpop.f32.mrf.mxu0 }
 0x54d   : > { %v10712_v44 = vadd.f32 %v4303_v1, %v10496_v59 }
 0x54e   : > { %5019 = vmatmul.bf16.gmra.mxu3 %v10407_v39  ;;  %v4741_v63 = vpop.f32.mrf.mxu2  ;;  %v4386_v39 = vld [vmem:[#allocation2 + $0x11b] sm:$0xff] }
 0x54f   : > { %v4803_v54 = vadd.f32 %v4741_v63, %v4569_v52  ;;  %5198 = vmatmul.bf16.gmra.mxu0 %v5093_v9  ;;  %v4402_v0 = vpack.c.bf16 %v4386_v39, %v4385_v7  ;;  %v5762_v7 = vld [vmem:[#allocation2 + $0x4c] sm:$0xff] }
 0x550   : > { %v4509_v57 = vpop.f32.mrf.mxu1  ;;  %v5291_v39 = vld [vmem:[#allocation2 + $0x32] sm:$0xff] }
 0x551   : > { %v4980_v41 = vpop.f32.mrf.mxu3  ;;  %v4570_v22 = vadd.f32 %v4509_v57, %v10571_v62  ;;  %v10715_v36 = vadd.f32 %v4975_v21, %v4803_v54  ;;  %v5759_v62 = vld [vmem:[#allocation2 + $0x34] sm:$0xff] }
 0x552   : > { %v5791_v28 = vpack.c.bf16 %v5760_v20, %v5759_v62  ;;  %v5292_v54 = vld [vmem:[#allocation2 + $0x3a] sm:$0xff]  ;;  %v5069_v20 = vld [vmem:[#allocation2 + $0x91] sm:$0xff] }
 0x553   : > { %v5526_v57 = vld [vmem:[#allocation2 + $0x3b] sm:$0xff] }
 0x554   : > { %v4305_v11 = vpop.f32.mrf.mxu0 }
 0x555   : > { %v10718_v31 = vadd.f32 %v4305_v11, %v10502_v33  ;;  %v5067_v33 = vld [vmem:[#allocation2 + $0x81] sm:$0xff] }
 0x556   : > { %v4743_v59 = vpop.f32.mrf.mxu2  ;;  %v5094_v52 = vpack.c.bf16 %v5068_v16, %v5067_v33 }
 0x557   : > { %v4804_v5 = vadd.f32 %v4743_v59, %v4570_v22  ;;  %v5323_v59 = vpack.c.bf16 %v5292_v54, %v5291_v39  ;;  %v5293_v54 = vld [vmem:[#allocation2 + $0x42] sm:$0xff] }
 0x558   : > { %v4512_v10 = vpop.f32.mrf.mxu1 }
 0x559   : > { %v4982_v18 = vpop.f32.mrf.mxu3  ;;  %v4571_v40 = vadd.f32 %v4512_v10, %v10577_v2  ;;  %v10721_v21 = vadd.f32 %v4977_v23, %v4804_v5  ;;  %v5557_v5 = vpack.c.bf16 %v5526_v57, %v5525_v4  ;;  %v5527_v57 = vld [vmem:[#allocation2 + $0x43] sm:$0xff] }
 0x55a   : > { %v5072_v4 = vld [vmem:[#allocation2 + $0xa9] sm:$0xff] }
 0x55b   : > { %4551 = vmatmul.bf16.gmra.mxu1 %v4402_v0  ;;  %4785 = vmatmul.bf16.gmra.mxu2 %v4636_v55  ;;  %v5070_v55 = vld [vmem:[#allocation2 + $0x99] sm:$0xff] }
 0x55c   : > { %v4308_v42 = vpop.f32.mrf.mxu0 }
 0x55d   : > { %v10724_v35 = vadd.f32 %v4308_v42, %v10508_v50 }
 0x55e   : > { %5880 = vmatmul.bf16.vlgmr.msra.gmra.mxu3 %v5791_v28  ;;  %v4746_v6 = vpop.f32.mrf.mxu2 }
 0x55f   : > { %v4805_v51 = vadd.f32 %v4746_v6, %v4571_v40  ;;  %5203 = vmatmul.bf16.gmra.mxu0 %v5094_v52  ;;  %v5095_v40 = vpack.c.bf16 %v5070_v55, %v5069_v20 }
 0x560   : > { %v4514_v1 = vpop.f32.mrf.mxu1 }
 0x561   : > { %v4985_v46 = vpop.f32.mrf.mxu3  ;;  %v4572_v2 = vadd.f32 %v4514_v1, %v10583_v32  ;;  %v10727_v23 = vadd.f32 %v4980_v41, %v4805_v51  ;;  %v5761_v32 = vld [vmem:[#allocation2 + $0x44] sm:$0xff] }
 0x562   : > { %v5792_v0 = vpack.c.bf16 %v5762_v7, %v5761_v32  ;;  %v5294_v51 = vld [vmem:[#allocation2 + $0x4a] sm:$0xff] }
 0x563   : > { %v5528_v1 = vld [vmem:[#allocation2 + $0x4b] sm:$0xff]  ;;  %v5324_v7 = vpack.c.bf16 %v5294_v51, %v5293_v54 }
 0x564   : > { %v4310_v30 = vpop.f32.mrf.mxu0  ;;  %v5295_v51 = vld [vmem:[#allocation2 + $0x52] sm:$0xff] }
 0x565   : > { %v10730_v9 = vadd.f32 %v4310_v30, %v10514_v38  ;;  %v5764_v30 = vld [vmem:[#allocation2 + $0x5c] sm:$0xff] }
 0x566   : > { %v4748_v63 = vpop.f32.mrf.mxu2 }
 0x567   : > { %v4806_v22 = vadd.f32 %v4748_v63, %v4572_v2 }
 0x568   : > { %v4517_v11 = vpop.f32.mrf.mxu1 }
 0x569   : > { %v4987_v50 = vpop.f32.mrf.mxu3  ;;  %v4573_v13 = vadd.f32 %v4517_v11, %v10589_v27  ;;  %v10733_v41 = vadd.f32 %v4982_v18, %v4806_v22  ;;  %v5558_v11 = vpack.c.bf16 %v5528_v1, %v5527_v57  ;;  %v5529_v1 = vld [vmem:[#allocation2 + $0x53] sm:$0xff] }
 0x56a   : > { %v5074_v57 = vld [vmem:[#allocation2 + $0xb9] sm:$0xff] }
 0x56b   : > { %5412 = vmatmul.bf16.vlgmr.msra.gmra.mxu1 %v5323_v59  ;;  %5646 = vmatmul.bf16.vlgmr.msra.gmra.mxu2 %v5557_v5 }
 0x56c   : > { %v4313_v38 = vpop.f32.mrf.mxu0 }
 0x56d   : > { %v10736_v10 = vadd.f32 %v4313_v38, %v10523_v25 }
 0x56e   : > { %5885 = vmatmul.bf16.gmra.mxu3 %v5792_v0  ;;  %v4751_v62 = vpop.f32.mrf.mxu2 }
 0x56f   : > { %v4807_v28 = vadd.f32 %v4751_v62, %v4573_v13  ;;  %5208 = vmatmul.bf16.gmra.mxu0 %v5095_v40  ;;  %v5071_v13 = vld [vmem:[#allocation2 + $0xa1] sm:$0xff] }
 0x570   : > { %v4519_v27 = vpop.f32.mrf.mxu1  ;;  %v5096_v5 = vpack.c.bf16 %v5072_v4, %v5071_v13 }
 0x571   : > { %v4990_v16 = vpop.f32.mrf.mxu3  ;;  %v4574_v42 = vadd.f32 %v4519_v27, %v10595_v61  ;;  %v10739_v18 = vadd.f32 %v4985_v46, %v4807_v28  ;;  %v5763_v61 = vld [vmem:[#allocation2 + $0x54] sm:$0xff] }
 0x572   : > { %v5793_v39 = vpack.c.bf16 %v5764_v30, %v5763_v61  ;;  %v5296_v28 = vld [vmem:[#allocation2 + $0x5a] sm:$0xff] }
 0x573   : > { %v5530_v27 = vld [vmem:[#allocation2 + $0x5b] sm:$0xff]  ;;  %v5325_v30 = vpack.c.bf16 %v5296_v28, %v5295_v51 }
 0x574   : > { %v4315_v33 = vpop.f32.mrf.mxu0  ;;  %v5297_v28 = vld [vmem:[#allocation2 + $0x62] sm:$0xff] }
 0x575   : > { %v10742_v52 = vadd.f32 %v4315_v33, %v10535_v53  ;;  %v5766_v33 = vld [vmem:[#allocation2 + $0x6c] sm:$0xff] }
 0x576   : > { %v4753_v6 = vpop.f32.mrf.mxu2 }
 0x577   : > { %v4808_v2 = vadd.f32 %v4753_v6, %v4574_v42 }
 0x578   : > { %v4522_v63 = vpop.f32.mrf.mxu1 }
 0x579   : > { %v4992_v25 = vpop.f32.mrf.mxu3  ;;  %v4575_v22 = vadd.f32 %v4522_v63, %v10601_v37  ;;  %v10745_v46 = vadd.f32 %v4987_v50, %v4808_v2  ;;  %v5559_v63 = vpack.c.bf16 %v5530_v27, %v5529_v1  ;;  %v5531_v27 = vld [vmem:[#allocation2 + $0x63] sm:$0xff] }
 0x57a   : > { %v5076_v1 = vld [vmem:[#allocation2 + $0xc9] sm:$0xff] }
 0x57b   : > { %5417 = vmatmul.bf16.gmra.mxu1 %v5324_v7  ;;  %5651 = vmatmul.bf16.gmra.mxu2 %v5558_v11 }
 0x57c   : > { %v4318_v53 = vpop.f32.mrf.mxu0 }
 0x57d   : > { %v10748_v59 = vadd.f32 %v4318_v53, %v10547_v29 }
 0x57e   : > { %5890 = vmatmul.bf16.gmra.mxu3 %v5793_v39  ;;  %v4756_v32 = vpop.f32.mrf.mxu2 }
 0x57f   : > { %v4809_v0 = vadd.f32 %v4756_v32, %v4575_v22  ;;  %5213 = vmatmul.bf16.gmra.mxu0 %v5096_v5  ;;  %v5073_v22 = vld [vmem:[#allocation2 + $0xb1] sm:$0xff] }
 0x580   : > { %v4524_v37 = vpop.f32.mrf.mxu1  ;;  %v5097_v11 = vpack.c.bf16 %v5074_v57, %v5073_v22 }
 0x581   : > { %v4995_v55 = vpop.f32.mrf.mxu3  ;;  %v4576_v38 = vadd.f32 %v4524_v37, %v10613_v19  ;;  %v10751_v50 = vadd.f32 %v4990_v16, %v4809_v0  ;;  %v5765_v19 = vld [vmem:[#allocation2 + $0x64] sm:$0xff] }
 0x582   : > { %v5794_v54 = vpack.c.bf16 %v5766_v33, %v5765_v19  ;;  %v5298_v0 = vld [vmem:[#allocation2 + $0x6a] sm:$0xff] }
 0x583   : > { %v5532_v37 = vld [vmem:[#allocation2 + $0x6b] sm:$0xff]  ;;  %v5326_v33 = vpack.c.bf16 %v5298_v0, %v5297_v28 }
 0x584   : > { %v4320_v20 = vpop.f32.mrf.mxu0  ;;  %v5299_v0 = vld [vmem:[#allocation2 + $0x72] sm:$0xff] }
 0x585   : > { %v10754_v40 = vadd.f32 %v4320_v20, %v10559_v43  ;;  %v5768_v20 = vld [vmem:[#allocation2 + $0x7c] sm:$0xff] }
 0x586   : > { %v4758_v62 = vpop.f32.mrf.mxu2 }
 0x587   : > { %v4810_v42 = vadd.f32 %v4758_v62, %v4576_v38 }
 0x588   : > { %v4527_v6 = vpop.f32.mrf.mxu1 }
 0x589   : > { %v4997_v29 = vpop.f32.mrf.mxu3  ;;  %v4577_v2 = vadd.f32 %v4527_v6, %v10626_v8  ;;  %v10757_v16 = vadd.f32 %v4992_v25, %v4810_v42  ;;  %v5560_v6 = vpack.c.bf16 %v5532_v37, %v5531_v27  ;;  %v5533_v37 = vld [vmem:[#allocation2 + $0x73] sm:$0xff] }
 0x58a   : > { %v5078_v27 = vld [vmem:[#allocation2 + $0xd9] sm:$0xff] }
 0x58b   : > { %5422 = vmatmul.bf16.gmra.mxu1 %v5325_v30  ;;  %5656 = vmatmul.bf16.gmra.mxu2 %v5559_v63 }
 0x58c   : > { %v5179_v43 = vpop.f32.mrf.mxu0 }
 0x58d   : > { %v10760_v7 = vadd.f32 %v5179_v43, %v10568_v17 }
 0x58e   : > { %5895 = vmatmul.bf16.gmra.mxu3 %v5794_v54  ;;  %v4761_v61 = vpop.f32.mrf.mxu2 }
 0x58f   : > { %v4811_v39 = vadd.f32 %v4761_v61, %v4577_v2  ;;  %5218 = vmatmul.bf16.gmra.mxu0 %v5097_v11  ;;  %v5075_v2 = vld [vmem:[#allocation2 + $0xc1] sm:$0xff] }
 0x590   : > { %v4529_v8 = vpop.f32.mrf.mxu1  ;;  %v5098_v63 = vpack.c.bf16 %v5076_v1, %v5075_v2 }
 0x591   : > { %v5000_v4 = vpop.f32.mrf.mxu3  ;;  %v4578_v53 = vadd.f32 %v4529_v8, %v10650_v24  ;;  %v10763_v25 = vadd.f32 %v4995_v55, %v4811_v39  ;;  %v5767_v24 = vld [vmem:[#allocation2 + $0x74] sm:$0xff] }
 0x592   : > { %v5795_v51 = vpack.c.bf16 %v5768_v20, %v5767_v24  ;;  %v5300_v39 = vld [vmem:[#allocation2 + $0x7a] sm:$0xff] }
 0x593   : > { %v5534_v8 = vld [vmem:[#allocation2 + $0x7b] sm:$0xff]  ;;  %v5327_v20 = vpack.c.bf16 %v5300_v39, %v5299_v0 }
 0x594   : > { %v5181_v13 = vpop.f32.mrf.mxu0  ;;  %v5301_v39 = vld [vmem:[#allocation2 + $0x82] sm:$0xff] }
 0x595   : > { %v10766_v5 = vadd.f32 %v5181_v13, %v10574_v3  ;;  %v5770_v13 = vld [vmem:[#allocation2 + $0x8c] sm:$0xff] }
 0x596   : > { %v4763_v32 = vpop.f32.mrf.mxu2 }
 0x597   : > { %v4812_v38 = vadd.f32 %v4763_v32, %v4578_v53 }
 0x598   : > { %v4532_v62 = vpop.f32.mrf.mxu1 }
 0x599   : > { %v5002_v17 = vpop.f32.mrf.mxu3  ;;  %v4579_v42 = vadd.f32 %v4532_v62, %v10675_v58  ;;  %v10769_v55 = vadd.f32 %v4997_v29, %v4812_v38  ;;  %v5561_v62 = vpack.c.bf16 %v5534_v8, %v5533_v37  ;;  %v5535_v8 = vld [vmem:[#allocation2 + $0x83] sm:$0xff] }
 0x59a   : > { %v5080_v37 = vld [vmem:[#allocation2 + $0xe9] sm:$0xff] }
 0x59b   : > { %5427 = vmatmul.bf16.gmra.mxu1 %v5326_v33  ;;  %5661 = vmatmul.bf16.gmra.mxu2 %v5560_v6 }
 0x59c   : > { %v5184_v3 = vpop.f32.mrf.mxu0 }
 0x59d   : > { %v10772_v30 = vadd.f32 %v5184_v3, %v10580_v26 }
 0x59e   : > { %5900 = vmatmul.bf16.gmra.mxu3 %v5795_v51  ;;  %v4766_v19 = vpop.f32.mrf.mxu2 }
 0x59f   : > { %v4813_v54 = vadd.f32 %v4766_v19, %v4579_v42  ;;  %5223 = vmatmul.bf16.gmra.mxu0 %v5098_v63  ;;  %v5077_v42 = vld [vmem:[#allocation2 + $0xd1] sm:$0xff] }
 0x5a0   : > { %v4534_v58 = vpop.f32.mrf.mxu1  ;;  %v5099_v6 = vpack.c.bf16 %v5078_v27, %v5077_v42 }
 0x5a1   : > { %v5005_v57 = vpop.f32.mrf.mxu3  ;;  %v4580_v43 = vadd.f32 %v4534_v58, %v10693_v15  ;;  %v10775_v29 = vadd.f32 %v5000_v4, %v4813_v54  ;;  %v5769_v15 = vld [vmem:[#allocation2 + $0x84] sm:$0xff] }
 0x5a2   : > { %v5796_v28 = vpack.c.bf16 %v5770_v13, %v5769_v15  ;;  %v5302_v54 = vld [vmem:[#allocation2 + $0x8a] sm:$0xff] }
 0x5a3   : > { %v5536_v58 = vld [vmem:[#allocation2 + $0x8b] sm:$0xff]  ;;  %v5328_v13 = vpack.c.bf16 %v5302_v54, %v5301_v39 }
 0x5a4   : > { %v5186_v22 = vpop.f32.mrf.mxu0  ;;  %v5303_v54 = vld [vmem:[#allocation2 + $0x92] sm:$0xff] }
 0x5a5   : > { %v10778_v11 = vadd.f32 %v5186_v22, %v10586_v49  ;;  %v5772_v22 = vld [vmem:[#allocation2 + $0x9c] sm:$0xff] }
 0x5a6   : > { %v4768_v61 = vpop.f32.mrf.mxu2 }
 0x5a7   : > { %v4814_v53 = vadd.f32 %v4768_v61, %v4580_v43 }
 0x5a8   : > { %v4537_v32 = vpop.f32.mrf.mxu1 }
 0x5a9   : > { %v5007_v26 = vpop.f32.mrf.mxu3  ;;  %v4581_v38 = vadd.f32 %v4537_v32, %v10712_v44  ;;  %v10781_v4 = vadd.f32 %v5002_v17, %v4814_v53  ;;  %v5562_v32 = vpack.c.bf16 %v5536_v58, %v5535_v8  ;;  %v5537_v58 = vld [vmem:[#allocation2 + $0x93] sm:$0xff] }
 0x5aa   : > { %v5081_v8 = vld [vmem:[#allocation2 + $0xf1] sm:$0xff] }
 0x5ab   : > { %5432 = vmatmul.bf16.gmra.mxu1 %v5327_v20  ;;  %5666 = vmatmul.bf16.gmra.mxu2 %v5561_v62 }
 0x5ac   : > { %v5189_v49 = vpop.f32.mrf.mxu0 }
 0x5ad   : > { %v10784_v33 = vadd.f32 %v5189_v49, %v10592_v60 }
 0x5ae   : > { %5905 = vmatmul.bf16.gmra.mxu3 %v5796_v28  ;;  %v4771_v24 = vpop.f32.mrf.mxu2 }
 0x5af   : > { %v4815_v51 = vadd.f32 %v4771_v24, %v4581_v38  ;;  %5228 = vmatmul.bf16.gmra.mxu0 %v5099_v6  ;;  %v5079_v38 = vld [vmem:[#allocation2 + $0xe1] sm:$0xff] }
 0x5b0   : > { %v4539_v44 = vpop.f32.mrf.mxu1  ;;  %v5100_v62 = vpack.c.bf16 %v5080_v37, %v5079_v38 }
 0x5b1   : > { %v5010_v1 = vpop.f32.mrf.mxu3  ;;  %v4582_v3 = vadd.f32 %v4539_v44, %v10718_v31  ;;  %v10787_v17 = vadd.f32 %v5005_v57, %v4815_v51  ;;  %v5771_v31 = vld [vmem:[#allocation2 + $0x94] sm:$0xff] }
 0x5b2   : > { %v5797_v0 = vpack.c.bf16 %v5772_v22, %v5771_v31  ;;  %v5304_v51 = vld [vmem:[#allocation2 + $0x9a] sm:$0xff] }
 0x5b3   : > { %v5538_v44 = vld [vmem:[#allocation2 + $0x9b] sm:$0xff]  ;;  %v5329_v22 = vpack.c.bf16 %v5304_v51, %v5303_v54 }
 0x5b4   : > { %v5191_v2 = vpop.f32.mrf.mxu0  ;;  %v5776_v51 = vld [vmem:[#allocation2 + $0xbc] sm:$0xff] }
 0x5b5   : > { %v10790_v63 = vadd.f32 %v5191_v2, %v10598_v14  ;;  %v5774_v2 = vld [vmem:[#allocation2 + $0xac] sm:$0xff] }
 0x5b6   : > { %v4773_v19 = vpop.f32.mrf.mxu2 }
 0x5b7   : > { %v4816_v43 = vadd.f32 %v4773_v19, %v4582_v3 }
 0x5b8   : > { %v4542_v61 = vpop.f32.mrf.mxu1 }
 0x5b9   : > { %v5012_v60 = vpop.f32.mrf.mxu3  ;;  %v4583_v53 = vadd.f32 %v4542_v61, %v10724_v35  ;;  %v10793_v57 = vadd.f32 %v5007_v26, %v4816_v43  ;;  %v5563_v61 = vpack.c.bf16 %v5538_v44, %v5537_v58  ;;  %v5775_v58 = vld [vmem:[#allocation2 + $0xb4] sm:$0xff] }
 0x5bb   : > { %5437 = vmatmul.bf16.gmra.mxu1 %v5328_v13  ;;  %5671 = vmatmul.bf16.gmra.mxu2 %v5562_v32 }
 0x5bc   : > { %v5194_v14 = vpop.f32.mrf.mxu0 }
 0x5bd   : > { %v10796_v20 = vadd.f32 %v5194_v14, %v10610_v34 }
 0x5be   : > { %5910 = vmatmul.bf16.gmra.mxu3 %v5797_v0  ;;  %v4776_v15 = vpop.f32.mrf.mxu2 }
 0x5bf   : > { %v4817_v28 = vadd.f32 %v4776_v15, %v4583_v53  ;;  %5233 = vmatmul.bf16.gmra.mxu0 %v5100_v62 }
 0x5c0   : > { %v4544_v35 = vpop.f32.mrf.mxu1 }
 0x5c1   : > { %v5015_v27 = vpop.f32.mrf.mxu3  ;;  %v4584_v49 = vadd.f32 %v4544_v35, %v10730_v9  ;;  %v10799_v26 = vadd.f32 %v5010_v1, %v4817_v28  ;;  %v5773_v9 = vld [vmem:[#allocation2 + $0xa4] sm:$0xff] }
 0x5c2   : > { %v5798_v39 = vpack.c.bf16 %v5774_v2, %v5773_v9  ;;  %v5306_v35 = vld [vmem:[#allocation2 + $0xaa] sm:$0xff] }
 0x5c3   : > { %v5084_v2 = vld [vmem:[#allocation2 + $0x109] sm:$0xff] }
 0x5c4   : > { %v5196_v42 = vpop.f32.mrf.mxu0 }
 0x5c5   : > { %v10802_v6 = vadd.f32 %v5196_v42, %v10622_v47  ;;  %v5082_v47 = vld [vmem:[#allocation2 + $0xf9] sm:$0xff] }
 0x5c6   : > { %v4778_v24 = vpop.f32.mrf.mxu2  ;;  %v5101_v32 = vpack.c.bf16 %v5082_v47, %v5081_v8 }
 0x5c7   : > { %v4818_v3 = vadd.f32 %v4778_v24, %v4584_v49  ;;  %v5540_v49 = vld [vmem:[#allocation2 + $0xab] sm:$0xff]  ;;  %v5305_v24 = vld [vmem:[#allocation2 + $0xa2] sm:$0xff] }
 0x5c8   : > { %v4547_v19 = vpop.f32.mrf.mxu1 }
 0x5c9   : > { %v5017_v34 = vpop.f32.mrf.mxu3  ;;  %v4585_v43 = vadd.f32 %v4547_v19, %v10736_v10  ;;  %v10805_v1 = vadd.f32 %v5012_v60, %v4818_v3  ;;  %v9092_v60 = vld [vmem:[%s11608_s2 + $0x538] sm:$0xff]  ;;  %v5083_v3 = vld [vmem:[#allocation2 + $0x101] sm:$0xff] }
 0x5ca   : > { %6106 = vmatpush.bf16.msra.mxu0 %v9092_v60  ;;  %v5102_v9 = vpack.c.bf16 %v5084_v2, %v5083_v3  ;;  %v9087_v60 = vld [vmem:[%s11608_s2 + $0x510] sm:$0xff]  ;;  %v5777_v2 = vld [vmem:[#allocation2 + $0xc4] sm:$0xff] }
 0x5cb   : > { %5442 = vmatmul.bf16.gmra.mxu1 %v5329_v22  ;;  %5676 = vmatmul.bf16.gmra.mxu2 %v5563_v61  ;;  %v5799_v61 = vpack.c.bf16 %v5776_v51, %v5775_v58  ;;  %v5541_v51 = vld [vmem:[#allocation2 + $0xb3] sm:$0xff] }
 0x5cc   : > { %v5199_v53 = vpop.f32.mrf.mxu0 }
 0x5cd   : > { %v10808_v13 = vadd.f32 %v5199_v53, %v10647_v45  ;;  %v9091_v45 = vld [vmem:[%s11608_s2 + $0x530] sm:$0xff] }
 0x5ce   : > { %5915 = vmatmul.bf16.gmra.mxu3 %v5798_v39  ;;  %v4781_v31 = vpop.f32.mrf.mxu2  ;;  %6107 = vmatpush.bf16.msra.mxu0 %v9091_v45  ;;  %v5308_v45 = vld [vmem:[#allocation2 + $0xba] sm:$0xff] }
 0x5cf   : > { %v4819_v0 = vadd.f32 %v4781_v31, %v4585_v43  ;;  %5238 = vmatmul.bf16.gmra.mxu0 %v5101_v32  ;;  %v9090_v43 = vld [vmem:[%s11608_s2 + $0x528] sm:$0xff] }
 0x5d0   : > { %v4549_v10 = vpop.f32.mrf.mxu1 }
 0x5d1   : > { %v5020_v37 = vpop.f32.mrf.mxu3  ;;  %v4586_v14 = vadd.f32 %v4549_v10, %v10742_v52  ;;  %v10814_v38 = vadd.f32 %v5015_v27, %v4819_v0  ;;  %v5539_v27 = vld [vmem:[#allocation2 + $0xa3] sm:$0xff]  ;;  %v9088_v0 = vld [vmem:[%s11608_s2 + $0x518] sm:$0xff] }
 0x5d2   : > { %v5564_v54 = vpack.c.bf16 %v5540_v49, %v5539_v27  ;;  %6108 = vmatpush.bf16.msra.mxu0 %v9090_v43  ;;  %v5307_v49 = vld [vmem:[#allocation2 + $0xb2] sm:$0xff] }
 0x5d4   : > { %v5201_v62 = vpop.f32.mrf.mxu0 }
 0x5d5   : > { %v10817_v15 = vadd.f32 %v5201_v62, %v10671_v12  ;;  %v5330_v12 = vpack.c.bf16 %v5306_v35, %v5305_v24 }
 0x5d6   : > { %v4783_v28 = vpop.f32.mrf.mxu2 }
 0x5d7   : > { %v4820_v42 = vadd.f32 %v4783_v28, %v4586_v14  ;;  %v5542_v28 = vld [vmem:[#allocation2 + $0xbb] sm:$0xff] }
 0x5d8   : > { %v4552_v44 = vpop.f32.mrf.mxu1  ;;  %v5565_v3 = vpack.c.bf16 %v5542_v28, %v5541_v51  ;;  %v5780_v28 = vld [vmem:[#allocation2 + $0xdc] sm:$0xff] }
 0x5d9   : > { %v5022_v52 = vpop.f32.mrf.mxu3  ;;  %v4587_v19 = vadd.f32 %v4552_v44, %v10748_v59  ;;  %v10826_v22 = vadd.f32 %v5017_v34, %v4820_v42  ;;  %v9089_v59 = vld [vmem:[%s11608_s2 + $0x520] sm:$0xff]  ;;  %v5778_v42 = vld [vmem:[#allocation2 + $0xcc] sm:$0xff] }
 0x5da   : > { %6109 = vmatpush.bf16.msra.mxu0 %v9089_v59  ;;  %v5086_v44 = vld [vmem:[#allocation2 + $0x119] sm:$0xff] }
 0x5db   : > { %5447 = vmatmul.bf16.gmra.mxu1 %v5330_v12  ;;  %5681 = vmatmul.bf16.gmra.mxu2 %v5564_v54  ;;  %v5800_v54 = vpack.c.bf16 %v5778_v42, %v5777_v2  ;;  %v5087_v42 = vld [vmem:[#allocation2 + $0x121] sm:$0xff] }
 0x5dc   : > { %v5204_v39 = vpop.f32.mrf.mxu0 }
 0x5dd   : > { %v10829_v8 = vadd.f32 %v5204_v39, %v10690_v48 }
 0x5de   : > { %5920 = vmatmul.bf16.gmra.mxu3 %v5799_v61  ;;  %v4786_v47 = vpop.f32.mrf.mxu2  ;;  %6110 = vmatpush.bf16.msra.mxu0 %v9088_v0  ;;  %v5310_v0 = vld [vmem:[#allocation2 + $0xca] sm:$0xff] }
 0x5df   : > { %v4821_v53 = vadd.f32 %v4786_v47, %v4587_v19  ;;  %5243 = vmatmul.bf16.gmra.mxu0 %v5102_v9  ;;  %v9086_v19 = vld [vmem:[%s11608_s2 + $0x508] sm:$0xff] }
 0x5e0   : > { %v4554_v34 = vpop.f32.mrf.mxu1 }
 0x5e1   : > { %v5881_v32 = vpop.f32.mrf.mxu3  ;;  %v4588_v31 = vadd.f32 %v4554_v34, %v10754_v40  ;;  %v10838_v10 = vadd.f32 %v5020_v37, %v4821_v53  ;;  %v5085_v37 = vld [vmem:[#allocation2 + $0x111] sm:$0xff] }
 0x5e2   : > { %6111 = vmatpush.bf16.msra.mxu0 %v9087_v60  ;;  %v5103_v58 = vpack.c.bf16 %v5086_v44, %v5085_v37  ;;  %v5779_v37 = vld [vmem:[#allocation2 + $0xd4] sm:$0xff] }
 0x5e4   : > { %v5206_v48 = vpop.f32.mrf.mxu0 }
 0x5e5   : > { %v10841_v14 = vadd.f32 %v5206_v48, %v10708_v56  ;;  %v5331_v56 = vpack.c.bf16 %v5308_v45, %v5307_v49  ;;  %v5544_v48 = vld [vmem:[#allocation2 + $0xcb] sm:$0xff]  ;;  %v5309_v45 = vld [vmem:[#allocation2 + $0xc2] sm:$0xff] }
 0x5e6   : > { %v4788_v62 = vpop.f32.mrf.mxu2  ;;  %6112 = vmatpush.bf16.msra.mxu0 %v9086_v19  ;;  %v5543_v49 = vld [vmem:[#allocation2 + $0xc3] sm:$0xff] }
 0x5e7   : > { %v4822_v35 = vadd.f32 %v4788_v62, %v4588_v31 }
 0x5e8   : > { %v5413_v24 = vpop.f32.mrf.mxu1 }
 0x5e9   : > { %v5883_v40 = vpop.f32.mrf.mxu3  ;;  %v5493_v27 = vadd.f32 %v5413_v24, %v10760_v7  ;;  %v10850_v12 = vadd.f32 %v5022_v52, %v4822_v35  ;;  %v9085_v7 = vld [vmem:[%s11608_s2 + $0x500] sm:$0xff]  ;;  %v5088_v24 = vld [vmem:[#allocation2 + $0x129] sm:$0xff] }
 0x5ea   : > { %6113 = vmatpush.bf16.msra.mxu0 %v9085_v7 }
 0x5eb   : > { %5452 = vmatmul.bf16.gmra.mxu1 %v5331_v56  ;;  %5686 = vmatmul.bf16.gmra.mxu2 %v5565_v3 }
 0x5ec   : > { %v5209_v43 = vpop.f32.mrf.mxu0 }
 0x5ed   : > { %v10853_v61 = vadd.f32 %v5209_v43, %v10715_v36 }
 0x5ee   : > { %5925 = vmatmul.bf16.gmra.mxu3 %v5800_v54  ;;  %v5647_v9 = vpop.f32.mrf.mxu2 }
 0x5ef   : > { %v5727_v39 = vadd.f32 %v5647_v9, %v5493_v27  ;;  %5248 = vmatmul.bf16.gmra.mxu0 %v5103_v58  ;;  %v5104_v27 = vpack.c.bf16 %v5088_v24, %v5087_v42  ;;  %v5993_v42 = vld [vmem:[#allocation2 + $0x40] sm:$0xff] }
 0x5f0   : > { %v5415_v52 = vpop.f32.mrf.mxu1 }
 0x5f1   : > { %v5886_v59 = vpop.f32.mrf.mxu3  ;;  %v5494_v47 = vadd.f32 %v5415_v52, %v10766_v5  ;;  %v10859_v53 = vadd.f32 %v5881_v32, %v5727_v39  ;;  %v5332_v5 = vpack.c.bf16 %v5310_v0, %v5309_v45  ;;  %v5566_v32 = vpack.c.bf16 %v5544_v48, %v5543_v49  ;;  %v5312_v39 = vld [vmem:[#allocation2 + $0xda] sm:$0xff]  ;;  %v5311_v0 = vld [vmem:[#allocation2 + $0xd2] sm:$0xff]  ;;  %v5994_v49 = vld [vmem:[#allocation2 + $0x48] sm:$0xff] }
 0x5f2   : > { %v5546_v52 = vld [vmem:[#allocation2 + $0xdb] sm:$0xff]  ;;  %v5545_v48 = vld [vmem:[#allocation2 + $0xd3] sm:$0xff]  ;;  %v5333_v45 = vpack.c.bf16 %v5312_v39, %v5311_v0 }
 0x5f4   : > { %v5211_v34 = vpop.f32.mrf.mxu0 }
 0x5f5   : > { %v10862_v31 = vadd.f32 %v5211_v34, %v10721_v21  ;;  %v5801_v21 = vpack.c.bf16 %v5780_v28, %v5779_v37  ;;  %v5567_v28 = vpack.c.bf16 %v5546_v52, %v5545_v48  ;;  %v5313_v52 = vld [vmem:[#allocation2 + $0xe2] sm:$0xff]  ;;  %v5996_v48 = vld [vmem:[#allocation2 + $0x58] sm:$0xff] }
 0x5f6   : > { %v5649_v36 = vpop.f32.mrf.mxu2 }
 0x5f7   : > { %v5728_v60 = vadd.f32 %v5649_v36, %v5494_v47 }
 0x5f8   : > { %v5418_v35 = vpop.f32.mrf.mxu1 }
 0x5f9   : > { %v5888_v62 = vpop.f32.mrf.mxu3  ;;  %v5495_v51 = vadd.f32 %v5418_v35, %v10772_v30  ;;  %v10865_v44 = vadd.f32 %v5883_v40, %v5728_v60 }
 0x5fb   : > { %5457 = vmatmul.bf16.gmra.mxu1 %v5332_v5  ;;  %5691 = vmatmul.bf16.gmra.mxu2 %v5566_v32 }
 0x5fc   : > { %v5214_v56 = vpop.f32.mrf.mxu0 }
 0x5fd   : > { %v10868_v3 = vadd.f32 %v5214_v56, %v10727_v23  ;;  %v5782_v23 = vld [vmem:[#allocation2 + $0xec] sm:$0xff] }
 0x5fe   : > { %5930 = vmatmul.bf16.gmra.mxu3 %v5801_v21  ;;  %v5652_v2 = vpop.f32.mrf.mxu2 }
 0x5ff   : > { %v5729_v19 = vadd.f32 %v5652_v2, %v5495_v51  ;;  %5253 = vmatmul.bf16.gmra.mxu0 %v5104_v27  ;;  %v6025_v51 = vpack.c.bf16 %v5994_v49, %v5993_v42  ;;  %v9115_v42 = vld [vmem:[%s11608_s2 + $0x5f0] sm:$0xff] }
 0x600   : > { %v5420_v58 = vpop.f32.mrf.mxu1 }
 0x601   : > { %v5891_v54 = vpop.f32.mrf.mxu3  ;;  %v5496_v30 = vadd.f32 %v5420_v58, %v10778_v11  ;;  %v10871_v43 = vadd.f32 %v5886_v59, %v5729_v19  ;;  %v5781_v11 = vld [vmem:[#allocation2 + $0xe4] sm:$0xff] }
 0x602   : > { %v5802_v35 = vpack.c.bf16 %v5782_v23, %v5781_v11  ;;  %v5314_v19 = vld [vmem:[#allocation2 + $0xea] sm:$0xff]  ;;  %v9116_v11 = vld [vmem:[%s11608_s2 + $0x5f8] sm:$0xff] }
 0x603   : > { %v5548_v58 = vld [vmem:[#allocation2 + $0xeb] sm:$0xff]  ;;  %6808 = vmatpush.bf16.msrb.mxu3 %v9116_v11 }
 0x604   : > { %v5216_v40 = vpop.f32.mrf.mxu0 }
 0x605   : > { %v10874_v7 = vadd.f32 %v5216_v40, %v10733_v41  ;;  %v5783_v40 = vld [vmem:[#allocation2 + $0xf4] sm:$0xff] }
 0x606   : > { %v5654_v9 = vpop.f32.mrf.mxu2 }
 0x607   : > { %v5730_v47 = vadd.f32 %v5654_v9, %v5496_v30  ;;  %v5784_v9 = vld [vmem:[#allocation2 + $0xfc] sm:$0xff]  ;;  %6809 = vmatpush.bf16.msrb.mxu3 %v9115_v42  ;;  %v9111_v42 = vld [vmem:[%s11608_s2 + $0x5d0] sm:$0xff] }
 0x608   : > { %v5423_v36 = vpop.f32.mrf.mxu1  ;;  %v5803_v0 = vpack.c.bf16 %v5784_v9, %v5783_v40 }
 0x609   : > { %v5893_v34 = vpop.f32.mrf.mxu3  ;;  %v5497_v60 = vadd.f32 %v5423_v36, %v10784_v33  ;;  %v10877_v59 = vadd.f32 %v5888_v62, %v5730_v47  ;;  %v5547_v47 = vld [vmem:[#allocation2 + $0xe3] sm:$0xff]  ;;  %v5334_v36 = vpack.c.bf16 %v5314_v19, %v5313_v52  ;;  %v5549_v19 = vld [vmem:[#allocation2 + $0xf3] sm:$0xff] }
 0x60b   : > { %5462 = vmatmul.bf16.gmra.mxu1 %v5333_v45  ;;  %5696 = vmatmul.bf16.gmra.mxu2 %v5567_v28 }
 0x60c   : > { %v5219_v41 = vpop.f32.mrf.mxu0 }
 0x60d   : > { %v10880_v24 = vadd.f32 %v5219_v41, %v10739_v18 }
 0x60e   : > { %5935 = vmatmul.bf16.gmra.mxu3 %v5802_v35  ;;  %v5657_v5 = vpop.f32.mrf.mxu2 }
 0x60f   : > { %v5731_v32 = vadd.f32 %v5657_v5, %v5497_v60  ;;  %6114 = vmatmul.bf16.vlgmr.msra.gmra.mxu0 %v6025_v51  ;;  %v5995_v60 = vld [vmem:[#allocation2 + $0x50] sm:$0xff] }
 0x610   : > { %v5425_v33 = vpop.f32.mrf.mxu1  ;;  %v6026_v28 = vpack.c.bf16 %v5996_v48, %v5995_v60  ;;  %v5315_v5 = vld [vmem:[#allocation2 + $0xf2] sm:$0xff] }
 0x611   : > { %v5896_v37 = vpop.f32.mrf.mxu3  ;;  %v5498_v21 = vadd.f32 %v5425_v33, %v10790_v63  ;;  %v10883_v62 = vadd.f32 %v5891_v54, %v5731_v32  ;;  %v5568_v63 = vpack.c.bf16 %v5548_v58, %v5547_v47  ;;  %v5785_v33 = vld [vmem:[#allocation2 + $0x104] sm:$0xff]  ;;  %v5550_v58 = vld [vmem:[#allocation2 + $0xfb] sm:$0xff] }
 0x612   : > { %v9113_v47 = vld [vmem:[%s11608_s2 + $0x5e0] sm:$0xff]  ;;  %v9112_v60 = vld [vmem:[%s11608_s2 + $0x5d8] sm:$0xff] }
 0x614   : > { %v5221_v27 = vpop.f32.mrf.mxu0 }
 0x615   : > { %v10886_v56 = vadd.f32 %v5221_v27, %v10745_v46  ;;  %v9114_v27 = vld [vmem:[%s11608_s2 + $0x5e8] sm:$0xff] }
 0x616   : > { %v5659_v2 = vpop.f32.mrf.mxu2  ;;  %6810 = vmatpush.bf16.msrb.mxu3 %v9114_v27  ;;  %v5552_v27 = vld [vmem:[#allocation2 + $0x10b] sm:$0xff] }
 0x617   : > { %v5732_v30 = vadd.f32 %v5659_v2, %v5498_v21  ;;  %v5786_v21 = vld [vmem:[#allocation2 + $0x10c] sm:$0xff] }
 0x618   : > { %v5428_v39 = vpop.f32.mrf.mxu1  ;;  %v5804_v9 = vpack.c.bf16 %v5786_v21, %v5785_v33  ;;  %v5318_v33 = vld [vmem:[#allocation2 + $0x10a] sm:$0xff] }
 0x619   : > { %v5898_v18 = vpop.f32.mrf.mxu3  ;;  %v5499_v23 = vadd.f32 %v5428_v39, %v10796_v20  ;;  %v10889_v54 = vadd.f32 %v5893_v34, %v5732_v30  ;;  %v5551_v21 = vld [vmem:[#allocation2 + $0x103] sm:$0xff] }
 0x61a   : > { %6811 = vmatpush.bf16.msrb.mxu3 %v9113_v47 }
 0x61b   : > { %5467 = vmatmul.bf16.gmra.mxu1 %v5334_v36  ;;  %5701 = vmatmul.bf16.gmra.mxu2 %v5568_v63  ;;  %v5998_v36 = vld [vmem:[#allocation2 + $0x68] sm:$0xff] }
 0x61c   : > { %v5224_v46 = vpop.f32.mrf.mxu0 }
 0x61d   : > { %v10892_v45 = vadd.f32 %v5224_v46, %v10751_v50 }
 0x61e   : > { %5940 = vmatmul.bf16.gmra.mxu3 %v5803_v0  ;;  %v5662_v20 = vpop.f32.mrf.mxu2  ;;  %v5997_v0 = vld [vmem:[#allocation2 + $0x60] sm:$0xff] }
 0x61f   : > { %v5733_v35 = vadd.f32 %v5662_v20, %v5499_v23  ;;  %6119 = vmatmul.bf16.gmra.mxu0 %v6026_v28  ;;  %v6027_v46 = vpack.c.bf16 %v5998_v36, %v5997_v0  ;;  %6812 = vmatpush.bf16.msrb.mxu3 %v9112_v60  ;;  %v9105_v0 = vld [vmem:[%s11608_s2 + $0x5a0] sm:$0xff]  ;;  %v5999_v60 = vld [vmem:[#allocation2 + $0x70] sm:$0xff] }
 0x620   : > { %v5430_v34 = vpop.f32.mrf.mxu1 }
 0x621   : > { %v5901_v49 = vpop.f32.mrf.mxu3  ;;  %v5500_v41 = vadd.f32 %v5430_v34, %v10802_v6  ;;  %v10901_v51 = vadd.f32 %v5896_v37, %v5733_v35  ;;  %v5316_v6 = vld [vmem:[#allocation2 + $0xfa] sm:$0xff]  ;;  %v9099_v34 = vld [vmem:[%s11608_s2 + $0x570] sm:$0xff] }
 0x622   : > { %v5335_v52 = vpack.c.bf16 %v5316_v6, %v5315_v5  ;;  %v5317_v5 = vld [vmem:[#allocation2 + $0x102] sm:$0xff] }
 0x623   : > { %v5788_v6 = vld [vmem:[#allocation2 + $0x11c] sm:$0xff]  ;;  %6813 = vmatpush.bf16.msrb.mxu3 %v9111_v42 }
 0x624   : > { %v5226_v50 = vpop.f32.mrf.mxu0 }
 0x625   : > { %v10904_v32 = vadd.f32 %v5226_v50, %v10757_v16  ;;  %v5569_v16 = vpack.c.bf16 %v5550_v58, %v5549_v19  ;;  %v9098_v58 = vld [vmem:[%s11608_s2 + $0x568] sm:$0xff] }
 0x626   : > { %v5664_v2 = vpop.f32.mrf.mxu2 }
 0x627   : > { %v5734_v30 = vadd.f32 %v5664_v2, %v5500_v41  ;;  %v9107_v41 = vld [vmem:[%s11608_s2 + $0x5b0] sm:$0xff] }
 0x628   : > { %v5433_v37 = vpop.f32.mrf.mxu1  ;;  %v5787_v2 = vld [vmem:[#allocation2 + $0x114] sm:$0xff] }
 0x629   : > { %v5903_v40 = vpop.f32.mrf.mxu3  ;;  %v5501_v39 = vadd.f32 %v5433_v37, %v10808_v13  ;;  %v10913_v23 = vadd.f32 %v5898_v18, %v5734_v30  ;;  %v9100_v13 = vld [vmem:[%s11608_s2 + $0x578] sm:$0xff]  ;;  %v9110_v30 = vld [vmem:[%s11608_s2 + $0x5c8] sm:$0xff]  ;;  %v5805_v47 = vpack.c.bf16 %v5788_v6, %v5787_v2 }
 0x62a   : > { %v9108_v18 = vld [vmem:[%s11608_s2 + $0x5b8] sm:$0xff]  ;;  %6340 = vmatpush.bf16.msrb.mxu1 %v9100_v13  ;;  %6814 = vmatpush.bf16.msrb.mxu3 %v9110_v30  ;;  %v5790_v30 = vld [vmem:[#allocation2 + $0x12c] sm:$0xff] }
 0x62b   : > { %5472 = vmatmul.bf16.gmra.mxu1 %v5335_v52  ;;  %5706 = vmatmul.bf16.gmra.mxu2 %v5569_v16  ;;  %v5336_v52 = vpack.c.bf16 %v5318_v33, %v5317_v5  ;;  %v5570_v16 = vpack.c.bf16 %v5552_v27, %v5551_v21  ;;  %v9095_v5 = vld [vmem:[%s11608_s2 + $0x550] sm:$0xff]  ;;  %v5320_v27 = vld [vmem:[#allocation2 + $0x11a] sm:$0xff] }
 0x62c   : > { %v5229_v63 = vpop.f32.mrf.mxu0  ;;  %6574 = vmatpush.bf16.msrb.mxu2 %v9108_v18  ;;  %v6000_v18 = vld [vmem:[#allocation2 + $0x78] sm:$0xff]  ;;  %v9103_v33 = vld [vmem:[%s11608_s2 + $0x590] sm:$0xff] }
 0x62d   : > { %v10916_v48 = vadd.f32 %v5229_v63, %v10763_v25  ;;  %v9097_v63 = vld [vmem:[%s11608_s2 + $0x560] sm:$0xff]  ;;  %v5553_v6 = vld [vmem:[#allocation2 + $0x113] sm:$0xff] }
 0x62e   : > { %5945 = vmatmul.bf16.gmra.mxu3 %v5804_v9  ;;  %v5667_v28 = vpop.f32.mrf.mxu2  ;;  %6341 = vmatpush.bf16.msrb.mxu1 %v9099_v34 }
 0x62f   : > { %v5735_v11 = vadd.f32 %v5667_v28, %v5501_v39  ;;  %6124 = vmatmul.bf16.gmra.mxu0 %v6027_v46  ;;  %v9109_v46 = vld [vmem:[%s11608_s2 + $0x5c0] sm:$0xff] }
 0x630   : > { %v5435_v25 = vpop.f32.mrf.mxu1  ;;  %6575 = vmatpush.bf16.msrb.mxu2 %v9107_v41  ;;  %6815 = vmatpush.bf16.msrb.mxu3 %v9109_v46  ;;  %v9101_v46 = vld [vmem:[%s11608_s2 + $0x580] sm:$0xff] }
 0x631   : > { %v10927_v20 = vpop.f32.mrf.mxu3  ;;  %v5502_v35 = vadd.f32 %v5435_v25, %v10817_v15  ;;  %v10939_v50 = vadd.f32 %v5901_v49, %v5735_v11  ;;  %v9106_v49 = vld [vmem:[%s11608_s2 + $0x5a8] sm:$0xff]  ;;  %v6028_v11 = vpack.c.bf16 %v6000_v18, %v5999_v60  ;;  %v9096_v25 = vld [vmem:[%s11608_s2 + $0x558] sm:$0xff] }
 0x632   : > { %6342 = vmatpush.bf16.msrb.mxu1 %v9098_v58  ;;  %v5554_v58 = vld [vmem:[#allocation2 + $0x11b] sm:$0xff] }
 0x634   : > { %v5231_v15 = vpop.f32.mrf.mxu0  ;;  %6576 = vmatpush.bf16.msrb.mxu2 %v9106_v49  ;;  %v5789_v49 = vld [vmem:[#allocation2 + $0x124] sm:$0xff] }
 0x635   : > { %v10942_v19 = vadd.f32 %v5231_v15, %v10769_v55  ;;  %v5319_v15 = vld [vmem:[#allocation2 + $0x112] sm:$0xff] }
 0x636   : > { %v5669_v37 = vpop.f32.mrf.mxu2  ;;  %6343 = vmatpush.bf16.msrb.mxu1 %v9097_v63  ;;  %v5806_v63 = vpack.c.bf16 %v5790_v30, %v5789_v49 }
 0x637   : > { %v5736_v9 = vadd.f32 %v5669_v37, %v5502_v35  ;;  %v9094_v37 = vld [vmem:[%s11608_s2 + $0x548] sm:$0xff] }
 0x638   : > { %v5438_v55 = vpop.f32.mrf.mxu1  ;;  %6577 = vmatpush.bf16.msrb.mxu2 %v9105_v0  ;;  %v9093_v0 = vld [vmem:[%s11608_s2 + $0x540] sm:$0xff] }
 0x639   : > { %v5908_v39 = vpop.f32.mrf.mxu3  ;;  %v5503_v36 = vadd.f32 %v5438_v55, %v10829_v8  ;;  %v10963_v13 = vadd.f32 %v5903_v40, %v5736_v9  ;;  %v9104_v40 = vld [vmem:[%s11608_s2 + $0x598] sm:$0xff]  ;;  %v5337_v55 = vpack.c.bf16 %v5320_v27, %v5319_v15  ;;  %v5322_v15 = vld [vmem:[#allocation2 + $0x12a] sm:$0xff] }
 0x63a   : > { %6344 = vmatpush.bf16.msrb.mxu1 %v9096_v25  ;;  %v5555_v27 = vld [vmem:[#allocation2 + $0x123] sm:$0xff] }
 0x63b   : > { %5477 = vmatmul.bf16.gmra.mxu1 %v5336_v52  ;;  %5711 = vmatmul.bf16.gmra.mxu2 %v5570_v16 }
 0x63c   : > { %v5234_v8 = vpop.f32.mrf.mxu0  ;;  %6578 = vmatpush.bf16.msrb.mxu2 %v9104_v40 }
 0x63d   : > { %v10966_v28 = vadd.f32 %v5234_v8, %v10775_v29  ;;  %v6002_v8 = vld [vmem:[#allocation2 + $0x88] sm:$0xff] }
 0x63e   : > { %5950 = vmatmul.bf16.gmra.mxu3 %v5805_v47  ;;  %v5672_v35 = vpop.f32.mrf.mxu2  ;;  %6345 = vmatpush.bf16.msrb.mxu1 %v9095_v5  ;;  %v5571_v47 = vpack.c.bf16 %v5554_v58, %v5553_v6  ;;  %v5321_v5 = vld [vmem:[#allocation2 + $0x122] sm:$0xff] }
 0x63f   : > { %v5737_v34 = vadd.f32 %v5672_v35, %v5503_v36  ;;  %6129 = vmatmul.bf16.gmra.mxu0 %v6028_v11  ;;  %v6001_v11 = vld [vmem:[#allocation2 + $0x80] sm:$0xff]  ;;  %v5338_v30 = vpack.c.bf16 %v5322_v15, %v5321_v5 }
 0x640   : > { %v5440_v42 = vpop.f32.mrf.mxu1  ;;  %6579 = vmatpush.bf16.msrb.mxu2 %v9103_v33  ;;  %v6029_v25 = vpack.c.bf16 %v6002_v8, %v6001_v11  ;;  %v6698_v5 = vld [vmem:[#allocation2 + $0x5b] sm:$0xff] }
 0x641   : > { %v5911_v41 = vpop.f32.mrf.mxu3  ;;  %v5504_v29 = vadd.f32 %v5440_v42, %v10841_v14  ;;  %v10982_v21 = vadd.f32 %v10927_v20, %v5737_v34  ;;  %v9102_v20 = vld [vmem:[%s11608_s2 + $0x588] sm:$0xff] }
 0x642   : > { %6346 = vmatpush.bf16.msrb.mxu1 %v9094_v37  ;;  %v6227_v15 = vld [vmem:[#allocation2 + $0x41] sm:$0xff] }
 0x644   : > { %v5236_v2 = vpop.f32.mrf.mxu0  ;;  %6580 = vmatpush.bf16.msrb.mxu2 %v9102_v20  ;;  %v6696_v20 = vld [vmem:[#allocation2 + $0x4b] sm:$0xff] }
 0x645   : > { %v10985_v14 = vadd.f32 %v5236_v2, %v10781_v4  ;;  %v5556_v2 = vld [vmem:[#allocation2 + $0x12b] sm:$0xff] }
 0x646   : > { %v5674_v9 = vpop.f32.mrf.mxu2  ;;  %6347 = vmatpush.bf16.msrb.mxu1 %v9093_v0  ;;  %v5572_v37 = vpack.c.bf16 %v5556_v2, %v5555_v27  ;;  %v6461_v27 = vld [vmem:[#allocation2 + $0x42] sm:$0xff] }
 0x647   : > { %v5738_v52 = vadd.f32 %v5674_v9, %v5504_v29 }
 0x648   : > { %v5443_v36 = vpop.f32.mrf.mxu1  ;;  %6581 = vmatpush.bf16.msrb.mxu2 %v9101_v46 }
 0x649   : > { %v5913_v16 = vpop.f32.mrf.mxu3  ;;  %v5505_v4 = vadd.f32 %v5443_v36, %v10853_v61  ;;  %v11000_v18 = vadd.f32 %v5908_v39, %v5738_v52 }
 0x64b   : > { %5482 = vmatmul.bf16.gmra.mxu1 %v5337_v55  ;;  %5716 = vmatmul.bf16.gmra.mxu2 %v5571_v47  ;;  %v6004_v47 = vld [vmem:[#allocation2 + $0x98] sm:$0xff] }
 0x64c   : > { %v5239_v60 = vpop.f32.mrf.mxu0 }
 0x64d   : > { %v11003_v61 = vadd.f32 %v5239_v60, %v10787_v17 }
 0x64e   : > { %5955 = vmatmul.bf16.gmra.mxu3 %v5806_v63  ;;  %v5677_v40 = vpop.f32.mrf.mxu2 }
 0x64f   : > { %v5739_v35 = vadd.f32 %v5677_v40, %v5505_v4  ;;  %6134 = vmatmul.bf16.gmra.mxu0 %v6029_v25 }
 0x650   : > { %v5445_v42 = vpop.f32.mrf.mxu1 }
 0x651   : > { %v5916_v34 = vpop.f32.mrf.mxu3  ;;  %v5506_v39 = vadd.f32 %v5445_v42, %v10862_v31  ;;  %v11006_v29 = vadd.f32 %v5911_v41, %v5739_v35  ;;  %v6695_v31 = vld [vmem:[#allocation2 + $0x43] sm:$0xff] }
 0x652   : > { %v6727_v55 = vpack.c.bf16 %v6696_v20, %v6695_v31  ;;  %v6228_v35 = vld [vmem:[#allocation2 + $0x49] sm:$0xff]  ;;  %v6005_v20 = vld [vmem:[#allocation2 + $0xa0] sm:$0xff] }
 0x653   : > { %v6462_v42 = vld [vmem:[#allocation2 + $0x4a] sm:$0xff] }
 0x654   : > { %v5241_v33 = vpop.f32.mrf.mxu0 }
 0x655   : > { %v11009_v6 = vadd.f32 %v5241_v33, %v10793_v57  ;;  %v6003_v57 = vld [vmem:[#allocation2 + $0x90] sm:$0xff] }
 0x656   : > { %v5679_v17 = vpop.f32.mrf.mxu2  ;;  %v6030_v4 = vpack.c.bf16 %v6004_v47, %v6003_v57 }
 0x657   : > { %v5740_v58 = vadd.f32 %v5679_v17, %v5506_v39  ;;  %v6259_v17 = vpack.c.bf16 %v6228_v35, %v6227_v15  ;;  %v6229_v35 = vld [vmem:[#allocation2 + $0x51] sm:$0xff] }
 0x658   : > { %v5448_v9 = vpop.f32.mrf.mxu1  ;;  %v6008_v15 = vld [vmem:[#allocation2 + $0xb8] sm:$0xff] }
 0x659   : > { %v5918_v49 = vpop.f32.mrf.mxu3  ;;  %v5507_v52 = vadd.f32 %v5448_v9, %v10868_v3  ;;  %v11012_v41 = vadd.f32 %v5913_v16, %v5740_v58  ;;  %v6493_v58 = vpack.c.bf16 %v6462_v42, %v6461_v27  ;;  %v6463_v42 = vld [vmem:[#allocation2 + $0x52] sm:$0xff] }
 0x65a   : > { %v6007_v27 = vld [vmem:[#allocation2 + $0xb0] sm:$0xff] }
 0x65b   : > { %5487 = vmatmul.bf16.gmra.mxu1 %v5338_v30  ;;  %5721 = vmatmul.bf16.gmra.mxu2 %v5572_v37  ;;  %v6006_v37 = vld [vmem:[#allocation2 + $0xa8] sm:$0xff] }
 0x65c   : > { %v5244_v36 = vpop.f32.mrf.mxu0 }
 0x65d   : > { %v11015_v63 = vadd.f32 %v5244_v36, %v10799_v26 }
 0x65e   : > { %6816 = vmatmul.bf16.vlgmr.msrb.gmra.mxu3 %v6727_v55  ;;  %v5682_v0 = vpop.f32.mrf.mxu2 }
 0x65f   : > { %v5741_v46 = vadd.f32 %v5682_v0, %v5507_v52  ;;  %6139 = vmatmul.bf16.gmra.mxu0 %v6030_v4  ;;  %v6031_v52 = vpack.c.bf16 %v6006_v37, %v6005_v20 }
 0x660   : > { %v5450_v60 = vpop.f32.mrf.mxu1 }
 0x661   : > { %v5921_v8 = vpop.f32.mrf.mxu3  ;;  %v5508_v3 = vadd.f32 %v5450_v60, %v10874_v7  ;;  %v11018_v16 = vadd.f32 %v5916_v34, %v5741_v46  ;;  %v6697_v7 = vld [vmem:[#allocation2 + $0x53] sm:$0xff] }
 0x662   : > { %v6728_v30 = vpack.c.bf16 %v6698_v5, %v6697_v7  ;;  %v6230_v46 = vld [vmem:[#allocation2 + $0x59] sm:$0xff] }
 0x663   : > { %v6464_v60 = vld [vmem:[#allocation2 + $0x5a] sm:$0xff]  ;;  %v6260_v5 = vpack.c.bf16 %v6230_v46, %v6229_v35 }
 0x664   : > { %v5246_v11 = vpop.f32.mrf.mxu0  ;;  %v6231_v46 = vld [vmem:[#allocation2 + $0x61] sm:$0xff] }
 0x665   : > { %v11021_v25 = vadd.f32 %v5246_v11, %v10805_v1  ;;  %v6700_v11 = vld [vmem:[#allocation2 + $0x6b] sm:$0xff] }
 0x666   : > { %v5684_v40 = vpop.f32.mrf.mxu2 }
 0x667   : > { %v5742_v39 = vadd.f32 %v5684_v40, %v5508_v3 }
 0x668   : > { %v5453_v33 = vpop.f32.mrf.mxu1 }
 0x669   : > { %v5923_v26 = vpop.f32.mrf.mxu3  ;;  %v5509_v2 = vadd.f32 %v5453_v33, %v10880_v24  ;;  %v11024_v34 = vadd.f32 %v5918_v49, %v5742_v39  ;;  %v6494_v33 = vpack.c.bf16 %v6464_v60, %v6463_v42  ;;  %v6465_v60 = vld [vmem:[#allocation2 + $0x62] sm:$0xff] }
 0x66a   : > { %v6010_v42 = vld [vmem:[#allocation2 + $0xc8] sm:$0xff] }
 0x66b   : > { %6348 = vmatmul.bf16.vlgmr.msrb.gmra.mxu1 %v6259_v17  ;;  %6582 = vmatmul.bf16.vlgmr.msrb.gmra.mxu2 %v6493_v58  ;;  %v6032_v17 = vpack.c.bf16 %v6008_v15, %v6007_v27 }
 0x66c   : > { %v5249_v1 = vpop.f32.mrf.mxu0 }
 0x66d   : > { %v11027_v9 = vadd.f32 %v5249_v1, %v10814_v38 }
 0x66e   : > { %6821 = vmatmul.bf16.gmra.mxu3 %v6728_v30  ;;  %v5687_v31 = vpop.f32.mrf.mxu2 }
 0x66f   : > { %v5743_v55 = vadd.f32 %v5687_v31, %v5509_v2  ;;  %6144 = vmatmul.bf16.gmra.mxu0 %v6031_v52 }
 0x670   : > { %v5455_v24 = vpop.f32.mrf.mxu1 }
 0x671   : > { %v5926_v47 = vpop.f32.mrf.mxu3  ;;  %v5510_v36 = vadd.f32 %v5455_v24, %v10886_v56  ;;  %v11030_v49 = vadd.f32 %v5921_v8, %v5743_v55  ;;  %v6699_v56 = vld [vmem:[#allocation2 + $0x63] sm:$0xff] }
 0x672   : > { %v6729_v8 = vpack.c.bf16 %v6700_v11, %v6699_v56  ;;  %v6232_v55 = vld [vmem:[#allocation2 + $0x69] sm:$0xff] }
 0x673   : > { %v6466_v24 = vld [vmem:[#allocation2 + $0x6a] sm:$0xff] }
 0x674   : > { %v5251_v57 = vpop.f32.mrf.mxu0 }
 0x675   : > { %v11033_v4 = vadd.f32 %v5251_v57, %v10826_v22  ;;  %v6702_v57 = vld [vmem:[#allocation2 + $0x7b] sm:$0xff] }
 0x676   : > { %v5689_v0 = vpop.f32.mrf.mxu2 }
 0x677   : > { %v5744_v3 = vadd.f32 %v5689_v0, %v5510_v36 }
 0x678   : > { %v5458_v40 = vpop.f32.mrf.mxu1 }
 0x679   : > { %v5928_v38 = vpop.f32.mrf.mxu3  ;;  %v5511_v39 = vadd.f32 %v5458_v40, %v10892_v45  ;;  %v11039_v45 = vadd.f32 %v5923_v26, %v5744_v3  ;;  %v6261_v3 = vpack.c.bf16 %v6232_v55, %v6231_v46  ;;  %v6495_v40 = vpack.c.bf16 %v6466_v24, %v6465_v60  ;;  %v6233_v55 = vld [vmem:[#allocation2 + $0x71] sm:$0xff] }
 0x67a   : > { %v6467_v24 = vld [vmem:[#allocation2 + $0x72] sm:$0xff] }
 0x67b   : > { %6353 = vmatmul.bf16.gmra.mxu1 %v6260_v5  ;;  %6587 = vmatmul.bf16.gmra.mxu2 %v6494_v33  ;;  %v6012_v60 = vld [vmem:[#allocation2 + $0xd8] sm:$0xff] }
 0x67c   : > { %v5254_v22 = vpop.f32.mrf.mxu0 }
 0x67d   : > { %v11037_v2 = vadd.f32 %v5254_v22, %v10838_v10 }
 0x67e   : > { %6826 = vmatmul.bf16.gmra.mxu3 %v6729_v8  ;;  %v5692_v58 = vpop.f32.mrf.mxu2 }
 0x67f   : > { %v5745_v7 = vadd.f32 %v5692_v58, %v5511_v39  ;;  %6149 = vmatmul.bf16.gmra.mxu0 %v6032_v17  ;;  %v6009_v39 = vld [vmem:[#allocation2 + $0xc0] sm:$0xff] }
 0x680   : > { %v5460_v37 = vpop.f32.mrf.mxu1  ;;  %v6033_v33 = vpack.c.bf16 %v6010_v42, %v6009_v39 }
 0x681   : > { %v5931_v30 = vpop.f32.mrf.mxu3  ;;  %v5512_v1 = vadd.f32 %v5460_v37, %v10904_v32  ;;  %v11045_v11 = vadd.f32 %v5926_v47, %v5745_v7  ;;  %v6701_v32 = vld [vmem:[#allocation2 + $0x73] sm:$0xff] }
 0x682   : > { %v6730_v35 = vpack.c.bf16 %v6702_v57, %v6701_v32  ;;  %v6234_v7 = vld [vmem:[#allocation2 + $0x79] sm:$0xff] }
 0x683   : > { %v6468_v37 = vld [vmem:[#allocation2 + $0x7a] sm:$0xff] }
 0x684   : > { %v5256_v20 = vpop.f32.mrf.mxu0 }
 0x685   : > { %v11043_v52 = vadd.f32 %v5256_v20, %v10850_v12  ;;  %v6704_v20 = vld [vmem:[#allocation2 + $0x8b] sm:$0xff] }
 0x686   : > { %v5694_v31 = vpop.f32.mrf.mxu2 }
 0x687   : > { %v5746_v36 = vadd.f32 %v5694_v31, %v5512_v1 }
 0x688   : > { %v5463_v0 = vpop.f32.mrf.mxu1 }
 0x689   : > { %v5933_v10 = vpop.f32.mrf.mxu3  ;;  %v5513_v26 = vadd.f32 %v5463_v0, %v10916_v48  ;;  %v11051_v48 = vadd.f32 %v5928_v38, %v5746_v36  ;;  %v6262_v36 = vpack.c.bf16 %v6234_v7, %v6233_v55  ;;  %v6496_v0 = vpack.c.bf16 %v6468_v37, %v6467_v24  ;;  %v6235_v7 = vld [vmem:[#allocation2 + $0x81] sm:$0xff] }
 0x68a   : > { %v6469_v37 = vld [vmem:[#allocation2 + $0x82] sm:$0xff] }
 0x68b   : > { %6358 = vmatmul.bf16.gmra.mxu1 %v6261_v3  ;;  %6592 = vmatmul.bf16.gmra.mxu2 %v6495_v40  ;;  %v6014_v24 = vld [vmem:[#allocation2 + $0xe8] sm:$0xff] }
 0x68c   : > { %v6115_v12 = vpop.f32.mrf.mxu0 }
 0x68d   : > { %v11049_v5 = vadd.f32 %v6115_v12, %v10859_v53 }
 0x68e   : > { %6831 = vmatmul.bf16.gmra.mxu3 %v6730_v35  ;;  %v5697_v56 = vpop.f32.mrf.mxu2 }
 0x68f   : > { %v5747_v8 = vadd.f32 %v5697_v56, %v5513_v26  ;;  %6154 = vmatmul.bf16.gmra.mxu0 %v6033_v33  ;;  %v6011_v26 = vld [vmem:[#allocation2 + $0xd0] sm:$0xff] }
 0x690   : > { %v5465_v15 = vpop.f32.mrf.mxu1  ;;  %v6034_v40 = vpack.c.bf16 %v6012_v60, %v6011_v26 }
 0x691   : > { %v5936_v47 = vpop.f32.mrf.mxu3  ;;  %v5514_v22 = vadd.f32 %v5465_v15, %v10942_v19  ;;  %v11057_v57 = vadd.f32 %v5931_v30, %v5747_v8  ;;  %v6703_v19 = vld [vmem:[#allocation2 + $0x83] sm:$0xff] }
 0x692   : > { %v6731_v46 = vpack.c.bf16 %v6704_v20, %v6703_v19  ;;  %v6236_v8 = vld [vmem:[#allocation2 + $0x89] sm:$0xff] }
 0x693   : > { %v6470_v15 = vld [vmem:[#allocation2 + $0x8a] sm:$0xff] }
 0x694   : > { %v6117_v27 = vpop.f32.mrf.mxu0 }
 0x695   : > { %v11055_v17 = vadd.f32 %v6117_v27, %v10865_v44  ;;  %v6706_v27 = vld [vmem:[#allocation2 + $0x9b] sm:$0xff] }
 0x696   : > { %v5699_v58 = vpop.f32.mrf.mxu2 }
 0x697   : > { %v5748_v1 = vadd.f32 %v5699_v58, %v5514_v22 }
 0x698   : > { %v5468_v31 = vpop.f32.mrf.mxu1 }
 0x699   : > { %v5938_v53 = vpop.f32.mrf.mxu3  ;;  %v5515_v38 = vadd.f32 %v5468_v31, %v10966_v28  ;;  %v11063_v28 = vadd.f32 %v5933_v10, %v5748_v1  ;;  %v6263_v1 = vpack.c.bf16 %v6236_v8, %v6235_v7  ;;  %v6497_v31 = vpack.c.bf16 %v6470_v15, %v6469_v37  ;;  %v6237_v8 = vld [vmem:[#allocation2 + $0x91] sm:$0xff] }
 0x69a   : > { %v6471_v15 = vld [vmem:[#allocation2 + $0x92] sm:$0xff] }
 0x69b   : > { %6363 = vmatmul.bf16.gmra.mxu1 %v6262_v36  ;;  %6597 = vmatmul.bf16.gmra.mxu2 %v6496_v0  ;;  %v6016_v37 = vld [vmem:[#allocation2 + $0xf8] sm:$0xff] }
 0x69c   : > { %v6120_v44 = vpop.f32.mrf.mxu0 }
 0x69d   : > { %v11061_v3 = vadd.f32 %v6120_v44, %v10871_v43 }
 0x69e   : > { %6836 = vmatmul.bf16.gmra.mxu3 %v6731_v46  ;;  %v5702_v32 = vpop.f32.mrf.mxu2 }
 0x69f   : > { %v5749_v35 = vadd.f32 %v5702_v32, %v5515_v38  ;;  %6159 = vmatmul.bf16.gmra.mxu0 %v6034_v40  ;;  %v6013_v38 = vld [vmem:[#allocation2 + $0xe0] sm:$0xff] }
 0x6a0   : > { %v5470_v42 = vpop.f32.mrf.mxu1  ;;  %v6035_v0 = vpack.c.bf16 %v6014_v24, %v6013_v38 }
 0x6a1   : > { %v5941_v30 = vpop.f32.mrf.mxu3  ;;  %v5516_v12 = vadd.f32 %v5470_v42, %v10985_v14  ;;  %v11069_v20 = vadd.f32 %v5936_v47, %v5749_v35  ;;  %v6705_v14 = vld [vmem:[#allocation2 + $0x93] sm:$0xff] }
 0x6a2   : > { %v6732_v55 = vpack.c.bf16 %v6706_v27, %v6705_v14  ;;  %v6238_v35 = vld [vmem:[#allocation2 + $0x99] sm:$0xff] }
 0x6a3   : > { %v6472_v42 = vld [vmem:[#allocation2 + $0x9a] sm:$0xff] }
 0x6a4   : > { %v6122_v39 = vpop.f32.mrf.mxu0 }
 0x6a5   : > { %v11067_v33 = vadd.f32 %v6122_v39, %v10877_v59  ;;  %v6708_v39 = vld [vmem:[#allocation2 + $0xab] sm:$0xff] }
 0x6a6   : > { %v5704_v56 = vpop.f32.mrf.mxu2 }
 0x6a7   : > { %v5750_v22 = vadd.f32 %v5704_v56, %v5516_v12 }
 0x6a8   : > { %v5473_v58 = vpop.f32.mrf.mxu1 }
 0x6a9   : > { %v5943_v43 = vpop.f32.mrf.mxu3  ;;  %v5517_v10 = vadd.f32 %v5473_v58, %v11003_v61  ;;  %v11075_v61 = vadd.f32 %v5938_v53, %v5750_v22  ;;  %v6264_v22 = vpack.c.bf16 %v6238_v35, %v6237_v8  ;;  %v6498_v58 = vpack.c.bf16 %v6472_v42, %v6471_v15  ;;  %v6239_v35 = vld [vmem:[#allocation2 + $0xa1] sm:$0xff] }
 0x6aa   : > { %v6473_v42 = vld [vmem:[#allocation2 + $0xa2] sm:$0xff] }
 0x6ab   : > { %6368 = vmatmul.bf16.gmra.mxu1 %v6263_v1  ;;  %6602 = vmatmul.bf16.gmra.mxu2 %v6497_v31 }
 0x6ac   : > { %v6125_v59 = vpop.f32.mrf.mxu0 }
 0x6ad   : > { %v11073_v36 = vadd.f32 %v6125_v59, %v10883_v62 }
 0x6ae   : > { %6841 = vmatmul.bf16.gmra.mxu3 %v6732_v55  ;;  %v5707_v19 = vpop.f32.mrf.mxu2 }
 0x6af   : > { %v5751_v46 = vadd.f32 %v5707_v19, %v5517_v10  ;;  %6164 = vmatmul.bf16.gmra.mxu0 %v6035_v0  ;;  %v6015_v10 = vld [vmem:[#allocation2 + $0xf0] sm:$0xff] }
 0x6b0   : > { %v5475_v60 = vpop.f32.mrf.mxu1  ;;  %v6036_v31 = vpack.c.bf16 %v6016_v37, %v6015_v10 }
 0x6b1   : > { %v5946_v47 = vpop.f32.mrf.mxu3  ;;  %v5518_v44 = vadd.f32 %v5475_v60, %v11009_v6  ;;  %v11081_v27 = vadd.f32 %v5941_v30, %v5751_v46  ;;  %v6707_v6 = vld [vmem:[#allocation2 + $0xa3] sm:$0xff] }
 0x6b2   : > { %v6733_v7 = vpack.c.bf16 %v6708_v39, %v6707_v6  ;;  %v6240_v46 = vld [vmem:[#allocation2 + $0xa9] sm:$0xff] }
 0x6b3   : > { %v6474_v60 = vld [vmem:[#allocation2 + $0xaa] sm:$0xff] }
 0x6b4   : > { %v6127_v26 = vpop.f32.mrf.mxu0 }
 0x6b5   : > { %v11079_v40 = vadd.f32 %v6127_v26, %v10889_v54  ;;  %v6710_v26 = vld [vmem:[#allocation2 + $0xbb] sm:$0xff] }
 0x6b6   : > { %v5709_v32 = vpop.f32.mrf.mxu2 }
 0x6b7   : > { %v5752_v12 = vadd.f32 %v5709_v32, %v5518_v44 }
 0x6b8   : > { %v5478_v56 = vpop.f32.mrf.mxu1 }
 0x6b9   : > { %v5948_v62 = vpop.f32.mrf.mxu3  ;;  %v5519_v53 = vadd.f32 %v5478_v56, %v11015_v63  ;;  %v11087_v63 = vadd.f32 %v5943_v43, %v5752_v12  ;;  %v6265_v12 = vpack.c.bf16 %v6240_v46, %v6239_v35  ;;  %v6709_v56 = vld [vmem:[#allocation2 + $0xb3] sm:$0xff]  ;;  %v9122_v35 = vld [vmem:[%s11608_s2 + $0x628] sm:$0xff] }
 0x6ba   : > { %v6734_v8 = vpack.c.bf16 %v6710_v26, %v6709_v56  ;;  %v6475_v46 = vld [vmem:[#allocation2 + $0xb2] sm:$0xff] }
 0x6bb   : > { %6373 = vmatmul.bf16.gmra.mxu1 %v6264_v22  ;;  %6607 = vmatmul.bf16.gmra.mxu2 %v6498_v58 }
 0x6bc   : > { %v6130_v54 = vpop.f32.mrf.mxu0 }
 0x6bd   : > { %v11085_v1 = vadd.f32 %v6130_v54, %v10901_v51  ;;  %v9124_v54 = vld [vmem:[%s11608_s2 + $0x638] sm:$0xff] }
 0x6be   : > { %6846 = vmatmul.bf16.gmra.mxu3 %v6733_v7  ;;  %v5712_v14 = vpop.f32.mrf.mxu2  ;;  %7042 = vmatpush.bf16.msrb.mxu0 %v9124_v54  ;;  %v6478_v54 = vld [vmem:[#allocation2 + $0xca] sm:$0xff] }
 0x6bf   : > { %v5753_v55 = vadd.f32 %v5712_v14, %v5519_v53  ;;  %6169 = vmatmul.bf16.gmra.mxu0 %v6036_v31  ;;  %v9123_v31 = vld [vmem:[%s11608_s2 + $0x630] sm:$0xff] }
 0x6c0   : > { %v5480_v24 = vpop.f32.mrf.mxu1 }
 0x6c1   : > { %v5951_v30 = vpop.f32.mrf.mxu3  ;;  %v5520_v59 = vadd.f32 %v5480_v24, %v11021_v25  ;;  %v11095_v39 = vadd.f32 %v5946_v47, %v5753_v55  ;;  %v6499_v25 = vpack.c.bf16 %v6474_v60, %v6473_v42  ;;  %v6242_v55 = vld [vmem:[#allocation2 + $0xb9] sm:$0xff] }
 0x6c2   : > { %v6476_v24 = vld [vmem:[#allocation2 + $0xba] sm:$0xff]  ;;  %7043 = vmatpush.bf16.msrb.mxu0 %v9123_v31 }
 0x6c3   : > { %v6500_v26 = vpack.c.bf16 %v6476_v24, %v6475_v46  ;;  %v6477_v24 = vld [vmem:[#allocation2 + $0xc2] sm:$0xff] }
 0x6c4   : > { %v6132_v38 = vpop.f32.mrf.mxu0  ;;  %v9118_v46 = vld [vmem:[%s11608_s2 + $0x608] sm:$0xff] }
 0x6c5   : > { %v11091_v0 = vadd.f32 %v6132_v38, %v10913_v23  ;;  %v9161_v23 = vld [vmem:[#allocation2 + $0x100] sm:$0xff] }
 0x6c6   : > { %v5714_v19 = vpop.f32.mrf.mxu2  ;;  %v11098_v15 = vpack.c.bf16 %v9161_v23, %v9161_v23  ;;  %7044 = vmatpush.bf16.msrb.mxu0 %v9122_v35 }
 0x6c7   : > { %v5754_v44 = vadd.f32 %v5714_v19, %v5520_v59  ;;  %v6241_v19 = vld [vmem:[#allocation2 + $0xb1] sm:$0xff] }
 0x6c8   : > { %v5483_v32 = vpop.f32.mrf.mxu1 }
 0x6c9   : > { %v11093_v51 = vpop.f32.mrf.mxu3  ;;  %v5521_v43 = vadd.f32 %v5483_v32, %v11027_v9  ;;  %v11106_v7 = vadd.f32 %v5948_v62, %v5754_v44  ;;  %v6266_v44 = vpack.c.bf16 %v6242_v55, %v6241_v19  ;;  %v6711_v32 = vld [vmem:[#allocation2 + $0xc3] sm:$0xff]  ;;  %v6713_v19 = vld [vmem:[#allocation2 + $0xd3] sm:$0xff] }
 0x6ca   : > { %v6243_v55 = vld [vmem:[#allocation2 + $0xc1] sm:$0xff] }
 0x6cb   : > { %6378 = vmatmul.bf16.gmra.mxu1 %v6265_v12  ;;  %6612 = vmatmul.bf16.gmra.mxu2 %v6499_v25 }
 0x6cc   : > { %v6135_v53 = vpop.f32.mrf.mxu0 }
 0x6cd   : > { %v11101_v22 = vadd.f32 %v6135_v53, %v10939_v50 }
 0x6ce   : > { %6851 = vmatmul.bf16.gmra.mxu3 %v6734_v8  ;;  %v5717_v58 = vpop.f32.mrf.mxu2 }
 0x6cf   : > { %v5755_v6 = vadd.f32 %v5717_v58, %v5521_v43  ;;  %6174 = vmatmul.bf16.gmra.mxu0 %v11098_v15 }
 0x6d0   : > { %v5485_v9 = vpop.f32.mrf.mxu1 }
 0x6d1   : > { %v11103_v47 = vpop.f32.mrf.mxu3  ;;  %v5522_v37 = vadd.f32 %v5485_v9, %v11033_v4  ;;  %v6712_v4 = vld [vmem:[#allocation2 + $0xcb] sm:$0xff]  ;;  %v11122_v60 = vadd.f32 %v5951_v30, %v5755_v6 }
 0x6d2   : > { %v6735_v42 = vpack.c.bf16 %v6712_v4, %v6711_v32  ;;  %v9119_v6 = vld [vmem:[%s11608_s2 + $0x610] sm:$0xff] }
 0x6d4   : > { %v6137_v10 = vpop.f32.mrf.mxu0 }
 0x6d5   : > { %v11113_v50 = vadd.f32 %v6137_v10, %v10963_v13 }
 0x6d6   : > { %v5719_v14 = vpop.f32.mrf.mxu2 }
 0x6d7   : > { %v11118_v62 = vadd.f32 %v5719_v14, %v5522_v37  ;;  %v6244_v37 = vld [vmem:[#allocation2 + $0xc9] sm:$0xff] }
 0x6d8   : > { %v5488_v38 = vpop.f32.mrf.mxu1 }
 0x6d9   : > { %v11120_v59 = vpop.f32.mrf.mxu3  ;;  %v5523_v13 = vadd.f32 %v5488_v38, %v11037_v2  ;;  %v9121_v2 = vld [vmem:[%s11608_s2 + $0x620] sm:$0xff]  ;;  %v6501_v38 = vpack.c.bf16 %v6478_v54, %v6477_v24  ;;  %v6245_v54 = vld [vmem:[#allocation2 + $0xd1] sm:$0xff] }
 0x6da   : > { %7045 = vmatpush.bf16.msrb.mxu0 %v9121_v2 }
 0x6db   : > { %6383 = vmatmul.bf16.gmra.mxu1 %v6266_v44  ;;  %6617 = vmatmul.bf16.gmra.mxu2 %v6500_v26 }
 0x6dc   : > { %v6140_v43 = vpop.f32.mrf.mxu0 }
 0x6dd   : > { %v11129_v12 = vadd.f32 %v6140_v43, %v10982_v21  ;;  %v9120_v21 = vld [vmem:[%s11608_s2 + $0x618] sm:$0xff] }
 0x6de   : > { %6856 = vmatmul.bf16.gmra.mxu3 %v6735_v42  ;;  %v5722_v30 = vpop.f32.mrf.mxu2  ;;  %7046 = vmatpush.bf16.msrb.mxu0 %v9120_v21  ;;  %v6480_v21 = vld [vmem:[#allocation2 + $0xda] sm:$0xff] }
 0x6df   : > { %v11134_v25 = vadd.f32 %v5722_v30, %v5523_v13  ;;  %6179 = vmatmul.bf16.gmra.mxu0 %v11098_v15 }
 0x6e0   : > { %v5490_v8 = vpop.f32.mrf.mxu1 }
 0x6e1   : > { %v11136_v56 = vpop.f32.mrf.mxu3  ;;  %v5524_v23 = vadd.f32 %v5490_v8, %v11043_v52  ;;  %v6714_v52 = vld [vmem:[#allocation2 + $0xdb] sm:$0xff] }
 0x6e2   : > { %7047 = vmatpush.bf16.msrb.mxu0 %v9119_v6  ;;  %v6736_v13 = vpack.c.bf16 %v6714_v52, %v6713_v19  ;;  %v6479_v52 = vld [vmem:[#allocation2 + $0xd2] sm:$0xff] }
 0x6e3   : > { %v6502_v24 = vpack.c.bf16 %v6480_v21, %v6479_v52 }
 0x6e4   : > { %v6142_v53 = vpop.f32.mrf.mxu0 }
 0x6e5   : > { %v11144_v58 = vadd.f32 %v6142_v53, %v11000_v18  ;;  %v6267_v18 = vpack.c.bf16 %v6244_v37, %v6243_v55 }
 0x6e6   : > { %v5724_v9 = vpop.f32.mrf.mxu2  ;;  %7048 = vmatpush.bf16.msrb.mxu0 %v9118_v46 }
 0x6e7   : > { %v11149_v10 = vadd.f32 %v5724_v9, %v5524_v23  ;;  %v6246_v23 = vld [vmem:[#allocation2 + $0xd9] sm:$0xff]  ;;  %v6716_v9 = vld [vmem:[#allocation2 + $0xeb] sm:$0xff] }
 0x6e8   : > { %v6349_v14 = vpop.f32.mrf.mxu1  ;;  %v6268_v55 = vpack.c.bf16 %v6246_v23, %v6245_v54  ;;  %v6718_v23 = vld [vmem:[#allocation2 + $0xfb] sm:$0xff] }
 0x6e9   : > { %v11151_v31 = vpop.f32.mrf.mxu3  ;;  %v6429_v4 = vadd.f32 %v6349_v14, %v11049_v5  ;;  %v9117_v5 = vld [vmem:[%s11608_s2 + $0x600] sm:$0xff] }
 0x6ea   : > { %7049 = vmatpush.bf16.msrb.mxu0 %v9117_v5 }
 0x6eb   : > { %6388 = vmatmul.bf16.gmra.mxu1 %v6267_v18  ;;  %6622 = vmatmul.bf16.gmra.mxu2 %v6501_v38 }
 0x6ec   : > { %v6145_v44 = vpop.f32.mrf.mxu0 }
 0x6ed   : > { %v11158_v26 = vadd.f32 %v6145_v44, %v11006_v29 }
 0x6ee   : > { %6861 = vmatmul.bf16.gmra.mxu3 %v6736_v13  ;;  %v6583_v32 = vpop.f32.mrf.mxu2 }
 0x6ef   : > { %v11163_v35 = vadd.f32 %v6583_v32, %v6429_v4  ;;  %6184 = vmatmul.bf16.gmra.mxu0 %v11098_v15 }
 0x6f0   : > { %v6351_v43 = vpop.f32.mrf.mxu1 }
 0x6f1   : > { %v11165_v42 = vpop.f32.mrf.mxu3  ;;  %v6430_v2 = vadd.f32 %v6351_v43, %v11055_v17  ;;  %v6715_v17 = vld [vmem:[#allocation2 + $0xe3] sm:$0xff] }
 0x6f2   : > { %v6737_v4 = vpack.c.bf16 %v6716_v9, %v6715_v17  ;;  %v6248_v43 = vld [vmem:[#allocation2 + $0xe9] sm:$0xff]  ;;  %v6247_v9 = vld [vmem:[#allocation2 + $0xe1] sm:$0xff] }
 0x6f3   : > { %v6269_v54 = vpack.c.bf16 %v6248_v43, %v6247_v9  ;;  %v6719_v43 = vld [vmem:[#allocation2 + $0x103] sm:$0xff]  ;;  %v6484_v9 = vld [vmem:[#allocation2 + $0xfa] sm:$0xff] }
 0x6f4   : > { %v6147_v30 = vpop.f32.mrf.mxu0 }
 0x6f5   : > { %v11170_v8 = vadd.f32 %v6147_v30, %v11012_v41 }
 0x6f6   : > { %v6585_v29 = vpop.f32.mrf.mxu2 }
 0x6f7   : > { %v11172_v53 = vadd.f32 %v6585_v29, %v6430_v2  ;;  %v6482_v2 = vld [vmem:[#allocation2 + $0xea] sm:$0xff]  ;;  %v6717_v29 = vld [vmem:[#allocation2 + $0xf3] sm:$0xff] }
 0x6f8   : > { %v6354_v37 = vpop.f32.mrf.mxu1  ;;  %v6738_v52 = vpack.c.bf16 %v6718_v23, %v6717_v29  ;;  %v6250_v23 = vld [vmem:[#allocation2 + $0xf9] sm:$0xff] }
 0x6f9   : > { %v11174_v6 = vpop.f32.mrf.mxu3  ;;  %v6431_v14 = vadd.f32 %v6354_v37, %v11061_v3  ;;  %v6481_v37 = vld [vmem:[#allocation2 + $0xe2] sm:$0xff] }
 0x6fb   : > { %6393 = vmatmul.bf16.gmra.mxu1 %v6268_v55  ;;  %6627 = vmatmul.bf16.gmra.mxu2 %v6502_v24  ;;  %v6929_v55 = vld [vmem:[#allocation2 + $0x44] sm:$0xff] }
 0x6fc   : > { %v6150_v41 = vpop.f32.mrf.mxu0 }
 0x6fd   : > { %v11178_v18 = vadd.f32 %v6150_v41, %v11018_v16 }
 0x6fe   : > { %6866 = vmatmul.bf16.gmra.mxu3 %v6737_v4  ;;  %v6588_v38 = vpop.f32.mrf.mxu2 }
 0x6ff   : > { %v11180_v19 = vadd.f32 %v6588_v38, %v6431_v14  ;;  %6189 = vmatmul.bf16.gmra.mxu0 %v11098_v15  ;;  %v6930_v14 = vld [vmem:[#allocation2 + $0x4c] sm:$0xff] }
 0x700   : > { %v6356_v13 = vpop.f32.mrf.mxu1  ;;  %v6961_v17 = vpack.c.bf16 %v6930_v14, %v6929_v55 }
 0x701   : > { %v11182_v46 = vpop.f32.mrf.mxu3  ;;  %v6432_v3 = vadd.f32 %v6356_v13, %v11067_v33  ;;  %v6503_v33 = vpack.c.bf16 %v6482_v2, %v6481_v37  ;;  %v6720_v2 = vld [vmem:[#allocation2 + $0x10b] sm:$0xff] }
 0x704   : > { %v6152_v44 = vpop.f32.mrf.mxu0 }
 0x705   : > { %v11187_v5 = vadd.f32 %v6152_v44, %v11024_v34 }
 0x706   : > { %v6590_v32 = vpop.f32.mrf.mxu2 }
 0x707   : > { %v11189_v30 = vadd.f32 %v6590_v32, %v6432_v3 }
 0x708   : > { %v6359_v21 = vpop.f32.mrf.mxu1 }
 0x709   : > { %v11191_v16 = vpop.f32.mrf.mxu3  ;;  %v6433_v15 = vadd.f32 %v6359_v21, %v11073_v36  ;;  %v11203_v36 = vadd.f32 %v11093_v51, %v11118_v62  ;;  %v6483_v21 = vld [vmem:[#allocation2 + $0xf2] sm:$0xff]  ;;  %v11215_v51 = vadd.f32 %v11103_v47, %v11134_v25  ;;  %v6739_v62 = vpack.c.bf16 %v6720_v2, %v6719_v43  ;;  %v6252_v43 = vld [vmem:[#allocation2 + $0x109] sm:$0xff] }
 0x70a   : > { %v6485_v2 = vld [vmem:[#allocation2 + $0x102] sm:$0xff] }
 0x70b   : > { %6398 = vmatmul.bf16.gmra.mxu1 %v6269_v54  ;;  %6632 = vmatmul.bf16.gmra.mxu2 %v6503_v33  ;;  %v6504_v33 = vpack.c.bf16 %v6484_v9, %v6483_v21  ;;  %v6722_v21 = vld [vmem:[#allocation2 + $0x11b] sm:$0xff] }
 0x70c   : > { %v6155_v34 = vpop.f32.mrf.mxu0 }
 0x70d   : > { %v11195_v24 = vadd.f32 %v6155_v34, %v11030_v49  ;;  %v6249_v49 = vld [vmem:[#allocation2 + $0xf1] sm:$0xff] }
 0x70e   : > { %6871 = vmatmul.bf16.gmra.mxu3 %v6738_v52  ;;  %v6593_v4 = vpop.f32.mrf.mxu2  ;;  %v6270_v54 = vpack.c.bf16 %v6250_v23, %v6249_v49  ;;  %v6932_v52 = vld [vmem:[#allocation2 + $0x5c] sm:$0xff]  ;;  %v6931_v34 = vld [vmem:[#allocation2 + $0x54] sm:$0xff] }
 0x70f   : > { %v11197_v41 = vadd.f32 %v6593_v4, %v6433_v15  ;;  %7050 = vmatmul.bf16.vlgmr.msrb.gmra.mxu0 %v6961_v17  ;;  %v6962_v17 = vpack.c.bf16 %v6932_v52, %v6931_v34  ;;  %v6721_v23 = vld [vmem:[#allocation2 + $0x113] sm:$0xff]  ;;  %v6933_v52 = vld [vmem:[#allocation2 + $0x64] sm:$0xff] }
 0x710   : > { %v6361_v13 = vpop.f32.mrf.mxu1 }
 0x711   : > { %v11199_v38 = vpop.f32.mrf.mxu3  ;;  %v6434_v3 = vadd.f32 %v6361_v13, %v11079_v40 }
 0x714   : > { %v6157_v44 = vpop.f32.mrf.mxu0 }
 0x715   : > { %v11207_v32 = vadd.f32 %v6157_v44, %v11039_v45  ;;  %v6251_v44 = vld [vmem:[#allocation2 + $0x101] sm:$0xff] }
 0x716   : > { %v6595_v29 = vpop.f32.mrf.mxu2 }
 0x717   : > { %v11209_v37 = vadd.f32 %v6595_v29, %v6434_v3 }
 0x718   : > { %v6364_v40 = vpop.f32.mrf.mxu1 }
 0x719   : > { %v11211_v15 = vpop.f32.mrf.mxu3  ;;  %v6435_v45 = vadd.f32 %v6364_v40, %v11085_v1  ;;  %v11227_v1 = vadd.f32 %v11120_v59, %v11149_v10  ;;  %v6271_v59 = vpack.c.bf16 %v6252_v43, %v6251_v44  ;;  %v6254_v44 = vld [vmem:[#allocation2 + $0x119] sm:$0xff] }
 0x71a   : > { %v6488_v43 = vld [vmem:[#allocation2 + $0x11a] sm:$0xff] }
 0x71b   : > { %6403 = vmatmul.bf16.gmra.mxu1 %v6270_v54  ;;  %6637 = vmatmul.bf16.gmra.mxu2 %v6504_v33  ;;  %v6740_v54 = vpack.c.bf16 %v6722_v21, %v6721_v23  ;;  %v6934_v33 = vld [vmem:[#allocation2 + $0x6c] sm:$0xff] }
 0x71c   : > { %v6160_v14 = vpop.f32.mrf.mxu0  ;;  %v6963_v34 = vpack.c.bf16 %v6934_v33, %v6933_v52  ;;  %v6935_v33 = vld [vmem:[#allocation2 + $0x74] sm:$0xff] }
 0x71d   : > { %v11219_v55 = vadd.f32 %v6160_v14, %v11045_v11  ;;  %v6486_v11 = vld [vmem:[#allocation2 + $0x10a] sm:$0xff] }
 0x71e   : > { %6876 = vmatmul.bf16.gmra.mxu3 %v6739_v62  ;;  %v6598_v4 = vpop.f32.mrf.mxu2  ;;  %v6505_v10 = vpack.c.bf16 %v6486_v11, %v6485_v2  ;;  %v6723_v2 = vld [vmem:[#allocation2 + $0x123] sm:$0xff]  ;;  %v6724_v11 = vld [vmem:[#allocation2 + $0x12b] sm:$0xff] }
 0x71f   : > { %v11221_v13 = vadd.f32 %v6598_v4, %v6435_v45  ;;  %7055 = vmatmul.bf16.gmra.mxu0 %v6962_v17 }
 0x720   : > { %v6366_v25 = vpop.f32.mrf.mxu1 }
 0x721   : > { %v11223_v47 = vpop.f32.mrf.mxu3  ;;  %v6436_v3 = vadd.f32 %v6366_v25, %v11091_v0  ;;  %v11239_v0 = vadd.f32 %v11136_v56, %v11163_v35  ;;  %v11252_v56 = vadd.f32 %v11151_v31, %v11172_v53  ;;  %v6253_v25 = vld [vmem:[#allocation2 + $0x111] sm:$0xff]  ;;  %v11265_v31 = vadd.f32 %v11165_v42, %v11180_v19 }
 0x722   : > { %v11278_v42 = vadd.f32 %v11174_v6, %v11189_v30  ;;  %v11291_v6 = vadd.f32 %v11182_v46, %v11197_v41  ;;  %v11304_v46 = vadd.f32 %v11191_v16, %v11209_v37  ;;  %v11317_v16 = vadd.f32 %v11199_v38, %v11221_v13 }
 0x724   : > { %v6162_v49 = vpop.f32.mrf.mxu0 }
 0x725   : > { %v11231_v29 = vadd.f32 %v6162_v49, %v11051_v48  ;;  %v6487_v49 = vld [vmem:[#allocation2 + $0x112] sm:$0xff] }
 0x726   : > { %v6600_v9 = vpop.f32.mrf.mxu2 }
 0x727   : > { %v11233_v40 = vadd.f32 %v6600_v9, %v6436_v3  ;;  %v6272_v9 = vpack.c.bf16 %v6254_v44, %v6253_v25 }
 0x728   : > { %v11241_v45 = vpop.f32.mrf.mxu1 }
 0x729   : > { %v11235_v62 = vpop.f32.mrf.mxu3 }
 0x72a   : > { %11614 = vst [vmem:[#allocation3_spill] sm:$0xff] %v11235_v62 }
 0x72b   : > { %6408 = vmatmul.bf16.gmra.mxu1 %v6271_v59  ;;  %6642 = vmatmul.bf16.gmra.mxu2 %v6505_v10  ;;  %v6506_v59 = vpack.c.bf16 %v6488_v43, %v6487_v49  ;;  %v6741_v10 = vpack.c.bf16 %v6724_v11, %v6723_v2  ;;  %v6256_v49 = vld [vmem:[#allocation2 + $0x129] sm:$0xff]  ;;  %v6725_v11 = vld [vmem:[#allocation2 + $0x133] sm:$0xff] }
 0x72c   : > { %v6165_v48 = vpop.f32.mrf.mxu0  ;;  %v6489_v43 = vld [vmem:[#allocation2 + $0x122] sm:$0xff]  ;;  %v6490_v2 = vld [vmem:[#allocation2 + $0x12a] sm:$0xff] }
 0x72d   : > { %v11244_v14 = vadd.f32 %v6165_v48, %v11057_v57 }
 0x72e   : > { %6881 = vmatmul.bf16.gmra.mxu3 %v6740_v54  ;;  %v11246_v17 = vpop.f32.mrf.mxu2  ;;  %v6936_v54 = vld [vmem:[#allocation2 + $0x7c] sm:$0xff] }
 0x72f   : > { %7060 = vmatmul.bf16.gmra.mxu0 %v6963_v34  ;;  %v6964_v52 = vpack.c.bf16 %v6936_v54, %v6935_v33 }
 0x730   : > { %v11254_v35 = vpop.f32.mrf.mxu1 }
 0x731   : > { %v11248_v4 = vpop.f32.mrf.mxu3  ;;  %11616 = vst [vmem:[#allocation5_spill] sm:$0xff] %v11254_v35  ;;  %v6948_v35 = vld [vmem:[#allocation2 + $0xdc] sm:$0xff] }
 0x732   : > { %11615 = vst [vmem:[#allocation4_spill] sm:$0xff] %v11248_v4 }
 0x734   : > { %v6167_v3 = vpop.f32.mrf.mxu0 }
 0x735   : > { %v11257_v57 = vadd.f32 %v6167_v3, %v11063_v28  ;;  %v6255_v3 = vld [vmem:[#allocation2 + $0x121] sm:$0xff] }
 0x736   : > { %v11259_v23 = vpop.f32.mrf.mxu2  ;;  %v6273_v54 = vpack.c.bf16 %v6256_v49, %v6255_v3  ;;  %v6257_v49 = vld [vmem:[#allocation2 + $0x131] sm:$0xff] }
 0x737   : > { %11617 = vst [vmem:[#allocation6_spill] sm:$0xff] %v11259_v23 }
 0x738   : > { %v11267_v53 = vpop.f32.mrf.mxu1 }
 0x739   : > { %v11261_v21 = vpop.f32.mrf.mxu3 }
 0x73a   : > { %11618 = vst [vmem:[#allocation7_spill] sm:$0xff] %v11261_v21 }
 0x73b   : > { %6413 = vmatmul.bf16.gmra.mxu1 %v6272_v9  ;;  %6647 = vmatmul.bf16.gmra.mxu2 %v6506_v59  ;;  %v6726_v9 = vld [vmem:[#allocation2 + $0x13b] sm:$0xff] }
 0x73c   : > { %v6170_v28 = vpop.f32.mrf.mxu0  ;;  %v6742_v33 = vpack.c.bf16 %v6726_v9, %v6725_v11  ;;  %v6491_v11 = vld [vmem:[#allocation2 + $0x132] sm:$0xff]  ;;  %v6492_v9 = vld [vmem:[#allocation2 + $0x13a] sm:$0xff] }
 0x73d   : > { %v11270_v48 = vadd.f32 %v6170_v28, %v11069_v20  ;;  %v6507_v28 = vpack.c.bf16 %v6490_v2, %v6489_v43  ;;  %v6258_v2 = vld [vmem:[#allocation2 + $0x139] sm:$0xff] }
 0x73e   : > { %6886 = vmatmul.bf16.gmra.mxu3 %v6741_v10  ;;  %v11272_v34 = vpop.f32.mrf.mxu2 }
 0x73f   : > { %11619 = vst [vmem:[#allocation8_spill] sm:$0xff] %v11272_v34  ;;  %7065 = vmatmul.bf16.gmra.mxu0 %v6964_v52  ;;  %v6938_v52 = vld [vmem:[#allocation2 + $0x8c] sm:$0xff] }
 0x740   : > { %v11280_v19 = vpop.f32.mrf.mxu1 }
 0x741   : > { %v11274_v25 = vpop.f32.mrf.mxu3 }
 0x742   : > { %11620 = vst [vmem:[#allocation9_spill] sm:$0xff] %v11274_v25 }
 0x744   : > { %v6172_v44 = vpop.f32.mrf.mxu0 }
 0x745   : > { %v11283_v20 = vadd.f32 %v6172_v44, %v11075_v61  ;;  %v6937_v44 = vld [vmem:[#allocation2 + $0x84] sm:$0xff] }
 0x746   : > { %v11285_v59 = vpop.f32.mrf.mxu2  ;;  %v6965_v4 = vpack.c.bf16 %v6938_v52, %v6937_v44  ;;  %v6940_v52 = vld [vmem:[#allocation2 + $0x9c] sm:$0xff]  ;;  %v6939_v44 = vld [vmem:[#allocation2 + $0x94] sm:$0xff] }
 0x748   : > { %v11293_v30 = vpop.f32.mrf.mxu1 }
 0x749   : > { %v11287_v10 = vpop.f32.mrf.mxu3 }
 0x74b   : > { %6418 = vmatmul.bf16.gmra.mxu1 %v6273_v54  ;;  %6652 = vmatmul.bf16.gmra.mxu2 %v6507_v28 }
 0x74c   : > { %v6175_v61 = vpop.f32.mrf.mxu0 }
 0x74d   : > { %v11296_v62 = vadd.f32 %v6175_v61, %v11081_v27 }
 0x74e   : > { %6891 = vmatmul.bf16.gmra.mxu3 %v6742_v33  ;;  %v11298_v21 = vpop.f32.mrf.mxu2  ;;  %v6274_v33 = vpack.c.bf16 %v6258_v2, %v6257_v49  ;;  %v11328_v49 = vadd.f32 %v11211_v15, %v11233_v40 }
 0x74f   : > { %7070 = vmatmul.bf16.gmra.mxu0 %v6965_v4  ;;  %v6508_v4 = vpack.c.bf16 %v6492_v9, %v6491_v11 }
 0x750   : > { %v11306_v41 = vpop.f32.mrf.mxu1 }
 0x751   : > { %v11300_v3 = vpop.f32.mrf.mxu3 }
 0x754   : > { %v6177_v43 = vpop.f32.mrf.mxu0 }
 0x755   : > { %v11309_v27 = vadd.f32 %v6177_v43, %v11087_v63  ;;  %v6966_v43 = vpack.c.bf16 %v6940_v52, %v6939_v44  ;;  %v6942_v52 = vld [vmem:[#allocation2 + $0xac] sm:$0xff]  ;;  %v6941_v44 = vld [vmem:[#allocation2 + $0xa4] sm:$0xff] }
 0x756   : > { %v11311_v54 = vpop.f32.mrf.mxu2  ;;  %v6967_v40 = vpack.c.bf16 %v6942_v52, %v6941_v44  ;;  %v6943_v44 = vld [vmem:[#allocation2 + $0xb4] sm:$0xff] }
 0x757   : > { %11621 = vst [vmem:[#allocation10_spill] sm:$0xff] %v11309_v27 }
 0x758   : > { %v11319_v37 = vpop.f32.mrf.mxu1 }
 0x759   : > { %v11313_v28 = vpop.f32.mrf.mxu3 }
 0x75b   : > { %6423 = vmatmul.bf16.gmra.mxu1 %v6274_v33  ;;  %6657 = vmatmul.bf16.gmra.mxu2 %v6508_v4 }
 0x75c   : > { %v6180_v61 = vpop.f32.mrf.mxu0 }
 0x75d   : > { %v11322_v63 = vadd.f32 %v6180_v61, %v11095_v39 }
 0x75e   : > { %v11324_v27 = vpop.f32.mrf.mxu2 }
 0x75f   : > { %11622 = vst [vmem:[#allocation11_spill] sm:$0xff] %v11322_v63  ;;  %7075 = vmatmul.bf16.gmra.mxu0 %v6966_v43 }
 0x760   : > { %v11332_v13 = vpop.f32.mrf.mxu1 }
 0x761   : > { %v11330_v38 = vpop.f32.mrf.mxu3 }
 0x764   : > { %v6182_v2 = vpop.f32.mrf.mxu0 }
 0x765   : > { %v11335_v11 = vadd.f32 %v6182_v2, %v11106_v7 }
 0x766   : > { %v11337_v9 = vpop.f32.mrf.mxu2 }
 0x767   : > { %11623 = vst [vmem:[#allocation12_spill] sm:$0xff] %v11335_v11 }
 0x768   : > { %v6389_v39 = vpop.f32.mrf.mxu1 }
 0x769   : > { %v6445_v33 = vadd.f32 %v6389_v39, %v11195_v24  ;;  %v11340_v4 = vpop.f32.mrf.mxu3 }
 0x76c   : > { %v6185_v61 = vpop.f32.mrf.mxu0 }
 0x76d   : > { %v11343_v15 = vadd.f32 %v6185_v61, %v11122_v60  ;;  %v6944_v61 = vld [vmem:[#allocation2 + $0xbc] sm:$0xff] }
 0x76e   : > { %v6623_v43 = vpop.f32.mrf.mxu2 }
 0x76f   : > { %11624 = vst [vmem:[#allocation13_spill] sm:$0xff] %v11343_v15  ;;  %v6679_v63 = vadd.f32 %v6623_v43, %v6445_v33  ;;  %7080 = vmatmul.bf16.gmra.mxu0 %v6967_v40  ;;  %v6968_v40 = vpack.c.bf16 %v6944_v61, %v6943_v44  ;;  %v6946_v61 = vld [vmem:[#allocation2 + $0xcc] sm:$0xff]  ;;  %v6945_v44 = vld [vmem:[#allocation2 + $0xc4] sm:$0xff] }
 0x770   : > { %v6391_v23 = vpop.f32.mrf.mxu1 }
 0x771   : > { %v6446_v7 = vadd.f32 %v6391_v23, %v11207_v32  ;;  %v11346_v2 = vpop.f32.mrf.mxu3 }
 0x774   : > { %v6187_v11 = vpop.f32.mrf.mxu0 }
 0x775   : > { %v11349_v24 = vadd.f32 %v6187_v11, %v11203_v36 }
 0x776   : > { %v6625_v39 = vpop.f32.mrf.mxu2 }
 0x777   : > { %11625 = vst [vmem:[#allocation14_spill] sm:$0xff] %v11349_v24  ;;  %v11351_v25 = vadd.f32 %v6625_v39, %v6446_v7 }
 0x778   : > { %v6394_v34 = vpop.f32.mrf.mxu1 }
 0x779   : > { %v6447_v60 = vadd.f32 %v6394_v34, %v11219_v55  ;;  %v11357_v32 = vpop.f32.mrf.mxu3 }
 0x77c   : > { %v6190_v52 = vpop.f32.mrf.mxu0 }
 0x77d   : > { %v11355_v33 = vadd.f32 %v6190_v52, %v11215_v51 }
 0x77e   : > { %v6628_v23 = vpop.f32.mrf.mxu2 }
 0x77f   : > { %11626 = vst [vmem:[#allocation15_spill] sm:$0xff] %v11355_v33  ;;  %v6681_v43 = vadd.f32 %v6628_v23, %v6447_v60  ;;  %7085 = vmatmul.bf16.gmra.mxu0 %v6968_v40  ;;  %v6969_v40 = vpack.c.bf16 %v6946_v61, %v6945_v44  ;;  %v6947_v61 = vld [vmem:[#allocation2 + $0xd4] sm:$0xff] }
 0x780   : > { %v6396_v36 = vpop.f32.mrf.mxu1  ;;  %v6970_v44 = vpack.c.bf16 %v6948_v35, %v6947_v61  ;;  %v6950_v35 = vld [vmem:[#allocation2 + $0xec] sm:$0xff] }
 0x781   : > { %v6448_v11 = vadd.f32 %v6396_v36, %v11231_v29  ;;  %v11363_v15 = vpop.f32.mrf.mxu3 }
 0x784   : > { %v6192_v7 = vpop.f32.mrf.mxu0 }
 0x785   : > { %v11361_v39 = vadd.f32 %v6192_v7, %v11227_v1 }
 0x786   : > { %v6630_v55 = vpop.f32.mrf.mxu2 }
 0x787   : > { %11627 = vst [vmem:[#allocation16_spill] sm:$0xff] %v11361_v39  ;;  %v6682_v34 = vadd.f32 %v6630_v55, %v6448_v11 }
 0x788   : > { %v6399_v24 = vpop.f32.mrf.mxu1 }
 0x789   : > { %v6449_v51 = vadd.f32 %v6399_v24, %v11244_v14  ;;  %v6869_v7 = vpop.f32.mrf.mxu3 }
 0x78c   : > { %v7051_v52 = vpop.f32.mrf.mxu0 }
 0x78d   : > { %v11367_v60 = vadd.f32 %v7051_v52, %v11239_v0 }
 0x78e   : > { %v6633_v23 = vpop.f32.mrf.mxu2 }
 0x78f   : > { %11628 = vst [vmem:[#allocation17_spill] sm:$0xff] %v11367_v60  ;;  %v6683_v29 = vadd.f32 %v6633_v23, %v6449_v51  ;;  %7090 = vmatmul.bf16.gmra.mxu0 %v6969_v40 }
 0x790   : > { %v6401_v36 = vpop.f32.mrf.mxu1 }
 0x791   : > { %v6450_v1 = vadd.f32 %v6401_v36, %v11257_v57  ;;  %v6872_v0 = vpop.f32.mrf.mxu3 }
 0x794   : > { %v7053_v11 = vpop.f32.mrf.mxu0 }
 0x795   : > { %v11371_v55 = vadd.f32 %v7053_v11, %v11252_v56 }
 0x796   : > { %v6635_v39 = vpop.f32.mrf.mxu2 }
 0x797   : > { %v6684_v14 = vadd.f32 %v6635_v39, %v6450_v1 }
 0x798   : > { %v6404_v24 = vpop.f32.mrf.mxu1 }
 0x799   : > { %v6451_v33 = vadd.f32 %v6404_v24, %v11270_v48  ;;  %v6874_v1 = vpop.f32.mrf.mxu3  ;;  %v11382_v24 = vadd.f32 %v11330_v38, %v6679_v63 }
 0x79c   : > { %v7056_v52 = vpop.f32.mrf.mxu0 }
 0x79d   : > { %v11375_v51 = vadd.f32 %v7056_v52, %v11265_v31 }
 0x79e   : > { %v6638_v40 = vpop.f32.mrf.mxu2 }
 0x79f   : > { %v6685_v57 = vadd.f32 %v6638_v40, %v6451_v33  ;;  %7095 = vmatmul.bf16.gmra.mxu0 %v6970_v44  ;;  %v6949_v33 = vld [vmem:[#allocation2 + $0xe4] sm:$0xff] }
 0x7a0   : > { %v6406_v23 = vpop.f32.mrf.mxu1 }
 0x7a1   : > { %v6452_v56 = vadd.f32 %v6406_v23, %v11283_v20  ;;  %v6971_v20 = vpack.c.bf16 %v6950_v35, %v6949_v33  ;;  %v6877_v40 = vpop.f32.mrf.mxu3  ;;  %v11390_v23 = vadd.f32 %v11340_v4, %v11351_v25  ;;  %v11404_v25 = vadd.f32 %v11357_v32, %v6682_v34 }
 0x7a2   : > { %v6437_v35 = vadd.f32 %v11241_v45, %v11101_v22  ;;  %v11418_v34 = vadd.f32 %v6869_v7, %v6684_v14  ;;  %v11420_v45 = vadd.f32 %v6872_v0, %v6685_v57  ;;  %v6960_v7 = vld [vmem:[#allocation2 + $0x13c] sm:$0xff]  ;;  %v6443_v14 = vadd.f32 %v11319_v37, %v11178_v18 }
 0x7a3   : > { %v6440_v18 = vadd.f32 %v11280_v19, %v11144_v58  ;;  %v11631_v19 = vld [vmem:[#allocation9_spill] sm:$0xff] }
 0x7a4   : > { %v7058_v36 = vpop.f32.mrf.mxu0 }
 0x7a5   : > { %v11379_v39 = vadd.f32 %v7058_v36, %v11278_v42 }
 0x7a6   : > { %v6640_v48 = vpop.f32.mrf.mxu2 }
 0x7a7   : > { %v6686_v11 = vadd.f32 %v6640_v48, %v6452_v56  ;;  %v6952_v56 = vld [vmem:[#allocation2 + $0xfc] sm:$0xff] }
 0x7a8   : > { %v6409_v60 = vpop.f32.mrf.mxu1 }
 0x7a9   : > { %v6453_v31 = vadd.f32 %v6409_v60, %v11296_v62  ;;  %v11398_v60 = vadd.f32 %v11346_v2, %v6681_v43  ;;  %v6671_v2 = vadd.f32 %v11246_v17, %v6437_v35  ;;  %v11413_v43 = vadd.f32 %v11363_v15, %v6683_v29 }
 0x7aa   : > { %v11422_v15 = vadd.f32 %v6874_v1, %v6686_v11  ;;  %v6677_v1 = vadd.f32 %v11324_v27, %v6443_v14  ;;  %v6444_v11 = vadd.f32 %v11332_v13, %v11187_v5  ;;  %v6441_v35 = vadd.f32 %v11293_v30, %v11158_v26 }
 0x7ab   : > { %v6905_v33 = vadd.f32 %v11223_v47, %v6671_v2  ;;  %v6958_v47 = vld [vmem:[#allocation2 + $0x12c] sm:$0xff]  ;;  %v6674_v5 = vadd.f32 %v11285_v59, %v6440_v18 }
 0x7ac   : > { %v7061_v52 = vpop.f32.mrf.mxu0  ;;  %v6675_v37 = vadd.f32 %v11298_v21, %v6441_v35  ;;  %v11450_v21 = vld [vmem:[%s11609_s3] ss:$0 sm:$0xff] }
 0x7ad   : > { %v11386_v61 = vadd.f32 %v7061_v52, %v11291_v6  ;;  %v6951_v6 = vld [vmem:[#allocation2 + $0xf4] sm:$0xff]  ;;  %v6953_v52 = vld [vmem:[#allocation2 + $0x104] sm:$0xff] }
 0x7ae   : > { %v6643_v44 = vpop.f32.mrf.mxu2 }
 0x7af   : > { %v6687_v42 = vadd.f32 %v6643_v44, %v6453_v31  ;;  %7100 = vmatmul.bf16.gmra.mxu0 %v6971_v20  ;;  %v6972_v31 = vpack.c.bf16 %v6952_v56, %v6951_v6 }
 0x7b1   : > { %v11392_v63 = vadd.f32 %v6877_v40, %v6687_v42  ;;  %v6956_v40 = vld [vmem:[#allocation2 + $0x11c] sm:$0xff] }
 0x7b4   : > { %v7063_v38 = vpop.f32.mrf.mxu0 }
 0x7b5   : > { %v11395_v62 = vadd.f32 %v7063_v38, %v11304_v46  ;;  %v6957_v38 = vld [vmem:[#allocation2 + $0x124] sm:$0xff] }
 0x7b6   : > { %v6975_v6 = vpack.c.bf16 %v6958_v47, %v6957_v38 }
 0x7bc   : > { %v7066_v36 = vpop.f32.mrf.mxu0 }
 0x7bd   : > { %v11401_v48 = vadd.f32 %v7066_v36, %v11317_v16  ;;  %v6954_v16 = vld [vmem:[#allocation2 + $0x10c] sm:$0xff] }
 0x7be   : > { %v6973_v20 = vpack.c.bf16 %v6954_v16, %v6953_v52  ;;  %v6678_v52 = vadd.f32 %v11337_v9, %v6444_v11  ;;  %v11630_v16 = vld [vmem:[#allocation8_spill] sm:$0xff] }
 0x7bf   : > { %7105 = vmatmul.bf16.gmra.mxu0 %v6972_v31  ;;  %v6959_v31 = vld [vmem:[#allocation2 + $0x134] sm:$0xff] }
 0x7c0   : > { %v6976_v0 = vpack.c.bf16 %v6960_v7, %v6959_v31  ;;  %v6912_v30 = vadd.f32 %v11313_v28, %v6678_v52 }
 0x7c4   : > { %v7068_v4 = vpop.f32.mrf.mxu0 }
 0x7c5   : > { %v11409_v46 = vadd.f32 %v7068_v4, %v11328_v49  ;;  %v6955_v49 = vld [vmem:[#allocation2 + $0x114] sm:$0xff]  ;;  %v6442_v4 = vadd.f32 %v11306_v41, %v11170_v8  ;;  %v6911_v8 = vadd.f32 %v11300_v3, %v6677_v1  ;;  %v6439_v41 = vadd.f32 %v11267_v53, %v11129_v12  ;;  %v11632_v3 = vld [vmem:[#allocation6_spill] sm:$0xff] }
 0x7c6   : > { %v6974_v17 = vpack.c.bf16 %v6956_v40, %v6955_v49  ;;  %v6909_v12 = vadd.f32 %v11631_v19, %v6675_v37  ;;  %v11634_v49 = vld [vmem:[#allocation4_spill] sm:$0xff] }
 0x7c7   : > { %v6676_v2 = vadd.f32 %v11311_v54, %v6442_v4  ;;  %v11629_v54 = vld [vmem:[#allocation5_spill] sm:$0xff]  ;;  %v6673_v58 = vadd.f32 %v11630_v16, %v6439_v41  ;;  %v7174_v18 = vadd.f32 %v11450_v21, %v11409_v46 }
 0x7c8   : > { %v6438_v13 = vadd.f32 %v11629_v54, %v11113_v50  ;;  %v7169_v54 = vadd.f32 %v11450_v21, %v11375_v51 }
 0x7c9   : > { %v6910_v27 = vadd.f32 %v11287_v10, %v6676_v2  ;;  %v6907_v40 = vadd.f32 %v11634_v49, %v6673_v58 }
 0x7ca   : > { %v6672_v10 = vadd.f32 %v11632_v3, %v6438_v13  ;;  %v7168_v13 = vadd.f32 %v11450_v21, %v11371_v55  ;;  %v7201_v58 = vmax.f32 %v7169_v54, 0.0 }
 0x7cc   : > { %v7071_v44 = vpop.f32.mrf.mxu0  ;;  %v7200_v19 = vmax.f32 %v7168_v13, 0.0 }
 0x7cd   : > { %v11416_v32 = vadd.f32 %v7071_v44, %v6905_v33  ;;  %v11633_v33 = vld [vmem:[#allocation7_spill] sm:$0xff] }
 0x7cf   : > { %7110 = vmatmul.bf16.gmra.mxu0 %v6973_v20  ;;  %v6908_v20 = vadd.f32 %v11633_v33, %v6674_v5  ;;  %v7175_v2 = vadd.f32 %v11450_v21, %v11416_v32  ;;  %v7172_v5 = vadd.f32 %v11450_v21, %v11395_v62  ;;  %v7206_v32 = vmax.f32 %v7174_v18, 0.0  ;;  %v6411_v33 = vpop.f32.mrf.mxu1  ;;  %v11638_v18 = vld [vmem:[#allocation14_spill] sm:$0xff] }
 0x7d1   : > { %v7207_v41 = vmax.f32 %v7175_v2, 0.0 }
 0x7d4   : > { %v7073_v22 = vpop.f32.mrf.mxu0 }
 0x7dc   : > { %v7076_v42 = vpop.f32.mrf.mxu0 }
 0x7dd   : > { %v7141_v7 = vadd.f32 %v7076_v42, %v6907_v40 }
 0x7df   : > { %7115 = vmatmul.bf16.gmra.mxu0 %v6974_v17 }
 0x7e4   : > { %v7078_v29 = vpop.f32.mrf.mxu0 }
 0x7e5   : > { %v7142_v17 = vadd.f32 %v7078_v29, %v6908_v20  ;;  %v7177_v29 = vadd.f32 %v11450_v21, %v7141_v7  ;;  %v6879_v20 = vpop.f32.mrf.mxu3 }
 0x7e7   : > { %v7209_v52 = vmax.f32 %v7177_v29, 0.0 }
 0x7ec   : > { %v7081_v56 = vpop.f32.mrf.mxu0 }
 0x7ed   : > { %v7143_v28 = vadd.f32 %v7081_v56, %v6909_v12  ;;  %v7178_v56 = vadd.f32 %v11450_v21, %v7142_v17  ;;  %v6882_v17 = vpop.f32.mrf.mxu3 }
 0x7ef   : > { %7120 = vmatmul.bf16.gmra.mxu0 %v6975_v6  ;;  %v11635_v6 = vld [vmem:[#allocation3_spill] sm:$0xff]  ;;  %v7210_v42 = vmax.f32 %v7178_v56, 0.0 }
 0x7f0   : > { %v6906_v31 = vadd.f32 %v11635_v6, %v6672_v10 }
 0x7f4   : > { %v7083_v36 = vpop.f32.mrf.mxu0 }
 0x7f5   : > { %v7144_v53 = vadd.f32 %v7083_v36, %v6910_v27  ;;  %v7179_v36 = vadd.f32 %v11450_v21, %v7143_v28  ;;  %v7171_v27 = vadd.f32 %v11450_v21, %v11386_v61  ;;  %v6884_v6 = vpop.f32.mrf.mxu3 }
 0x7f7   : > { %v7180_v38 = vadd.f32 %v11450_v21, %v7144_v53  ;;  %v7211_v11 = vmax.f32 %v7179_v36, 0.0  ;;  %v7203_v62 = vmax.f32 %v7171_v27, 0.0 }
 0x7f9   : > { %v7212_v4 = vmax.f32 %v7180_v38, 0.0 }
 0x7fc   : > { %v7086_v57 = vpop.f32.mrf.mxu0 }
 0x7fd   : > { %v7145_v26 = vadd.f32 %v7086_v57, %v6911_v8  ;;  %v7140_v57 = vadd.f32 %v7073_v22, %v6906_v31  ;;  %v7173_v8 = vadd.f32 %v11450_v21, %v11401_v48  ;;  %v7204_v48 = vmax.f32 %v7172_v5, 0.0  ;;  %v6887_v36 = vpop.f32.mrf.mxu3 }
 0x7ff   : > { %7125 = vmatmul.bf16.gmra.mxu0 %v6976_v0  ;;  %v7181_v44 = vadd.f32 %v11450_v21, %v7145_v26  ;;  %v7176_v35 = vadd.f32 %v11450_v21, %v7140_v57  ;;  %v7205_v26 = vmax.f32 %v7173_v8, 0.0 }
 0x801   : > { %v7213_v14 = vmax.f32 %v7181_v44, 0.0 }
 0x804   : > { %v7088_v9 = vpop.f32.mrf.mxu0 }
 0x805   : > { %v7146_v59 = vadd.f32 %v7088_v9, %v6912_v30  ;;  %v11636_v9 = vld [vmem:[#allocation17_spill] sm:$0xff] }
 0x806   : > { %v7167_v16 = vadd.f32 %v11450_v21, %v11636_v9 }
 0x807   : > { %v7182_v50 = vadd.f32 %v11450_v21, %v7146_v59 }
 0x808   : > { %v7199_v12 = vmax.f32 %v7167_v16, 0.0 }
 0x809   : > { %v7214_v47 = vmax.f32 %v7182_v50, 0.0  ;;  %v6414_v50 = vpop.f32.mrf.mxu1 }
 0x80b   : > { %7237 = vmatpush.msra.mxu1 %v7214_v47 }
 0x80c   : > { %v7091_v0 = vpop.f32.mrf.mxu0 }
 0x80d   : > { %v11463_v1 = vadd.f32 %v7091_v0, %v11382_v24  ;;  %7238 = vmatpush.msra.mxu1 %v7213_v14  ;;  %v7208_v24 = vmax.f32 %v7176_v35, 0.0 }
 0x80f   : > { %7239 = vmatpush.msra.mxu1 %v7212_v4 }
 0x811   : > { %7240 = vmatpush.msra.mxu1 %v7211_v11 }
 0x813   : > { %7241 = vmatpush.msra.mxu1 %v7210_v42  ;;  %v11637_v42 = vld [vmem:[#allocation15_spill] sm:$0xff] }
 0x814   : > { %v7093_v22 = vpop.f32.mrf.mxu0 }
 0x815   : > { %v11472_v37 = vadd.f32 %v7093_v22, %v11390_v23  ;;  %7242 = vmatpush.msra.mxu1 %v7209_v52  ;;  %v7170_v23 = vadd.f32 %v11450_v21, %v11379_v39 }
 0x817   : > { %7243 = vmatpush.msra.mxu1 %v7208_v24  ;;  %v7202_v61 = vmax.f32 %v7170_v23, 0.0 }
 0x819   : > { %7244 = vmatpush.msra.mxu1 %v7207_v41  ;;  %v11639_v41 = vld [vmem:[#allocation16_spill] sm:$0xff] }
 0x81b   : > { %7245 = vmatpush.msra.mxu1 %v7206_v32  ;;  %v11640_v32 = vld [vmem:[#allocation13_spill] sm:$0xff] }
 0x81c   : > { %v7096_v46 = vpop.f32.mrf.mxu0 }
 0x81d   : > { %v11483_v30 = vadd.f32 %v7096_v46, %v11398_v60  ;;  %7246 = vmatpush.msra.mxu1 %v7205_v26 }
 0x81f   : > { %7247 = vmatpush.msra.mxu1 %v7204_v48  ;;  %v11641_v48 = vld [vmem:[#allocation12_spill] sm:$0xff] }
 0x821   : > { %7248 = vmatpush.msra.mxu1 %v7203_v62 }
 0x823   : > { %7249 = vmatpush.msra.mxu1 %v7202_v61  ;;  %v11642_v61 = vld [vmem:[#allocation11_spill] sm:$0xff] }
 0x824   : > { %v7098_v39 = vpop.f32.mrf.mxu0  ;;  %v6455_v9 = vadd.f32 %v6414_v50, %v11642_v61  ;;  %v7281_v61 = vld [vmem:[%s11610_s4 + $0x20] sm:$0xff] }
 0x825   : > { %v11492_v60 = vadd.f32 %v7098_v39, %v11404_v25  ;;  %7250 = vmatpush.msra.mxu1 %v7201_v58  ;;  %v6645_v25 = vpop.f32.mrf.mxu2 }
 0x827   : > { %7251 = vmatpush.msra.mxu1 %v7200_v19 }
 0x829   : > { %7252 = vmatpush.msra.mxu1 %v7199_v12  ;;  %v11643_v12 = vld [vmem:[#allocation10_spill] sm:$0xff] }
 0x82c   : > { %v7101_v51 = vpop.f32.mrf.mxu0 }
 0x82d   : > { %v11495_v53 = vadd.f32 %v7101_v51, %v11413_v43  ;;  %v6648_v49 = vpop.f32.mrf.mxu2  ;;  %v6454_v51 = vadd.f32 %v6411_v33, %v11643_v12  ;;  %v7292_v33 = vld [vmem:[%s11610_s4 + $0x78] sm:$0xff]  ;;  %v7278_v12 = vld [vmem:[%s11610_s4 + $0x8] sm:$0xff] }
 0x82e   : > { %7294 = vmatpush.msra.mxu3 %v7292_v33 }
 0x834   : > { %v7103_v55 = vpop.f32.mrf.mxu0 }
 0x835   : > { %v11498_v59 = vadd.f32 %v7103_v55, %v11418_v34  ;;  %v6416_v34 = vpop.f32.mrf.mxu1  ;;  %v6650_v38 = vpop.f32.mrf.mxu2 }
 0x836   : > { %v6456_v54 = vadd.f32 %v6416_v34, %v11641_v48  ;;  %v7283_v48 = vld [vmem:[%s11610_s4 + $0x30] sm:$0xff] }
 0x838   : > { %v6690_v16 = vadd.f32 %v6650_v38, %v6456_v54 }
 0x83c   : > { %v7106_v3 = vpop.f32.mrf.mxu0 }
 0x83d   : > { %v11501_v10 = vadd.f32 %v7106_v3, %v11420_v45  ;;  %v6419_v45 = vpop.f32.mrf.mxu1  ;;  %v6653_v7 = vpop.f32.mrf.mxu2  ;;  %v6689_v3 = vadd.f32 %v6648_v49, %v6455_v9  ;;  %v7291_v49 = vld [vmem:[%s11610_s4 + $0x70] sm:$0xff] }
 0x83e   : > { %v6457_v27 = vadd.f32 %v6419_v45, %v11640_v32  ;;  %7295 = vmatpush.msra.mxu3 %v7291_v49 }
 0x840   : > { %v6691_v62 = vadd.f32 %v6653_v7, %v6457_v27  ;;  %v7285_v27 = vld [vmem:[%s11610_s4 + $0x40] sm:$0xff] }
 0x844   : > { %v7108_v28 = vpop.f32.mrf.mxu0 }
 0x845   : > { %v11504_v44 = vadd.f32 %v7108_v28, %v11422_v15  ;;  %v6421_v0 = vpop.f32.mrf.mxu1  ;;  %v6655_v57 = vpop.f32.mrf.mxu2  ;;  %v6925_v28 = vadd.f32 %v6887_v36, %v6691_v62  ;;  %v7282_v62 = vld [vmem:[%s11610_s4 + $0x28] sm:$0xff] }
 0x846   : > { %v6889_v15 = vpop.f32.mrf.mxu3  ;;  %v6458_v24 = vadd.f32 %v6421_v0, %v11638_v18  ;;  %v6688_v0 = vadd.f32 %v6645_v25, %v6454_v51  ;;  %v7287_v18 = vld [vmem:[%s11610_s4 + $0x50] sm:$0xff] }
 0x848   : > { %v6692_v26 = vadd.f32 %v6655_v57, %v6458_v24  ;;  %v6924_v57 = vadd.f32 %v6884_v6, %v6690_v16  ;;  %v6922_v25 = vadd.f32 %v6879_v20, %v6688_v0  ;;  %v7280_v16 = vld [vmem:[%s11610_s4 + $0x18] sm:$0xff] }
 0x84a   : > { %v6926_v58 = vadd.f32 %v6889_v15, %v6692_v26 }
 0x84c   : > { %v7111_v40 = vpop.f32.mrf.mxu0 }
 0x84d   : > { %v11507_v43 = vadd.f32 %v7111_v40, %v11392_v63  ;;  %v6424_v4 = vpop.f32.mrf.mxu1  ;;  %v6658_v29 = vpop.f32.mrf.mxu2 }
 0x84e   : > { %v6892_v35 = vpop.f32.mrf.mxu3  ;;  %v6459_v2 = vadd.f32 %v6424_v4, %v11637_v42 }
 0x84f   : > { %v7191_v24 = vadd.f32 %v11450_v21, %v11507_v43  ;;  %v7189_v43 = vadd.f32 %v11450_v21, %v11501_v10  ;;  %v7187_v10 = vadd.f32 %v11450_v21, %v11495_v53  ;;  %v7185_v53 = vadd.f32 %v11450_v21, %v11483_v30 }
 0x850   : > { %v6693_v8 = vadd.f32 %v6658_v29, %v6459_v2  ;;  %v6923_v29 = vadd.f32 %v6882_v17, %v6689_v3  ;;  %v7290_v17 = vld [vmem:[%s11610_s4 + $0x68] sm:$0xff]  ;;  %v7183_v30 = vadd.f32 %v11450_v21, %v11463_v1 }
 0x851   : > { %7296 = vmatpush.msra.mxu3 %v7290_v17  ;;  %v7223_v26 = vmax.f32 %v7191_v24, 0.0  ;;  %v7221_v54 = vmax.f32 %v7189_v43, 0.0  ;;  %v7219_v9 = vmax.f32 %v7187_v10, 0.0 }
 0x852   : > { %v6927_v13 = vadd.f32 %v6892_v35, %v6693_v8  ;;  %v7215_v3 = vmax.f32 %v7183_v30, 0.0 }
 0x854   : > { %v7113_v47 = vpop.f32.mrf.mxu0 }
 0x855   : > { %v6426_v63 = vpop.f32.mrf.mxu1  ;;  %v6660_v52 = vpop.f32.mrf.mxu2  ;;  %v7156_v35 = vadd.f32 %v7113_v47, %v6922_v25 }
 0x856   : > { %v6460_v5 = vadd.f32 %v6426_v63, %v11639_v41  ;;  %v6894_v23 = vpop.f32.mrf.mxu3  ;;  %v7289_v63 = vld [vmem:[%s11610_s4 + $0x60] sm:$0xff]  ;;  %v7286_v41 = vld [vmem:[%s11610_s4 + $0x48] sm:$0xff] }
 0x857   : > { %7297 = vmatpush.msra.mxu3 %v7289_v63  ;;  %v7192_v47 = vadd.f32 %v11450_v21, %v7156_v35 }
 0x858   : > { %v6694_v46 = vadd.f32 %v6660_v52, %v6460_v5  ;;  %v7288_v52 = vld [vmem:[%s11610_s4 + $0x58] sm:$0xff]  ;;  %v7190_v5 = vadd.f32 %v11450_v21, %v11504_v44  ;;  %v7188_v44 = vadd.f32 %v11450_v21, %v11498_v59  ;;  %v7186_v59 = vadd.f32 %v11450_v21, %v11492_v60 }
 0x859   : > { %7298 = vmatpush.msra.mxu3 %v7288_v52  ;;  %v7224_v32 = vmax.f32 %v7192_v47, 0.0  ;;  %v7184_v60 = vadd.f32 %v11450_v21, %v11472_v37  ;;  %v7277_v37 = vld [vmem:[%s11610_s4] sm:$0xff] }
 0x85a   : > { %v6928_v39 = vadd.f32 %v6894_v23, %v6694_v46  ;;  %v7284_v46 = vld [vmem:[%s11610_s4 + $0x38] sm:$0xff]  ;;  %v7222_v23 = vmax.f32 %v7190_v5, 0.0 }
 0x85b   : > { %7299 = vmatpush.msra.mxu3 %v7287_v18  ;;  %v7216_v51 = vmax.f32 %v7184_v60, 0.0 }
 0x85c   : > { %v7116_v31 = vpop.f32.mrf.mxu0 }
 0x85d   : > { %v7157_v6 = vadd.f32 %v7116_v31, %v6923_v29  ;;  %7300 = vmatpush.msra.mxu3 %v7286_v41 }
 0x85f   : > { %v7193_v42 = vadd.f32 %v11450_v21, %v7157_v6  ;;  %7301 = vmatpush.msra.mxu3 %v7285_v27 }
 0x861   : > { %v7225_v8 = vmax.f32 %v7193_v42, 0.0  ;;  %7302 = vmatpush.msra.mxu3 %v7284_v46 }
 0x863   : > { %7303 = vmatpush.msra.mxu3 %v7283_v48 }
 0x864   : > { %v7118_v14 = vpop.f32.mrf.mxu0 }
 0x865   : > { %v7158_v50 = vadd.f32 %v7118_v14, %v6924_v57  ;;  %v11532_v14 = vld [vmem:[%s11612_s6] sm:$0x3]  ;;  %7304 = vmatpush.msra.mxu3 %v7282_v62 }
 0x867   : > { %v7194_v20 = vadd.f32 %v11450_v21, %v7158_v50  ;;  %7305 = vmatpush.msra.mxu3 %v7281_v61 }
 0x869   : > { %7306 = vmatpush.msra.mxu3 %v7280_v16 }
 0x86c   : > { %v7121_v56 = vpop.f32.mrf.mxu0 }
 0x86d   : > { %v7159_v4 = vadd.f32 %v7121_v56, %v6925_v28 }
 0x86f   : > { %v7195_v36 = vadd.f32 %v11450_v21, %v7159_v4 }
 0x871   : > { %v7227_v2 = vmax.f32 %v7195_v36, 0.0 }
 0x874   : > { %v7123_v11 = vpop.f32.mrf.mxu0 }
 0x875   : > { %v7160_v40 = vadd.f32 %v7123_v11, %v6926_v58  ;;  %v7233_v11 = vperm.slane %v11532_v14, 0  ;;  %v7218_v58 = vmax.f32 %v7186_v59, 0.0 }
 0x877   : > { %v7196_v38 = vadd.f32 %v11450_v21, %v7160_v40  ;;  %7253 = vmatmul.f32.vlgmr.msra.gmra.mxu1 %v7233_v11  ;;  %v7293_v40 = vld [vmem:[%s11611_s5] sm:$0x1] }
 0x879   : > { %v7228_v31 = vmax.f32 %v7196_v38, 0.0 }
 0x87c   : > { %v7126_v22 = vpop.f32.mrf.mxu0 }
 0x87d   : > { %v7161_v19 = vadd.f32 %v7126_v22, %v6927_v13  ;;  %v7226_v22 = vmax.f32 %v7194_v20, 0.0  ;;  %v7220_v13 = vmax.f32 %v7188_v44, 0.0 }
 0x87f   : > { %v7197_v34 = vadd.f32 %v11450_v21, %v7161_v19  ;;  %v7217_v19 = vmax.f32 %v7185_v53, 0.0 }
 0x881   : > { %v7229_v56 = vmax.f32 %v7197_v34, 0.0 }
 0x884   : > { %v7128_v55 = vpop.f32.mrf.mxu0 }
 0x885   : > { %v7162_v45 = vadd.f32 %v7128_v55, %v6928_v39  ;;  %v7279_v39 = vld [vmem:[%s11610_s4 + $0x10] sm:$0xff]  ;;  %v7234_v55 = vperm.slane %v11532_v14, 1 }
 0x886   : > { %7307 = vmatpush.msra.mxu3 %v7279_v39 }
 0x887   : > { %v7198_v7 = vadd.f32 %v11450_v21, %v7162_v45 }
 0x888   : > { %7308 = vmatpush.msra.mxu3 %v7278_v12 }
 0x889   : > { %v7230_v15 = vmax.f32 %v7198_v7, 0.0 }
 0x88a   : > { %7309 = vmatpush.msra.mxu3 %v7277_v37 }
 0x88b   : > { %7257 = vmatpush.msra.mxu2 %v7230_v15 }
 0x88d   : > { %7258 = vmatpush.msra.mxu2 %v7229_v56 }
 0x88f   : > { %7259 = vmatpush.msra.mxu2 %v7228_v31 }
 0x891   : > { %7260 = vmatpush.msra.mxu2 %v7227_v2 }
 0x893   : > { %7261 = vmatpush.msra.mxu2 %v7226_v22 }
 0x895   : > { %7262 = vmatpush.msra.mxu2 %v7225_v8 }
 0x897   : > { %7263 = vmatpush.msra.mxu2 %v7224_v32 }
 0x899   : > { %7264 = vmatpush.msra.mxu2 %v7223_v26 }
 0x89b   : > { %7265 = vmatpush.msra.mxu2 %v7222_v23 }
 0x89d   : > { %7266 = vmatpush.msra.mxu2 %v7221_v54 }
 0x89f   : > { %7267 = vmatpush.msra.mxu2 %v7220_v13 }
 0x8a1   : > { %7268 = vmatpush.msra.mxu2 %v7219_v9 }
 0x8a3   : > { %7269 = vmatpush.msra.mxu2 %v7218_v58 }
 0x8a5   : > { %7270 = vmatpush.msra.mxu2 %v7217_v19 }
 0x8a7   : > { %7271 = vmatpush.msra.mxu2 %v7216_v51 }
 0x8a9   : > { %7272 = vmatpush.msra.mxu2 %v7215_v3 }
 0x8aa   : > { %7273 = vmatmul.f32.vlgmr.msra.gmra.mxu2 %v7234_v55 }
 0x8f4   : > { %v7254_v21 = vpop.f32.mrf.mxu1 }
 0x92d   : > { %v7274_v1 = vpop.f32.mrf.mxu2 }
 0x92e   : > { %v7275_v28 = vadd.f32 %v7274_v1, %v7254_v21 }
 0x930   : > { %7310 = vmatmul.f32.vlgmr.msra.gmra.mxu3 %v7275_v28 }
 0x9b3   : > { %v7311_v45 = vpop.f32.mrf.mxu3 }
 0x9b4   : > { %v7312_v0 = vadd.f32 %v7311_v45, %v7293_v40 }
 0x9b6   : > { %v7315_v57 = vsel %vm7314_vm0, %v7312_v0, 0.0 }
 0x9b7   : > { %7316 = vst [vmem:[%s276_s28] sm:$0xff] %v7315_v57 }
 0x9b8 PF: > { %s17_s24 = sadd.s32 1, %s9168_s24  }
 0x9b9   : > { %p14_p4 = scmp.ge.s32.totalorder %s17_s24, 4  }
 0x9bb   :  { %16 = sbr.rel (!%p14_p4) target bundleno = 1 (0x1), region = 102 }

</bundles_post_ra>
